<compile_context>
chip_gen: v7x
topology: tpu7x:2x2x1
jax: 0.10.0
libtpu: 0.0.40
codegen_flags: <defaults>
</compile_context>

<pallas_src>
import functools

import numpy as np

import jax
import jax.numpy as jnp
from jax import lax
from jax.experimental import pallas as pl
from jax.experimental.pallas import tpu as pltpu

NUM_STEPS = 2  # fixed-step Euler steps for the ODE block (see TODO below)


# ----------------------------------------------------------------------------
# Pallas kernels
# ----------------------------------------------------------------------------
def _matmul_relu_kernel(x_ref, w_ref, o_ref, *, apply_relu):
    """(M, K) @ (K, N) on the MXU, f32 accumulation, optional fused ReLU."""
    acc = jnp.dot(x_ref[...], w_ref[...], preferred_element_type=jnp.float32)
    if apply_relu:
        acc = jnp.maximum(acc, 0.0)
    o_ref[...] = acc.astype(o_ref.dtype)


def _tail_kernel(p3_ref, w3_ref, wa_ref, wb_ref, mask_ref, pool_ref,
                 fcw_ref, fcb_ref, o_ref, xbuf_ref, *, hw, num_steps):
    """Fused tail: conv3 -> ODE (Euler) -> ReLU -> AvgPool(hw,hw) -> fc.

    p3_ref  : (B*hw*hw, 4*4*C) bf16  im2col patches of relu(conv2) for conv3
    w3_ref  : (4*4*C, C)       bf16
    wa_ref  : (9, C, C)        bf16  ODE conv-A taps (dh*3+dw, cin, cout)
    wb_ref  : (9, C, C)        bf16  ODE conv-B taps
    mask_ref: (9, B*hw*hw, C)  f32   zero-padding validity mask per tap
    pool_ref: (B, B*hw*hw)     f32   per-batch mean-pooling matrix (1/(hw*hw))
    fcw_ref : (C, 10) f32, fcb_ref: (1, 10) f32
    o_ref   : (B, 10) f32
    xbuf_ref: (B*hw*hw + 16, C) f32  haloed staging buffer for shifted views
    """
    rows = p3_ref.shape[0]
    halo = (xbuf_ref.shape[0] - rows) // 2  # = 8, tile-aligned interior store

    # conv3: one MXU matmul on the pre-built patches; result stays in VMEM.
    x = jnp.dot(p3_ref[...], w3_ref[...], preferred_element_type=jnp.float32)

    xbuf_ref[...] = jnp.zeros_like(xbuf_ref)

    def conv3x3(state, w_taps_ref):
        # In-VMEM im2col for a 3x3 / pad-1 / stride-1 conv on the flattened
        # (b, h, w) rows: stage the state once, then 9 statically-offset row
        # views * padding mask -> small bf16 MXU matmuls, f32 accumulation.
        xbuf_ref[pl.ds(halo, rows), :] = state
        acc = jnp.zeros_like(state)
        for t in range(9):
            dh, dw = t // 3, t % 3
            off = (dh - 1) * hw + (dw - 1)           # row offset of this tap
            shifted = xbuf_ref[pl.ds(halo + off, rows), :]
            tap = (shifted * mask_ref[t]).astype(jnp.bfloat16)
            acc = acc + jnp.dot(tap, w_taps_ref[t],
                                preferred_element_type=jnp.float32)
        return acc

    # Fixed-step Euler ODE block, residual + dt fused in-kernel.
    dt = 1.0 / num_steps
    for _ in range(num_steps):
        h = jnp.maximum(conv3x3(x, wa_ref), 0.0)
        x = x + dt * conv3x3(h, wb_ref)

    # Head: ReLU -> AvgPool(hw,hw) (per-batch mean via pooling matmul) -> fc.
    xr = jnp.maximum(x, 0.0)
    pooled = jnp.dot(pool_ref[...], xr, preferred_element_type=jnp.float32)
    out = jnp.dot(pooled, fcw_ref[...], preferred_element_type=jnp.float32)
    o_ref[...] = (out + fcb_ref[...]).astype(o_ref.dtype)


# ----------------------------------------------------------------------------
# Conv2d = im2col (XLA glue) + Pallas matmul (hot path)
# ----------------------------------------------------------------------------
def _im2col(x, kh, kw, stride, padding):
    """x: (B, H, W, C) NHWC -> patches (B*Ho*Wo, kh*kw*C)."""
    if padding:
        x = jnp.pad(x, ((0, 0), (padding, padding), (padding, padding), (0, 0)))
    B, H, W, C = x.shape
    Ho = (H - kh) // stride + 1
    Wo = (W - kw) // stride + 1
    pieces = [x[:, i:i + Ho * stride:stride, j:j + Wo * stride:stride, :]
              for i in range(kh) for j in range(kw)]
    patches = jnp.stack(pieces, axis=3)              # (B, Ho, Wo, kh*kw, C)
    return patches.reshape(B * Ho * Wo, kh * kw * C), (B, Ho, Wo)


def _conv_matmul(patches, w_mat, out_dtype, apply_relu):
    m, _ = patches.shape
    n = w_mat.shape[1]
    return pl.pallas_call(
        functools.partial(_matmul_relu_kernel, apply_relu=apply_relu),
        out_shape=jax.ShapeDtypeStruct((m, n), out_dtype),
        in_specs=[pl.BlockSpec(memory_space=pltpu.MemorySpace.VMEM)] * 2,
        out_specs=pl.BlockSpec(memory_space=pltpu.MemorySpace.VMEM),
    )(patches, w_mat)


def _tail_pallas(patches3, p, batch, hw=6, out_dim=10, num_steps=NUM_STEPS):
    rows, kcin = patches3.shape
    hidden = p["w3"].shape[1]
    flops = 2 * (rows * kcin * hidden
                 + 2 * num_steps * 9 * rows * hidden * hidden
                 + batch * rows * hidden + batch * hidden * out_dim)
    bytes_accessed = int(sum(int(a.size) * a.dtype.itemsize for a in (
        patches3, p["w3"], p["ode_wa"], p["ode_wb"], p["mask"], p["pool"],
        p["fc_w"], p["fc_b"])) + batch * out_dim * 4)
    return pl.pallas_call(
        functools.partial(_tail_kernel, hw=hw, num_steps=num_steps),
        out_shape=jax.ShapeDtypeStruct((batch, out_dim), jnp.float32),
        in_specs=[pl.BlockSpec(memory_space=pltpu.MemorySpace.VMEM)] * 8,
        out_specs=pl.BlockSpec(memory_space=pltpu.MemorySpace.VMEM),
        scratch_shapes=[pltpu.VMEM((rows + 16, hidden), jnp.float32)],
        compiler_params=pltpu.CompilerParams(vmem_limit_bytes=32 * 1024 * 1024),
        cost_estimate=pl.CostEstimate(flops=int(flops), transcendentals=0,
                                      bytes_accessed=bytes_accessed),
    )(patches3, p["w3"], p["ode_wa"], p["ode_wb"], p["mask"], p["pool"],
      p["fc_w"], p["fc_b"])


# ----------------------------------------------------------------------------
# Full forward (matches ConvODENet.forward)
# ----------------------------------------------------------------------------
@jax.jit
def conv_ode_net_forward(x_nchw, p):
    # NCHW -> NHWC; bf16 operands for MXU-native matmuls (f32 accumulation).
    x = jnp.transpose(x_nchw, (0, 2, 3, 1)).astype(jnp.bfloat16)
    B = x.shape[0]

    # conv1 (3x3, s1, p0) + ReLU
    patches, (_, Ho, Wo) = _im2col(x, 3, 3, 1, 0)
    x = _conv_matmul(patches, p["w1"], jnp.bfloat16, True).reshape(B, Ho, Wo, -1)

    # conv2 (4x4, s2, p1) + ReLU
    # TODO(synk): stride-2 im2col stays as XLA strided-window glue; moving it
    # in-kernel needs strided sublane slicing and was judged not worth the risk.
    patches, (_, Ho, Wo) = _im2col(x, 4, 4, 2, 1)
    x = _conv_matmul(patches, p["w2"], jnp.bfloat16, True).reshape(B, Ho, Wo, -1)

    # conv3 patches (4x4, s2, p1); conv3 + ODE + head run fused in one kernel.
    patches, (_, Ho, Wo) = _im2col(x, 4, 4, 2, 1)
    # AvgPool2d((6,6)) + Linear(64,10) in the spec require a 6x6 map here.
    assert (Ho, Wo) == (6, 6), (Ho, Wo)
    return _tail_pallas(patches, p, batch=B, hw=Ho)


# ----------------------------------------------------------------------------
# One-time parameter preparation (outside jit)
# ----------------------------------------------------------------------------
def prepare_params(params, batch, hw=6, hidden=64):
    """Re-lay conv weights as matmul operands (bf16) and build the constant
    padding-mask / pooling tables used by the fused tail kernel."""
    def conv_mat(w):
        cout, cin, kh, kw = w.shape
        return jnp.asarray(jnp.transpose(w, (2, 3, 1, 0)).reshape(kh * kw * cin, cout),
                           jnp.bfloat16)

    def conv_taps(w):   # (cout, cin, 3, 3) -> (9, cin, cout)
        return jnp.asarray(jnp.transpose(w, (2, 3, 1, 0)).reshape(9, w.shape[1], w.shape[0]),
                           jnp.bfloat16)

    rows = batch * hw * hw
    r = np.arange(rows)
    ho = (r % (hw * hw)) // hw
    wo = r % hw
    mask = np.zeros((9, rows, hidden), np.float32)
    for t in range(9):
        dh, dw = t // 3, t % 3
        valid = ((ho + dh >= 1) & (ho + dh <= hw) &
                 (wo + dw >= 1) & (wo + dw <= hw))
        mask[t] = valid[:, None].astype(np.float32)
    pool = np.zeros((batch, rows), np.float32)
    for b in range(batch):
        pool[b, b * hw * hw:(b + 1) * hw * hw] = 1.0 / (hw * hw)

    return {
        "w1": conv_mat(params["conv1"]),
        "w2": conv_mat(params["conv2"]),
        "w3": conv_mat(params["conv3"]),
        "ode_wa": conv_taps(params["ode_w1"]),
        "ode_wb": conv_taps(params["ode_w2"]),
        "mask": jnp.asarray(mask),
        "pool": jnp.asarray(pool),
        "fc_w": jnp.asarray(params["fc_w"].T, jnp.float32),          # (64, 10)
        "fc_b": jnp.asarray(params["fc_b"].reshape(1, -1), jnp.float32),
    }


# ----------------------------------------------------------------------------
# Pure-JAX f32 reference (for correctness sanity check)
# ----------------------------------------------------------------------------
def _conv_ref(x, w_oihw, stride, pad):
    return lax.conv_general_dilated(
        x, jnp.transpose(w_oihw, (2, 3, 1, 0)),
        window_strides=(stride, stride), padding=[(pad, pad), (pad, pad)],
        dimension_numbers=("NHWC", "HWIO", "NHWC"))


def reference_forward(x_nchw, params, num_steps=NUM_STEPS):
    x = jnp.transpose(x_nchw, (0, 2, 3, 1))
    x = jax.nn.relu(_conv_ref(x, params["conv1"], 1, 0))
    x = jax.nn.relu(_conv_ref(x, params["conv2"], 2, 1))
    x = _conv_ref(x, params["conv3"], 2, 1)
    # TODO(synk): `ode` is a user-supplied module; a fixed-step Euler block with
    # odefunc = conv3x3 -> ReLU -> conv3x3 (pad=1, no bias) stands in for it.
    dt = 1.0 / num_steps
    for _ in range(num_steps):
        h = jax.nn.relu(_conv_ref(x, params["ode_w1"], 1, 1))
        x = x + dt * _conv_ref(h, params["ode_w2"], 1, 1)
    x = jax.nn.relu(x)
    x = jnp.mean(x, axis=(1, 2))                                   # AvgPool2d((6,6))
    return x @ params["fc_w"].T + params["fc_b"]


# ----------------------------------------------------------------------------
# Parameter init + demo
# ----------------------------------------------------------------------------
def init_params(key, input_dim, hidden):
    ks = jax.random.split(key, 7)

    def conv_w(k, cout, cin, kh, kw):
        scale = (2.0 / (cin * kh * kw)) ** 0.5
        return scale * jax.random.normal(k, (cout, cin, kh, kw), jnp.float32)

    return {
        "conv1": conv_w(ks[0], hidden, input_dim, 3, 3),
        "conv2": conv_w(ks[1], hidden, hidden, 4, 4),
        "conv3": conv_w(ks[2], hidden, hidden, 4, 4),
        "ode_w1": conv_w(ks[3], hidden, hidden, 3, 3),
        "ode_w2": conv_w(ks[4], hidden, hidden, 3, 3),
        "fc_w": (1.0 / hidden ** 0.5) * jax.random.normal(ks[5], (10, hidden), jnp.float32),
        "fc_b": (1.0 / hidden ** 0.5) * jax.random.normal(ks[6], (10,), jnp.float32),
    }


if __name__ == "__main__":
    # fc1 = Linear(64, 10) forces hidden = 64 and a 28x28 input:
    # 28 -3x3-> 26 -4x4,s2,p1-> 13 -4x4,s2,p1-> 6 -AvgPool(6,6)-> 1x1x64.
    B, INPUT_DIM, H, W, HIDDEN = 2, 3, 28, 28, 64

    key = jax.random.PRNGKey(0)
    kx, kp = jax.random.split(key)
    x = jax.random.normal(kx, (B, INPUT_DIM, H, W), jnp.float32)    # NCHW input
    params = init_params(kp, INPUT_DIM, HIDDEN)
    prepared = prepare_params(params, batch=B, hw=6, hidden=HIDDEN)

    out = conv_ode_net_forward(x, prepared)
    out = jax.block_until_ready(out)
    assert out.shape == (B, 10), out.shape

    ref = reference_forward(x, params)
    rel_err = float(jnp.max(jnp.abs(out - ref)) / (jnp.max(jnp.abs(ref)) + 1e-6))
    # bf16 MXU operands (f32 accumulation) vs. all-f32 reference.
    assert rel_err < 5e-2, f"mismatch vs reference: rel_err={rel_err}"

    print("KERNEL_OK")
</pallas_src>

<mosaic_0001>
module attributes {stable_mosaic.version = 11 : i64} {
  func.func @_matmul_relu_kernel(%arg0: memref<1352x27xbf16, #tpu.memory_space<vmem>>, %arg1: memref<27x64xbf16, #tpu.memory_space<vmem>>, %arg2: memref<1352x64xbf16, #tpu.memory_space<vmem>>) attributes {dimension_semantics = [], scalar_prefetch = 0 : i64, scratch_operands = 0 : i64, tpu.core_type = #tpu.core_type<tc>} {
    %c0 = arith.constant 0 : index
    %c0_0 = arith.constant 0 : index
    %0 = vector.load %arg0[%c0, %c0_0] : memref<1352x27xbf16, #tpu.memory_space<vmem>>, vector<1352x27xbf16>
    %c0_1 = arith.constant 0 : index
    %c0_2 = arith.constant 0 : index
    %1 = vector.load %arg1[%c0_1, %c0_2] : memref<27x64xbf16, #tpu.memory_space<vmem>>, vector<27x64xbf16>
    %cst = arith.constant dense<0.000000e+00> : vector<1352x64xf32>
    %2 = tpu.matmul %0, %1, %cst {dimension_numbers = #tpu.dot_dimension_numbers<[1], [0], [0], [1], [0, 0, 1, 1], [], []>} : vector<1352x27xbf16>, vector<27x64xbf16>, vector<1352x64xf32> -> vector<1352x64xf32>
    %cst_3 = arith.constant 0.000000e+00 : f32
    %3 = vector.broadcast %cst_3 : f32 to vector<1352x64xf32>
    %4 = arith.maximumf %2, %3 : vector<1352x64xf32>
    %5 = arith.truncf %4 : vector<1352x64xf32> to vector<1352x64xbf16>
    %c0_4 = arith.constant 0 : index
    %c0_5 = arith.constant 0 : index
    %6 = vector.load %arg2[%c0_4, %c0_5] : memref<1352x64xbf16, #tpu.memory_space<vmem>>, vector<1352x64xbf16>
    tpu.vector_store %arg2[%c0_4, %c0_5], %5 {strides = array<i32>} : memref<1352x64xbf16, #tpu.memory_space<vmem>>, vector<1352x64xbf16>,
    return
  }
}

module attributes {stable_mosaic.version = 11 : i64} {
  func.func @_matmul_relu_kernel(%arg0: memref<338x1024xbf16, #tpu.memory_space<vmem>>, %arg1: memref<1024x64xbf16, #tpu.memory_space<vmem>>, %arg2: memref<338x64xbf16, #tpu.memory_space<vmem>>) attributes {dimension_semantics = [], scalar_prefetch = 0 : i64, scratch_operands = 0 : i64, tpu.core_type = #tpu.core_type<tc>} {
    %c0 = arith.constant 0 : index
    %c0_0 = arith.constant 0 : index
    %0 = vector.load %arg0[%c0, %c0_0] : memref<338x1024xbf16, #tpu.memory_space<vmem>>, vector<338x1024xbf16>
    %c0_1 = arith.constant 0 : index
    %c0_2 = arith.constant 0 : index
    %1 = vector.load %arg1[%c0_1, %c0_2] : memref<1024x64xbf16, #tpu.memory_space<vmem>>, vector<1024x64xbf16>
    %cst = arith.constant dense<0.000000e+00> : vector<338x64xf32>
    %2 = tpu.matmul %0, %1, %cst {dimension_numbers = #tpu.dot_dimension_numbers<[1], [0], [0], [1], [0, 0, 1, 1], [], []>} : vector<338x1024xbf16>, vector<1024x64xbf16>, vector<338x64xf32> -> vector<338x64xf32>
    %cst_3 = arith.constant 0.000000e+00 : f32
    %3 = vector.broadcast %cst_3 : f32 to vector<338x64xf32>
    %4 = arith.maximumf %2, %3 : vector<338x64xf32>
    %5 = arith.truncf %4 : vector<338x64xf32> to vector<338x64xbf16>
    %c0_4 = arith.constant 0 : index
    %c0_5 = arith.constant 0 : index
    %6 = vector.load %arg2[%c0_4, %c0_5] : memref<338x64xbf16, #tpu.memory_space<vmem>>, vector<338x64xbf16>
    tpu.vector_store %arg2[%c0_4, %c0_5], %5 {strides = array<i32>} : memref<338x64xbf16, #tpu.memory_space<vmem>>, vector<338x64xbf16>,
    return
  }
}

module attributes {stable_mosaic.version = 11 : i64} {
  func.func @_tail_kernel(%arg0: memref<72x1024xbf16, #tpu.memory_space<vmem>>, %arg1: memref<1024x64xbf16, #tpu.memory_space<vmem>>, %arg2: memref<9x64x64xbf16, #tpu.memory_space<vmem>>, %arg3: memref<9x64x64xbf16, #tpu.memory_space<vmem>>, %arg4: memref<9x72x64xf32, #tpu.memory_space<vmem>>, %arg5: memref<2x72xf32, #tpu.memory_space<vmem>>, %arg6: memref<64x10xf32, #tpu.memory_space<vmem>>, %arg7: memref<1x10xf32, #tpu.memory_space<vmem>>, %arg8: memref<2x10xf32, #tpu.memory_space<vmem>>, %arg9: memref<88x64xf32, #tpu.memory_space<vmem>>) attributes {dimension_semantics = [], scalar_prefetch = 0 : i64, scratch_operands = 1 : i64, tpu.core_type = #tpu.core_type<tc>} {
    %c0 = arith.constant 0 : index
    %c0_0 = arith.constant 0 : index
    %0 = vector.load %arg0[%c0, %c0_0] : memref<72x1024xbf16, #tpu.memory_space<vmem>>, vector<72x1024xbf16>
    %c0_1 = arith.constant 0 : index
    %c0_2 = arith.constant 0 : index
    %1 = vector.load %arg1[%c0_1, %c0_2] : memref<1024x64xbf16, #tpu.memory_space<vmem>>, vector<1024x64xbf16>
    %cst = arith.constant dense<0.000000e+00> : vector<72x64xf32>
    %2 = tpu.matmul %0, %1, %cst {dimension_numbers = #tpu.dot_dimension_numbers<[1], [0], [0], [1], [0, 0, 1, 1], [], []>} : vector<72x1024xbf16>, vector<1024x64xbf16>, vector<72x64xf32> -> vector<72x64xf32>
    %cst_3 = arith.constant 0.000000e+00 : f32
    %3 = vector.broadcast %cst_3 : f32 to vector<88x64xf32>
    %c0_4 = arith.constant 0 : index
    %c0_5 = arith.constant 0 : index
    %4 = vector.load %arg9[%c0_4, %c0_5] : memref<88x64xf32, #tpu.memory_space<vmem>>, vector<88x64xf32>
    tpu.vector_store %arg9[%c0_4, %c0_5], %3 {strides = array<i32>} : memref<88x64xf32, #tpu.memory_space<vmem>>, vector<88x64xf32>,
    %c8 = arith.constant 8 : index
    %c0_6 = arith.constant 0 : index
    %5 = vector.load %arg9[%c8, %c0_6] : memref<88x64xf32, #tpu.memory_space<vmem>>, vector<72x64xf32>
    tpu.vector_store %arg9[%c8, %c0_6], %2 {strides = array<i32>} : memref<88x64xf32, #tpu.memory_space<vmem>>, vector<72x64xf32>,
    %cst_7 = arith.constant 0.000000e+00 : f32
    %6 = vector.broadcast %cst_7 : f32 to vector<72x64xf32>
    %c1 = arith.constant 1 : index
    %c0_8 = arith.constant 0 : index
    %7 = vector.load %arg9[%c1, %c0_8] : memref<88x64xf32, #tpu.memory_space<vmem>>, vector<72x64xf32>
    %c0_9 = arith.constant 0 : index
    %c0_10 = arith.constant 0 : index
    %c0_11 = arith.constant 0 : index
    %8 = vector.load %arg4[%c0_9, %c0_10, %c0_11] : memref<9x72x64xf32, #tpu.memory_space<vmem>>, vector<1x72x64xf32>
    %9 = vector.shape_cast %8 : vector<1x72x64xf32> to vector<72x64xf32>
    %10 = arith.mulf %7, %9 : vector<72x64xf32>
    %11 = arith.truncf %10 : vector<72x64xf32> to vector<72x64xbf16>
    %c0_12 = arith.constant 0 : index
    %c0_13 = arith.constant 0 : index
    %c0_14 = arith.constant 0 : index
    %12 = vector.load %arg2[%c0_12, %c0_13, %c0_14] : memref<9x64x64xbf16, #tpu.memory_space<vmem>>, vector<1x64x64xbf16>
    %13 = vector.shape_cast %12 : vector<1x64x64xbf16> to vector<64x64xbf16>
    %cst_15 = arith.constant dense<0.000000e+00> : vector<72x64xf32>
    %14 = tpu.matmul %11, %13, %cst_15 {dimension_numbers = #tpu.dot_dimension_numbers<[1], [0], [0], [1], [0, 0, 1, 1], [], []>} : vector<72x64xbf16>, vector<64x64xbf16>, vector<72x64xf32> -> vector<72x64xf32>
    %15 = arith.addf %6, %14 : vector<72x64xf32>
    %c2 = arith.constant 2 : index
    %c0_16 = arith.constant 0 : index
    %16 = vector.load %arg9[%c2, %c0_16] : memref<88x64xf32, #tpu.memory_space<vmem>>, vector<72x64xf32>
    %c1_17 = arith.constant 1 : index
    %c0_18 = arith.constant 0 : index
    %c0_19 = arith.constant 0 : index
    %17 = vector.load %arg4[%c1_17, %c0_18, %c0_19] : memref<9x72x64xf32, #tpu.memory_space<vmem>>, vector<1x72x64xf32>
    %18 = vector.shape_cast %17 : vector<1x72x64xf32> to vector<72x64xf32>
    %19 = arith.mulf %16, %18 : vector<72x64xf32>
    %20 = arith.truncf %19 : vector<72x64xf32> to vector<72x64xbf16>
    %c1_20 = arith.constant 1 : index
    %c0_21 = arith.constant 0 : index
    %c0_22 = arith.constant 0 : index
    %21 = vector.load %arg2[%c1_20, %c0_21, %c0_22] : memref<9x64x64xbf16, #tpu.memory_space<vmem>>, vector<1x64x64xbf16>
    %22 = vector.shape_cast %21 : vector<1x64x64xbf16> to vector<64x64xbf16>
    %cst_23 = arith.constant dense<0.000000e+00> : vector<72x64xf32>
    %23 = tpu.matmul %20, %22, %cst_23 {dimension_numbers = #tpu.dot_dimension_numbers<[1], [0], [0], [1], [0, 0, 1, 1], [], []>} : vector<72x64xbf16>, vector<64x64xbf16>, vector<72x64xf32> -> vector<72x64xf32>
    %24 = arith.addf %15, %23 : vector<72x64xf32>
    %c3 = arith.constant 3 : index
    %c0_24 = arith.constant 0 : index
    %25 = vector.load %arg9[%c3, %c0_24] : memref<88x64xf32, #tpu.memory_space<vmem>>, vector<72x64xf32>
    %c2_25 = arith.constant 2 : index
    %c0_26 = arith.constant 0 : index
    %c0_27 = arith.constant 0 : index
    %26 = vector.load %arg4[%c2_25, %c0_26, %c0_27] : memref<9x72x64xf32, #tpu.memory_space<vmem>>, vector<1x72x64xf32>
    %27 = vector.shape_cast %26 : vector<1x72x64xf32> to vector<72x64xf32>
    %28 = arith.mulf %25, %27 : vector<72x64xf32>
    %29 = arith.truncf %28 : vector<72x64xf32> to vector<72x64xbf16>
    %c2_28 = arith.constant 2 : index
    %c0_29 = arith.constant 0 : index
    %c0_30 = arith.constant 0 : index
    %30 = vector.load %arg2[%c2_28, %c0_29, %c0_30] : memref<9x64x64xbf16, #tpu.memory_space<vmem>>, vector<1x64x64xbf16>
    %31 = vector.shape_cast %30 : vector<1x64x64xbf16> to vector<64x64xbf16>
    %cst_31 = arith.constant dense<0.000000e+00> : vector<72x64xf32>
    %32 = tpu.matmul %29, %31, %cst_31 {dimension_numbers = #tpu.dot_dimension_numbers<[1], [0], [0], [1], [0, 0, 1, 1], [], []>} : vector<72x64xbf16>, vector<64x64xbf16>, vector<72x64xf32> -> vector<72x64xf32>
    %33 = arith.addf %24, %32 : vector<72x64xf32>
    %c7 = arith.constant 7 : index
    %c0_32 = arith.constant 0 : index
    %34 = vector.load %arg9[%c7, %c0_32] : memref<88x64xf32, #tpu.memory_space<vmem>>, vector<72x64xf32>
    %c3_33 = arith.constant 3 : index
    %c0_34 = arith.constant 0 : index
    %c0_35 = arith.constant 0 : index
    %35 = vector.load %arg4[%c3_33, %c0_34, %c0_35] : memref<9x72x64xf32, #tpu.memory_space<vmem>>, vector<1x72x64xf32>
    %36 = vector.shape_cast %35 : vector<1x72x64xf32> to vector<72x64xf32>
    %37 = arith.mulf %34, %36 : vector<72x64xf32>
    %38 = arith.truncf %37 : vector<72x64xf32> to vector<72x64xbf16>
    %c3_36 = arith.constant 3 : index
    %c0_37 = arith.constant 0 : index
    %c0_38 = arith.constant 0 : index
    %39 = vector.load %arg2[%c3_36, %c0_37, %c0_38] : memref<9x64x64xbf16, #tpu.memory_space<vmem>>, vector<1x64x64xbf16>
    %40 = vector.shape_cast %39 : vector<1x64x64xbf16> to vector<64x64xbf16>
    %cst_39 = arith.constant dense<0.000000e+00> : vector<72x64xf32>
    %41 = tpu.matmul %38, %40, %cst_39 {dimension_numbers = #tpu.dot_dimension_numbers<[1], [0], [0], [1], [0, 0, 1, 1], [], []>} : vector<72x64xbf16>, vector<64x64xbf16>, vector<72x64xf32> -> vector<72x64xf32>
    %42 = arith.addf %33, %41 : vector<72x64xf32>
    %c8_40 = arith.constant 8 : index
    %c0_41 = arith.constant 0 : index
    %43 = vector.load %arg9[%c8_40, %c0_41] : memref<88x64xf32, #tpu.memory_space<vmem>>, vector<72x64xf32>
    %c4 = arith.constant 4 : index
    %c0_42 = arith.constant 0 : index
    %c0_43 = arith.constant 0 : index
    %44 = vector.load %arg4[%c4, %c0_42, %c0_43] : memref<9x72x64xf32, #tpu.memory_space<vmem>>, vector<1x72x64xf32>
    %45 = vector.shape_cast %44 : vector<1x72x64xf32> to vector<72x64xf32>
    %46 = arith.mulf %43, %45 : vector<72x64xf32>
    %47 = arith.truncf %46 : vector<72x64xf32> to vector<72x64xbf16>
    %c4_44 = arith.constant 4 : index
    %c0_45 = arith.constant 0 : index
    %c0_46 = arith.constant 0 : index
    %48 = vector.load %arg2[%c4_44, %c0_45, %c0_46] : memref<9x64x64xbf16, #tpu.memory_space<vmem>>, vector<1x64x64xbf16>
    %49 = vector.shape_cast %48 : vector<1x64x64xbf16> to vector<64x64xbf16>
    %cst_47 = arith.constant dense<0.000000e+00> : vector<72x64xf32>
    %50 = tpu.matmul %47, %49, %cst_47 {dimension_numbers = #tpu.dot_dimension_numbers<[1], [0], [0], [1], [0, 0, 1, 1], [], []>} : vector<72x64xbf16>, vector<64x64xbf16>, vector<72x64xf32> -> vector<72x64xf32>
    %51 = arith.addf %42, %50 : vector<72x64xf32>
    %c9 = arith.constant 9 : index
    %c0_48 = arith.constant 0 : index
    %52 = vector.load %arg9[%c9, %c0_48] : memref<88x64xf32, #tpu.memory_space<vmem>>, vector<72x64xf32>
    %c5 = arith.constant 5 : index
    %c0_49 = arith.constant 0 : index
    %c0_50 = arith.constant 0 : index
    %53 = vector.load %arg4[%c5, %c0_49, %c0_50] : memref<9x72x64xf32, #tpu.memory_space<vmem>>, vector<1x72x64xf32>
    %54 = vector.shape_cast %53 : vector<1x72x64xf32> to vector<72x64xf32>
    %55 = arith.mulf %52, %54 : vector<72x64xf32>
    %56 = arith.truncf %55 : vector<72x64xf32> to vector<72x64xbf16>
    %c5_51 = arith.constant 5 : index
    %c0_52 = arith.constant 0 : index
    %c0_53 = arith.constant 0 : index
    %57 = vector.load %arg2[%c5_51, %c0_52, %c0_53] : memref<9x64x64xbf16, #tpu.memory_space<vmem>>, vector<1x64x64xbf16>
    %58 = vector.shape_cast %57 : vector<1x64x64xbf16> to vector<64x64xbf16>
    %cst_54 = arith.constant dense<0.000000e+00> : vector<72x64xf32>
    %59 = tpu.matmul %56, %58, %cst_54 {dimension_numbers = #tpu.dot_dimension_numbers<[1], [0], [0], [1], [0, 0, 1, 1], [], []>} : vector<72x64xbf16>, vector<64x64xbf16>, vector<72x64xf32> -> vector<72x64xf32>
    %60 = arith.addf %51, %59 : vector<72x64xf32>
    %c13 = arith.constant 13 : index
    %c0_55 = arith.constant 0 : index
    %61 = vector.load %arg9[%c13, %c0_55] : memref<88x64xf32, #tpu.memory_space<vmem>>, vector<72x64xf32>
    %c6 = arith.constant 6 : index
    %c0_56 = arith.constant 0 : index
    %c0_57 = arith.constant 0 : index
    %62 = vector.load %arg4[%c6, %c0_56, %c0_57] : memref<9x72x64xf32, #tpu.memory_space<vmem>>, vector<1x72x64xf32>
    %63 = vector.shape_cast %62 : vector<1x72x64xf32> to vector<72x64xf32>
    %64 = arith.mulf %61, %63 : vector<72x64xf32>
    %65 = arith.truncf %64 : vector<72x64xf32> to vector<72x64xbf16>
    %c6_58 = arith.constant 6 : index
    %c0_59 = arith.constant 0 : index
    %c0_60 = arith.constant 0 : index
    %66 = vector.load %arg2[%c6_58, %c0_59, %c0_60] : memref<9x64x64xbf16, #tpu.memory_space<vmem>>, vector<1x64x64xbf16>
    %67 = vector.shape_cast %66 : vector<1x64x64xbf16> to vector<64x64xbf16>
    %cst_61 = arith.constant dense<0.000000e+00> : vector<72x64xf32>
    %68 = tpu.matmul %65, %67, %cst_61 {dimension_numbers = #tpu.dot_dimension_numbers<[1], [0], [0], [1], [0, 0, 1, 1], [], []>} : vector<72x64xbf16>, vector<64x64xbf16>, vector<72x64xf32> -> vector<72x64xf32>
    %69 = arith.addf %60, %68 : vector<72x64xf32>
    %c14 = arith.constant 14 : index
    %c0_62 = arith.constant 0 : index
    %70 = vector.load %arg9[%c14, %c0_62] : memref<88x64xf32, #tpu.memory_space<vmem>>, vector<72x64xf32>
    %c7_63 = arith.constant 7 : index
    %c0_64 = arith.constant 0 : index
    %c0_65 = arith.constant 0 : index
    %71 = vector.load %arg4[%c7_63, %c0_64, %c0_65] : memref<9x72x64xf32, #tpu.memory_space<vmem>>, vector<1x72x64xf32>
    %72 = vector.shape_cast %71 : vector<1x72x64xf32> to vector<72x64xf32>
    %73 = arith.mulf %70, %72 : vector<72x64xf32>
    %74 = arith.truncf %73 : vector<72x64xf32> to vector<72x64xbf16>
    %c7_66 = arith.constant 7 : index
    %c0_67 = arith.constant 0 : index
    %c0_68 = arith.constant 0 : index
    %75 = vector.load %arg2[%c7_66, %c0_67, %c0_68] : memref<9x64x64xbf16, #tpu.memory_space<vmem>>, vector<1x64x64xbf16>
    %76 = vector.shape_cast %75 : vector<1x64x64xbf16> to vector<64x64xbf16>
    %cst_69 = arith.constant dense<0.000000e+00> : vector<72x64xf32>
    %77 = tpu.matmul %74, %76, %cst_69 {dimension_numbers = #tpu.dot_dimension_numbers<[1], [0], [0], [1], [0, 0, 1, 1], [], []>} : vector<72x64xbf16>, vector<64x64xbf16>, vector<72x64xf32> -> vector<72x64xf32>
    %78 = arith.addf %69, %77 : vector<72x64xf32>
    %c15 = arith.constant 15 : index
    %c0_70 = arith.constant 0 : index
    %79 = vector.load %arg9[%c15, %c0_70] : memref<88x64xf32, #tpu.memory_space<vmem>>, vector<72x64xf32>
    %c8_71 = arith.constant 8 : index
    %c0_72 = arith.constant 0 : index
    %c0_73 = arith.constant 0 : index
    %80 = vector.load %arg4[%c8_71, %c0_72, %c0_73] : memref<9x72x64xf32, #tpu.memory_space<vmem>>, vector<1x72x64xf32>
    %81 = vector.shape_cast %80 : vector<1x72x64xf32> to vector<72x64xf32>
    %82 = arith.mulf %79, %81 : vector<72x64xf32>
    %83 = arith.truncf %82 : vector<72x64xf32> to vector<72x64xbf16>
    %c8_74 = arith.constant 8 : index
    %c0_75 = arith.constant 0 : index
    %c0_76 = arith.constant 0 : index
    %84 = vector.load %arg2[%c8_74, %c0_75, %c0_76] : memref<9x64x64xbf16, #tpu.memory_space<vmem>>, vector<1x64x64xbf16>
    %85 = vector.shape_cast %84 : vector<1x64x64xbf16> to vector<64x64xbf16>
    %cst_77 = arith.constant dense<0.000000e+00> : vector<72x64xf32>
    %86 = tpu.matmul %83, %85, %cst_77 {dimension_numbers = #tpu.dot_dimension_numbers<[1], [0], [0], [1], [0, 0, 1, 1], [], []>} : vector<72x64xbf16>, vector<64x64xbf16>, vector<72x64xf32> -> vector<72x64xf32>
    %87 = arith.addf %78, %86 : vector<72x64xf32>
    %cst_78 = arith.constant 0.000000e+00 : f32
    %88 = vector.broadcast %cst_78 : f32 to vector<72x64xf32>
    %89 = arith.maximumf %87, %88 : vector<72x64xf32>
    %c8_79 = arith.constant 8 : index
    %c0_80 = arith.constant 0 : index
    %90 = vector.load %arg9[%c8_79, %c0_80] : memref<88x64xf32, #tpu.memory_space<vmem>>, vector<72x64xf32>
    tpu.vector_store %arg9[%c8_79, %c0_80], %89 {strides = array<i32>} : memref<88x64xf32, #tpu.memory_space<vmem>>, vector<72x64xf32>,
    %cst_81 = arith.constant 0.000000e+00 : f32
    %91 = vector.broadcast %cst_81 : f32 to vector<72x64xf32>
    %c1_82 = arith.constant 1 : index
    %c0_83 = arith.constant 0 : index
    %92 = vector.load %arg9[%c1_82, %c0_83] : memref<88x64xf32, #tpu.memory_space<vmem>>, vector<72x64xf32>
    %c0_84 = arith.constant 0 : index
    %c0_85 = arith.constant 0 : index
    %c0_86 = arith.constant 0 : index
    %93 = vector.load %arg4[%c0_84, %c0_85, %c0_86] : memref<9x72x64xf32, #tpu.memory_space<vmem>>, vector<1x72x64xf32>
    %94 = vector.shape_cast %93 : vector<1x72x64xf32> to vector<72x64xf32>
    %95 = arith.mulf %92, %94 : vector<72x64xf32>
    %96 = arith.truncf %95 : vector<72x64xf32> to vector<72x64xbf16>
    %c0_87 = arith.constant 0 : index
    %c0_88 = arith.constant 0 : index
    %c0_89 = arith.constant 0 : index
    %97 = vector.load %arg3[%c0_87, %c0_88, %c0_89] : memref<9x64x64xbf16, #tpu.memory_space<vmem>>, vector<1x64x64xbf16>
    %98 = vector.shape_cast %97 : vector<1x64x64xbf16> to vector<64x64xbf16>
    %cst_90 = arith.constant dense<0.000000e+00> : vector<72x64xf32>
    %99 = tpu.matmul %96, %98, %cst_90 {dimension_numbers = #tpu.dot_dimension_numbers<[1], [0], [0], [1], [0, 0, 1, 1], [], []>} : vector<72x64xbf16>, vector<64x64xbf16>, vector<72x64xf32> -> vector<72x64xf32>
    %100 = arith.addf %91, %99 : vector<72x64xf32>
    %c2_91 = arith.constant 2 : index
    %c0_92 = arith.constant 0 : index
    %101 = vector.load %arg9[%c2_91, %c0_92] : memref<88x64xf32, #tpu.memory_space<vmem>>, vector<72x64xf32>
    %c1_93 = arith.constant 1 : index
    %c0_94 = arith.constant 0 : index
    %c0_95 = arith.constant 0 : index
    %102 = vector.load %arg4[%c1_93, %c0_94, %c0_95] : memref<9x72x64xf32, #tpu.memory_space<vmem>>, vector<1x72x64xf32>
    %103 = vector.shape_cast %102 : vector<1x72x64xf32> to vector<72x64xf32>
    %104 = arith.mulf %101, %103 : vector<72x64xf32>
    %105 = arith.truncf %104 : vector<72x64xf32> to vector<72x64xbf16>
    %c1_96 = arith.constant 1 : index
    %c0_97 = arith.constant 0 : index
    %c0_98 = arith.constant 0 : index
    %106 = vector.load %arg3[%c1_96, %c0_97, %c0_98] : memref<9x64x64xbf16, #tpu.memory_space<vmem>>, vector<1x64x64xbf16>
    %107 = vector.shape_cast %106 : vector<1x64x64xbf16> to vector<64x64xbf16>
    %cst_99 = arith.constant dense<0.000000e+00> : vector<72x64xf32>
    %108 = tpu.matmul %105, %107, %cst_99 {dimension_numbers = #tpu.dot_dimension_numbers<[1], [0], [0], [1], [0, 0, 1, 1], [], []>} : vector<72x64xbf16>, vector<64x64xbf16>, vector<72x64xf32> -> vector<72x64xf32>
    %109 = arith.addf %100, %108 : vector<72x64xf32>
    %c3_100 = arith.constant 3 : index
    %c0_101 = arith.constant 0 : index
    %110 = vector.load %arg9[%c3_100, %c0_101] : memref<88x64xf32, #tpu.memory_space<vmem>>, vector<72x64xf32>
    %c2_102 = arith.constant 2 : index
    %c0_103 = arith.constant 0 : index
    %c0_104 = arith.constant 0 : index
    %111 = vector.load %arg4[%c2_102, %c0_103, %c0_104] : memref<9x72x64xf32, #tpu.memory_space<vmem>>, vector<1x72x64xf32>
    %112 = vector.shape_cast %111 : vector<1x72x64xf32> to vector<72x64xf32>
    %113 = arith.mulf %110, %112 : vector<72x64xf32>
    %114 = arith.truncf %113 : vector<72x64xf32> to vector<72x64xbf16>
    %c2_105 = arith.constant 2 : index
    %c0_106 = arith.constant 0 : index
    %c0_107 = arith.constant 0 : index
    %115 = vector.load %arg3[%c2_105, %c0_106, %c0_107] : memref<9x64x64xbf16, #tpu.memory_space<vmem>>, vector<1x64x64xbf16>
    %116 = vector.shape_cast %115 : vector<1x64x64xbf16> to vector<64x64xbf16>
    %cst_108 = arith.constant dense<0.000000e+00> : vector<72x64xf32>
    %117 = tpu.matmul %114, %116, %cst_108 {dimension_numbers = #tpu.dot_dimension_numbers<[1], [0], [0], [1], [0, 0, 1, 1], [], []>} : vector<72x64xbf16>, vector<64x64xbf16>, vector<72x64xf32> -> vector<72x64xf32>
    %118 = arith.addf %109, %117 : vector<72x64xf32>
    %c7_109 = arith.constant 7 : index
    %c0_110 = arith.constant 0 : index
    %119 = vector.load %arg9[%c7_109, %c0_110] : memref<88x64xf32, #tpu.memory_space<vmem>>, vector<72x64xf32>
    %c3_111 = arith.constant 3 : index
    %c0_112 = arith.constant 0 : index
    %c0_113 = arith.constant 0 : index
    %120 = vector.load %arg4[%c3_111, %c0_112, %c0_113] : memref<9x72x64xf32, #tpu.memory_space<vmem>>, vector<1x72x64xf32>
    %121 = vector.shape_cast %120 : vector<1x72x64xf32> to vector<72x64xf32>
    %122 = arith.mulf %119, %121 : vector<72x64xf32>
    %123 = arith.truncf %122 : vector<72x64xf32> to vector<72x64xbf16>
    %c3_114 = arith.constant 3 : index
    %c0_115 = arith.constant 0 : index
    %c0_116 = arith.constant 0 : index
    %124 = vector.load %arg3[%c3_114, %c0_115, %c0_116] : memref<9x64x64xbf16, #tpu.memory_space<vmem>>, vector<1x64x64xbf16>
    %125 = vector.shape_cast %124 : vector<1x64x64xbf16> to vector<64x64xbf16>
    %cst_117 = arith.constant dense<0.000000e+00> : vector<72x64xf32>
    %126 = tpu.matmul %123, %125, %cst_117 {dimension_numbers = #tpu.dot_dimension_numbers<[1], [0], [0], [1], [0, 0, 1, 1], [], []>} : vector<72x64xbf16>, vector<64x64xbf16>, vector<72x64xf32> -> vector<72x64xf32>
    %127 = arith.addf %118, %126 : vector<72x64xf32>
    %c8_118 = arith.constant 8 : index
    %c0_119 = arith.constant 0 : index
    %128 = vector.load %arg9[%c8_118, %c0_119] : memref<88x64xf32, #tpu.memory_space<vmem>>, vector<72x64xf32>
    %c4_120 = arith.constant 4 : index
    %c0_121 = arith.constant 0 : index
    %c0_122 = arith.constant 0 : index
    %129 = vector.load %arg4[%c4_120, %c0_121, %c0_122] : memref<9x72x64xf32, #tpu.memory_space<vmem>>, vector<1x72x64xf32>
    %130 = vector.shape_cast %129 : vector<1x72x64xf32> to vector<72x64xf32>
    %131 = arith.mulf %128, %130 : vector<72x64xf32>
    %132 = arith.truncf %131 : vector<72x64xf32> to vector<72x64xbf16>
    %c4_123 = arith.constant 4 : index
    %c0_124 = arith.constant 0 : index
    %c0_125 = arith.constant 0 : index
    %133 = vector.load %arg3[%c4_123, %c0_124, %c0_125] : memref<9x64x64xbf16, #tpu.memory_space<vmem>>, vector<1x64x64xbf16>
    %134 = vector.shape_cast %133 : vector<1x64x64xbf16> to vector<64x64xbf16>
    %cst_126 = arith.constant dense<0.000000e+00> : vector<72x64xf32>
    %135 = tpu.matmul %132, %134, %cst_126 {dimension_numbers = #tpu.dot_dimension_numbers<[1], [0], [0], [1], [0, 0, 1, 1], [], []>} : vector<72x64xbf16>, vector<64x64xbf16>, vector<72x64xf32> -> vector<72x64xf32>
    %136 = arith.addf %127, %135 : vector<72x64xf32>
    %c9_127 = arith.constant 9 : index
    %c0_128 = arith.constant 0 : index
    %137 = vector.load %arg9[%c9_127, %c0_128] : memref<88x64xf32, #tpu.memory_space<vmem>>, vector<72x64xf32>
    %c5_129 = arith.constant 5 : index
    %c0_130 = arith.constant 0 : index
    %c0_131 = arith.constant 0 : index
    %138 = vector.load %arg4[%c5_129, %c0_130, %c0_131] : memref<9x72x64xf32, #tpu.memory_space<vmem>>, vector<1x72x64xf32>
    %139 = vector.shape_cast %138 : vector<1x72x64xf32> to vector<72x64xf32>
    %140 = arith.mulf %137, %139 : vector<72x64xf32>
    %141 = arith.truncf %140 : vector<72x64xf32> to vector<72x64xbf16>
    %c5_132 = arith.constant 5 : index
    %c0_133 = arith.constant 0 : index
    %c0_134 = arith.constant 0 : index
    %142 = vector.load %arg3[%c5_132, %c0_133, %c0_134] : memref<9x64x64xbf16, #tpu.memory_space<vmem>>, vector<1x64x64xbf16>
    %143 = vector.shape_cast %142 : vector<1x64x64xbf16> to vector<64x64xbf16>
    %cst_135 = arith.constant dense<0.000000e+00> : vector<72x64xf32>
    %144 = tpu.matmul %141, %143, %cst_135 {dimension_numbers = #tpu.dot_dimension_numbers<[1], [0], [0], [1], [0, 0, 1, 1], [], []>} : vector<72x64xbf16>, vector<64x64xbf16>, vector<72x64xf32> -> vector<72x64xf32>
    %145 = arith.addf %136, %144 : vector<72x64xf32>
    %c13_136 = arith.constant 13 : index
    %c0_137 = arith.constant 0 : index
    %146 = vector.load %arg9[%c13_136, %c0_137] : memref<88x64xf32, #tpu.memory_space<vmem>>, vector<72x64xf32>
    %c6_138 = arith.constant 6 : index
    %c0_139 = arith.constant 0 : index
    %c0_140 = arith.constant 0 : index
    %147 = vector.load %arg4[%c6_138, %c0_139, %c0_140] : memref<9x72x64xf32, #tpu.memory_space<vmem>>, vector<1x72x64xf32>
    %148 = vector.shape_cast %147 : vector<1x72x64xf32> to vector<72x64xf32>
    %149 = arith.mulf %146, %148 : vector<72x64xf32>
    %150 = arith.truncf %149 : vector<72x64xf32> to vector<72x64xbf16>
    %c6_141 = arith.constant 6 : index
    %c0_142 = arith.constant 0 : index
    %c0_143 = arith.constant 0 : index
    %151 = vector.load %arg3[%c6_141, %c0_142, %c0_143] : memref<9x64x64xbf16, #tpu.memory_space<vmem>>, vector<1x64x64xbf16>
    %152 = vector.shape_cast %151 : vector<1x64x64xbf16> to vector<64x64xbf16>
    %cst_144 = arith.constant dense<0.000000e+00> : vector<72x64xf32>
    %153 = tpu.matmul %150, %152, %cst_144 {dimension_numbers = #tpu.dot_dimension_numbers<[1], [0], [0], [1], [0, 0, 1, 1], [], []>} : vector<72x64xbf16>, vector<64x64xbf16>, vector<72x64xf32> -> vector<72x64xf32>
    %154 = arith.addf %145, %153 : vector<72x64xf32>
    %c14_145 = arith.constant 14 : index
    %c0_146 = arith.constant 0 : index
    %155 = vector.load %arg9[%c14_145, %c0_146] : memref<88x64xf32, #tpu.memory_space<vmem>>, vector<72x64xf32>
    %c7_147 = arith.constant 7 : index
    %c0_148 = arith.constant 0 : index
    %c0_149 = arith.constant 0 : index
    %156 = vector.load %arg4[%c7_147, %c0_148, %c0_149] : memref<9x72x64xf32, #tpu.memory_space<vmem>>, vector<1x72x64xf32>
    %157 = vector.shape_cast %156 : vector<1x72x64xf32> to vector<72x64xf32>
    %158 = arith.mulf %155, %157 : vector<72x64xf32>
    %159 = arith.truncf %158 : vector<72x64xf32> to vector<72x64xbf16>
    %c7_150 = arith.constant 7 : index
    %c0_151 = arith.constant 0 : index
    %c0_152 = arith.constant 0 : index
    %160 = vector.load %arg3[%c7_150, %c0_151, %c0_152] : memref<9x64x64xbf16, #tpu.memory_space<vmem>>, vector<1x64x64xbf16>
    %161 = vector.shape_cast %160 : vector<1x64x64xbf16> to vector<64x64xbf16>
    %cst_153 = arith.constant dense<0.000000e+00> : vector<72x64xf32>
    %162 = tpu.matmul %159, %161, %cst_153 {dimension_numbers = #tpu.dot_dimension_numbers<[1], [0], [0], [1], [0, 0, 1, 1], [], []>} : vector<72x64xbf16>, vector<64x64xbf16>, vector<72x64xf32> -> vector<72x64xf32>
    %163 = arith.addf %154, %162 : vector<72x64xf32>
    %c15_154 = arith.constant 15 : index
    %c0_155 = arith.constant 0 : index
    %164 = vector.load %arg9[%c15_154, %c0_155] : memref<88x64xf32, #tpu.memory_space<vmem>>, vector<72x64xf32>
    %c8_156 = arith.constant 8 : index
    %c0_157 = arith.constant 0 : index
    %c0_158 = arith.constant 0 : index
    %165 = vector.load %arg4[%c8_156, %c0_157, %c0_158] : memref<9x72x64xf32, #tpu.memory_space<vmem>>, vector<1x72x64xf32>
    %166 = vector.shape_cast %165 : vector<1x72x64xf32> to vector<72x64xf32>
    %167 = arith.mulf %164, %166 : vector<72x64xf32>
    %168 = arith.truncf %167 : vector<72x64xf32> to vector<72x64xbf16>
    %c8_159 = arith.constant 8 : index
    %c0_160 = arith.constant 0 : index
    %c0_161 = arith.constant 0 : index
    %169 = vector.load %arg3[%c8_159, %c0_160, %c0_161] : memref<9x64x64xbf16, #tpu.memory_space<vmem>>, vector<1x64x64xbf16>
    %170 = vector.shape_cast %169 : vector<1x64x64xbf16> to vector<64x64xbf16>
    %cst_162 = arith.constant dense<0.000000e+00> : vector<72x64xf32>
    %171 = tpu.matmul %168, %170, %cst_162 {dimension_numbers = #tpu.dot_dimension_numbers<[1], [0], [0], [1], [0, 0, 1, 1], [], []>} : vector<72x64xbf16>, vector<64x64xbf16>, vector<72x64xf32> -> vector<72x64xf32>
    %172 = arith.addf %163, %171 : vector<72x64xf32>
    %cst_163 = arith.constant 5.000000e-01 : f32
    %173 = vector.broadcast %cst_163 : f32 to vector<72x64xf32>
    %174 = arith.mulf %173, %172 : vector<72x64xf32>
    %175 = arith.addf %2, %174 : vector<72x64xf32>
    %c8_164 = arith.constant 8 : index
    %c0_165 = arith.constant 0 : index
    %176 = vector.load %arg9[%c8_164, %c0_165] : memref<88x64xf32, #tpu.memory_space<vmem>>, vector<72x64xf32>
    tpu.vector_store %arg9[%c8_164, %c0_165], %175 {strides = array<i32>} : memref<88x64xf32, #tpu.memory_space<vmem>>, vector<72x64xf32>,
    %cst_166 = arith.constant 0.000000e+00 : f32
    %177 = vector.broadcast %cst_166 : f32 to vector<72x64xf32>
    %c1_167 = arith.constant 1 : index
    %c0_168 = arith.constant 0 : index
    %178 = vector.load %arg9[%c1_167, %c0_168] : memref<88x64xf32, #tpu.memory_space<vmem>>, vector<72x64xf32>
    %c0_169 = arith.constant 0 : index
    %c0_170 = arith.constant 0 : index
    %c0_171 = arith.constant 0 : index
    %179 = vector.load %arg4[%c0_169, %c0_170, %c0_171] : memref<9x72x64xf32, #tpu.memory_space<vmem>>, vector<1x72x64xf32>
    %180 = vector.shape_cast %179 : vector<1x72x64xf32> to vector<72x64xf32>
    %181 = arith.mulf %178, %180 : vector<72x64xf32>
    %182 = arith.truncf %181 : vector<72x64xf32> to vector<72x64xbf16>
    %c0_172 = arith.constant 0 : index
    %c0_173 = arith.constant 0 : index
    %c0_174 = arith.constant 0 : index
    %183 = vector.load %arg2[%c0_172, %c0_173, %c0_174] : memref<9x64x64xbf16, #tpu.memory_space<vmem>>, vector<1x64x64xbf16>
    %184 = vector.shape_cast %183 : vector<1x64x64xbf16> to vector<64x64xbf16>
    %cst_175 = arith.constant dense<0.000000e+00> : vector<72x64xf32>
    %185 = tpu.matmul %182, %184, %cst_175 {dimension_numbers = #tpu.dot_dimension_numbers<[1], [0], [0], [1], [0, 0, 1, 1], [], []>} : vector<72x64xbf16>, vector<64x64xbf16>, vector<72x64xf32> -> vector<72x64xf32>
    %186 = arith.addf %177, %185 : vector<72x64xf32>
    %c2_176 = arith.constant 2 : index
    %c0_177 = arith.constant 0 : index
    %187 = vector.load %arg9[%c2_176, %c0_177] : memref<88x64xf32, #tpu.memory_space<vmem>>, vector<72x64xf32>
    %c1_178 = arith.constant 1 : index
    %c0_179 = arith.constant 0 : index
    %c0_180 = arith.constant 0 : index
    %188 = vector.load %arg4[%c1_178, %c0_179, %c0_180] : memref<9x72x64xf32, #tpu.memory_space<vmem>>, vector<1x72x64xf32>
    %189 = vector.shape_cast %188 : vector<1x72x64xf32> to vector<72x64xf32>
    %190 = arith.mulf %187, %189 : vector<72x64xf32>
    %191 = arith.truncf %190 : vector<72x64xf32> to vector<72x64xbf16>
    %c1_181 = arith.constant 1 : index
    %c0_182 = arith.constant 0 : index
    %c0_183 = arith.constant 0 : index
    %192 = vector.load %arg2[%c1_181, %c0_182, %c0_183] : memref<9x64x64xbf16, #tpu.memory_space<vmem>>, vector<1x64x64xbf16>
    %193 = vector.shape_cast %192 : vector<1x64x64xbf16> to vector<64x64xbf16>
    %cst_184 = arith.constant dense<0.000000e+00> : vector<72x64xf32>
    %194 = tpu.matmul %191, %193, %cst_184 {dimension_numbers = #tpu.dot_dimension_numbers<[1], [0], [0], [1], [0, 0, 1, 1], [], []>} : vector<72x64xbf16>, vector<64x64xbf16>, vector<72x64xf32> -> vector<72x64xf32>
    %195 = arith.addf %186, %194 : vector<72x64xf32>
    %c3_185 = arith.constant 3 : index
    %c0_186 = arith.constant 0 : index
    %196 = vector.load %arg9[%c3_185, %c0_186] : memref<88x64xf32, #tpu.memory_space<vmem>>, vector<72x64xf32>
    %c2_187 = arith.constant 2 : index
    %c0_188 = arith.constant 0 : index
    %c0_189 = arith.constant 0 : index
    %197 = vector.load %arg4[%c2_187, %c0_188, %c0_189] : memref<9x72x64xf32, #tpu.memory_space<vmem>>, vector<1x72x64xf32>
    %198 = vector.shape_cast %197 : vector<1x72x64xf32> to vector<72x64xf32>
    %199 = arith.mulf %196, %198 : vector<72x64xf32>
    %200 = arith.truncf %199 : vector<72x64xf32> to vector<72x64xbf16>
    %c2_190 = arith.constant 2 : index
    %c0_191 = arith.constant 0 : index
    %c0_192 = arith.constant 0 : index
    %201 = vector.load %arg2[%c2_190, %c0_191, %c0_192] : memref<9x64x64xbf16, #tpu.memory_space<vmem>>, vector<1x64x64xbf16>
    %202 = vector.shape_cast %201 : vector<1x64x64xbf16> to vector<64x64xbf16>
    %cst_193 = arith.constant dense<0.000000e+00> : vector<72x64xf32>
    %203 = tpu.matmul %200, %202, %cst_193 {dimension_numbers = #tpu.dot_dimension_numbers<[1], [0], [0], [1], [0, 0, 1, 1], [], []>} : vector<72x64xbf16>, vector<64x64xbf16>, vector<72x64xf32> -> vector<72x64xf32>
    %204 = arith.addf %195, %203 : vector<72x64xf32>
    %c7_194 = arith.constant 7 : index
    %c0_195 = arith.constant 0 : index
    %205 = vector.load %arg9[%c7_194, %c0_195] : memref<88x64xf32, #tpu.memory_space<vmem>>, vector<72x64xf32>
    %c3_196 = arith.constant 3 : index
    %c0_197 = arith.constant 0 : index
    %c0_198 = arith.constant 0 : index
    %206 = vector.load %arg4[%c3_196, %c0_197, %c0_198] : memref<9x72x64xf32, #tpu.memory_space<vmem>>, vector<1x72x64xf32>
    %207 = vector.shape_cast %206 : vector<1x72x64xf32> to vector<72x64xf32>
    %208 = arith.mulf %205, %207 : vector<72x64xf32>
    %209 = arith.truncf %208 : vector<72x64xf32> to vector<72x64xbf16>
    %c3_199 = arith.constant 3 : index
    %c0_200 = arith.constant 0 : index
    %c0_201 = arith.constant 0 : index
    %210 = vector.load %arg2[%c3_199, %c0_200, %c0_201] : memref<9x64x64xbf16, #tpu.memory_space<vmem>>, vector<1x64x64xbf16>
    %211 = vector.shape_cast %210 : vector<1x64x64xbf16> to vector<64x64xbf16>
    %cst_202 = arith.constant dense<0.000000e+00> : vector<72x64xf32>
    %212 = tpu.matmul %209, %211, %cst_202 {dimension_numbers = #tpu.dot_dimension_numbers<[1], [0], [0], [1], [0, 0, 1, 1], [], []>} : vector<72x64xbf16>, vector<64x64xbf16>, vector<72x64xf32> -> vector<72x64xf32>
    %213 = arith.addf %204, %212 : vector<72x64xf32>
    %c8_203 = arith.constant 8 : index
    %c0_204 = arith.constant 0 : index
    %214 = vector.load %arg9[%c8_203, %c0_204] : memref<88x64xf32, #tpu.memory_space<vmem>>, vector<72x64xf32>
    %c4_205 = arith.constant 4 : index
    %c0_206 = arith.constant 0 : index
    %c0_207 = arith.constant 0 : index
    %215 = vector.load %arg4[%c4_205, %c0_206, %c0_207] : memref<9x72x64xf32, #tpu.memory_space<vmem>>, vector<1x72x64xf32>
    %216 = vector.shape_cast %215 : vector<1x72x64xf32> to vector<72x64xf32>
    %217 = arith.mulf %214, %216 : vector<72x64xf32>
    %218 = arith.truncf %217 : vector<72x64xf32> to vector<72x64xbf16>
    %c4_208 = arith.constant 4 : index
    %c0_209 = arith.constant 0 : index
    %c0_210 = arith.constant 0 : index
    %219 = vector.load %arg2[%c4_208, %c0_209, %c0_210] : memref<9x64x64xbf16, #tpu.memory_space<vmem>>, vector<1x64x64xbf16>
    %220 = vector.shape_cast %219 : vector<1x64x64xbf16> to vector<64x64xbf16>
    %cst_211 = arith.constant dense<0.000000e+00> : vector<72x64xf32>
    %221 = tpu.matmul %218, %220, %cst_211 {dimension_numbers = #tpu.dot_dimension_numbers<[1], [0], [0], [1], [0, 0, 1, 1], [], []>} : vector<72x64xbf16>, vector<64x64xbf16>, vector<72x64xf32> -> vector<72x64xf32>
    %222 = arith.addf %213, %221 : vector<72x64xf32>
    %c9_212 = arith.constant 9 : index
    %c0_213 = arith.constant 0 : index
    %223 = vector.load %arg9[%c9_212, %c0_213] : memref<88x64xf32, #tpu.memory_space<vmem>>, vector<72x64xf32>
    %c5_214 = arith.constant 5 : index
    %c0_215 = arith.constant 0 : index
    %c0_216 = arith.constant 0 : index
    %224 = vector.load %arg4[%c5_214, %c0_215, %c0_216] : memref<9x72x64xf32, #tpu.memory_space<vmem>>, vector<1x72x64xf32>
    %225 = vector.shape_cast %224 : vector<1x72x64xf32> to vector<72x64xf32>
    %226 = arith.mulf %223, %225 : vector<72x64xf32>
    %227 = arith.truncf %226 : vector<72x64xf32> to vector<72x64xbf16>
    %c5_217 = arith.constant 5 : index
    %c0_218 = arith.constant 0 : index
    %c0_219 = arith.constant 0 : index
    %228 = vector.load %arg2[%c5_217, %c0_218, %c0_219] : memref<9x64x64xbf16, #tpu.memory_space<vmem>>, vector<1x64x64xbf16>
    %229 = vector.shape_cast %228 : vector<1x64x64xbf16> to vector<64x64xbf16>
    %cst_220 = arith.constant dense<0.000000e+00> : vector<72x64xf32>
    %230 = tpu.matmul %227, %229, %cst_220 {dimension_numbers = #tpu.dot_dimension_numbers<[1], [0], [0], [1], [0, 0, 1, 1], [], []>} : vector<72x64xbf16>, vector<64x64xbf16>, vector<72x64xf32> -> vector<72x64xf32>
    %231 = arith.addf %222, %230 : vector<72x64xf32>
    %c13_221 = arith.constant 13 : index
    %c0_222 = arith.constant 0 : index
    %232 = vector.load %arg9[%c13_221, %c0_222] : memref<88x64xf32, #tpu.memory_space<vmem>>, vector<72x64xf32>
    %c6_223 = arith.constant 6 : index
    %c0_224 = arith.constant 0 : index
    %c0_225 = arith.constant 0 : index
    %233 = vector.load %arg4[%c6_223, %c0_224, %c0_225] : memref<9x72x64xf32, #tpu.memory_space<vmem>>, vector<1x72x64xf32>
    %234 = vector.shape_cast %233 : vector<1x72x64xf32> to vector<72x64xf32>
    %235 = arith.mulf %232, %234 : vector<72x64xf32>
    %236 = arith.truncf %235 : vector<72x64xf32> to vector<72x64xbf16>
    %c6_226 = arith.constant 6 : index
    %c0_227 = arith.constant 0 : index
    %c0_228 = arith.constant 0 : index
    %237 = vector.load %arg2[%c6_226, %c0_227, %c0_228] : memref<9x64x64xbf16, #tpu.memory_space<vmem>>, vector<1x64x64xbf16>
    %238 = vector.shape_cast %237 : vector<1x64x64xbf16> to vector<64x64xbf16>
    %cst_229 = arith.constant dense<0.000000e+00> : vector<72x64xf32>
    %239 = tpu.matmul %236, %238, %cst_229 {dimension_numbers = #tpu.dot_dimension_numbers<[1], [0], [0], [1], [0, 0, 1, 1], [], []>} : vector<72x64xbf16>, vector<64x64xbf16>, vector<72x64xf32> -> vector<72x64xf32>
    %240 = arith.addf %231, %239 : vector<72x64xf32>
    %c14_230 = arith.constant 14 : index
    %c0_231 = arith.constant 0 : index
    %241 = vector.load %arg9[%c14_230, %c0_231] : memref<88x64xf32, #tpu.memory_space<vmem>>, vector<72x64xf32>
    %c7_232 = arith.constant 7 : index
    %c0_233 = arith.constant 0 : index
    %c0_234 = arith.constant 0 : index
    %242 = vector.load %arg4[%c7_232, %c0_233, %c0_234] : memref<9x72x64xf32, #tpu.memory_space<vmem>>, vector<1x72x64xf32>
    %243 = vector.shape_cast %242 : vector<1x72x64xf32> to vector<72x64xf32>
    %244 = arith.mulf %241, %243 : vector<72x64xf32>
    %245 = arith.truncf %244 : vector<72x64xf32> to vector<72x64xbf16>
    %c7_235 = arith.constant 7 : index
    %c0_236 = arith.constant 0 : index
    %c0_237 = arith.constant 0 : index
    %246 = vector.load %arg2[%c7_235, %c0_236, %c0_237] : memref<9x64x64xbf16, #tpu.memory_space<vmem>>, vector<1x64x64xbf16>
    %247 = vector.shape_cast %246 : vector<1x64x64xbf16> to vector<64x64xbf16>
    %cst_238 = arith.constant dense<0.000000e+00> : vector<72x64xf32>
    %248 = tpu.matmul %245, %247, %cst_238 {dimension_numbers = #tpu.dot_dimension_numbers<[1], [0], [0], [1], [0, 0, 1, 1], [], []>} : vector<72x64xbf16>, vector<64x64xbf16>, vector<72x64xf32> -> vector<72x64xf32>
    %249 = arith.addf %240, %248 : vector<72x64xf32>
    %c15_239 = arith.constant 15 : index
    %c0_240 = arith.constant 0 : index
    %250 = vector.load %arg9[%c15_239, %c0_240] : memref<88x64xf32, #tpu.memory_space<vmem>>, vector<72x64xf32>
    %c8_241 = arith.constant 8 : index
    %c0_242 = arith.constant 0 : index
    %c0_243 = arith.constant 0 : index
    %251 = vector.load %arg4[%c8_241, %c0_242, %c0_243] : memref<9x72x64xf32, #tpu.memory_space<vmem>>, vector<1x72x64xf32>
    %252 = vector.shape_cast %251 : vector<1x72x64xf32> to vector<72x64xf32>
    %253 = arith.mulf %250, %252 : vector<72x64xf32>
    %254 = arith.truncf %253 : vector<72x64xf32> to vector<72x64xbf16>
    %c8_244 = arith.constant 8 : index
    %c0_245 = arith.constant 0 : index
    %c0_246 = arith.constant 0 : index
    %255 = vector.load %arg2[%c8_244, %c0_245, %c0_246] : memref<9x64x64xbf16, #tpu.memory_space<vmem>>, vector<1x64x64xbf16>
    %256 = vector.shape_cast %255 : vector<1x64x64xbf16> to vector<64x64xbf16>
    %cst_247 = arith.constant dense<0.000000e+00> : vector<72x64xf32>
    %257 = tpu.matmul %254, %256, %cst_247 {dimension_numbers = #tpu.dot_dimension_numbers<[1], [0], [0], [1], [0, 0, 1, 1], [], []>} : vector<72x64xbf16>, vector<64x64xbf16>, vector<72x64xf32> -> vector<72x64xf32>
    %258 = arith.addf %249, %257 : vector<72x64xf32>
    %cst_248 = arith.constant 0.000000e+00 : f32
    %259 = vector.broadcast %cst_248 : f32 to vector<72x64xf32>
    %260 = arith.maximumf %258, %259 : vector<72x64xf32>
    %c8_249 = arith.constant 8 : index
    %c0_250 = arith.constant 0 : index
    %261 = vector.load %arg9[%c8_249, %c0_250] : memref<88x64xf32, #tpu.memory_space<vmem>>, vector<72x64xf32>
    tpu.vector_store %arg9[%c8_249, %c0_250], %260 {strides = array<i32>} : memref<88x64xf32, #tpu.memory_space<vmem>>, vector<72x64xf32>,
    %cst_251 = arith.constant 0.000000e+00 : f32
    %262 = vector.broadcast %cst_251 : f32 to vector<72x64xf32>
    %c1_252 = arith.constant 1 : index
    %c0_253 = arith.constant 0 : index
    %263 = vector.load %arg9[%c1_252, %c0_253] : memref<88x64xf32, #tpu.memory_space<vmem>>, vector<72x64xf32>
    %c0_254 = arith.constant 0 : index
    %c0_255 = arith.constant 0 : index
    %c0_256 = arith.constant 0 : index
    %264 = vector.load %arg4[%c0_254, %c0_255, %c0_256] : memref<9x72x64xf32, #tpu.memory_space<vmem>>, vector<1x72x64xf32>
    %265 = vector.shape_cast %264 : vector<1x72x64xf32> to vector<72x64xf32>
    %266 = arith.mulf %263, %265 : vector<72x64xf32>
    %267 = arith.truncf %266 : vector<72x64xf32> to vector<72x64xbf16>
    %c0_257 = arith.constant 0 : index
    %c0_258 = arith.constant 0 : index
    %c0_259 = arith.constant 0 : index
    %268 = vector.load %arg3[%c0_257, %c0_258, %c0_259] : memref<9x64x64xbf16, #tpu.memory_space<vmem>>, vector<1x64x64xbf16>
    %269 = vector.shape_cast %268 : vector<1x64x64xbf16> to vector<64x64xbf16>
    %cst_260 = arith.constant dense<0.000000e+00> : vector<72x64xf32>
    %270 = tpu.matmul %267, %269, %cst_260 {dimension_numbers = #tpu.dot_dimension_numbers<[1], [0], [0], [1], [0, 0, 1, 1], [], []>} : vector<72x64xbf16>, vector<64x64xbf16>, vector<72x64xf32> -> vector<72x64xf32>
    %271 = arith.addf %262, %270 : vector<72x64xf32>
    %c2_261 = arith.constant 2 : index
    %c0_262 = arith.constant 0 : index
    %272 = vector.load %arg9[%c2_261, %c0_262] : memref<88x64xf32, #tpu.memory_space<vmem>>, vector<72x64xf32>
    %c1_263 = arith.constant 1 : index
    %c0_264 = arith.constant 0 : index
    %c0_265 = arith.constant 0 : index
    %273 = vector.load %arg4[%c1_263, %c0_264, %c0_265] : memref<9x72x64xf32, #tpu.memory_space<vmem>>, vector<1x72x64xf32>
    %274 = vector.shape_cast %273 : vector<1x72x64xf32> to vector<72x64xf32>
    %275 = arith.mulf %272, %274 : vector<72x64xf32>
    %276 = arith.truncf %275 : vector<72x64xf32> to vector<72x64xbf16>
    %c1_266 = arith.constant 1 : index
    %c0_267 = arith.constant 0 : index
    %c0_268 = arith.constant 0 : index
    %277 = vector.load %arg3[%c1_266, %c0_267, %c0_268] : memref<9x64x64xbf16, #tpu.memory_space<vmem>>, vector<1x64x64xbf16>
    %278 = vector.shape_cast %277 : vector<1x64x64xbf16> to vector<64x64xbf16>
    %cst_269 = arith.constant dense<0.000000e+00> : vector<72x64xf32>
    %279 = tpu.matmul %276, %278, %cst_269 {dimension_numbers = #tpu.dot_dimension_numbers<[1], [0], [0], [1], [0, 0, 1, 1], [], []>} : vector<72x64xbf16>, vector<64x64xbf16>, vector<72x64xf32> -> vector<72x64xf32>
    %280 = arith.addf %271, %279 : vector<72x64xf32>
    %c3_270 = arith.constant 3 : index
    %c0_271 = arith.constant 0 : index
    %281 = vector.load %arg9[%c3_270, %c0_271] : memref<88x64xf32, #tpu.memory_space<vmem>>, vector<72x64xf32>
    %c2_272 = arith.constant 2 : index
    %c0_273 = arith.constant 0 : index
    %c0_274 = arith.constant 0 : index
    %282 = vector.load %arg4[%c2_272, %c0_273, %c0_274] : memref<9x72x64xf32, #tpu.memory_space<vmem>>, vector<1x72x64xf32>
    %283 = vector.shape_cast %282 : vector<1x72x64xf32> to vector<72x64xf32>
    %284 = arith.mulf %281, %283 : vector<72x64xf32>
    %285 = arith.truncf %284 : vector<72x64xf32> to vector<72x64xbf16>
    %c2_275 = arith.constant 2 : index
    %c0_276 = arith.constant 0 : index
    %c0_277 = arith.constant 0 : index
    %286 = vector.load %arg3[%c2_275, %c0_276, %c0_277] : memref<9x64x64xbf16, #tpu.memory_space<vmem>>, vector<1x64x64xbf16>
    %287 = vector.shape_cast %286 : vector<1x64x64xbf16> to vector<64x64xbf16>
    %cst_278 = arith.constant dense<0.000000e+00> : vector<72x64xf32>
    %288 = tpu.matmul %285, %287, %cst_278 {dimension_numbers = #tpu.dot_dimension_numbers<[1], [0], [0], [1], [0, 0, 1, 1], [], []>} : vector<72x64xbf16>, vector<64x64xbf16>, vector<72x64xf32> -> vector<72x64xf32>
    %289 = arith.addf %280, %288 : vector<72x64xf32>
    %c7_279 = arith.constant 7 : index
    %c0_280 = arith.constant 0 : index
    %290 = vector.load %arg9[%c7_279, %c0_280] : memref<88x64xf32, #tpu.memory_space<vmem>>, vector<72x64xf32>
    %c3_281 = arith.constant 3 : index
    %c0_282 = arith.constant 0 : index
    %c0_283 = arith.constant 0 : index
    %291 = vector.load %arg4[%c3_281, %c0_282, %c0_283] : memref<9x72x64xf32, #tpu.memory_space<vmem>>, vector<1x72x64xf32>
    %292 = vector.shape_cast %291 : vector<1x72x64xf32> to vector<72x64xf32>
    %293 = arith.mulf %290, %292 : vector<72x64xf32>
    %294 = arith.truncf %293 : vector<72x64xf32> to vector<72x64xbf16>
    %c3_284 = arith.constant 3 : index
    %c0_285 = arith.constant 0 : index
    %c0_286 = arith.constant 0 : index
    %295 = vector.load %arg3[%c3_284, %c0_285, %c0_286] : memref<9x64x64xbf16, #tpu.memory_space<vmem>>, vector<1x64x64xbf16>
    %296 = vector.shape_cast %295 : vector<1x64x64xbf16> to vector<64x64xbf16>
    %cst_287 = arith.constant dense<0.000000e+00> : vector<72x64xf32>
    %297 = tpu.matmul %294, %296, %cst_287 {dimension_numbers = #tpu.dot_dimension_numbers<[1], [0], [0], [1], [0, 0, 1, 1], [], []>} : vector<72x64xbf16>, vector<64x64xbf16>, vector<72x64xf32> -> vector<72x64xf32>
    %298 = arith.addf %289, %297 : vector<72x64xf32>
    %c8_288 = arith.constant 8 : index
    %c0_289 = arith.constant 0 : index
    %299 = vector.load %arg9[%c8_288, %c0_289] : memref<88x64xf32, #tpu.memory_space<vmem>>, vector<72x64xf32>
    %c4_290 = arith.constant 4 : index
    %c0_291 = arith.constant 0 : index
    %c0_292 = arith.constant 0 : index
    %300 = vector.load %arg4[%c4_290, %c0_291, %c0_292] : memref<9x72x64xf32, #tpu.memory_space<vmem>>, vector<1x72x64xf32>
    %301 = vector.shape_cast %300 : vector<1x72x64xf32> to vector<72x64xf32>
    %302 = arith.mulf %299, %301 : vector<72x64xf32>
    %303 = arith.truncf %302 : vector<72x64xf32> to vector<72x64xbf16>
    %c4_293 = arith.constant 4 : index
    %c0_294 = arith.constant 0 : index
    %c0_295 = arith.constant 0 : index
    %304 = vector.load %arg3[%c4_293, %c0_294, %c0_295] : memref<9x64x64xbf16, #tpu.memory_space<vmem>>, vector<1x64x64xbf16>
    %305 = vector.shape_cast %304 : vector<1x64x64xbf16> to vector<64x64xbf16>
    %cst_296 = arith.constant dense<0.000000e+00> : vector<72x64xf32>
    %306 = tpu.matmul %303, %305, %cst_296 {dimension_numbers = #tpu.dot_dimension_numbers<[1], [0], [0], [1], [0, 0, 1, 1], [], []>} : vector<72x64xbf16>, vector<64x64xbf16>, vector<72x64xf32> -> vector<72x64xf32>
    %307 = arith.addf %298, %306 : vector<72x64xf32>
    %c9_297 = arith.constant 9 : index
    %c0_298 = arith.constant 0 : index
    %308 = vector.load %arg9[%c9_297, %c0_298] : memref<88x64xf32, #tpu.memory_space<vmem>>, vector<72x64xf32>
    %c5_299 = arith.constant 5 : index
    %c0_300 = arith.constant 0 : index
    %c0_301 = arith.constant 0 : index
    %309 = vector.load %arg4[%c5_299, %c0_300, %c0_301] : memref<9x72x64xf32, #tpu.memory_space<vmem>>, vector<1x72x64xf32>
    %310 = vector.shape_cast %309 : vector<1x72x64xf32> to vector<72x64xf32>
    %311 = arith.mulf %308, %310 : vector<72x64xf32>
    %312 = arith.truncf %311 : vector<72x64xf32> to vector<72x64xbf16>
    %c5_302 = arith.constant 5 : index
    %c0_303 = arith.constant 0 : index
    %c0_304 = arith.constant 0 : index
    %313 = vector.load %arg3[%c5_302, %c0_303, %c0_304] : memref<9x64x64xbf16, #tpu.memory_space<vmem>>, vector<1x64x64xbf16>
    %314 = vector.shape_cast %313 : vector<1x64x64xbf16> to vector<64x64xbf16>
    %cst_305 = arith.constant dense<0.000000e+00> : vector<72x64xf32>
    %315 = tpu.matmul %312, %314, %cst_305 {dimension_numbers = #tpu.dot_dimension_numbers<[1], [0], [0], [1], [0, 0, 1, 1], [], []>} : vector<72x64xbf16>, vector<64x64xbf16>, vector<72x64xf32> -> vector<72x64xf32>
    %316 = arith.addf %307, %315 : vector<72x64xf32>
    %c13_306 = arith.constant 13 : index
    %c0_307 = arith.constant 0 : index
    %317 = vector.load %arg9[%c13_306, %c0_307] : memref<88x64xf32, #tpu.memory_space<vmem>>, vector<72x64xf32>
    %c6_308 = arith.constant 6 : index
    %c0_309 = arith.constant 0 : index
    %c0_310 = arith.constant 0 : index
    %318 = vector.load %arg4[%c6_308, %c0_309, %c0_310] : memref<9x72x64xf32, #tpu.memory_space<vmem>>, vector<1x72x64xf32>
    %319 = vector.shape_cast %318 : vector<1x72x64xf32> to vector<72x64xf32>
    %320 = arith.mulf %317, %319 : vector<72x64xf32>
    %321 = arith.truncf %320 : vector<72x64xf32> to vector<72x64xbf16>
    %c6_311 = arith.constant 6 : index
    %c0_312 = arith.constant 0 : index
    %c0_313 = arith.constant 0 : index
    %322 = vector.load %arg3[%c6_311, %c0_312, %c0_313] : memref<9x64x64xbf16, #tpu.memory_space<vmem>>, vector<1x64x64xbf16>
    %323 = vector.shape_cast %322 : vector<1x64x64xbf16> to vector<64x64xbf16>
    %cst_314 = arith.constant dense<0.000000e+00> : vector<72x64xf32>
    %324 = tpu.matmul %321, %323, %cst_314 {dimension_numbers = #tpu.dot_dimension_numbers<[1], [0], [0], [1], [0, 0, 1, 1], [], []>} : vector<72x64xbf16>, vector<64x64xbf16>, vector<72x64xf32> -> vector<72x64xf32>
    %325 = arith.addf %316, %324 : vector<72x64xf32>
    %c14_315 = arith.constant 14 : index
    %c0_316 = arith.constant 0 : index
    %326 = vector.load %arg9[%c14_315, %c0_316] : memref<88x64xf32, #tpu.memory_space<vmem>>, vector<72x64xf32>
    %c7_317 = arith.constant 7 : index
    %c0_318 = arith.constant 0 : index
    %c0_319 = arith.constant 0 : index
    %327 = vector.load %arg4[%c7_317, %c0_318, %c0_319] : memref<9x72x64xf32, #tpu.memory_space<vmem>>, vector<1x72x64xf32>
    %328 = vector.shape_cast %327 : vector<1x72x64xf32> to vector<72x64xf32>
    %329 = arith.mulf %326, %328 : vector<72x64xf32>
    %330 = arith.truncf %329 : vector<72x64xf32> to vector<72x64xbf16>
    %c7_320 = arith.constant 7 : index
    %c0_321 = arith.constant 0 : index
    %c0_322 = arith.constant 0 : index
    %331 = vector.load %arg3[%c7_320, %c0_321, %c0_322] : memref<9x64x64xbf16, #tpu.memory_space<vmem>>, vector<1x64x64xbf16>
    %332 = vector.shape_cast %331 : vector<1x64x64xbf16> to vector<64x64xbf16>
    %cst_323 = arith.constant dense<0.000000e+00> : vector<72x64xf32>
    %333 = tpu.matmul %330, %332, %cst_323 {dimension_numbers = #tpu.dot_dimension_numbers<[1], [0], [0], [1], [0, 0, 1, 1], [], []>} : vector<72x64xbf16>, vector<64x64xbf16>, vector<72x64xf32> -> vector<72x64xf32>
    %334 = arith.addf %325, %333 : vector<72x64xf32>
    %c15_324 = arith.constant 15 : index
    %c0_325 = arith.constant 0 : index
    %335 = vector.load %arg9[%c15_324, %c0_325] : memref<88x64xf32, #tpu.memory_space<vmem>>, vector<72x64xf32>
    %c8_326 = arith.constant 8 : index
    %c0_327 = arith.constant 0 : index
    %c0_328 = arith.constant 0 : index
    %336 = vector.load %arg4[%c8_326, %c0_327, %c0_328] : memref<9x72x64xf32, #tpu.memory_space<vmem>>, vector<1x72x64xf32>
    %337 = vector.shape_cast %336 : vector<1x72x64xf32> to vector<72x64xf32>
    %338 = arith.mulf %335, %337 : vector<72x64xf32>
    %339 = arith.truncf %338 : vector<72x64xf32> to vector<72x64xbf16>
    %c8_329 = arith.constant 8 : index
    %c0_330 = arith.constant 0 : index
    %c0_331 = arith.constant 0 : index
    %340 = vector.load %arg3[%c8_329, %c0_330, %c0_331] : memref<9x64x64xbf16, #tpu.memory_space<vmem>>, vector<1x64x64xbf16>
    %341 = vector.shape_cast %340 : vector<1x64x64xbf16> to vector<64x64xbf16>
    %cst_332 = arith.constant dense<0.000000e+00> : vector<72x64xf32>
    %342 = tpu.matmul %339, %341, %cst_332 {dimension_numbers = #tpu.dot_dimension_numbers<[1], [0], [0], [1], [0, 0, 1, 1], [], []>} : vector<72x64xbf16>, vector<64x64xbf16>, vector<72x64xf32> -> vector<72x64xf32>
    %343 = arith.addf %334, %342 : vector<72x64xf32>
    %cst_333 = arith.constant 5.000000e-01 : f32
    %344 = vector.broadcast %cst_333 : f32 to vector<72x64xf32>
    %345 = arith.mulf %344, %343 : vector<72x64xf32>
    %346 = arith.addf %175, %345 : vector<72x64xf32>
    %cst_334 = arith.constant 0.000000e+00 : f32
    %347 = vector.broadcast %cst_334 : f32 to vector<72x64xf32>
    %348 = arith.maximumf %346, %347 : vector<72x64xf32>
    %c0_335 = arith.constant 0 : index
    %c0_336 = arith.constant 0 : index
    %349 = vector.load %arg5[%c0_335, %c0_336] : memref<2x72xf32, #tpu.memory_space<vmem>>, vector<2x72xf32>
    %cst_337 = arith.constant dense<0.000000e+00> : vector<2x64xf32>
    %350 = tpu.matmul %349, %348, %cst_337 {dimension_numbers = #tpu.dot_dimension_numbers<[1], [0], [0], [1], [0, 0, 1, 1], [], []>} : vector<2x72xf32>, vector<72x64xf32>, vector<2x64xf32> -> vector<2x64xf32>
    %c0_338 = arith.constant 0 : index
    %c0_339 = arith.constant 0 : index
    %351 = vector.load %arg6[%c0_338, %c0_339] : memref<64x10xf32, #tpu.memory_space<vmem>>, vector<64x10xf32>
    %cst_340 = arith.constant dense<0.000000e+00> : vector<2x10xf32>
    %352 = tpu.matmul %350, %351, %cst_340 {dimension_numbers = #tpu.dot_dimension_numbers<[1], [0], [0], [1], [0, 0, 1, 1], [], []>} : vector<2x64xf32>, vector<64x10xf32>, vector<2x10xf32> -> vector<2x10xf32>
    %c0_341 = arith.constant 0 : index
    %c0_342 = arith.constant 0 : index
    %353 = vector.load %arg7[%c0_341, %c0_342] : memref<1x10xf32, #tpu.memory_space<vmem>>, vector<1x10xf32>
    %354 = vector.broadcast %353 : vector<1x10xf32> to vector<2x10xf32>
    %355 = arith.addf %352, %354 : vector<2x10xf32>
    %c0_343 = arith.constant 0 : index
    %c0_344 = arith.constant 0 : index
    %356 = vector.load %arg8[%c0_343, %c0_344] : memref<2x10xf32, #tpu.memory_space<vmem>>, vector<2x10xf32>
    tpu.vector_store %arg8[%c0_343, %c0_344], %355 {strides = array<i32>} : memref<2x10xf32, #tpu.memory_space<vmem>>, vector<2x10xf32>,
    return
  }
}

</mosaic_0001>

<bundles_post_ra>
// kernel: conv_ode_net_forward.3
= control target key start
LH: loop header
LB: loop body
LE: loop exit
PB: predicated region body
PF: predicated region fallthrough
CT: control target
= control target key end

     0   :  { %vm875_vm0 = vcmask 1044480   ;;  %vm876_vm1 = vcmask 1045504   ;;  %v3649_v0 = vmov 0.0   ;;  %v3650_v2 = vmov 65535   ;;  %s4863_s1 = inlined_call_operand.vmem [shape: bf16[27,64], index: 1, kind: input, shape index: {}]   ;;  %s4864_s0 = inlined_call_operand.vmem [shape: bf16[1352,27], index: 0, kind: input, shape index: {}]   ;;  %s4865_s2 = inlined_call_operand.vmem [shape: bf16[1352,64], index: 2, kind: output, shape index: {}]  }
   0x1   :  { %3211 = vmatprep.subr.bf16.mxu0 %v3649_v0  ;;  %v3562_v1 = vld [vmem:[%s4863_s1] sm:$0xff]   ;;  %v877_v3 = vsel %vm875_vm0, 4294967295, %v3650_v2  ;;  %3555 = vmatprep.subr.bf16.mxu1 %v3649_v0  ;;  %v3563_v4 = vld [vmem:[%s4863_s1 + $0x8] sm:$0x3f]   ;;  %vm3651_vm2 = vmmov 0   ;;  %v3565_v8 = vld [vmem:[%s4864_s0 + $0x158] sm:$0xff]  }
   0x2   :  { %3212 = vmatpush3.bf16.msra.mxu0 %v3562_v1  ;;  %v878_v5 = vsel %vm876_vm1, %v877_v3, 0  ;;  %3557 = vmatpush3.bf16.msra.mxu1 %v3562_v1  ;;  %v3564_v7 = vld [vmem:[%s4864_s0] sm:$0xff]   ;;  %vm619_vm3 = vcmask 220160   ;;  %v3566_v9 = vld [vmem:[%s4864_s0 + $0x8] sm:$0xff]   ;;  %v3568_v11 = vld [vmem:[%s4864_s0 + $0x10] sm:$0xff]   ;;  %vm2440_vm4 = vcmask 519168  }
   0x3   :  { %3213 = vmatprep.subr.bf16.mxu0 %v3649_v0  ;;  %v880_v6 = vand.u32 %v3563_v4, %v878_v5  ;;  %3215 = vmatprep.mubr.msk.bf16.mxu0 %vm3651_vm2, %v3649_v0  ;;  %v3567_v10 = vld [vmem:[%s4864_s0 + $0x160] sm:$0xff]   ;;  %v3569_v12 = vld [vmem:[%s4864_s0 + $0x168] sm:$0xff]   ;;  %v3570_v13 = vld [vmem:[%s4864_s0 + $0x18] sm:$0xff]  }
   0x4   :  { %3556 = vmatprep.subr.bf16.mxu1 %v3649_v0  ;;  %3387 = vmatprep.mubr.msk.bf16.mxu1 %vm3651_vm2, %v3649_v0  ;;  %v3571_v14 = vld [vmem:[%s4864_s0 + $0x170] sm:$0xff]   ;;  %v3572_v15 = vld [vmem:[%s4864_s0 + $0x20] sm:$0xff]   ;;  %v3573_v16 = vld [vmem:[%s4864_s0 + $0x178] sm:$0xff]  }
   0x5   :  { %v3574_v17 = vld [vmem:[%s4864_s0 + $0x28] sm:$0xff]   ;;  %v3575_v18 = vld [vmem:[%s4864_s0 + $0x180] sm:$0xff]   ;;  %v3576_v19 = vld [vmem:[%s4864_s0 + $0x30] sm:$0xff]  }
   0x6   :  { %3214 = vmatpush3.bf16.msra.mxu0 %v880_v6  ;;  %3558 = vmatpush3.bf16.msra.mxu1 %v880_v6  ;;  %v3577_v20 = vld [vmem:[%s4864_s0 + $0x188] sm:$0xff]   ;;  %v3578_v21 = vld [vmem:[%s4864_s0 + $0x38] sm:$0xff]   ;;  %v3579_v22 = vld [vmem:[%s4864_s0 + $0x190] sm:$0xff]  }
   0x7   :  { %v3580_v23 = vld [vmem:[%s4864_s0 + $0x40] sm:$0xff]   ;;  %v3581_v24 = vld [vmem:[%s4864_s0 + $0x198] sm:$0xff]   ;;  %v3582_v25 = vld [vmem:[%s4864_s0 + $0x48] sm:$0xff]  }
   0x8   :  { %v3583_v26 = vld [vmem:[%s4864_s0 + $0x1a0] sm:$0xff]   ;;  %v3584_v27 = vld [vmem:[%s4864_s0 + $0x50] sm:$0xff]   ;;  %v3585_v28 = vld [vmem:[%s4864_s0 + $0x1a8] sm:$0xff]  }
   0x9   :  { %3216 = vmatmul.mubr.msk.bf16.vlgmr.msra.gmra.mrb[0].mxu0 %vm619_vm3, %v3564_v7  ;;  %3388 = vmatmul.mubr.msk.bf16.vlgmr.msra.gmra.mrb[0].mxu1 %vm619_vm3, %v3565_v8  ;;  %v3586_v29 = vld [vmem:[%s4864_s0 + $0x58] sm:$0xff]   ;;  %v3587_v30 = vld [vmem:[%s4864_s0 + $0x1b0] sm:$0xff]   ;;  %v3588_v31 = vld [vmem:[%s4864_s0 + $0x60] sm:$0xff]  }
   0xa   :  { %3219 = vmatprep.mubr.msk.bf16.mxu0 %vm3651_vm2, %v3649_v0  ;;  %3391 = vmatprep.mubr.msk.bf16.mxu1 %vm3651_vm2, %v3649_v0  ;;  %v3589_v32 = vld [vmem:[%s4864_s0 + $0x1b8] sm:$0xff]   ;;  %v3590_v33 = vld [vmem:[%s4864_s0 + $0x68] sm:$0xff]   ;;  %v3591_v34 = vld [vmem:[%s4864_s0 + $0x1c0] sm:$0xff]  }
   0xb   :  { %v3592_v35 = vld [vmem:[%s4864_s0 + $0x70] sm:$0xff]   ;;  %v3593_v36 = vld [vmem:[%s4864_s0 + $0x1c8] sm:$0xff]   ;;  %v3594_v37 = vld [vmem:[%s4864_s0 + $0x78] sm:$0xff]  }
   0xc   :  { %v3595_v38 = vld [vmem:[%s4864_s0 + $0x1d0] sm:$0xff]   ;;  %v3596_v39 = vld [vmem:[%s4864_s0 + $0x80] sm:$0xff]   ;;  %v3597_v40 = vld [vmem:[%s4864_s0 + $0x1d8] sm:$0xff]  }
   0xd   :  { %v3598_v41 = vld [vmem:[%s4864_s0 + $0x88] sm:$0xff]   ;;  %v3599_v42 = vld [vmem:[%s4864_s0 + $0x1e0] sm:$0xff]   ;;  %v3600_v43 = vld [vmem:[%s4864_s0 + $0x90] sm:$0xff]  }
   0xe   :  { %v3601_v44 = vld [vmem:[%s4864_s0 + $0x1e8] sm:$0xff]   ;;  %v3602_v45 = vld [vmem:[%s4864_s0 + $0x98] sm:$0xff]   ;;  %v3603_v46 = vld [vmem:[%s4864_s0 + $0x1f0] sm:$0xff]  }
   0xf   :  { %v3604_v47 = vld [vmem:[%s4864_s0 + $0xa0] sm:$0xff]   ;;  %v3605_v48 = vld [vmem:[%s4864_s0 + $0x1f8] sm:$0xff]   ;;  %v3606_v49 = vld [vmem:[%s4864_s0 + $0xa8] sm:$0xff]  }
  0x10   :  { %v3607_v50 = vld [vmem:[%s4864_s0 + $0x200] sm:$0xff]   ;;  %v3608_v51 = vld [vmem:[%s4864_s0 + $0xb0] sm:$0xff]   ;;  %v3609_v52 = vld [vmem:[%s4864_s0 + $0x208] sm:$0xff]  }
  0x11   :  { %3220 = vmatmul.mubr.msk.bf16.gmra.mrb[4].mxu0 %vm619_vm3, %v3566_v9  ;;  %3392 = vmatmul.mubr.msk.bf16.gmra.mrb[4].mxu1 %vm619_vm3, %v3567_v10  ;;  %v3610_v53 = vld [vmem:[%s4864_s0 + $0xb8] sm:$0xff]   ;;  %v3611_v54 = vld [vmem:[%s4864_s0 + $0x210] sm:$0xff]   ;;  %v3612_v55 = vld [vmem:[%s4864_s0 + $0xc0] sm:$0xff]  }
  0x12   :  { %3223 = vmatprep.mubr.msk.bf16.mxu0 %vm3651_vm2, %v3649_v0  ;;  %3395 = vmatprep.mubr.msk.bf16.mxu1 %vm3651_vm2, %v3649_v0  ;;  %v3613_v56 = vld [vmem:[%s4864_s0 + $0x218] sm:$0xff]   ;;  %v3614_v57 = vld [vmem:[%s4864_s0 + $0xc8] sm:$0xff]   ;;  %v3615_v58 = vld [vmem:[%s4864_s0 + $0x220] sm:$0xff]  }
  0x13   :  { %v3616_v59 = vld [vmem:[%s4864_s0 + $0xd0] sm:$0xff]   ;;  %v3617_v60 = vld [vmem:[%s4864_s0 + $0x228] sm:$0xff]   ;;  %v3618_v2 = vld [vmem:[%s4864_s0 + $0xd8] sm:$0xff]  }
  0x14   :  { %v3619_v5 = vld [vmem:[%s4864_s0 + $0x230] sm:$0xff]  }
  0x19   :  { %3224 = vmatmul.mubr.msk.bf16.gmra.mrb[8].mxu0 %vm619_vm3, %v3568_v11  ;;  %3396 = vmatmul.mubr.msk.bf16.gmra.mrb[8].mxu1 %vm619_vm3, %v3569_v12 }
  0x1a   :  { %3227 = vmatprep.mubr.msk.bf16.mxu0 %vm3651_vm2, %v3649_v0  ;;  %3399 = vmatprep.mubr.msk.bf16.mxu1 %vm3651_vm2, %v3649_v0 }
  0x21   :  { %3228 = vmatmul.mubr.msk.bf16.gmra.mrb[12].mxu0 %vm619_vm3, %v3570_v13  ;;  %3400 = vmatmul.mubr.msk.bf16.gmra.mrb[12].mxu1 %vm619_vm3, %v3571_v14 }
  0x22   :  { %3231 = vmatprep.mubr.msk.bf16.mxu0 %vm3651_vm2, %v3649_v0  ;;  %3403 = vmatprep.mubr.msk.bf16.mxu1 %vm3651_vm2, %v3649_v0 }
  0x29   :  { %3232 = vmatmul.mubr.msk.bf16.gmra.mrb[16].mxu0 %vm619_vm3, %v3572_v15  ;;  %3404 = vmatmul.mubr.msk.bf16.gmra.mrb[16].mxu1 %vm619_vm3, %v3573_v16 }
  0x2a   :  { %3235 = vmatprep.mubr.msk.bf16.mxu0 %vm3651_vm2, %v3649_v0  ;;  %3407 = vmatprep.mubr.msk.bf16.mxu1 %vm3651_vm2, %v3649_v0 }
  0x31   :  { %3236 = vmatmul.mubr.msk.bf16.gmra.mrb[20].mxu0 %vm619_vm3, %v3574_v17  ;;  %3408 = vmatmul.mubr.msk.bf16.gmra.mrb[20].mxu1 %vm619_vm3, %v3575_v18 }
  0x32   :  { %3239 = vmatprep.mubr.msk.bf16.mxu0 %vm3651_vm2, %v3649_v0  ;;  %3411 = vmatprep.mubr.msk.bf16.mxu1 %vm3651_vm2, %v3649_v0 }
  0x39   :  { %3240 = vmatmul.mubr.msk.bf16.gmra.mrb[24].mxu0 %vm619_vm3, %v3576_v19  ;;  %3412 = vmatmul.mubr.msk.bf16.gmra.mrb[24].mxu1 %vm619_vm3, %v3577_v20  ;;  %v3620_v20 = vld [vmem:[%s4864_s0 + $0xe0] sm:$0xff]  }
  0x3a   :  { %3243 = vmatprep.mubr.msk.bf16.mxu0 %vm3651_vm2, %v3649_v0  ;;  %3415 = vmatprep.mubr.msk.bf16.mxu1 %vm3651_vm2, %v3649_v0 }
  0x41   :  { %3244 = vmatmul.mubr.msk.bf16.gmra.mrb[28].mxu0 %vm619_vm3, %v3578_v21  ;;  %3416 = vmatmul.mubr.msk.bf16.gmra.mrb[28].mxu1 %vm619_vm3, %v3579_v22 }
  0x42   :  { %3247 = vmatprep.mubr.msk.bf16.mxu0 %vm3651_vm2, %v3649_v0  ;;  %3419 = vmatprep.mubr.msk.bf16.mxu1 %vm3651_vm2, %v3649_v0 }
  0x49   :  { %3248 = vmatmul.mubr.msk.bf16.gmra.mrb[32].mxu0 %vm619_vm3, %v3580_v23  ;;  %3420 = vmatmul.mubr.msk.bf16.gmra.mrb[32].mxu1 %vm619_vm3, %v3581_v24  ;;  %v3621_v23 = vld [vmem:[%s4864_s0 + $0x238] sm:$0xff]  }
  0x4a   :  { %3251 = vmatprep.mubr.msk.bf16.mxu0 %vm3651_vm2, %v3649_v0  ;;  %3423 = vmatprep.mubr.msk.bf16.mxu1 %vm3651_vm2, %v3649_v0 }
  0x51   :  { %3252 = vmatmul.mubr.msk.bf16.gmra.mrb[36].mxu0 %vm619_vm3, %v3582_v25  ;;  %3424 = vmatmul.mubr.msk.bf16.gmra.mrb[36].mxu1 %vm619_vm3, %v3583_v26 }
  0x52   :  { %3255 = vmatprep.mubr.msk.bf16.mxu0 %vm3651_vm2, %v3649_v0  ;;  %3427 = vmatprep.mubr.msk.bf16.mxu1 %vm3651_vm2, %v3649_v0 }
  0x59   :  { %3256 = vmatmul.mubr.msk.bf16.gmra.mrb[40].mxu0 %vm619_vm3, %v3584_v27  ;;  %3428 = vmatmul.mubr.msk.bf16.gmra.mrb[40].mxu1 %vm619_vm3, %v3585_v28 }
  0x5a   :  { %3259 = vmatprep.mubr.msk.bf16.mxu0 %vm3651_vm2, %v3649_v0  ;;  %3431 = vmatprep.mubr.msk.bf16.mxu1 %vm3651_vm2, %v3649_v0 }
  0x61   :  { %3260 = vmatmul.mubr.msk.bf16.gmra.mrb[44].mxu0 %vm619_vm3, %v3586_v29  ;;  %3432 = vmatmul.mubr.msk.bf16.gmra.mrb[44].mxu1 %vm619_vm3, %v3587_v30 }
  0x62   :  { %3263 = vmatprep.mubr.msk.bf16.mxu0 %vm3651_vm2, %v3649_v0  ;;  %3435 = vmatprep.mubr.msk.bf16.mxu1 %vm3651_vm2, %v3649_v0 }
  0x69   :  { %3264 = vmatmul.mubr.msk.bf16.gmra.mrb[48].mxu0 %vm619_vm3, %v3588_v31  ;;  %3436 = vmatmul.mubr.msk.bf16.gmra.mrb[48].mxu1 %vm619_vm3, %v3589_v32 }
  0x6a   :  { %3267 = vmatprep.mubr.msk.bf16.mxu0 %vm3651_vm2, %v3649_v0  ;;  %3439 = vmatprep.mubr.msk.bf16.mxu1 %vm3651_vm2, %v3649_v0 }
  0x71   :  { %3268 = vmatmul.mubr.msk.bf16.gmra.mrb[52].mxu0 %vm619_vm3, %v3590_v33  ;;  %3440 = vmatmul.mubr.msk.bf16.gmra.mrb[52].mxu1 %vm619_vm3, %v3591_v34 }
  0x72   :  { %3271 = vmatprep.mubr.msk.bf16.mxu0 %vm3651_vm2, %v3649_v0  ;;  %3443 = vmatprep.mubr.msk.bf16.mxu1 %vm3651_vm2, %v3649_v0 }
  0x79   :  { %3272 = vmatmul.mubr.msk.bf16.gmra.mrb[56].mxu0 %vm619_vm3, %v3592_v35  ;;  %3444 = vmatmul.mubr.msk.bf16.gmra.mrb[56].mxu1 %vm619_vm3, %v3593_v36 }
  0x7a   :  { %3275 = vmatprep.mubr.msk.bf16.mxu0 %vm3651_vm2, %v3649_v0  ;;  %3447 = vmatprep.mubr.msk.bf16.mxu1 %vm3651_vm2, %v3649_v0 }
  0x81   :  { %3276 = vmatmul.mubr.msk.bf16.gmra.mrb[60].mxu0 %vm619_vm3, %v3594_v37  ;;  %3448 = vmatmul.mubr.msk.bf16.gmra.mrb[60].mxu1 %vm619_vm3, %v3595_v38  ;;  %v3622_v38 = vld [vmem:[%s4864_s0 + $0xe8] sm:$0xff]  }
  0x82   :  { %3279 = vmatprep.mubr.msk.bf16.mxu0 %vm3651_vm2, %v3649_v0  ;;  %3451 = vmatprep.mubr.msk.bf16.mxu1 %vm3651_vm2, %v3649_v0 }
  0x89   :  { %3280 = vmatmul.mubr.msk.bf16.gmra.mrb[64].mxu0 %vm619_vm3, %v3596_v39  ;;  %3452 = vmatmul.mubr.msk.bf16.gmra.mrb[64].mxu1 %vm619_vm3, %v3597_v40 }
  0x8a   :  { %3283 = vmatprep.mubr.msk.bf16.mxu0 %vm3651_vm2, %v3649_v0  ;;  %3455 = vmatprep.mubr.msk.bf16.mxu1 %vm3651_vm2, %v3649_v0 }
  0x91   :  { %3284 = vmatmul.mubr.msk.bf16.gmra.mrb[68].mxu0 %vm619_vm3, %v3598_v41  ;;  %3456 = vmatmul.mubr.msk.bf16.gmra.mrb[68].mxu1 %vm619_vm3, %v3599_v42  ;;  %v3623_v41 = vld [vmem:[%s4864_s0 + $0x240] sm:$0xff]  }
  0x92   :  { %3287 = vmatprep.mubr.msk.bf16.mxu0 %vm3651_vm2, %v3649_v0  ;;  %3459 = vmatprep.mubr.msk.bf16.mxu1 %vm3651_vm2, %v3649_v0 }
  0x99   :  { %3288 = vmatmul.mubr.msk.bf16.gmra.mrb[72].mxu0 %vm619_vm3, %v3600_v43  ;;  %3460 = vmatmul.mubr.msk.bf16.gmra.mrb[72].mxu1 %vm619_vm3, %v3601_v44 }
  0x9a   :  { %3291 = vmatprep.mubr.msk.bf16.mxu0 %vm3651_vm2, %v3649_v0  ;;  %3463 = vmatprep.mubr.msk.bf16.mxu1 %vm3651_vm2, %v3649_v0 }
  0xa1   :  { %3292 = vmatmul.mubr.msk.bf16.gmra.mrb[76].mxu0 %vm619_vm3, %v3602_v45  ;;  %3464 = vmatmul.mubr.msk.bf16.gmra.mrb[76].mxu1 %vm619_vm3, %v3603_v46 }
  0xa2   :  { %3295 = vmatprep.mubr.msk.bf16.mxu0 %vm3651_vm2, %v3649_v0  ;;  %3467 = vmatprep.mubr.msk.bf16.mxu1 %vm3651_vm2, %v3649_v0 }
  0xa9   :  { %3296 = vmatmul.mubr.msk.bf16.gmra.mrb[80].mxu0 %vm619_vm3, %v3604_v47  ;;  %3468 = vmatmul.mubr.msk.bf16.gmra.mrb[80].mxu1 %vm619_vm3, %v3605_v48 }
  0xaa   :  { %3299 = vmatprep.mubr.msk.bf16.mxu0 %vm3651_vm2, %v3649_v0  ;;  %3471 = vmatprep.mubr.msk.bf16.mxu1 %vm3651_vm2, %v3649_v0 }
  0xb1   :  { %3300 = vmatmul.mubr.msk.bf16.gmra.mrb[84].mxu0 %vm619_vm3, %v3606_v49  ;;  %3472 = vmatmul.mubr.msk.bf16.gmra.mrb[84].mxu1 %vm619_vm3, %v3607_v50 }
  0xb2   :  { %3303 = vmatprep.mubr.msk.bf16.mxu0 %vm3651_vm2, %v3649_v0  ;;  %3475 = vmatprep.mubr.msk.bf16.mxu1 %vm3651_vm2, %v3649_v0 }
  0xb9   :  { %3304 = vmatmul.mubr.msk.bf16.gmra.mrb[88].mxu0 %vm619_vm3, %v3608_v51  ;;  %3476 = vmatmul.mubr.msk.bf16.gmra.mrb[88].mxu1 %vm619_vm3, %v3609_v52 }
  0xba   :  { %3307 = vmatprep.mubr.msk.bf16.mxu0 %vm3651_vm2, %v3649_v0  ;;  %3479 = vmatprep.mubr.msk.bf16.mxu1 %vm3651_vm2, %v3649_v0 }
  0xc1   :  { %3308 = vmatmul.mubr.msk.bf16.gmra.mrb[92].mxu0 %vm619_vm3, %v3610_v53  ;;  %3480 = vmatmul.mubr.msk.bf16.gmra.mrb[92].mxu1 %vm619_vm3, %v3611_v54 }
  0xc2   :  { %3311 = vmatprep.mubr.msk.bf16.mxu0 %vm3651_vm2, %v3649_v0  ;;  %3483 = vmatprep.mubr.msk.bf16.mxu1 %vm3651_vm2, %v3649_v0 }
  0xc9   :  { %3312 = vmatmul.mubr.msk.bf16.gmra.mrb[96].mxu0 %vm619_vm3, %v3612_v55  ;;  %3484 = vmatmul.mubr.msk.bf16.gmra.mrb[96].mxu1 %vm619_vm3, %v3613_v56  ;;  %v3624_v56 = vld [vmem:[%s4864_s0 + $0xf0] sm:$0xff]  }
  0xca   :  { %3315 = vmatprep.mubr.msk.bf16.mxu0 %vm3651_vm2, %v3649_v0  ;;  %3487 = vmatprep.mubr.msk.bf16.mxu1 %vm3651_vm2, %v3649_v0 }
  0xd1   :  { %3316 = vmatmul.mubr.msk.bf16.gmra.mrb[100].mxu0 %vm619_vm3, %v3614_v57  ;;  %3488 = vmatmul.mubr.msk.bf16.gmra.mrb[100].mxu1 %vm619_vm3, %v3615_v58 }
  0xd2   :  { %3319 = vmatprep.mubr.msk.bf16.mxu0 %vm3651_vm2, %v3649_v0  ;;  %3491 = vmatprep.mubr.msk.bf16.mxu1 %vm3651_vm2, %v3649_v0 }
  0xd9   :  { %3320 = vmatmul.mubr.msk.bf16.gmra.mrb[104].mxu0 %vm619_vm3, %v3616_v59  ;;  %3492 = vmatmul.mubr.msk.bf16.gmra.mrb[104].mxu1 %vm619_vm3, %v3617_v60  ;;  %v3625_v59 = vld [vmem:[%s4864_s0 + $0x248] sm:$0xff]  }
  0xda   :  { %3323 = vmatprep.mubr.msk.bf16.mxu0 %vm3651_vm2, %v3649_v0  ;;  %3495 = vmatprep.mubr.msk.bf16.mxu1 %vm3651_vm2, %v3649_v0 }
  0xdc   :  { %v916_v61 = vpop.f32.mrb[0].mxu0  ;;  %v1260_v62 = vpop.f32.mrb[0].mxu1 }
  0xdd   :  { %v1594_v63 = vmax.f32 %v916_v61, 0.0  ;;  %v3217_v1 = vpop.f32.mrb[1].mxu0  ;;  %v1680_v3 = vmax.f32 %v1260_v62, 0.0  ;;  %v3389_v4 = vpop.f32.mrb[1].mxu1 }
  0xde   :  { %v919_v6 = vpop.f32.mrb[2].mxu0  ;;  %v1263_v7 = vpop.f32.mrb[2].mxu1 }
  0xdf   :  { %v2955_v8 = vpack.c.bf16 %v1594_v63, %v1594_v63  ;;  %v1595_v9 = vmax.f32 %v919_v6, 0.0  ;;  %v3218_v10 = vpop.f32.mrb[3].mxu0  ;;  %v3041_v11 = vpack.c.bf16 %v1680_v3, %v1680_v3  ;;  %v1681_v12 = vmax.f32 %v1263_v7, 0.0  ;;  %v3390_v13 = vpop.f32.mrb[3].mxu1 }
  0xe1   :  { %2441 = vst.msk [vmem:[%s4865_s2] sm:$0xf] %vm2440_vm4, %v2955_v8  ;;  %v2956_v14 = vpack.c.bf16 %v1595_v9, %v1595_v9  ;;  %3324 = vmatmul.mubr.msk.bf16.gmra.mrb[108].mxu0 %vm619_vm3, %v3618_v2  ;;  %2527 = vst.msk [vmem:[%s4865_s2 + $0x158] sm:$0xf] %vm2440_vm4, %v3041_v11  ;;  %v3042_v15 = vpack.c.bf16 %v1681_v12, %v1681_v12  ;;  %3496 = vmatmul.mubr.msk.bf16.gmra.mrb[108].mxu1 %vm619_vm3, %v3619_v5  ;;  %v3626_v11 = vld [vmem:[%s4864_s0 + $0xf8] sm:$0xff]  }
  0xe2   :  { %3327 = vmatprep.mubr.msk.bf16.mxu0 %vm3651_vm2, %v3649_v0  ;;  %3499 = vmatprep.mubr.msk.bf16.mxu1 %vm3651_vm2, %v3649_v0 }
  0xe3   :  { %2442 = vst.msk [vmem:[%s4865_s2 + $0x4] sm:$0xf] %vm2440_vm4, %v2956_v14  ;;  %2528 = vst.msk [vmem:[%s4865_s2 + $0x15c] sm:$0xf] %vm2440_vm4, %v3042_v15  ;;  %v3627_v14 = vld [vmem:[%s4864_s0 + $0x250] sm:$0xff]  }
  0xe4   :  { %v924_v16 = vpop.f32.mrb[4].mxu0  ;;  %v1268_v17 = vpop.f32.mrb[4].mxu1 }
  0xe5   :  { %v1596_v18 = vmax.f32 %v924_v16, 0.0  ;;  %v3221_v19 = vpop.f32.mrb[5].mxu0  ;;  %v1682_v21 = vmax.f32 %v1268_v17, 0.0  ;;  %v3393_v22 = vpop.f32.mrb[5].mxu1 }
  0xe6   :  { %v927_v24 = vpop.f32.mrb[6].mxu0  ;;  %v1271_v25 = vpop.f32.mrb[6].mxu1 }
  0xe7   :  { %v2957_v26 = vpack.c.bf16 %v1596_v18, %v1596_v18  ;;  %v1597_v27 = vmax.f32 %v927_v24, 0.0  ;;  %v3222_v28 = vpop.f32.mrb[7].mxu0  ;;  %v3043_v29 = vpack.c.bf16 %v1682_v21, %v1682_v21  ;;  %v1683_v30 = vmax.f32 %v1271_v25, 0.0  ;;  %v3394_v31 = vpop.f32.mrb[7].mxu1 }
  0xe9   :  { %2443 = vst.msk [vmem:[%s4865_s2 + $0x8] sm:$0xf] %vm2440_vm4, %v2957_v26  ;;  %v2958_v32 = vpack.c.bf16 %v1597_v27, %v1597_v27  ;;  %3328 = vmatmul.mubr.msk.bf16.gmra.mrb[112].mxu0 %vm619_vm3, %v3620_v20  ;;  %2529 = vst.msk [vmem:[%s4865_s2 + $0x160] sm:$0xf] %vm2440_vm4, %v3043_v29  ;;  %v3044_v33 = vpack.c.bf16 %v1683_v30, %v1683_v30  ;;  %3500 = vmatmul.mubr.msk.bf16.gmra.mrb[112].mxu1 %vm619_vm3, %v3621_v23  ;;  %v3628_v29 = vld [vmem:[%s4864_s0 + $0x100] sm:$0xff]  }
  0xea   :  { %3331 = vmatprep.mubr.msk.bf16.mxu0 %vm3651_vm2, %v3649_v0  ;;  %3503 = vmatprep.mubr.msk.bf16.mxu1 %vm3651_vm2, %v3649_v0 }
  0xeb   :  { %2444 = vst.msk [vmem:[%s4865_s2 + $0xc] sm:$0xf] %vm2440_vm4, %v2958_v32  ;;  %2530 = vst.msk [vmem:[%s4865_s2 + $0x164] sm:$0xf] %vm2440_vm4, %v3044_v33  ;;  %v3629_v32 = vld [vmem:[%s4864_s0 + $0x258] sm:$0xff]  }
  0xec   :  { %v932_v34 = vpop.f32.mrb[8].mxu0  ;;  %v1276_v35 = vpop.f32.mrb[8].mxu1 }
  0xed   :  { %v1598_v36 = vmax.f32 %v932_v34, 0.0  ;;  %v3225_v37 = vpop.f32.mrb[9].mxu0  ;;  %v1684_v39 = vmax.f32 %v1276_v35, 0.0  ;;  %v3397_v40 = vpop.f32.mrb[9].mxu1 }
  0xee   :  { %v935_v42 = vpop.f32.mrb[10].mxu0  ;;  %v1279_v43 = vpop.f32.mrb[10].mxu1 }
  0xef   :  { %v2959_v44 = vpack.c.bf16 %v1598_v36, %v1598_v36  ;;  %v1599_v45 = vmax.f32 %v935_v42, 0.0  ;;  %v3226_v46 = vpop.f32.mrb[11].mxu0  ;;  %v3045_v47 = vpack.c.bf16 %v1684_v39, %v1684_v39  ;;  %v1685_v48 = vmax.f32 %v1279_v43, 0.0  ;;  %v3398_v49 = vpop.f32.mrb[11].mxu1 }
  0xf1   :  { %2445 = vst.msk [vmem:[%s4865_s2 + $0x10] sm:$0xf] %vm2440_vm4, %v2959_v44  ;;  %v2960_v50 = vpack.c.bf16 %v1599_v45, %v1599_v45  ;;  %3332 = vmatmul.mubr.msk.bf16.gmra.mrb[116].mxu0 %vm619_vm3, %v3622_v38  ;;  %2531 = vst.msk [vmem:[%s4865_s2 + $0x168] sm:$0xf] %vm2440_vm4, %v3045_v47  ;;  %v3046_v51 = vpack.c.bf16 %v1685_v48, %v1685_v48  ;;  %3504 = vmatmul.mubr.msk.bf16.gmra.mrb[116].mxu1 %vm619_vm3, %v3623_v41  ;;  %v3630_v47 = vld [vmem:[%s4864_s0 + $0x108] sm:$0xff]  }
  0xf2   :  { %3335 = vmatprep.mubr.msk.bf16.mxu0 %vm3651_vm2, %v3649_v0  ;;  %3507 = vmatprep.mubr.msk.bf16.mxu1 %vm3651_vm2, %v3649_v0 }
  0xf3   :  { %2446 = vst.msk [vmem:[%s4865_s2 + $0x14] sm:$0xf] %vm2440_vm4, %v2960_v50  ;;  %2532 = vst.msk [vmem:[%s4865_s2 + $0x16c] sm:$0xf] %vm2440_vm4, %v3046_v51  ;;  %v3631_v50 = vld [vmem:[%s4864_s0 + $0x260] sm:$0xff]  }
  0xf4   :  { %v940_v52 = vpop.f32.mrb[12].mxu0  ;;  %v1284_v53 = vpop.f32.mrb[12].mxu1 }
  0xf5   :  { %v1600_v54 = vmax.f32 %v940_v52, 0.0  ;;  %v3229_v55 = vpop.f32.mrb[13].mxu0  ;;  %v1686_v57 = vmax.f32 %v1284_v53, 0.0  ;;  %v3401_v58 = vpop.f32.mrb[13].mxu1 }
  0xf6   :  { %v943_v60 = vpop.f32.mrb[14].mxu0  ;;  %v1287_v61 = vpop.f32.mrb[14].mxu1 }
  0xf7   :  { %v2961_v62 = vpack.c.bf16 %v1600_v54, %v1600_v54  ;;  %v1601_v63 = vmax.f32 %v943_v60, 0.0  ;;  %v3230_v1 = vpop.f32.mrb[15].mxu0  ;;  %v3047_v2 = vpack.c.bf16 %v1686_v57, %v1686_v57  ;;  %v1687_v3 = vmax.f32 %v1287_v61, 0.0  ;;  %v3402_v4 = vpop.f32.mrb[15].mxu1 }
  0xf9   :  { %2447 = vst.msk [vmem:[%s4865_s2 + $0x18] sm:$0xf] %vm2440_vm4, %v2961_v62  ;;  %v2962_v5 = vpack.c.bf16 %v1601_v63, %v1601_v63  ;;  %3336 = vmatmul.mubr.msk.bf16.gmra.mrb[120].mxu0 %vm619_vm3, %v3624_v56  ;;  %2533 = vst.msk [vmem:[%s4865_s2 + $0x170] sm:$0xf] %vm2440_vm4, %v3047_v2  ;;  %v3048_v6 = vpack.c.bf16 %v1687_v3, %v1687_v3  ;;  %3508 = vmatmul.mubr.msk.bf16.gmra.mrb[120].mxu1 %vm619_vm3, %v3625_v59  ;;  %v3632_v2 = vld [vmem:[%s4864_s0 + $0x110] sm:$0xff]  }
  0xfa   :  { %3339 = vmatprep.mubr.msk.bf16.mxu0 %vm3651_vm2, %v3649_v0  ;;  %3511 = vmatprep.mubr.msk.bf16.mxu1 %vm3651_vm2, %v3649_v0 }
  0xfb   :  { %2448 = vst.msk [vmem:[%s4865_s2 + $0x1c] sm:$0xf] %vm2440_vm4, %v2962_v5  ;;  %2534 = vst.msk [vmem:[%s4865_s2 + $0x174] sm:$0xf] %vm2440_vm4, %v3048_v6  ;;  %v3633_v5 = vld [vmem:[%s4864_s0 + $0x268] sm:$0xff]  }
  0xfc   :  { %v948_v7 = vpop.f32.mrb[16].mxu0  ;;  %v1292_v8 = vpop.f32.mrb[16].mxu1 }
  0xfd   :  { %v1602_v9 = vmax.f32 %v948_v7, 0.0  ;;  %v3233_v10 = vpop.f32.mrb[17].mxu0  ;;  %v1688_v12 = vmax.f32 %v1292_v8, 0.0  ;;  %v3405_v13 = vpop.f32.mrb[17].mxu1 }
  0xfe   :  { %v951_v15 = vpop.f32.mrb[18].mxu0  ;;  %v1295_v16 = vpop.f32.mrb[18].mxu1 }
  0xff   :  { %v2963_v17 = vpack.c.bf16 %v1602_v9, %v1602_v9  ;;  %v1603_v18 = vmax.f32 %v951_v15, 0.0  ;;  %v3234_v19 = vpop.f32.mrb[19].mxu0  ;;  %v3049_v20 = vpack.c.bf16 %v1688_v12, %v1688_v12  ;;  %v1689_v21 = vmax.f32 %v1295_v16, 0.0  ;;  %v3406_v22 = vpop.f32.mrb[19].mxu1 }
 0x101   :  { %2449 = vst.msk [vmem:[%s4865_s2 + $0x20] sm:$0xf] %vm2440_vm4, %v2963_v17  ;;  %v2964_v23 = vpack.c.bf16 %v1603_v18, %v1603_v18  ;;  %3340 = vmatmul.mubr.msk.bf16.gmra.mrb[124].mxu0 %vm619_vm3, %v3626_v11  ;;  %2535 = vst.msk [vmem:[%s4865_s2 + $0x178] sm:$0xf] %vm2440_vm4, %v3049_v20  ;;  %v3050_v24 = vpack.c.bf16 %v1689_v21, %v1689_v21  ;;  %3512 = vmatmul.mubr.msk.bf16.gmra.mrb[124].mxu1 %vm619_vm3, %v3627_v14  ;;  %v3634_v20 = vld [vmem:[%s4864_s0 + $0x118] sm:$0xff]  }
 0x102   :  { %3343 = vmatprep.mubr.msk.bf16.mxu0 %vm3651_vm2, %v3649_v0  ;;  %3515 = vmatprep.mubr.msk.bf16.mxu1 %vm3651_vm2, %v3649_v0 }
 0x103   :  { %2450 = vst.msk [vmem:[%s4865_s2 + $0x24] sm:$0xf] %vm2440_vm4, %v2964_v23  ;;  %2536 = vst.msk [vmem:[%s4865_s2 + $0x17c] sm:$0xf] %vm2440_vm4, %v3050_v24  ;;  %v3635_v23 = vld [vmem:[%s4864_s0 + $0x270] sm:$0xff]  }
 0x104   :  { %v956_v25 = vpop.f32.mrb[20].mxu0  ;;  %v1300_v26 = vpop.f32.mrb[20].mxu1 }
 0x105   :  { %v1604_v27 = vmax.f32 %v956_v25, 0.0  ;;  %v3237_v28 = vpop.f32.mrb[21].mxu0  ;;  %v1690_v30 = vmax.f32 %v1300_v26, 0.0  ;;  %v3409_v31 = vpop.f32.mrb[21].mxu1 }
 0x106   :  { %v959_v33 = vpop.f32.mrb[22].mxu0  ;;  %v1303_v34 = vpop.f32.mrb[22].mxu1 }
 0x107   :  { %v2965_v35 = vpack.c.bf16 %v1604_v27, %v1604_v27  ;;  %v1605_v36 = vmax.f32 %v959_v33, 0.0  ;;  %v3238_v37 = vpop.f32.mrb[23].mxu0  ;;  %v3051_v38 = vpack.c.bf16 %v1690_v30, %v1690_v30  ;;  %v1691_v39 = vmax.f32 %v1303_v34, 0.0  ;;  %v3410_v40 = vpop.f32.mrb[23].mxu1 }
 0x109   :  { %2451 = vst.msk [vmem:[%s4865_s2 + $0x28] sm:$0xf] %vm2440_vm4, %v2965_v35  ;;  %v2966_v41 = vpack.c.bf16 %v1605_v36, %v1605_v36  ;;  %3344 = vmatmul.mubr.msk.bf16.gmra.mrb[128].mxu0 %vm619_vm3, %v3628_v29  ;;  %2537 = vst.msk [vmem:[%s4865_s2 + $0x180] sm:$0xf] %vm2440_vm4, %v3051_v38  ;;  %v3052_v42 = vpack.c.bf16 %v1691_v39, %v1691_v39  ;;  %3516 = vmatmul.mubr.msk.bf16.gmra.mrb[128].mxu1 %vm619_vm3, %v3629_v32  ;;  %v3636_v38 = vld [vmem:[%s4864_s0 + $0x120] sm:$0xff]  }
 0x10a   :  { %3347 = vmatprep.mubr.msk.bf16.mxu0 %vm3651_vm2, %v3649_v0  ;;  %3519 = vmatprep.mubr.msk.bf16.mxu1 %vm3651_vm2, %v3649_v0 }
 0x10b   :  { %2452 = vst.msk [vmem:[%s4865_s2 + $0x2c] sm:$0xf] %vm2440_vm4, %v2966_v41  ;;  %2538 = vst.msk [vmem:[%s4865_s2 + $0x184] sm:$0xf] %vm2440_vm4, %v3052_v42  ;;  %v3637_v41 = vld [vmem:[%s4864_s0 + $0x278] sm:$0xff]  }
 0x10c   :  { %v964_v43 = vpop.f32.mrb[24].mxu0  ;;  %v1308_v44 = vpop.f32.mrb[24].mxu1 }
 0x10d   :  { %v1606_v45 = vmax.f32 %v964_v43, 0.0  ;;  %v3241_v46 = vpop.f32.mrb[25].mxu0  ;;  %v1692_v48 = vmax.f32 %v1308_v44, 0.0  ;;  %v3413_v49 = vpop.f32.mrb[25].mxu1 }
 0x10e   :  { %v967_v51 = vpop.f32.mrb[26].mxu0  ;;  %v1311_v52 = vpop.f32.mrb[26].mxu1 }
 0x10f   :  { %v2967_v53 = vpack.c.bf16 %v1606_v45, %v1606_v45  ;;  %v1607_v54 = vmax.f32 %v967_v51, 0.0  ;;  %v3242_v55 = vpop.f32.mrb[27].mxu0  ;;  %v3053_v56 = vpack.c.bf16 %v1692_v48, %v1692_v48  ;;  %v1693_v57 = vmax.f32 %v1311_v52, 0.0  ;;  %v3414_v58 = vpop.f32.mrb[27].mxu1 }
 0x111   :  { %2453 = vst.msk [vmem:[%s4865_s2 + $0x30] sm:$0xf] %vm2440_vm4, %v2967_v53  ;;  %v2968_v59 = vpack.c.bf16 %v1607_v54, %v1607_v54  ;;  %3348 = vmatmul.mubr.msk.bf16.gmra.mrb[132].mxu0 %vm619_vm3, %v3630_v47  ;;  %2539 = vst.msk [vmem:[%s4865_s2 + $0x188] sm:$0xf] %vm2440_vm4, %v3053_v56  ;;  %v3054_v60 = vpack.c.bf16 %v1693_v57, %v1693_v57  ;;  %3520 = vmatmul.mubr.msk.bf16.gmra.mrb[132].mxu1 %vm619_vm3, %v3631_v50  ;;  %v3638_v56 = vld [vmem:[%s4864_s0 + $0x128] sm:$0xff]  }
 0x112   :  { %3351 = vmatprep.mubr.msk.bf16.mxu0 %vm3651_vm2, %v3649_v0  ;;  %3523 = vmatprep.mubr.msk.bf16.mxu1 %vm3651_vm2, %v3649_v0 }
 0x113   :  { %2454 = vst.msk [vmem:[%s4865_s2 + $0x34] sm:$0xf] %vm2440_vm4, %v2968_v59  ;;  %2540 = vst.msk [vmem:[%s4865_s2 + $0x18c] sm:$0xf] %vm2440_vm4, %v3054_v60  ;;  %v3639_v59 = vld [vmem:[%s4864_s0 + $0x280] sm:$0xff]  }
 0x114   :  { %v972_v61 = vpop.f32.mrb[28].mxu0  ;;  %v1316_v62 = vpop.f32.mrb[28].mxu1 }
 0x115   :  { %v1608_v63 = vmax.f32 %v972_v61, 0.0  ;;  %v3245_v1 = vpop.f32.mrb[29].mxu0  ;;  %v1694_v3 = vmax.f32 %v1316_v62, 0.0  ;;  %v3417_v4 = vpop.f32.mrb[29].mxu1 }
 0x116   :  { %v975_v6 = vpop.f32.mrb[30].mxu0  ;;  %v1319_v7 = vpop.f32.mrb[30].mxu1 }
 0x117   :  { %v2969_v8 = vpack.c.bf16 %v1608_v63, %v1608_v63  ;;  %v1609_v9 = vmax.f32 %v975_v6, 0.0  ;;  %v3246_v10 = vpop.f32.mrb[31].mxu0  ;;  %v3055_v11 = vpack.c.bf16 %v1694_v3, %v1694_v3  ;;  %v1695_v12 = vmax.f32 %v1319_v7, 0.0  ;;  %v3418_v13 = vpop.f32.mrb[31].mxu1 }
 0x119   :  { %2455 = vst.msk [vmem:[%s4865_s2 + $0x38] sm:$0xf] %vm2440_vm4, %v2969_v8  ;;  %v2970_v14 = vpack.c.bf16 %v1609_v9, %v1609_v9  ;;  %3352 = vmatmul.mubr.msk.bf16.gmra.mrb[136].mxu0 %vm619_vm3, %v3632_v2  ;;  %2541 = vst.msk [vmem:[%s4865_s2 + $0x190] sm:$0xf] %vm2440_vm4, %v3055_v11  ;;  %v3056_v15 = vpack.c.bf16 %v1695_v12, %v1695_v12  ;;  %3524 = vmatmul.mubr.msk.bf16.gmra.mrb[136].mxu1 %vm619_vm3, %v3633_v5  ;;  %v3640_v11 = vld [vmem:[%s4864_s0 + $0x130] sm:$0xff]  }
 0x11a   :  { %3355 = vmatprep.mubr.msk.bf16.mxu0 %vm3651_vm2, %v3649_v0  ;;  %3527 = vmatprep.mubr.msk.bf16.mxu1 %vm3651_vm2, %v3649_v0 }
 0x11b   :  { %2456 = vst.msk [vmem:[%s4865_s2 + $0x3c] sm:$0xf] %vm2440_vm4, %v2970_v14  ;;  %2542 = vst.msk [vmem:[%s4865_s2 + $0x194] sm:$0xf] %vm2440_vm4, %v3056_v15  ;;  %v3641_v14 = vld [vmem:[%s4864_s0 + $0x288] sm:$0xff]  }
 0x11c   :  { %v980_v16 = vpop.f32.mrb[32].mxu0  ;;  %v1324_v17 = vpop.f32.mrb[32].mxu1 }
 0x11d   :  { %v1610_v18 = vmax.f32 %v980_v16, 0.0  ;;  %v3249_v19 = vpop.f32.mrb[33].mxu0  ;;  %v1696_v21 = vmax.f32 %v1324_v17, 0.0  ;;  %v3421_v22 = vpop.f32.mrb[33].mxu1 }
 0x11e   :  { %v983_v24 = vpop.f32.mrb[34].mxu0  ;;  %v1327_v25 = vpop.f32.mrb[34].mxu1 }
 0x11f   :  { %v2971_v26 = vpack.c.bf16 %v1610_v18, %v1610_v18  ;;  %v1611_v27 = vmax.f32 %v983_v24, 0.0  ;;  %v3250_v28 = vpop.f32.mrb[35].mxu0  ;;  %v3057_v29 = vpack.c.bf16 %v1696_v21, %v1696_v21  ;;  %v1697_v30 = vmax.f32 %v1327_v25, 0.0  ;;  %v3422_v31 = vpop.f32.mrb[35].mxu1 }
 0x121   :  { %2457 = vst.msk [vmem:[%s4865_s2 + $0x40] sm:$0xf] %vm2440_vm4, %v2971_v26  ;;  %v2972_v32 = vpack.c.bf16 %v1611_v27, %v1611_v27  ;;  %3356 = vmatmul.mubr.msk.bf16.gmra.mrb[140].mxu0 %vm619_vm3, %v3634_v20  ;;  %2543 = vst.msk [vmem:[%s4865_s2 + $0x198] sm:$0xf] %vm2440_vm4, %v3057_v29  ;;  %v3058_v33 = vpack.c.bf16 %v1697_v30, %v1697_v30  ;;  %3528 = vmatmul.mubr.msk.bf16.gmra.mrb[140].mxu1 %vm619_vm3, %v3635_v23  ;;  %v3642_v29 = vld [vmem:[%s4864_s0 + $0x138] sm:$0xff]  }
 0x122   :  { %3359 = vmatprep.mubr.msk.bf16.mxu0 %vm3651_vm2, %v3649_v0  ;;  %3531 = vmatprep.mubr.msk.bf16.mxu1 %vm3651_vm2, %v3649_v0 }
 0x123   :  { %2458 = vst.msk [vmem:[%s4865_s2 + $0x44] sm:$0xf] %vm2440_vm4, %v2972_v32  ;;  %2544 = vst.msk [vmem:[%s4865_s2 + $0x19c] sm:$0xf] %vm2440_vm4, %v3058_v33  ;;  %v3643_v32 = vld [vmem:[%s4864_s0 + $0x290] sm:$0xff]  }
 0x124   :  { %v988_v34 = vpop.f32.mrb[36].mxu0  ;;  %v1332_v35 = vpop.f32.mrb[36].mxu1 }
 0x125   :  { %v1612_v36 = vmax.f32 %v988_v34, 0.0  ;;  %v3253_v37 = vpop.f32.mrb[37].mxu0  ;;  %v1698_v39 = vmax.f32 %v1332_v35, 0.0  ;;  %v3425_v40 = vpop.f32.mrb[37].mxu1 }
 0x126   :  { %v991_v42 = vpop.f32.mrb[38].mxu0  ;;  %v1335_v43 = vpop.f32.mrb[38].mxu1 }
 0x127   :  { %v2973_v44 = vpack.c.bf16 %v1612_v36, %v1612_v36  ;;  %v1613_v45 = vmax.f32 %v991_v42, 0.0  ;;  %v3254_v46 = vpop.f32.mrb[39].mxu0  ;;  %v3059_v47 = vpack.c.bf16 %v1698_v39, %v1698_v39  ;;  %v1699_v48 = vmax.f32 %v1335_v43, 0.0  ;;  %v3426_v49 = vpop.f32.mrb[39].mxu1 }
 0x129   :  { %2459 = vst.msk [vmem:[%s4865_s2 + $0x48] sm:$0xf] %vm2440_vm4, %v2973_v44  ;;  %v2974_v50 = vpack.c.bf16 %v1613_v45, %v1613_v45  ;;  %3360 = vmatmul.mubr.msk.bf16.gmra.mrb[144].mxu0 %vm619_vm3, %v3636_v38  ;;  %2545 = vst.msk [vmem:[%s4865_s2 + $0x1a0] sm:$0xf] %vm2440_vm4, %v3059_v47  ;;  %v3060_v51 = vpack.c.bf16 %v1699_v48, %v1699_v48  ;;  %3532 = vmatmul.mubr.msk.bf16.gmra.mrb[144].mxu1 %vm619_vm3, %v3637_v41  ;;  %v3644_v47 = vld [vmem:[%s4864_s0 + $0x140] sm:$0xff]  }
 0x12a   :  { %3363 = vmatprep.mubr.msk.bf16.mxu0 %vm3651_vm2, %v3649_v0  ;;  %3535 = vmatprep.mubr.msk.bf16.mxu1 %vm3651_vm2, %v3649_v0 }
 0x12b   :  { %2460 = vst.msk [vmem:[%s4865_s2 + $0x4c] sm:$0xf] %vm2440_vm4, %v2974_v50  ;;  %2546 = vst.msk [vmem:[%s4865_s2 + $0x1a4] sm:$0xf] %vm2440_vm4, %v3060_v51  ;;  %v3645_v50 = vld [vmem:[%s4864_s0 + $0x298] sm:$0xff]  }
 0x12c   :  { %v996_v52 = vpop.f32.mrb[40].mxu0  ;;  %v1340_v53 = vpop.f32.mrb[40].mxu1 }
 0x12d   :  { %v1614_v54 = vmax.f32 %v996_v52, 0.0  ;;  %v3257_v55 = vpop.f32.mrb[41].mxu0  ;;  %v1700_v57 = vmax.f32 %v1340_v53, 0.0  ;;  %v3429_v58 = vpop.f32.mrb[41].mxu1 }
 0x12e   :  { %v999_v60 = vpop.f32.mrb[42].mxu0  ;;  %v1343_v61 = vpop.f32.mrb[42].mxu1 }
 0x12f   :  { %v2975_v62 = vpack.c.bf16 %v1614_v54, %v1614_v54  ;;  %v1615_v63 = vmax.f32 %v999_v60, 0.0  ;;  %v3258_v1 = vpop.f32.mrb[43].mxu0  ;;  %v3061_v2 = vpack.c.bf16 %v1700_v57, %v1700_v57  ;;  %v1701_v3 = vmax.f32 %v1343_v61, 0.0  ;;  %v3430_v4 = vpop.f32.mrb[43].mxu1 }
 0x131   :  { %2461 = vst.msk [vmem:[%s4865_s2 + $0x50] sm:$0xf] %vm2440_vm4, %v2975_v62  ;;  %v2976_v5 = vpack.c.bf16 %v1615_v63, %v1615_v63  ;;  %3364 = vmatmul.mubr.msk.bf16.gmra.mrb[148].mxu0 %vm619_vm3, %v3638_v56  ;;  %2547 = vst.msk [vmem:[%s4865_s2 + $0x1a8] sm:$0xf] %vm2440_vm4, %v3061_v2  ;;  %v3062_v6 = vpack.c.bf16 %v1701_v3, %v1701_v3  ;;  %3536 = vmatmul.mubr.msk.bf16.gmra.mrb[148].mxu1 %vm619_vm3, %v3639_v59  ;;  %v3646_v62 = vld [vmem:[%s4864_s0 + $0x148] sm:$0xff]  }
 0x132   :  { %3367 = vmatprep.mubr.msk.bf16.mxu0 %vm3651_vm2, %v3649_v0  ;;  %3539 = vmatprep.mubr.msk.bf16.mxu1 %vm3651_vm2, %v3649_v0 }
 0x133   :  { %2462 = vst.msk [vmem:[%s4865_s2 + $0x54] sm:$0xf] %vm2440_vm4, %v2976_v5  ;;  %2548 = vst.msk [vmem:[%s4865_s2 + $0x1ac] sm:$0xf] %vm2440_vm4, %v3062_v6  ;;  %v3647_v5 = vld [vmem:[%s4864_s0 + $0x2a0] ss:$0 sps:$4 sm:$0xff]  }
 0x134   :  { %v1004_v7 = vpop.f32.mrb[44].mxu0  ;;  %v1348_v8 = vpop.f32.mrb[44].mxu1 }
 0x135   :  { %v1616_v9 = vmax.f32 %v1004_v7, 0.0  ;;  %v3261_v10 = vpop.f32.mrb[45].mxu0  ;;  %v1702_v12 = vmax.f32 %v1348_v8, 0.0  ;;  %v3433_v13 = vpop.f32.mrb[45].mxu1 }
 0x136   :  { %v1007_v15 = vpop.f32.mrb[46].mxu0  ;;  %v1351_v16 = vpop.f32.mrb[46].mxu1 }
 0x137   :  { %v2977_v17 = vpack.c.bf16 %v1616_v9, %v1616_v9  ;;  %v1617_v18 = vmax.f32 %v1007_v15, 0.0  ;;  %v3262_v19 = vpop.f32.mrb[47].mxu0  ;;  %v3063_v20 = vpack.c.bf16 %v1702_v12, %v1702_v12  ;;  %v1703_v21 = vmax.f32 %v1351_v16, 0.0  ;;  %v3434_v22 = vpop.f32.mrb[47].mxu1 }
 0x139   :  { %2463 = vst.msk [vmem:[%s4865_s2 + $0x58] sm:$0xf] %vm2440_vm4, %v2977_v17  ;;  %v2978_v23 = vpack.c.bf16 %v1617_v18, %v1617_v18  ;;  %3368 = vmatmul.mubr.msk.bf16.gmra.mrb[152].mxu0 %vm619_vm3, %v3640_v11  ;;  %2549 = vst.msk [vmem:[%s4865_s2 + $0x1b0] sm:$0xf] %vm2440_vm4, %v3063_v20  ;;  %v3064_v24 = vpack.c.bf16 %v1703_v21, %v1703_v21  ;;  %3540 = vmatmul.mubr.msk.bf16.gmra.mrb[152].mxu1 %vm619_vm3, %v3641_v14  ;;  %v3648_v20 = vld [vmem:[%s4864_s0 + $0x150] sm:$0xff]  }
 0x13a   :  { %3371 = vmatprep.mubr.msk.bf16.mxu0 %vm3651_vm2, %v3649_v0  ;;  %3543 = vmatprep.mubr.msk.bf16.mxu1 %vm3651_vm2, %v3649_v0 }
 0x13b   :  { %2464 = vst.msk [vmem:[%s4865_s2 + $0x5c] sm:$0xf] %vm2440_vm4, %v2978_v23  ;;  %2550 = vst.msk [vmem:[%s4865_s2 + $0x1b4] sm:$0xf] %vm2440_vm4, %v3064_v24 }
 0x13c   :  { %v1012_v25 = vpop.f32.mrb[48].mxu0  ;;  %v1356_v26 = vpop.f32.mrb[48].mxu1 }
 0x13d   :  { %v1618_v27 = vmax.f32 %v1012_v25, 0.0  ;;  %v3265_v28 = vpop.f32.mrb[49].mxu0  ;;  %v1704_v30 = vmax.f32 %v1356_v26, 0.0  ;;  %v3437_v31 = vpop.f32.mrb[49].mxu1 }
 0x13e   :  { %v1015_v33 = vpop.f32.mrb[50].mxu0  ;;  %v1359_v34 = vpop.f32.mrb[50].mxu1 }
 0x13f   :  { %v2979_v35 = vpack.c.bf16 %v1618_v27, %v1618_v27  ;;  %v1619_v36 = vmax.f32 %v1015_v33, 0.0  ;;  %v3266_v37 = vpop.f32.mrb[51].mxu0  ;;  %v3065_v38 = vpack.c.bf16 %v1704_v30, %v1704_v30  ;;  %v1705_v39 = vmax.f32 %v1359_v34, 0.0  ;;  %v3438_v40 = vpop.f32.mrb[51].mxu1 }
 0x141   :  { %2465 = vst.msk [vmem:[%s4865_s2 + $0x60] sm:$0xf] %vm2440_vm4, %v2979_v35  ;;  %v2980_v41 = vpack.c.bf16 %v1619_v36, %v1619_v36  ;;  %3372 = vmatmul.mubr.msk.bf16.gmra.mrb[156].mxu0 %vm619_vm3, %v3642_v29  ;;  %2551 = vst.msk [vmem:[%s4865_s2 + $0x1b8] sm:$0xf] %vm2440_vm4, %v3065_v38  ;;  %v3066_v42 = vpack.c.bf16 %v1705_v39, %v1705_v39  ;;  %3544 = vmatmul.mubr.msk.bf16.gmra.mrb[156].mxu1 %vm619_vm3, %v3643_v32 }
 0x142   :  { %3375 = vmatprep.mubr.msk.bf16.mxu0 %vm3651_vm2, %v3649_v0  ;;  %3547 = vmatprep.mubr.msk.bf16.mxu1 %vm3651_vm2, %v3649_v0 }
 0x143   :  { %2466 = vst.msk [vmem:[%s4865_s2 + $0x64] sm:$0xf] %vm2440_vm4, %v2980_v41  ;;  %2552 = vst.msk [vmem:[%s4865_s2 + $0x1bc] sm:$0xf] %vm2440_vm4, %v3066_v42 }
 0x144   :  { %v1020_v43 = vpop.f32.mrb[52].mxu0  ;;  %v1364_v44 = vpop.f32.mrb[52].mxu1 }
 0x145   :  { %v1620_v45 = vmax.f32 %v1020_v43, 0.0  ;;  %v3269_v46 = vpop.f32.mrb[53].mxu0  ;;  %v1706_v48 = vmax.f32 %v1364_v44, 0.0  ;;  %v3441_v49 = vpop.f32.mrb[53].mxu1 }
 0x146   :  { %v1023_v51 = vpop.f32.mrb[54].mxu0  ;;  %v1367_v52 = vpop.f32.mrb[54].mxu1 }
 0x147   :  { %v2981_v53 = vpack.c.bf16 %v1620_v45, %v1620_v45  ;;  %v1621_v54 = vmax.f32 %v1023_v51, 0.0  ;;  %v3270_v55 = vpop.f32.mrb[55].mxu0  ;;  %v3067_v56 = vpack.c.bf16 %v1706_v48, %v1706_v48  ;;  %v1707_v57 = vmax.f32 %v1367_v52, 0.0  ;;  %v3442_v58 = vpop.f32.mrb[55].mxu1 }
 0x149   :  { %2467 = vst.msk [vmem:[%s4865_s2 + $0x68] sm:$0xf] %vm2440_vm4, %v2981_v53  ;;  %v2982_v59 = vpack.c.bf16 %v1621_v54, %v1621_v54  ;;  %3376 = vmatmul.mubr.msk.bf16.gmra.mrb[160].mxu0 %vm619_vm3, %v3644_v47  ;;  %2553 = vst.msk [vmem:[%s4865_s2 + $0x1c0] sm:$0xf] %vm2440_vm4, %v3067_v56  ;;  %v3068_v60 = vpack.c.bf16 %v1707_v57, %v1707_v57  ;;  %3548 = vmatmul.mubr.msk.bf16.gmra.mrb[160].mxu1 %vm619_vm3, %v3645_v50 }
 0x14a   :  { %3379 = vmatprep.mubr.msk.bf16.mxu0 %vm3651_vm2, %v3649_v0  ;;  %3551 = vmatprep.mubr.msk.bf16.mxu1 %vm3651_vm2, %v3649_v0 }
 0x14b   :  { %2468 = vst.msk [vmem:[%s4865_s2 + $0x6c] sm:$0xf] %vm2440_vm4, %v2982_v59  ;;  %2554 = vst.msk [vmem:[%s4865_s2 + $0x1c4] sm:$0xf] %vm2440_vm4, %v3068_v60 }
 0x14c   :  { %v1028_v61 = vpop.f32.mrb[56].mxu0  ;;  %v1372_v63 = vpop.f32.mrb[56].mxu1 }
 0x14d   :  { %v1622_v1 = vmax.f32 %v1028_v61, 0.0  ;;  %v3273_v2 = vpop.f32.mrb[57].mxu0  ;;  %v1708_v3 = vmax.f32 %v1372_v63, 0.0  ;;  %v3445_v4 = vpop.f32.mrb[57].mxu1 }
 0x14e   :  { %v1031_v6 = vpop.f32.mrb[58].mxu0  ;;  %v1375_v7 = vpop.f32.mrb[58].mxu1 }
 0x14f   :  { %v2983_v8 = vpack.c.bf16 %v1622_v1, %v1622_v1  ;;  %v1623_v9 = vmax.f32 %v1031_v6, 0.0  ;;  %v3274_v10 = vpop.f32.mrb[59].mxu0  ;;  %v3069_v11 = vpack.c.bf16 %v1708_v3, %v1708_v3  ;;  %v1709_v12 = vmax.f32 %v1375_v7, 0.0  ;;  %v3446_v13 = vpop.f32.mrb[59].mxu1 }
 0x151   :  { %2469 = vst.msk [vmem:[%s4865_s2 + $0x70] sm:$0xf] %vm2440_vm4, %v2983_v8  ;;  %v2984_v14 = vpack.c.bf16 %v1623_v9, %v1623_v9  ;;  %3380 = vmatmul.mubr.msk.bf16.gmra.mrb[164].mxu0 %vm619_vm3, %v3646_v62  ;;  %2555 = vst.msk [vmem:[%s4865_s2 + $0x1c8] sm:$0xf] %vm2440_vm4, %v3069_v11  ;;  %v3070_v15 = vpack.c.bf16 %v1709_v12, %v1709_v12  ;;  %3552 = vmatmul.mubr.msk.bf16.gmra.mrb[164].mxu1 %vm619_vm3, %v3647_v5 }
 0x152   :  { %3383 = vmatprep.mubr.msk.bf16.mxu0 %vm3651_vm2, %v3649_v0 }
 0x153   :  { %2470 = vst.msk [vmem:[%s4865_s2 + $0x74] sm:$0xf] %vm2440_vm4, %v2984_v14  ;;  %2556 = vst.msk [vmem:[%s4865_s2 + $0x1cc] sm:$0xf] %vm2440_vm4, %v3070_v15 }
 0x154   :  { %v1036_v16 = vpop.f32.mrb[60].mxu0  ;;  %v1380_v17 = vpop.f32.mrb[60].mxu1 }
 0x155   :  { %v1624_v18 = vmax.f32 %v1036_v16, 0.0  ;;  %v3277_v19 = vpop.f32.mrb[61].mxu0  ;;  %v1710_v21 = vmax.f32 %v1380_v17, 0.0  ;;  %v3449_v0 = vpop.f32.mrb[61].mxu1 }
 0x156   :  { %v1039_v22 = vpop.f32.mrb[62].mxu0  ;;  %v1383_v23 = vpop.f32.mrb[62].mxu1 }
 0x157   :  { %v2985_v24 = vpack.c.bf16 %v1624_v18, %v1624_v18  ;;  %v1625_v25 = vmax.f32 %v1039_v22, 0.0  ;;  %v3278_v26 = vpop.f32.mrb[63].mxu0  ;;  %v3071_v27 = vpack.c.bf16 %v1710_v21, %v1710_v21  ;;  %v1711_v28 = vmax.f32 %v1383_v23, 0.0  ;;  %v3450_v29 = vpop.f32.mrb[63].mxu1 }
 0x159   :  { %2471 = vst.msk [vmem:[%s4865_s2 + $0x78] sm:$0xf] %vm2440_vm4, %v2985_v24  ;;  %v2986_v30 = vpack.c.bf16 %v1625_v25, %v1625_v25  ;;  %3384 = vmatmul.mubr.msk.bf16.gmra.mrb[168].mxu0 %vm619_vm3, %v3648_v20  ;;  %2557 = vst.msk [vmem:[%s4865_s2 + $0x1d0] sm:$0xf] %vm2440_vm4, %v3071_v27  ;;  %v3072_v31 = vpack.c.bf16 %v1711_v28, %v1711_v28 }
 0x15b   :  { %2472 = vst.msk [vmem:[%s4865_s2 + $0x7c] sm:$0xf] %vm2440_vm4, %v2986_v30  ;;  %2558 = vst.msk [vmem:[%s4865_s2 + $0x1d4] sm:$0xf] %vm2440_vm4, %v3072_v31 }
 0x15c   :  { %v1044_v32 = vpop.f32.mrb[64].mxu0  ;;  %v1388_v33 = vpop.f32.mrb[64].mxu1 }
 0x15d   :  { %v1626_v34 = vmax.f32 %v1044_v32, 0.0  ;;  %v3281_v35 = vpop.f32.mrb[65].mxu0  ;;  %v1712_v36 = vmax.f32 %v1388_v33, 0.0  ;;  %v3453_v37 = vpop.f32.mrb[65].mxu1 }
 0x15e   :  { %v1047_v38 = vpop.f32.mrb[66].mxu0  ;;  %v1391_v39 = vpop.f32.mrb[66].mxu1 }
 0x15f   :  { %v2987_v40 = vpack.c.bf16 %v1626_v34, %v1626_v34  ;;  %v1627_v41 = vmax.f32 %v1047_v38, 0.0  ;;  %v3282_v42 = vpop.f32.mrb[67].mxu0  ;;  %v3073_v43 = vpack.c.bf16 %v1712_v36, %v1712_v36  ;;  %v1713_v44 = vmax.f32 %v1391_v39, 0.0  ;;  %v3454_v45 = vpop.f32.mrb[67].mxu1 }
 0x161   :  { %2473 = vst.msk [vmem:[%s4865_s2 + $0x80] sm:$0xf] %vm2440_vm4, %v2987_v40  ;;  %v2988_v46 = vpack.c.bf16 %v1627_v41, %v1627_v41  ;;  %2559 = vst.msk [vmem:[%s4865_s2 + $0x1d8] sm:$0xf] %vm2440_vm4, %v3073_v43  ;;  %v3074_v47 = vpack.c.bf16 %v1713_v44, %v1713_v44 }
 0x163   :  { %2474 = vst.msk [vmem:[%s4865_s2 + $0x84] sm:$0xf] %vm2440_vm4, %v2988_v46  ;;  %2560 = vst.msk [vmem:[%s4865_s2 + $0x1dc] sm:$0xf] %vm2440_vm4, %v3074_v47 }
 0x164   :  { %v1052_v48 = vpop.f32.mrb[68].mxu0  ;;  %v1396_v49 = vpop.f32.mrb[68].mxu1 }
 0x165   :  { %v1628_v50 = vmax.f32 %v1052_v48, 0.0  ;;  %v3285_v51 = vpop.f32.mrb[69].mxu0  ;;  %v1714_v52 = vmax.f32 %v1396_v49, 0.0  ;;  %v3457_v53 = vpop.f32.mrb[69].mxu1 }
 0x166   :  { %v1055_v54 = vpop.f32.mrb[70].mxu0  ;;  %v1399_v55 = vpop.f32.mrb[70].mxu1 }
 0x167   :  { %v2989_v56 = vpack.c.bf16 %v1628_v50, %v1628_v50  ;;  %v1629_v57 = vmax.f32 %v1055_v54, 0.0  ;;  %v3286_v58 = vpop.f32.mrb[71].mxu0  ;;  %v3075_v59 = vpack.c.bf16 %v1714_v52, %v1714_v52  ;;  %v1715_v60 = vmax.f32 %v1399_v55, 0.0  ;;  %v3458_v61 = vpop.f32.mrb[71].mxu1 }
 0x169   :  { %2475 = vst.msk [vmem:[%s4865_s2 + $0x88] sm:$0xf] %vm2440_vm4, %v2989_v56  ;;  %v2990_v62 = vpack.c.bf16 %v1629_v57, %v1629_v57  ;;  %2561 = vst.msk [vmem:[%s4865_s2 + $0x1e0] sm:$0xf] %vm2440_vm4, %v3075_v59  ;;  %v3076_v63 = vpack.c.bf16 %v1715_v60, %v1715_v60 }
 0x16b   :  { %2476 = vst.msk [vmem:[%s4865_s2 + $0x8c] sm:$0xf] %vm2440_vm4, %v2990_v62  ;;  %2562 = vst.msk [vmem:[%s4865_s2 + $0x1e4] sm:$0xf] %vm2440_vm4, %v3076_v63 }
 0x16c   :  { %v1060_v1 = vpop.f32.mrb[72].mxu0  ;;  %v1404_v2 = vpop.f32.mrb[72].mxu1 }
 0x16d   :  { %v1630_v3 = vmax.f32 %v1060_v1, 0.0  ;;  %v3289_v4 = vpop.f32.mrb[73].mxu0  ;;  %v1716_v5 = vmax.f32 %v1404_v2, 0.0  ;;  %v3461_v6 = vpop.f32.mrb[73].mxu1 }
 0x16e   :  { %v1063_v7 = vpop.f32.mrb[74].mxu0  ;;  %v1407_v8 = vpop.f32.mrb[74].mxu1 }
 0x16f   :  { %v2991_v9 = vpack.c.bf16 %v1630_v3, %v1630_v3  ;;  %v1631_v10 = vmax.f32 %v1063_v7, 0.0  ;;  %v3290_v11 = vpop.f32.mrb[75].mxu0  ;;  %v3077_v12 = vpack.c.bf16 %v1716_v5, %v1716_v5  ;;  %v1717_v13 = vmax.f32 %v1407_v8, 0.0  ;;  %v3462_v14 = vpop.f32.mrb[75].mxu1 }
 0x171   :  { %2477 = vst.msk [vmem:[%s4865_s2 + $0x90] sm:$0xf] %vm2440_vm4, %v2991_v9  ;;  %v2992_v15 = vpack.c.bf16 %v1631_v10, %v1631_v10  ;;  %2563 = vst.msk [vmem:[%s4865_s2 + $0x1e8] sm:$0xf] %vm2440_vm4, %v3077_v12  ;;  %v3078_v16 = vpack.c.bf16 %v1717_v13, %v1717_v13 }
 0x173   :  { %2478 = vst.msk [vmem:[%s4865_s2 + $0x94] sm:$0xf] %vm2440_vm4, %v2992_v15  ;;  %2564 = vst.msk [vmem:[%s4865_s2 + $0x1ec] sm:$0xf] %vm2440_vm4, %v3078_v16 }
 0x174   :  { %v1068_v17 = vpop.f32.mrb[76].mxu0  ;;  %v1412_v18 = vpop.f32.mrb[76].mxu1 }
 0x175   :  { %v1632_v19 = vmax.f32 %v1068_v17, 0.0  ;;  %v3293_v20 = vpop.f32.mrb[77].mxu0  ;;  %v1718_v21 = vmax.f32 %v1412_v18, 0.0  ;;  %v3465_v0 = vpop.f32.mrb[77].mxu1 }
 0x176   :  { %v1071_v22 = vpop.f32.mrb[78].mxu0  ;;  %v1415_v23 = vpop.f32.mrb[78].mxu1 }
 0x177   :  { %v2993_v24 = vpack.c.bf16 %v1632_v19, %v1632_v19  ;;  %v1633_v25 = vmax.f32 %v1071_v22, 0.0  ;;  %v3294_v26 = vpop.f32.mrb[79].mxu0  ;;  %v3079_v27 = vpack.c.bf16 %v1718_v21, %v1718_v21  ;;  %v1719_v28 = vmax.f32 %v1415_v23, 0.0  ;;  %v3466_v29 = vpop.f32.mrb[79].mxu1 }
 0x179   :  { %2479 = vst.msk [vmem:[%s4865_s2 + $0x98] sm:$0xf] %vm2440_vm4, %v2993_v24  ;;  %v2994_v30 = vpack.c.bf16 %v1633_v25, %v1633_v25  ;;  %2565 = vst.msk [vmem:[%s4865_s2 + $0x1f0] sm:$0xf] %vm2440_vm4, %v3079_v27  ;;  %v3080_v31 = vpack.c.bf16 %v1719_v28, %v1719_v28 }
 0x17b   :  { %2480 = vst.msk [vmem:[%s4865_s2 + $0x9c] sm:$0xf] %vm2440_vm4, %v2994_v30  ;;  %2566 = vst.msk [vmem:[%s4865_s2 + $0x1f4] sm:$0xf] %vm2440_vm4, %v3080_v31 }
 0x17c   :  { %v1076_v32 = vpop.f32.mrb[80].mxu0  ;;  %v1420_v33 = vpop.f32.mrb[80].mxu1 }
 0x17d   :  { %v1634_v34 = vmax.f32 %v1076_v32, 0.0  ;;  %v3297_v35 = vpop.f32.mrb[81].mxu0  ;;  %v1720_v36 = vmax.f32 %v1420_v33, 0.0  ;;  %v3469_v37 = vpop.f32.mrb[81].mxu1 }
 0x17e   :  { %v1079_v38 = vpop.f32.mrb[82].mxu0  ;;  %v1423_v39 = vpop.f32.mrb[82].mxu1 }
 0x17f   :  { %v2995_v40 = vpack.c.bf16 %v1634_v34, %v1634_v34  ;;  %v1635_v41 = vmax.f32 %v1079_v38, 0.0  ;;  %v3298_v42 = vpop.f32.mrb[83].mxu0  ;;  %v3081_v43 = vpack.c.bf16 %v1720_v36, %v1720_v36  ;;  %v1721_v44 = vmax.f32 %v1423_v39, 0.0  ;;  %v3470_v45 = vpop.f32.mrb[83].mxu1 }
 0x181   :  { %2481 = vst.msk [vmem:[%s4865_s2 + $0xa0] sm:$0xf] %vm2440_vm4, %v2995_v40  ;;  %v2996_v46 = vpack.c.bf16 %v1635_v41, %v1635_v41  ;;  %2567 = vst.msk [vmem:[%s4865_s2 + $0x1f8] sm:$0xf] %vm2440_vm4, %v3081_v43  ;;  %v3082_v47 = vpack.c.bf16 %v1721_v44, %v1721_v44 }
 0x183   :  { %2482 = vst.msk [vmem:[%s4865_s2 + $0xa4] sm:$0xf] %vm2440_vm4, %v2996_v46  ;;  %2568 = vst.msk [vmem:[%s4865_s2 + $0x1fc] sm:$0xf] %vm2440_vm4, %v3082_v47 }
 0x184   :  { %v1084_v48 = vpop.f32.mrb[84].mxu0  ;;  %v1428_v49 = vpop.f32.mrb[84].mxu1 }
 0x185   :  { %v1636_v50 = vmax.f32 %v1084_v48, 0.0  ;;  %v3301_v51 = vpop.f32.mrb[85].mxu0  ;;  %v1722_v52 = vmax.f32 %v1428_v49, 0.0  ;;  %v3473_v53 = vpop.f32.mrb[85].mxu1 }
 0x186   :  { %v1087_v54 = vpop.f32.mrb[86].mxu0  ;;  %v1431_v55 = vpop.f32.mrb[86].mxu1 }
 0x187   :  { %v2997_v56 = vpack.c.bf16 %v1636_v50, %v1636_v50  ;;  %v1637_v57 = vmax.f32 %v1087_v54, 0.0  ;;  %v3302_v58 = vpop.f32.mrb[87].mxu0  ;;  %v3083_v59 = vpack.c.bf16 %v1722_v52, %v1722_v52  ;;  %v1723_v60 = vmax.f32 %v1431_v55, 0.0  ;;  %v3474_v61 = vpop.f32.mrb[87].mxu1 }
 0x189   :  { %2483 = vst.msk [vmem:[%s4865_s2 + $0xa8] sm:$0xf] %vm2440_vm4, %v2997_v56  ;;  %v2998_v62 = vpack.c.bf16 %v1637_v57, %v1637_v57  ;;  %2569 = vst.msk [vmem:[%s4865_s2 + $0x200] sm:$0xf] %vm2440_vm4, %v3083_v59  ;;  %v3084_v63 = vpack.c.bf16 %v1723_v60, %v1723_v60 }
 0x18b   :  { %2484 = vst.msk [vmem:[%s4865_s2 + $0xac] sm:$0xf] %vm2440_vm4, %v2998_v62  ;;  %2570 = vst.msk [vmem:[%s4865_s2 + $0x204] sm:$0xf] %vm2440_vm4, %v3084_v63 }
 0x18c   :  { %v1092_v1 = vpop.f32.mrb[88].mxu0  ;;  %v1436_v2 = vpop.f32.mrb[88].mxu1 }
 0x18d   :  { %v1638_v3 = vmax.f32 %v1092_v1, 0.0  ;;  %v3305_v4 = vpop.f32.mrb[89].mxu0  ;;  %v1724_v5 = vmax.f32 %v1436_v2, 0.0  ;;  %v3477_v6 = vpop.f32.mrb[89].mxu1 }
 0x18e   :  { %v1095_v7 = vpop.f32.mrb[90].mxu0  ;;  %v1439_v8 = vpop.f32.mrb[90].mxu1 }
 0x18f   :  { %v2999_v9 = vpack.c.bf16 %v1638_v3, %v1638_v3  ;;  %v1639_v10 = vmax.f32 %v1095_v7, 0.0  ;;  %v3306_v11 = vpop.f32.mrb[91].mxu0  ;;  %v3085_v12 = vpack.c.bf16 %v1724_v5, %v1724_v5  ;;  %v1725_v13 = vmax.f32 %v1439_v8, 0.0  ;;  %v3478_v14 = vpop.f32.mrb[91].mxu1 }
 0x191   :  { %2485 = vst.msk [vmem:[%s4865_s2 + $0xb0] sm:$0xf] %vm2440_vm4, %v2999_v9  ;;  %v3000_v15 = vpack.c.bf16 %v1639_v10, %v1639_v10  ;;  %2571 = vst.msk [vmem:[%s4865_s2 + $0x208] sm:$0xf] %vm2440_vm4, %v3085_v12  ;;  %v3086_v16 = vpack.c.bf16 %v1725_v13, %v1725_v13 }
 0x193   :  { %2486 = vst.msk [vmem:[%s4865_s2 + $0xb4] sm:$0xf] %vm2440_vm4, %v3000_v15  ;;  %2572 = vst.msk [vmem:[%s4865_s2 + $0x20c] sm:$0xf] %vm2440_vm4, %v3086_v16 }
 0x194   :  { %v1100_v17 = vpop.f32.mrb[92].mxu0  ;;  %v1444_v18 = vpop.f32.mrb[92].mxu1 }
 0x195   :  { %v1640_v19 = vmax.f32 %v1100_v17, 0.0  ;;  %v3309_v20 = vpop.f32.mrb[93].mxu0  ;;  %v1726_v21 = vmax.f32 %v1444_v18, 0.0  ;;  %v3481_v0 = vpop.f32.mrb[93].mxu1 }
 0x196   :  { %v1103_v22 = vpop.f32.mrb[94].mxu0  ;;  %v1447_v23 = vpop.f32.mrb[94].mxu1 }
 0x197   :  { %v3001_v24 = vpack.c.bf16 %v1640_v19, %v1640_v19  ;;  %v1641_v25 = vmax.f32 %v1103_v22, 0.0  ;;  %v3310_v26 = vpop.f32.mrb[95].mxu0  ;;  %v3087_v27 = vpack.c.bf16 %v1726_v21, %v1726_v21  ;;  %v1727_v28 = vmax.f32 %v1447_v23, 0.0  ;;  %v3482_v29 = vpop.f32.mrb[95].mxu1 }
 0x199   :  { %2487 = vst.msk [vmem:[%s4865_s2 + $0xb8] sm:$0xf] %vm2440_vm4, %v3001_v24  ;;  %v3002_v30 = vpack.c.bf16 %v1641_v25, %v1641_v25  ;;  %2573 = vst.msk [vmem:[%s4865_s2 + $0x210] sm:$0xf] %vm2440_vm4, %v3087_v27  ;;  %v3088_v31 = vpack.c.bf16 %v1727_v28, %v1727_v28 }
 0x19b   :  { %2488 = vst.msk [vmem:[%s4865_s2 + $0xbc] sm:$0xf] %vm2440_vm4, %v3002_v30  ;;  %2574 = vst.msk [vmem:[%s4865_s2 + $0x214] sm:$0xf] %vm2440_vm4, %v3088_v31 }
 0x19c   :  { %v1108_v32 = vpop.f32.mrb[96].mxu0  ;;  %v1452_v33 = vpop.f32.mrb[96].mxu1 }
 0x19d   :  { %v1642_v34 = vmax.f32 %v1108_v32, 0.0  ;;  %v3313_v35 = vpop.f32.mrb[97].mxu0  ;;  %v1728_v36 = vmax.f32 %v1452_v33, 0.0  ;;  %v3485_v37 = vpop.f32.mrb[97].mxu1 }
 0x19e   :  { %v1111_v38 = vpop.f32.mrb[98].mxu0  ;;  %v1455_v39 = vpop.f32.mrb[98].mxu1 }
 0x19f   :  { %v3003_v40 = vpack.c.bf16 %v1642_v34, %v1642_v34  ;;  %v1643_v41 = vmax.f32 %v1111_v38, 0.0  ;;  %v3314_v42 = vpop.f32.mrb[99].mxu0  ;;  %v3089_v43 = vpack.c.bf16 %v1728_v36, %v1728_v36  ;;  %v1729_v44 = vmax.f32 %v1455_v39, 0.0  ;;  %v3486_v45 = vpop.f32.mrb[99].mxu1 }
 0x1a1   :  { %2489 = vst.msk [vmem:[%s4865_s2 + $0xc0] sm:$0xf] %vm2440_vm4, %v3003_v40  ;;  %v3004_v46 = vpack.c.bf16 %v1643_v41, %v1643_v41  ;;  %2575 = vst.msk [vmem:[%s4865_s2 + $0x218] sm:$0xf] %vm2440_vm4, %v3089_v43  ;;  %v3090_v47 = vpack.c.bf16 %v1729_v44, %v1729_v44 }
 0x1a3   :  { %2490 = vst.msk [vmem:[%s4865_s2 + $0xc4] sm:$0xf] %vm2440_vm4, %v3004_v46  ;;  %2576 = vst.msk [vmem:[%s4865_s2 + $0x21c] sm:$0xf] %vm2440_vm4, %v3090_v47 }
 0x1a4   :  { %v1116_v48 = vpop.f32.mrb[100].mxu0  ;;  %v1460_v49 = vpop.f32.mrb[100].mxu1 }
 0x1a5   :  { %v1644_v50 = vmax.f32 %v1116_v48, 0.0  ;;  %v3317_v51 = vpop.f32.mrb[101].mxu0  ;;  %v1730_v52 = vmax.f32 %v1460_v49, 0.0  ;;  %v3489_v53 = vpop.f32.mrb[101].mxu1 }
 0x1a6   :  { %v1119_v54 = vpop.f32.mrb[102].mxu0  ;;  %v1463_v55 = vpop.f32.mrb[102].mxu1 }
 0x1a7   :  { %v3005_v56 = vpack.c.bf16 %v1644_v50, %v1644_v50  ;;  %v1645_v57 = vmax.f32 %v1119_v54, 0.0  ;;  %v3318_v58 = vpop.f32.mrb[103].mxu0  ;;  %v3091_v59 = vpack.c.bf16 %v1730_v52, %v1730_v52  ;;  %v1731_v60 = vmax.f32 %v1463_v55, 0.0  ;;  %v3490_v61 = vpop.f32.mrb[103].mxu1 }
 0x1a9   :  { %2491 = vst.msk [vmem:[%s4865_s2 + $0xc8] sm:$0xf] %vm2440_vm4, %v3005_v56  ;;  %v3006_v62 = vpack.c.bf16 %v1645_v57, %v1645_v57  ;;  %2577 = vst.msk [vmem:[%s4865_s2 + $0x220] sm:$0xf] %vm2440_vm4, %v3091_v59  ;;  %v3092_v63 = vpack.c.bf16 %v1731_v60, %v1731_v60 }
 0x1ab   :  { %2492 = vst.msk [vmem:[%s4865_s2 + $0xcc] sm:$0xf] %vm2440_vm4, %v3006_v62  ;;  %2578 = vst.msk [vmem:[%s4865_s2 + $0x224] sm:$0xf] %vm2440_vm4, %v3092_v63 }
 0x1ac   :  { %v1124_v1 = vpop.f32.mrb[104].mxu0  ;;  %v1468_v2 = vpop.f32.mrb[104].mxu1 }
 0x1ad   :  { %v1646_v3 = vmax.f32 %v1124_v1, 0.0  ;;  %v3321_v4 = vpop.f32.mrb[105].mxu0  ;;  %v1732_v5 = vmax.f32 %v1468_v2, 0.0  ;;  %v3493_v6 = vpop.f32.mrb[105].mxu1 }
 0x1ae   :  { %v1127_v7 = vpop.f32.mrb[106].mxu0  ;;  %v1471_v8 = vpop.f32.mrb[106].mxu1 }
 0x1af   :  { %v3007_v9 = vpack.c.bf16 %v1646_v3, %v1646_v3  ;;  %v1647_v10 = vmax.f32 %v1127_v7, 0.0  ;;  %v3322_v11 = vpop.f32.mrb[107].mxu0  ;;  %v3093_v12 = vpack.c.bf16 %v1732_v5, %v1732_v5  ;;  %v1733_v13 = vmax.f32 %v1471_v8, 0.0  ;;  %v3494_v14 = vpop.f32.mrb[107].mxu1 }
 0x1b1   :  { %2493 = vst.msk [vmem:[%s4865_s2 + $0xd0] sm:$0xf] %vm2440_vm4, %v3007_v9  ;;  %v3008_v15 = vpack.c.bf16 %v1647_v10, %v1647_v10  ;;  %2579 = vst.msk [vmem:[%s4865_s2 + $0x228] sm:$0xf] %vm2440_vm4, %v3093_v12  ;;  %v3094_v16 = vpack.c.bf16 %v1733_v13, %v1733_v13 }
 0x1b3   :  { %2494 = vst.msk [vmem:[%s4865_s2 + $0xd4] sm:$0xf] %vm2440_vm4, %v3008_v15  ;;  %2580 = vst.msk [vmem:[%s4865_s2 + $0x22c] sm:$0xf] %vm2440_vm4, %v3094_v16 }
 0x1b4   :  { %v1132_v17 = vpop.f32.mrb[108].mxu0  ;;  %v1476_v18 = vpop.f32.mrb[108].mxu1 }
 0x1b5   :  { %v1648_v19 = vmax.f32 %v1132_v17, 0.0  ;;  %v3325_v20 = vpop.f32.mrb[109].mxu0  ;;  %v1734_v21 = vmax.f32 %v1476_v18, 0.0  ;;  %v3497_v0 = vpop.f32.mrb[109].mxu1 }
 0x1b6   :  { %v1135_v22 = vpop.f32.mrb[110].mxu0  ;;  %v1479_v23 = vpop.f32.mrb[110].mxu1 }
 0x1b7   :  { %v3009_v24 = vpack.c.bf16 %v1648_v19, %v1648_v19  ;;  %v1649_v25 = vmax.f32 %v1135_v22, 0.0  ;;  %v3326_v26 = vpop.f32.mrb[111].mxu0  ;;  %v3095_v27 = vpack.c.bf16 %v1734_v21, %v1734_v21  ;;  %v1735_v28 = vmax.f32 %v1479_v23, 0.0  ;;  %v3498_v29 = vpop.f32.mrb[111].mxu1 }
 0x1b9   :  { %2495 = vst.msk [vmem:[%s4865_s2 + $0xd8] sm:$0xf] %vm2440_vm4, %v3009_v24  ;;  %v3010_v30 = vpack.c.bf16 %v1649_v25, %v1649_v25  ;;  %2581 = vst.msk [vmem:[%s4865_s2 + $0x230] sm:$0xf] %vm2440_vm4, %v3095_v27  ;;  %v3096_v31 = vpack.c.bf16 %v1735_v28, %v1735_v28 }
 0x1bb   :  { %2496 = vst.msk [vmem:[%s4865_s2 + $0xdc] sm:$0xf] %vm2440_vm4, %v3010_v30  ;;  %2582 = vst.msk [vmem:[%s4865_s2 + $0x234] sm:$0xf] %vm2440_vm4, %v3096_v31 }
 0x1bc   :  { %v1140_v32 = vpop.f32.mrb[112].mxu0  ;;  %v1484_v33 = vpop.f32.mrb[112].mxu1 }
 0x1bd   :  { %v1650_v34 = vmax.f32 %v1140_v32, 0.0  ;;  %v3329_v35 = vpop.f32.mrb[113].mxu0  ;;  %v1736_v36 = vmax.f32 %v1484_v33, 0.0  ;;  %v3501_v37 = vpop.f32.mrb[113].mxu1 }
 0x1be   :  { %v1143_v38 = vpop.f32.mrb[114].mxu0  ;;  %v1487_v39 = vpop.f32.mrb[114].mxu1 }
 0x1bf   :  { %v3011_v40 = vpack.c.bf16 %v1650_v34, %v1650_v34  ;;  %v1651_v41 = vmax.f32 %v1143_v38, 0.0  ;;  %v3330_v42 = vpop.f32.mrb[115].mxu0  ;;  %v3097_v43 = vpack.c.bf16 %v1736_v36, %v1736_v36  ;;  %v1737_v44 = vmax.f32 %v1487_v39, 0.0  ;;  %v3502_v45 = vpop.f32.mrb[115].mxu1 }
 0x1c1   :  { %2497 = vst.msk [vmem:[%s4865_s2 + $0xe0] sm:$0xf] %vm2440_vm4, %v3011_v40  ;;  %v3012_v46 = vpack.c.bf16 %v1651_v41, %v1651_v41  ;;  %2583 = vst.msk [vmem:[%s4865_s2 + $0x238] sm:$0xf] %vm2440_vm4, %v3097_v43  ;;  %v3098_v47 = vpack.c.bf16 %v1737_v44, %v1737_v44 }
 0x1c3   :  { %2498 = vst.msk [vmem:[%s4865_s2 + $0xe4] sm:$0xf] %vm2440_vm4, %v3012_v46  ;;  %2584 = vst.msk [vmem:[%s4865_s2 + $0x23c] sm:$0xf] %vm2440_vm4, %v3098_v47 }
 0x1c4   :  { %v1148_v48 = vpop.f32.mrb[116].mxu0  ;;  %v1492_v49 = vpop.f32.mrb[116].mxu1 }
 0x1c5   :  { %v1652_v50 = vmax.f32 %v1148_v48, 0.0  ;;  %v3333_v51 = vpop.f32.mrb[117].mxu0  ;;  %v1738_v52 = vmax.f32 %v1492_v49, 0.0  ;;  %v3505_v53 = vpop.f32.mrb[117].mxu1 }
 0x1c6   :  { %v1151_v54 = vpop.f32.mrb[118].mxu0  ;;  %v1495_v55 = vpop.f32.mrb[118].mxu1 }
 0x1c7   :  { %v3013_v56 = vpack.c.bf16 %v1652_v50, %v1652_v50  ;;  %v1653_v57 = vmax.f32 %v1151_v54, 0.0  ;;  %v3334_v58 = vpop.f32.mrb[119].mxu0  ;;  %v3099_v59 = vpack.c.bf16 %v1738_v52, %v1738_v52  ;;  %v1739_v60 = vmax.f32 %v1495_v55, 0.0  ;;  %v3506_v61 = vpop.f32.mrb[119].mxu1 }
 0x1c9   :  { %2499 = vst.msk [vmem:[%s4865_s2 + $0xe8] sm:$0xf] %vm2440_vm4, %v3013_v56  ;;  %v3014_v62 = vpack.c.bf16 %v1653_v57, %v1653_v57  ;;  %2585 = vst.msk [vmem:[%s4865_s2 + $0x240] sm:$0xf] %vm2440_vm4, %v3099_v59  ;;  %v3100_v63 = vpack.c.bf16 %v1739_v60, %v1739_v60 }
 0x1cb   :  { %2500 = vst.msk [vmem:[%s4865_s2 + $0xec] sm:$0xf] %vm2440_vm4, %v3014_v62  ;;  %2586 = vst.msk [vmem:[%s4865_s2 + $0x244] sm:$0xf] %vm2440_vm4, %v3100_v63 }
 0x1cc   :  { %v1156_v1 = vpop.f32.mrb[120].mxu0  ;;  %v1500_v2 = vpop.f32.mrb[120].mxu1 }
 0x1cd   :  { %v1654_v3 = vmax.f32 %v1156_v1, 0.0  ;;  %v3337_v4 = vpop.f32.mrb[121].mxu0  ;;  %v1740_v5 = vmax.f32 %v1500_v2, 0.0  ;;  %v3509_v6 = vpop.f32.mrb[121].mxu1 }
 0x1ce   :  { %v1159_v7 = vpop.f32.mrb[122].mxu0  ;;  %v1503_v8 = vpop.f32.mrb[122].mxu1 }
 0x1cf   :  { %v3015_v9 = vpack.c.bf16 %v1654_v3, %v1654_v3  ;;  %v1655_v10 = vmax.f32 %v1159_v7, 0.0  ;;  %v3338_v11 = vpop.f32.mrb[123].mxu0  ;;  %v3101_v12 = vpack.c.bf16 %v1740_v5, %v1740_v5  ;;  %v1741_v13 = vmax.f32 %v1503_v8, 0.0  ;;  %v3510_v14 = vpop.f32.mrb[123].mxu1 }
 0x1d1   :  { %2501 = vst.msk [vmem:[%s4865_s2 + $0xf0] sm:$0xf] %vm2440_vm4, %v3015_v9  ;;  %v3016_v15 = vpack.c.bf16 %v1655_v10, %v1655_v10  ;;  %2587 = vst.msk [vmem:[%s4865_s2 + $0x248] sm:$0xf] %vm2440_vm4, %v3101_v12  ;;  %v3102_v16 = vpack.c.bf16 %v1741_v13, %v1741_v13 }
 0x1d3   :  { %2502 = vst.msk [vmem:[%s4865_s2 + $0xf4] sm:$0xf] %vm2440_vm4, %v3016_v15  ;;  %2588 = vst.msk [vmem:[%s4865_s2 + $0x24c] sm:$0xf] %vm2440_vm4, %v3102_v16 }
 0x1d4   :  { %v1164_v17 = vpop.f32.mrb[124].mxu0  ;;  %v1508_v18 = vpop.f32.mrb[124].mxu1 }
 0x1d5   :  { %v1656_v19 = vmax.f32 %v1164_v17, 0.0  ;;  %v3341_v20 = vpop.f32.mrb[125].mxu0  ;;  %v1742_v21 = vmax.f32 %v1508_v18, 0.0  ;;  %v3513_v0 = vpop.f32.mrb[125].mxu1 }
 0x1d6   :  { %v1167_v22 = vpop.f32.mrb[126].mxu0  ;;  %v1511_v23 = vpop.f32.mrb[126].mxu1 }
 0x1d7   :  { %v3017_v24 = vpack.c.bf16 %v1656_v19, %v1656_v19  ;;  %v1657_v25 = vmax.f32 %v1167_v22, 0.0  ;;  %v3342_v26 = vpop.f32.mrb[127].mxu0  ;;  %v3103_v27 = vpack.c.bf16 %v1742_v21, %v1742_v21  ;;  %v1743_v28 = vmax.f32 %v1511_v23, 0.0  ;;  %v3514_v29 = vpop.f32.mrb[127].mxu1 }
 0x1d9   :  { %2503 = vst.msk [vmem:[%s4865_s2 + $0xf8] sm:$0xf] %vm2440_vm4, %v3017_v24  ;;  %v3018_v30 = vpack.c.bf16 %v1657_v25, %v1657_v25  ;;  %2589 = vst.msk [vmem:[%s4865_s2 + $0x250] sm:$0xf] %vm2440_vm4, %v3103_v27  ;;  %v3104_v31 = vpack.c.bf16 %v1743_v28, %v1743_v28 }
 0x1db   :  { %2504 = vst.msk [vmem:[%s4865_s2 + $0xfc] sm:$0xf] %vm2440_vm4, %v3018_v30  ;;  %2590 = vst.msk [vmem:[%s4865_s2 + $0x254] sm:$0xf] %vm2440_vm4, %v3104_v31 }
 0x1dc   :  { %v1172_v32 = vpop.f32.mrb[128].mxu0  ;;  %v1516_v33 = vpop.f32.mrb[128].mxu1 }
 0x1dd   :  { %v1658_v34 = vmax.f32 %v1172_v32, 0.0  ;;  %v3345_v35 = vpop.f32.mrb[129].mxu0  ;;  %v1744_v36 = vmax.f32 %v1516_v33, 0.0  ;;  %v3517_v37 = vpop.f32.mrb[129].mxu1 }
 0x1de   :  { %v1175_v38 = vpop.f32.mrb[130].mxu0  ;;  %v1519_v39 = vpop.f32.mrb[130].mxu1 }
 0x1df   :  { %v3019_v40 = vpack.c.bf16 %v1658_v34, %v1658_v34  ;;  %v1659_v41 = vmax.f32 %v1175_v38, 0.0  ;;  %v3346_v42 = vpop.f32.mrb[131].mxu0  ;;  %v3105_v43 = vpack.c.bf16 %v1744_v36, %v1744_v36  ;;  %v1745_v44 = vmax.f32 %v1519_v39, 0.0  ;;  %v3518_v45 = vpop.f32.mrb[131].mxu1 }
 0x1e1   :  { %2505 = vst.msk [vmem:[%s4865_s2 + $0x100] sm:$0xf] %vm2440_vm4, %v3019_v40  ;;  %v3020_v46 = vpack.c.bf16 %v1659_v41, %v1659_v41  ;;  %2591 = vst.msk [vmem:[%s4865_s2 + $0x258] sm:$0xf] %vm2440_vm4, %v3105_v43  ;;  %v3106_v47 = vpack.c.bf16 %v1745_v44, %v1745_v44 }
 0x1e3   :  { %2506 = vst.msk [vmem:[%s4865_s2 + $0x104] sm:$0xf] %vm2440_vm4, %v3020_v46  ;;  %2592 = vst.msk [vmem:[%s4865_s2 + $0x25c] sm:$0xf] %vm2440_vm4, %v3106_v47 }
 0x1e4   :  { %v1180_v48 = vpop.f32.mrb[132].mxu0  ;;  %v1524_v49 = vpop.f32.mrb[132].mxu1 }
 0x1e5   :  { %v1660_v50 = vmax.f32 %v1180_v48, 0.0  ;;  %v3349_v51 = vpop.f32.mrb[133].mxu0  ;;  %v1746_v52 = vmax.f32 %v1524_v49, 0.0  ;;  %v3521_v53 = vpop.f32.mrb[133].mxu1 }
 0x1e6   :  { %v1183_v54 = vpop.f32.mrb[134].mxu0  ;;  %v1527_v55 = vpop.f32.mrb[134].mxu1 }
 0x1e7   :  { %v3021_v56 = vpack.c.bf16 %v1660_v50, %v1660_v50  ;;  %v1661_v57 = vmax.f32 %v1183_v54, 0.0  ;;  %v3350_v58 = vpop.f32.mrb[135].mxu0  ;;  %v3107_v59 = vpack.c.bf16 %v1746_v52, %v1746_v52  ;;  %v1747_v60 = vmax.f32 %v1527_v55, 0.0  ;;  %v3522_v61 = vpop.f32.mrb[135].mxu1 }
 0x1e9   :  { %2507 = vst.msk [vmem:[%s4865_s2 + $0x108] sm:$0xf] %vm2440_vm4, %v3021_v56  ;;  %v3022_v62 = vpack.c.bf16 %v1661_v57, %v1661_v57  ;;  %2593 = vst.msk [vmem:[%s4865_s2 + $0x260] sm:$0xf] %vm2440_vm4, %v3107_v59  ;;  %v3108_v63 = vpack.c.bf16 %v1747_v60, %v1747_v60 }
 0x1eb   :  { %2508 = vst.msk [vmem:[%s4865_s2 + $0x10c] sm:$0xf] %vm2440_vm4, %v3022_v62  ;;  %2594 = vst.msk [vmem:[%s4865_s2 + $0x264] sm:$0xf] %vm2440_vm4, %v3108_v63 }
 0x1ec   :  { %v1188_v1 = vpop.f32.mrb[136].mxu0  ;;  %v1532_v2 = vpop.f32.mrb[136].mxu1 }
 0x1ed   :  { %v1662_v3 = vmax.f32 %v1188_v1, 0.0  ;;  %v3353_v4 = vpop.f32.mrb[137].mxu0  ;;  %v1748_v5 = vmax.f32 %v1532_v2, 0.0  ;;  %v3525_v6 = vpop.f32.mrb[137].mxu1 }
 0x1ee   :  { %v1191_v7 = vpop.f32.mrb[138].mxu0  ;;  %v1535_v8 = vpop.f32.mrb[138].mxu1 }
 0x1ef   :  { %v3023_v9 = vpack.c.bf16 %v1662_v3, %v1662_v3  ;;  %v1663_v10 = vmax.f32 %v1191_v7, 0.0  ;;  %v3354_v11 = vpop.f32.mrb[139].mxu0  ;;  %v3109_v12 = vpack.c.bf16 %v1748_v5, %v1748_v5  ;;  %v1749_v13 = vmax.f32 %v1535_v8, 0.0  ;;  %v3526_v14 = vpop.f32.mrb[139].mxu1 }
 0x1f1   :  { %2509 = vst.msk [vmem:[%s4865_s2 + $0x110] sm:$0xf] %vm2440_vm4, %v3023_v9  ;;  %v3024_v15 = vpack.c.bf16 %v1663_v10, %v1663_v10  ;;  %2595 = vst.msk [vmem:[%s4865_s2 + $0x268] sm:$0xf] %vm2440_vm4, %v3109_v12  ;;  %v3110_v16 = vpack.c.bf16 %v1749_v13, %v1749_v13 }
 0x1f3   :  { %2510 = vst.msk [vmem:[%s4865_s2 + $0x114] sm:$0xf] %vm2440_vm4, %v3024_v15  ;;  %2596 = vst.msk [vmem:[%s4865_s2 + $0x26c] sm:$0xf] %vm2440_vm4, %v3110_v16 }
 0x1f4   :  { %v1196_v17 = vpop.f32.mrb[140].mxu0  ;;  %v1540_v18 = vpop.f32.mrb[140].mxu1 }
 0x1f5   :  { %v1664_v19 = vmax.f32 %v1196_v17, 0.0  ;;  %v3357_v20 = vpop.f32.mrb[141].mxu0  ;;  %v1750_v21 = vmax.f32 %v1540_v18, 0.0  ;;  %v3529_v0 = vpop.f32.mrb[141].mxu1 }
 0x1f6   :  { %v1199_v22 = vpop.f32.mrb[142].mxu0  ;;  %v1543_v23 = vpop.f32.mrb[142].mxu1 }
 0x1f7   :  { %v3025_v24 = vpack.c.bf16 %v1664_v19, %v1664_v19  ;;  %v1665_v25 = vmax.f32 %v1199_v22, 0.0  ;;  %v3358_v26 = vpop.f32.mrb[143].mxu0  ;;  %v3111_v27 = vpack.c.bf16 %v1750_v21, %v1750_v21  ;;  %v1751_v28 = vmax.f32 %v1543_v23, 0.0  ;;  %v3530_v29 = vpop.f32.mrb[143].mxu1 }
 0x1f9   :  { %2511 = vst.msk [vmem:[%s4865_s2 + $0x118] sm:$0xf] %vm2440_vm4, %v3025_v24  ;;  %v3026_v30 = vpack.c.bf16 %v1665_v25, %v1665_v25  ;;  %2597 = vst.msk [vmem:[%s4865_s2 + $0x270] sm:$0xf] %vm2440_vm4, %v3111_v27  ;;  %v3112_v31 = vpack.c.bf16 %v1751_v28, %v1751_v28 }
 0x1fb   :  { %2512 = vst.msk [vmem:[%s4865_s2 + $0x11c] sm:$0xf] %vm2440_vm4, %v3026_v30  ;;  %2598 = vst.msk [vmem:[%s4865_s2 + $0x274] sm:$0xf] %vm2440_vm4, %v3112_v31 }
 0x1fc   :  { %v1204_v32 = vpop.f32.mrb[144].mxu0  ;;  %v1548_v33 = vpop.f32.mrb[144].mxu1 }
 0x1fd   :  { %v1666_v34 = vmax.f32 %v1204_v32, 0.0  ;;  %v3361_v35 = vpop.f32.mrb[145].mxu0  ;;  %v1752_v36 = vmax.f32 %v1548_v33, 0.0  ;;  %v3533_v37 = vpop.f32.mrb[145].mxu1 }
 0x1fe   :  { %v1207_v38 = vpop.f32.mrb[146].mxu0  ;;  %v1551_v39 = vpop.f32.mrb[146].mxu1 }
 0x1ff   :  { %v3027_v40 = vpack.c.bf16 %v1666_v34, %v1666_v34  ;;  %v1667_v41 = vmax.f32 %v1207_v38, 0.0  ;;  %v3362_v42 = vpop.f32.mrb[147].mxu0  ;;  %v3113_v43 = vpack.c.bf16 %v1752_v36, %v1752_v36  ;;  %v1753_v44 = vmax.f32 %v1551_v39, 0.0  ;;  %v3534_v45 = vpop.f32.mrb[147].mxu1 }
 0x201   :  { %2513 = vst.msk [vmem:[%s4865_s2 + $0x120] sm:$0xf] %vm2440_vm4, %v3027_v40  ;;  %v3028_v46 = vpack.c.bf16 %v1667_v41, %v1667_v41  ;;  %2599 = vst.msk [vmem:[%s4865_s2 + $0x278] sm:$0xf] %vm2440_vm4, %v3113_v43  ;;  %v3114_v47 = vpack.c.bf16 %v1753_v44, %v1753_v44 }
 0x203   :  { %2514 = vst.msk [vmem:[%s4865_s2 + $0x124] sm:$0xf] %vm2440_vm4, %v3028_v46  ;;  %2600 = vst.msk [vmem:[%s4865_s2 + $0x27c] sm:$0xf] %vm2440_vm4, %v3114_v47 }
 0x204   :  { %v1212_v48 = vpop.f32.mrb[148].mxu0  ;;  %v1556_v49 = vpop.f32.mrb[148].mxu1 }
 0x205   :  { %v1668_v50 = vmax.f32 %v1212_v48, 0.0  ;;  %v3365_v51 = vpop.f32.mrb[149].mxu0  ;;  %v1754_v52 = vmax.f32 %v1556_v49, 0.0  ;;  %v3537_v53 = vpop.f32.mrb[149].mxu1 }
 0x206   :  { %v1215_v54 = vpop.f32.mrb[150].mxu0  ;;  %v1559_v55 = vpop.f32.mrb[150].mxu1 }
 0x207   :  { %v3029_v56 = vpack.c.bf16 %v1668_v50, %v1668_v50  ;;  %v1669_v57 = vmax.f32 %v1215_v54, 0.0  ;;  %v3366_v58 = vpop.f32.mrb[151].mxu0  ;;  %v3115_v59 = vpack.c.bf16 %v1754_v52, %v1754_v52  ;;  %v1755_v60 = vmax.f32 %v1559_v55, 0.0  ;;  %v3538_v61 = vpop.f32.mrb[151].mxu1 }
 0x209   :  { %2515 = vst.msk [vmem:[%s4865_s2 + $0x128] sm:$0xf] %vm2440_vm4, %v3029_v56  ;;  %v3030_v62 = vpack.c.bf16 %v1669_v57, %v1669_v57  ;;  %2601 = vst.msk [vmem:[%s4865_s2 + $0x280] sm:$0xf] %vm2440_vm4, %v3115_v59  ;;  %v3116_v63 = vpack.c.bf16 %v1755_v60, %v1755_v60 }
 0x20b   :  { %2516 = vst.msk [vmem:[%s4865_s2 + $0x12c] sm:$0xf] %vm2440_vm4, %v3030_v62  ;;  %2602 = vst.msk [vmem:[%s4865_s2 + $0x284] sm:$0xf] %vm2440_vm4, %v3116_v63 }
 0x20c   :  { %v1220_v1 = vpop.f32.mrb[152].mxu0  ;;  %v1564_v2 = vpop.f32.mrb[152].mxu1 }
 0x20d   :  { %v1670_v3 = vmax.f32 %v1220_v1, 0.0  ;;  %v3369_v4 = vpop.f32.mrb[153].mxu0  ;;  %v1756_v5 = vmax.f32 %v1564_v2, 0.0  ;;  %v3541_v6 = vpop.f32.mrb[153].mxu1 }
 0x20e   :  { %v1223_v7 = vpop.f32.mrb[154].mxu0  ;;  %v1567_v8 = vpop.f32.mrb[154].mxu1 }
 0x20f   :  { %v3031_v9 = vpack.c.bf16 %v1670_v3, %v1670_v3  ;;  %v1671_v10 = vmax.f32 %v1223_v7, 0.0  ;;  %v3370_v11 = vpop.f32.mrb[155].mxu0  ;;  %v3117_v12 = vpack.c.bf16 %v1756_v5, %v1756_v5  ;;  %v1757_v13 = vmax.f32 %v1567_v8, 0.0  ;;  %v3542_v14 = vpop.f32.mrb[155].mxu1 }
 0x211   :  { %2517 = vst.msk [vmem:[%s4865_s2 + $0x130] sm:$0xf] %vm2440_vm4, %v3031_v9  ;;  %v3032_v15 = vpack.c.bf16 %v1671_v10, %v1671_v10  ;;  %2603 = vst.msk [vmem:[%s4865_s2 + $0x288] sm:$0xf] %vm2440_vm4, %v3117_v12  ;;  %v3118_v16 = vpack.c.bf16 %v1757_v13, %v1757_v13 }
 0x213   :  { %2518 = vst.msk [vmem:[%s4865_s2 + $0x134] sm:$0xf] %vm2440_vm4, %v3032_v15  ;;  %2604 = vst.msk [vmem:[%s4865_s2 + $0x28c] sm:$0xf] %vm2440_vm4, %v3118_v16 }
 0x214   :  { %v1228_v17 = vpop.f32.mrb[156].mxu0  ;;  %v1572_v18 = vpop.f32.mrb[156].mxu1 }
 0x215   :  { %v1672_v19 = vmax.f32 %v1228_v17, 0.0  ;;  %v3373_v20 = vpop.f32.mrb[157].mxu0  ;;  %v1758_v21 = vmax.f32 %v1572_v18, 0.0  ;;  %v3545_v0 = vpop.f32.mrb[157].mxu1 }
 0x216   :  { %v1231_v22 = vpop.f32.mrb[158].mxu0  ;;  %v1575_v23 = vpop.f32.mrb[158].mxu1 }
 0x217   :  { %v3033_v24 = vpack.c.bf16 %v1672_v19, %v1672_v19  ;;  %v1673_v25 = vmax.f32 %v1231_v22, 0.0  ;;  %v3374_v26 = vpop.f32.mrb[159].mxu0  ;;  %v3119_v27 = vpack.c.bf16 %v1758_v21, %v1758_v21  ;;  %v1759_v28 = vmax.f32 %v1575_v23, 0.0  ;;  %v3546_v29 = vpop.f32.mrb[159].mxu1 }
 0x219   :  { %2519 = vst.msk [vmem:[%s4865_s2 + $0x138] sm:$0xf] %vm2440_vm4, %v3033_v24  ;;  %v3034_v30 = vpack.c.bf16 %v1673_v25, %v1673_v25  ;;  %2605 = vst.msk [vmem:[%s4865_s2 + $0x290] sm:$0xf] %vm2440_vm4, %v3119_v27  ;;  %v3120_v31 = vpack.c.bf16 %v1759_v28, %v1759_v28 }
 0x21b   :  { %2520 = vst.msk [vmem:[%s4865_s2 + $0x13c] sm:$0xf] %vm2440_vm4, %v3034_v30  ;;  %2606 = vst.msk [vmem:[%s4865_s2 + $0x294] sm:$0xf] %vm2440_vm4, %v3120_v31 }
 0x21c   :  { %v1236_v32 = vpop.f32.mrb[160].mxu0  ;;  %v1580_v33 = vpop.f32.mrb[160].mxu1 }
 0x21d   :  { %v1674_v34 = vmax.f32 %v1236_v32, 0.0  ;;  %v3377_v35 = vpop.f32.mrb[161].mxu0  ;;  %v1760_v36 = vmax.f32 %v1580_v33, 0.0  ;;  %v3549_v37 = vpop.f32.mrb[161].mxu1 }
 0x21e   :  { %v1239_v38 = vpop.f32.mrb[162].mxu0  ;;  %v1583_v39 = vpop.f32.mrb[162].mxu1 }
 0x21f   :  { %v3035_v40 = vpack.c.bf16 %v1674_v34, %v1674_v34  ;;  %v1675_v41 = vmax.f32 %v1239_v38, 0.0  ;;  %v3378_v42 = vpop.f32.mrb[163].mxu0  ;;  %v3121_v43 = vpack.c.bf16 %v1760_v36, %v1760_v36  ;;  %v1761_v44 = vmax.f32 %v1583_v39, 0.0  ;;  %v3550_v45 = vpop.f32.mrb[163].mxu1 }
 0x221   :  { %2521 = vst.msk [vmem:[%s4865_s2 + $0x140] sm:$0xf] %vm2440_vm4, %v3035_v40  ;;  %v3036_v46 = vpack.c.bf16 %v1675_v41, %v1675_v41  ;;  %2607 = vst.msk [vmem:[%s4865_s2 + $0x298] sm:$0xf] %vm2440_vm4, %v3121_v43  ;;  %v3122_v47 = vpack.c.bf16 %v1761_v44, %v1761_v44 }
 0x223   :  { %2522 = vst.msk [vmem:[%s4865_s2 + $0x144] sm:$0xf] %vm2440_vm4, %v3036_v46  ;;  %2608 = vst.msk [vmem:[%s4865_s2 + $0x29c] sm:$0xf] %vm2440_vm4, %v3122_v47 }
 0x224   :  { %v1244_v48 = vpop.f32.mrb[164].mxu0  ;;  %v1588_v49 = vpop.f32.mrb[164].mxu1 }
 0x225   :  { %v1676_v50 = vmax.f32 %v1244_v48, 0.0  ;;  %v3381_v51 = vpop.f32.mrb[165].mxu0  ;;  %v1762_v52 = vmax.f32 %v1588_v49, 0.0  ;;  %v3553_v53 = vpop.f32.mrb[165].mxu1 }
 0x226   :  { %v1247_v54 = vpop.f32.mrb[166].mxu0  ;;  %v1591_v55 = vpop.f32.mrb[166].mxu1 }
 0x227   :  { %v3037_v56 = vpack.c.bf16 %v1676_v50, %v1676_v50  ;;  %v1677_v57 = vmax.f32 %v1247_v54, 0.0  ;;  %v3382_v58 = vpop.f32.mrb[167].mxu0  ;;  %v3123_v59 = vpack.c.bf16 %v1762_v52, %v1762_v52  ;;  %v3554_v60 = vpop.f32.mrb[167].mxu1 }
 0x229   :  { %2523 = vst.msk [vmem:[%s4865_s2 + $0x148] sm:$0xf] %vm2440_vm4, %v3037_v56  ;;  %v3038_v61 = vpack.c.bf16 %v1677_v57, %v1677_v57  ;;  %2609 = vst.msk [vmem:[%s4865_s2 + $0x2a0] sm:$0xf] %vm2440_vm4, %v3123_v59 }
 0x22b   :  { %2524 = vst.msk [vmem:[%s4865_s2 + $0x14c] sm:$0xf] %vm2440_vm4, %v3038_v61 }
 0x22c   :  { %v1252_v62 = vpop.f32.mrb[168].mxu0 }
 0x22d   :  { %v1678_v63 = vmax.f32 %v1252_v62, 0.0  ;;  %v3385_v1 = vpop.f32.mrb[169].mxu0 }
 0x22e   :  { %v1255_v2 = vpop.f32.mrb[170].mxu0 }
 0x22f   :  { %v3039_v3 = vpack.c.bf16 %v1678_v63, %v1678_v63  ;;  %v1679_v4 = vmax.f32 %v1255_v2, 0.0  ;;  %v3386_v5 = vpop.f32.mrb[171].mxu0 }
 0x231   :  { %2525 = vst.msk [vmem:[%s4865_s2 + $0x150] sm:$0xf] %vm2440_vm4, %v3039_v3  ;;  %v3040_v6 = vpack.c.bf16 %v1679_v4, %v1679_v4 }
 0x233   :  { %2526 = vst.msk [vmem:[%s4865_s2 + $0x154] sm:$0xf] %vm2440_vm4, %v3040_v6 }

// kernel: conv_ode_net_forward.4
= control target key start
LH: loop header
LB: loop body
LE: loop exit
PB: predicated region body
PF: predicated region fallthrough
CT: control target
= control target key end

     0   :  { %v3279_v0 = vmov 0   ;;  %vm2612_vm0 = vcmask 519168   ;;  %vm2655_vm1 = vcmask 516096   ;;  %s4250_s1 = inlined_call_operand.vmem [shape: bf16[1024,64], index: 1, kind: input, shape index: {}]   ;;  %s4251_s0 = inlined_call_operand.vmem [shape: bf16[338,1024], index: 0, kind: input, shape index: {}]   ;;  %s4252_s2 = inlined_call_operand.vmem [shape: bf16[338,64], index: 2, kind: output, shape index: {}]  }
   0x1   :  { %1564 = vmatprep.subr.bf16.mxu1 %v3279_v0  ;;  %1980 = vmatprep.subr.bf16.mxu0 %v3279_v0  ;;  %v3207_v1 = vld [vmem:[%s4250_s1] sm:$0xff]   ;;  %v3209_v3 = vld [vmem:[%s4250_s1 + $0x8] sm:$0xff]   ;;  %v3211_v5 = vld [vmem:[%s4250_s1 + $0x10] sm:$0xff]  }
   0x2   :  { %v3208_v2 = vld [vmem:[%s4250_s1 + $0x100] sm:$0xff]   ;;  %1565 = vmatpush1.bf16.msra.mxu1 %v3207_v1  ;;  %v3210_v4 = vld [vmem:[%s4250_s1 + $0x108] sm:$0xff]   ;;  %v3212_v6 = vld [vmem:[%s4250_s1 + $0x110] sm:$0xff]  }
   0x3   :  { %1981 = vmatpush1.bf16.msra.mxu0 %v3208_v2  ;;  %1566 = vmatprep.subr.bf16.mxu1 %v3279_v0  ;;  %v3213_v7 = vld [vmem:[%s4250_s1 + $0x18] sm:$0xff]   ;;  %v3215_v9 = vld [vmem:[%s4250_s1 + $0x20] sm:$0xff]   ;;  %v3217_v11 = vld [vmem:[%s4250_s1 + $0x28] sm:$0xff]  }
   0x4   :  { %1982 = vmatprep.subr.bf16.mxu0 %v3279_v0  ;;  %v3214_v8 = vld [vmem:[%s4250_s1 + $0x118] sm:$0xff]   ;;  %v3216_v10 = vld [vmem:[%s4250_s1 + $0x120] sm:$0xff]   ;;  %v3218_v12 = vld [vmem:[%s4250_s1 + $0x128] sm:$0xff]  }
   0x5   :  { %v3219_v13 = vld [vmem:[%s4250_s1 + $0x30] sm:$0xff]   ;;  %v3221_v15 = vld [vmem:[%s4250_s1 + $0x38] sm:$0xff]   ;;  %v3223_v17 = vld [vmem:[%s4250_s1 + $0x40] sm:$0xff]  }
   0x6   :  { %1567 = vmatpush1.bf16.msra.mxu1 %v3209_v3  ;;  %v3220_v14 = vld [vmem:[%s4250_s1 + $0x130] sm:$0xff]   ;;  %v3222_v16 = vld [vmem:[%s4250_s1 + $0x138] sm:$0xff]   ;;  %v3224_v18 = vld [vmem:[%s4250_s1 + $0x140] sm:$0xff]  }
   0x7   :  { %1983 = vmatpush1.bf16.msra.mxu0 %v3210_v4  ;;  %1568 = vmatprep.subr.bf16.mxu1 %v3279_v0  ;;  %v3370_v19 = vld [vmem:[%s4251_s0] sm:$0xff]  ;;  %v3380_v21 = vld [vmem:[%s4251_s0 + $0x10] sm:$0xff]  ;;  %v3225_v24 = vld [vmem:[%s4250_s1 + $0x48] sm:$0xff]  }
   0x8   :  { %1984 = vmatprep.subr.bf16.mxu0 %v3279_v0  ;;  %v3375_v20 = vld [vmem:[%s4251_s0 + $0x20] sm:$0xff]  ;;  %v18_v23 = vld [vmem:[%s4251_s0 + $0x30] sm:$0xff]  ;;  %v3226_v26 = vld [vmem:[%s4250_s1 + $0x148] sm:$0xff]  }
   0x9   :  { %v2662_v22 = vcombine.high %v3370_v19, %v3375_v20  ;;  %v2666_v25 = vcombine.high %v3380_v21, %v18_v23  ;;  %v3227_v27 = vld [vmem:[%s4250_s1 + $0x50] sm:$0xff]   ;;  %v3229_v29 = vld [vmem:[%s4250_s1 + $0x58] sm:$0xff]   ;;  %v3231_v31 = vld [vmem:[%s4250_s1 + $0x60] sm:$0xff]   ;;  %v2661_v41 = vcombine.low %v3370_v19, %v3375_v20  ;;  %v2665_v44 = vcombine.low %v3380_v21, %v18_v23 }
   0xa   :  { %1569 = vmatpush1.bf16.msra.mxu1 %v3211_v5  ;;  %v3228_v28 = vld [vmem:[%s4250_s1 + $0x150] sm:$0xff]   ;;  %v3230_v30 = vld [vmem:[%s4250_s1 + $0x158] sm:$0xff]   ;;  %v3232_v32 = vld [vmem:[%s4250_s1 + $0x160] sm:$0xff]  }
   0xb   :  { %1985 = vmatpush1.bf16.msra.mxu0 %v3212_v6  ;;  %1570 = vmatprep.subr.bf16.mxu1 %v3279_v0  ;;  %v3233_v33 = vld [vmem:[%s4250_s1 + $0x68] sm:$0xff]   ;;  %v3235_v35 = vld [vmem:[%s4250_s1 + $0x70] sm:$0xff]   ;;  %v3237_v37 = vld [vmem:[%s4250_s1 + $0x78] sm:$0xff]  }
   0xc   :  { %1986 = vmatprep.subr.bf16.mxu0 %v3279_v0  ;;  %1596 = vmatprep.mubr.bf16.mxu1 %v2662_v22  ;;  %v3234_v34 = vld [vmem:[%s4250_s1 + $0x168] sm:$0xff]   ;;  %v3236_v36 = vld [vmem:[%s4250_s1 + $0x170] sm:$0xff]   ;;  %v3238_v38 = vld [vmem:[%s4250_s1 + $0x178] sm:$0xff]  }
   0xd   :  { %2012 = vmatprep.mubr.bf16.mxu0 %v2666_v25  ;;  %v20_v39 = vld [vmem:[%s4251_s0 + $0x40] sm:$0xff]  ;;  %v22_v42 = vld [vmem:[%s4251_s0 + $0x50] sm:$0xff]  ;;  %v3241_v49 = vld [vmem:[%s4250_s1 + $0x88] sm:$0xff]  }
   0xe   :  { %1571 = vmatpush1.bf16.msra.mxu1 %v3213_v7  ;;  %v24_v40 = vld [vmem:[%s4251_s0 + $0x60] sm:$0xff]  ;;  %v26_v43 = vld [vmem:[%s4251_s0 + $0x70] sm:$0xff]  ;;  %v3242_v50 = vld [vmem:[%s4250_s1 + $0x188] sm:$0xff]  }
   0xf   :  { %1987 = vmatpush1.bf16.msra.mxu0 %v3214_v8  ;;  %1572 = vmatprep.subr.bf16.mxu1 %v3279_v0  ;;  %v3239_v45 = vld [vmem:[%s4250_s1 + $0x80] sm:$0xff]   ;;  %v2670_v47 = vcombine.high %v20_v39, %v24_v40  ;;  %v2674_v48 = vcombine.high %v22_v42, %v26_v43  ;;  %v30_v53 = vld [vmem:[%s4251_s0 + $0x90] sm:$0xff]  ;;  %v2669_v55 = vcombine.low %v20_v39, %v24_v40  ;;  %v3245_v2 = vld [vmem:[%s4250_s1 + $0x98] sm:$0xff]  }
  0x10   :  { %1988 = vmatprep.subr.bf16.mxu0 %v3279_v0  ;;  %v3240_v46 = vld [vmem:[%s4250_s1 + $0x180] sm:$0xff]   ;;  %v34_v54 = vld [vmem:[%s4251_s0 + $0xb0] sm:$0xff]  ;;  %v2673_v56 = vcombine.low %v22_v42, %v26_v43  ;;  %v3246_v3 = vld [vmem:[%s4250_s1 + $0x198] sm:$0xff]  }
  0x11   :  { %v28_v51 = vld [vmem:[%s4251_s0 + $0x80] sm:$0xff]  ;;  %v2682_v58 = vcombine.high %v30_v53, %v34_v54  ;;  %v3243_v59 = vld [vmem:[%s4250_s1 + $0x90] sm:$0xff]   ;;  %v2681_v5 = vcombine.low %v30_v53, %v34_v54  ;;  %v3258_v39 = vld [vmem:[%s4250_s1 + $0x1c8] sm:$0xff]  }
  0x12   :  { %1573 = vmatpush1.bf16.msra.mxu1 %v3215_v9  ;;  %v32_v52 = vld [vmem:[%s4251_s0 + $0xa0] sm:$0xff]  ;;  %v3244_v60 = vld [vmem:[%s4250_s1 + $0x190] sm:$0xff]  }
  0x13   :  { %1989 = vmatpush1.bf16.msra.mxu0 %v3216_v10  ;;  %1574 = vmatprep.subr.bf16.mxu1 %v3279_v0  ;;  %v2678_v57 = vcombine.high %v28_v51, %v32_v52  ;;  %v36_v61 = vld [vmem:[%s4251_s0 + $0xc0] sm:$0xff]  ;;  %v38_v63 = vld [vmem:[%s4251_s0 + $0xd0] sm:$0xff]  ;;  %v2677_v4 = vcombine.low %v28_v51, %v32_v52  ;;  %v3262_v51 = vld [vmem:[%s4250_s1 + $0x1d8] sm:$0xff]  }
  0x14   :  { %1990 = vmatprep.subr.bf16.mxu0 %v3279_v0  ;;  %v40_v62 = vld [vmem:[%s4251_s0 + $0xe0] sm:$0xff]  ;;  %v42_v1 = vld [vmem:[%s4251_s0 + $0xf0] sm:$0xff] }
  0x15   :  { %v2686_v6 = vcombine.high %v36_v61, %v40_v62  ;;  %v2690_v7 = vcombine.high %v38_v63, %v42_v1  ;;  %v3247_v8 = vld [vmem:[%s4250_s1 + $0xa0] sm:$0xff]   ;;  %v3251_v19 = vld [vmem:[%s4250_s1 + $0xb0] sm:$0xff]  }
  0x16   :  { %1575 = vmatpush1.bf16.msra.mxu1 %v3217_v11  ;;  %v3248_v9 = vld [vmem:[%s4250_s1 + $0x1a0] sm:$0xff]   ;;  %v3252_v20 = vld [vmem:[%s4250_s1 + $0x1b0] sm:$0xff]  }
  0x17   :  { %1991 = vmatpush1.bf16.msra.mxu0 %v3218_v12  ;;  %1576 = vmatprep.subr.bf16.mxu1 %v3279_v0  ;;  %v44_v10 = vld [vmem:[%s4251_s0 + $0x100] sm:$0xff]  ;;  %v46_v12 = vld [vmem:[%s4251_s0 + $0x110] sm:$0xff] }
  0x18   :  { %1992 = vmatprep.subr.bf16.mxu0 %v3279_v0  ;;  %v48_v11 = vld [vmem:[%s4251_s0 + $0x120] sm:$0xff]  ;;  %v54_v25 = vld [vmem:[%s4251_s0 + $0x150] sm:$0xff] }
  0x19   :  { %v52_v22 = vld [vmem:[%s4251_s0 + $0x140] sm:$0xff] }
  0x1a   :  { %1577 = vmatpush1.bf16.msra.mxu1 %v3219_v13  ;;  %v50_v13 = vld [vmem:[%s4251_s0 + $0x130] sm:$0xff]  ;;  %v56_v23 = vld [vmem:[%s4251_s0 + $0x160] sm:$0xff] }
  0x1b   :  { %1993 = vmatpush1.bf16.msra.mxu0 %v3220_v14  ;;  %1578 = vmatprep.subr.bf16.mxu1 %v3279_v0  ;;  %v3249_v14 = vld [vmem:[%s4250_s1 + $0xa8] sm:$0xff]   ;;  %v2698_v21 = vcombine.high %v46_v12, %v50_v13  ;;  %v2701_v40 = vcombine.low %v52_v22, %v56_v23 }
  0x1c   :  { %1994 = vmatprep.subr.bf16.mxu0 %v3279_v0 }
  0x1e   :  { %1579 = vmatpush1.bf16.msra.mxu1 %v3221_v15  ;;  %v3250_v15 = vld [vmem:[%s4250_s1 + $0x1a8] sm:$0xff]  }
  0x1f   :  { %1995 = vmatpush1.bf16.msra.mxu0 %v3222_v16  ;;  %1580 = vmatprep.subr.bf16.mxu1 %v3279_v0  ;;  %v2685_v16 = vcombine.low %v36_v61, %v40_v62  ;;  %v78_v61 = vld [vmem:[%s4251_s0 + $0x210] sm:$0xff] }
  0x20   :  { %1996 = vmatprep.subr.bf16.mxu0 %v3279_v0  ;;  %v82_v62 = vld [vmem:[%s4251_s0 + $0x230] sm:$0xff] }
  0x22   :  { %1581 = vmatpush1.bf16.msra.mxu1 %v3223_v17  ;;  %v2689_v17 = vcombine.low %v38_v63, %v42_v1  ;;  %v3266_v63 = vld [vmem:[%s4250_s1 + $0x1e8] sm:$0xff]  }
  0x23   :  { %1997 = vmatpush1.bf16.msra.mxu0 %v3224_v18  ;;  %1582 = vmatprep.subr.bf16.mxu1 %v3279_v0  ;;  %v2694_v18 = vcombine.high %v44_v10, %v48_v11 }
  0x24   :  { %1998 = vmatprep.subr.bf16.mxu0 %v3279_v0 }
  0x26   :  { %1583 = vmatpush1.bf16.msra.mxu1 %v3225_v24  ;;  %v3253_v24 = vld [vmem:[%s4250_s1 + $0xb8] sm:$0xff]  }
  0x27   :  { %1999 = vmatpush1.bf16.msra.mxu0 %v3226_v26  ;;  %1584 = vmatprep.subr.bf16.mxu1 %v3279_v0  ;;  %v58_v26 = vld [vmem:[%s4251_s0 + $0x170] sm:$0xff] }
  0x28   :  { %2000 = vmatprep.subr.bf16.mxu0 %v3279_v0 }
  0x2a   :  { %1585 = vmatpush1.bf16.msra.mxu1 %v3227_v27  ;;  %v3254_v27 = vld [vmem:[%s4250_s1 + $0x1b8] sm:$0xff]  }
  0x2b   :  { %2001 = vmatpush1.bf16.msra.mxu0 %v3228_v28  ;;  %1586 = vmatprep.subr.bf16.mxu1 %v3279_v0  ;;  %v2693_v28 = vcombine.low %v44_v10, %v48_v11  ;;  %v86_v10 = vld [vmem:[%s4251_s0 + $0x250] sm:$0xff] }
  0x2c   :  { %2002 = vmatprep.subr.bf16.mxu0 %v3279_v0  ;;  %v90_v11 = vld [vmem:[%s4251_s0 + $0x270] sm:$0xff] }
  0x2e   :  { %1587 = vmatpush1.bf16.msra.mxu1 %v3229_v29  ;;  %v2697_v29 = vcombine.low %v46_v12, %v50_v13  ;;  %v3270_v12 = vld [vmem:[%s4250_s1 + $0x1f8] sm:$0xff]  }
  0x2f   :  { %2003 = vmatpush1.bf16.msra.mxu0 %v3230_v30  ;;  %1588 = vmatprep.subr.bf16.mxu1 %v3279_v0  ;;  %v2702_v30 = vcombine.high %v52_v22, %v56_v23 }
  0x30   :  { %2004 = vmatprep.subr.bf16.mxu0 %v3279_v0 }
  0x32   :  { %1589 = vmatpush1.bf16.msra.mxu1 %v3231_v31  ;;  %v2706_v31 = vcombine.high %v54_v25, %v58_v26 }
  0x33   :  { %2005 = vmatpush1.bf16.msra.mxu0 %v3232_v32  ;;  %1590 = vmatprep.subr.bf16.mxu1 %v3279_v0  ;;  %v3255_v32 = vld [vmem:[%s4250_s1 + $0xc0] sm:$0xff]  }
  0x34   :  { %2006 = vmatprep.subr.bf16.mxu0 %v3279_v0 }
  0x36   :  { %1591 = vmatpush1.bf16.msra.mxu1 %v3233_v33  ;;  %v3256_v33 = vld [vmem:[%s4250_s1 + $0x1c0] sm:$0xff]  }
  0x37   :  { %2007 = vmatpush1.bf16.msra.mxu0 %v3234_v34  ;;  %1592 = vmatprep.subr.bf16.mxu1 %v3279_v0  ;;  %v60_v34 = vld [vmem:[%s4251_s0 + $0x180] sm:$0xff] }
  0x38   :  { %2008 = vmatprep.subr.bf16.mxu0 %v3279_v0 }
  0x3a   :  { %1593 = vmatpush1.bf16.msra.mxu1 %v3235_v35  ;;  %v64_v35 = vld [vmem:[%s4251_s0 + $0x1a0] sm:$0xff] }
  0x3b   :  { %2009 = vmatpush1.bf16.msra.mxu0 %v3236_v36  ;;  %1594 = vmatprep.subr.bf16.mxu1 %v3279_v0  ;;  %v3257_v36 = vld [vmem:[%s4250_s1 + $0xc8] sm:$0xff]   ;;  %v2710_v42 = vcombine.high %v60_v34, %v64_v35  ;;  %v2709_v52 = vcombine.low %v60_v34, %v64_v35  ;;  %v110_v34 = vld [vmem:[%s4251_s0 + $0x310] sm:$0xff] }
  0x3c   :  { %2010 = vmatprep.subr.bf16.mxu0 %v3279_v0  ;;  %v114_v35 = vld [vmem:[%s4251_s0 + $0x330] sm:$0xff] }
  0x3e   :  { %1595 = vmatpush1.bf16.msra.mxu1 %v3237_v37  ;;  %v62_v37 = vld [vmem:[%s4251_s0 + $0x190] sm:$0xff] }
  0x3f   :  { %2011 = vmatpush1.bf16.msra.mxu0 %v3238_v38  ;;  %1772 = vmatprep.subr.bf16.mxu1 %v3279_v0  ;;  %v66_v38 = vld [vmem:[%s4251_s0 + $0x1b0] sm:$0xff] }
  0x40   :  { %2188 = vmatprep.subr.bf16.mxu0 %v3279_v0  ;;  %v2714_v43 = vcombine.high %v62_v37, %v66_v38  ;;  %v2713_v53 = vcombine.low %v62_v37, %v66_v38 }
  0x41   :  { %1597 = vmatmul.mubr.bf16.vlgmr.msra.gmra.mrb[0].mxu1 %v2661_v41  ;;  %v2705_v41 = vcombine.low %v54_v25, %v58_v26  ;;  %v104_v25 = vld [vmem:[%s4251_s0 + $0x2e0] sm:$0xff]  ;;  %v102_v26 = vld [vmem:[%s4251_s0 + $0x2d0] sm:$0xff] }
  0x42   :  { %2013 = vmatmul.mubr.bf16.vlgmr.msra.gmra.mrb[0].mxu0 %v2665_v44  ;;  %1773 = vmatpush1.bf16.msra.mxu1 %v3239_v45  ;;  %v3259_v44 = vld [vmem:[%s4250_s1 + $0xd0] sm:$0xff]  }
  0x43   :  { %2189 = vmatpush1.bf16.msra.mxu0 %v3240_v46  ;;  %1604 = vmatprep.mubr.bf16.mxu1 %v2670_v47  ;;  %v3260_v45 = vld [vmem:[%s4250_s1 + $0x1d0] sm:$0xff]   ;;  %v68_v46 = vld [vmem:[%s4251_s0 + $0x1c0] sm:$0xff] }
  0x44   :  { %2020 = vmatprep.mubr.bf16.mxu0 %v2674_v48  ;;  %1774 = vmatprep.subr.bf16.mxu1 %v3279_v0  ;;  %v72_v47 = vld [vmem:[%s4251_s0 + $0x1e0] sm:$0xff]  ;;  %v3261_v48 = vld [vmem:[%s4250_s1 + $0xd8] sm:$0xff]  }
  0x45   :  { %2190 = vmatprep.subr.bf16.mxu0 %v3279_v0  ;;  %v2718_v54 = vcombine.high %v68_v46, %v72_v47  ;;  %v2717_v1 = vcombine.low %v68_v46, %v72_v47 }
  0x46   :  { %1775 = vmatpush1.bf16.msra.mxu1 %v3241_v49  ;;  %v70_v49 = vld [vmem:[%s4251_s0 + $0x1d0] sm:$0xff] }
  0x47   :  { %2191 = vmatpush1.bf16.msra.mxu0 %v3242_v50  ;;  %1776 = vmatprep.subr.bf16.mxu1 %v3279_v0  ;;  %v74_v50 = vld [vmem:[%s4251_s0 + $0x1f0] sm:$0xff] }
  0x48   :  { %2192 = vmatprep.subr.bf16.mxu0 %v3279_v0 }
  0x49   :  { %1605 = vmatmul.mubr.bf16.gmra.mrb[4].mxu1 %v2669_v55  ;;  %v2722_v55 = vcombine.high %v70_v49, %v74_v50 }
  0x4a   :  { %2021 = vmatmul.mubr.bf16.gmra.mrb[4].mxu0 %v2673_v56  ;;  %1612 = vmatprep.mubr.bf16.mxu1 %v2678_v57  ;;  %v3263_v56 = vld [vmem:[%s4250_s1 + $0xe0] sm:$0xff]  }
  0x4b   :  { %2028 = vmatprep.mubr.bf16.mxu0 %v2682_v58  ;;  %1777 = vmatpush1.bf16.msra.mxu1 %v3243_v59  ;;  %v3264_v57 = vld [vmem:[%s4250_s1 + $0x1e0] sm:$0xff]  }
  0x4c   :  { %2193 = vmatpush1.bf16.msra.mxu0 %v3244_v60  ;;  %1778 = vmatprep.subr.bf16.mxu1 %v3279_v0  ;;  %v76_v58 = vld [vmem:[%s4251_s0 + $0x200] sm:$0xff]  ;;  %v3265_v60 = vld [vmem:[%s4250_s1 + $0xe8] sm:$0xff]  }
  0x4d   :  { %2194 = vmatprep.subr.bf16.mxu0 %v3279_v0  ;;  %v80_v59 = vld [vmem:[%s4251_s0 + $0x220] sm:$0xff] }
  0x4e   :  { %v2725_v13 = vcombine.low %v76_v58, %v80_v59 }
  0x4f   :  { %1779 = vmatpush1.bf16.msra.mxu1 %v3245_v2  ;;  %v2721_v2 = vcombine.low %v70_v49, %v74_v50  ;;  %v128_v49 = vld [vmem:[%s4251_s0 + $0x3a0] sm:$0xff]  ;;  %v126_v50 = vld [vmem:[%s4251_s0 + $0x390] sm:$0xff] }
  0x50   :  { %2195 = vmatpush1.bf16.msra.mxu0 %v3246_v3  ;;  %1780 = vmatprep.subr.bf16.mxu1 %v3279_v0  ;;  %v2726_v3 = vcombine.high %v76_v58, %v80_v59  ;;  %v134_v58 = vld [vmem:[%s4251_s0 + $0x3d0] sm:$0xff] }
  0x51   :  { %1613 = vmatmul.mubr.bf16.gmra.mrb[8].mxu1 %v2677_v4  ;;  %2196 = vmatprep.subr.bf16.mxu0 %v3279_v0  ;;  %v2730_v4 = vcombine.high %v78_v61, %v82_v62  ;;  %v138_v59 = vld [vmem:[%s4251_s0 + $0x3f0] sm:$0xff] }
  0x52   :  { %2029 = vmatmul.mubr.bf16.gmra.mrb[8].mxu0 %v2681_v5  ;;  %1620 = vmatprep.mubr.bf16.mxu1 %v2686_v6  ;;  %v3267_v5 = vld [vmem:[%s4250_s1 + $0xf0] sm:$0xff]  }
  0x53   :  { %2036 = vmatprep.mubr.bf16.mxu0 %v2690_v7  ;;  %1781 = vmatpush1.bf16.msra.mxu1 %v3247_v8  ;;  %v3268_v6 = vld [vmem:[%s4250_s1 + $0x1f0] sm:$0xff]   ;;  %v84_v7 = vld [vmem:[%s4251_s0 + $0x240] sm:$0xff] }
  0x54   :  { %2197 = vmatpush1.bf16.msra.mxu0 %v3248_v9  ;;  %1782 = vmatprep.subr.bf16.mxu1 %v3279_v0  ;;  %v88_v8 = vld [vmem:[%s4251_s0 + $0x260] sm:$0xff]  ;;  %v3269_v9 = vld [vmem:[%s4250_s1 + $0xf8] sm:$0xff]  }
  0x55   :  { %2198 = vmatprep.subr.bf16.mxu0 %v3279_v0 }
  0x57   :  { %1783 = vmatpush1.bf16.msra.mxu1 %v3249_v14  ;;  %v2729_v14 = vcombine.low %v78_v61, %v82_v62 }
  0x58   :  { %2199 = vmatpush1.bf16.msra.mxu0 %v3250_v15  ;;  %1784 = vmatprep.subr.bf16.mxu1 %v3279_v0  ;;  %v2734_v15 = vcombine.high %v84_v7, %v88_v8 }
  0x59   :  { %1621 = vmatmul.mubr.bf16.gmra.mrb[12].mxu1 %v2685_v16  ;;  %2200 = vmatprep.subr.bf16.mxu0 %v3279_v0  ;;  %v2738_v16 = vcombine.high %v86_v10, %v90_v11 }
  0x5a   :  { %2037 = vmatmul.mubr.bf16.gmra.mrb[12].mxu0 %v2689_v17  ;;  %1628 = vmatprep.mubr.bf16.mxu1 %v2694_v18  ;;  %v92_v17 = vld [vmem:[%s4251_s0 + $0x280] sm:$0xff] }
  0x5b   :  { %2044 = vmatprep.mubr.bf16.mxu0 %v2698_v21  ;;  %1785 = vmatpush1.bf16.msra.mxu1 %v3251_v19  ;;  %v96_v18 = vld [vmem:[%s4251_s0 + $0x2a0] sm:$0xff]  ;;  %v98_v19 = vld [vmem:[%s4251_s0 + $0x2b0] sm:$0xff]  ;;  %v2737_v21 = vcombine.low %v86_v10, %v90_v11 }
  0x5c   :  { %2201 = vmatpush1.bf16.msra.mxu0 %v3252_v20  ;;  %1786 = vmatprep.subr.bf16.mxu1 %v3279_v0  ;;  %v2733_v20 = vcombine.low %v84_v7, %v88_v8  ;;  %v2742_v22 = vcombine.high %v92_v17, %v96_v18  ;;  %v152_v10 = vld [vmem:[%s4251_s0 + $0x460] sm:$0xff]  ;;  %v150_v11 = vld [vmem:[%s4251_s0 + $0x450] sm:$0xff] }
  0x5d   :  { %2202 = vmatprep.subr.bf16.mxu0 %v3279_v0 }
  0x5f   :  { %1787 = vmatpush1.bf16.msra.mxu1 %v3253_v24  ;;  %v100_v24 = vld [vmem:[%s4251_s0 + $0x2c0] sm:$0xff] }
  0x60   :  { %2203 = vmatpush1.bf16.msra.mxu0 %v3254_v27  ;;  %1788 = vmatprep.subr.bf16.mxu1 %v3279_v0  ;;  %v106_v27 = vld [vmem:[%s4251_s0 + $0x2f0] sm:$0xff] }
  0x61   :  { %1629 = vmatmul.mubr.bf16.gmra.mrb[16].mxu1 %v2693_v28  ;;  %2204 = vmatprep.subr.bf16.mxu0 %v3279_v0  ;;  %v2741_v28 = vcombine.low %v92_v17, %v96_v18  ;;  %v2753_v37 = vcombine.low %v102_v26, %v106_v27  ;;  %v156_v17 = vld [vmem:[%s4251_s0 + $0x480] sm:$0xff] }
  0x62   :  { %2045 = vmatmul.mubr.bf16.gmra.mrb[16].mxu0 %v2697_v29  ;;  %1636 = vmatprep.mubr.bf16.mxu1 %v2702_v30  ;;  %v2750_v30 = vcombine.high %v100_v24, %v104_v25  ;;  %v160_v18 = vld [vmem:[%s4251_s0 + $0x4a0] sm:$0xff] }
  0x63   :  { %2052 = vmatprep.mubr.bf16.mxu0 %v2706_v31  ;;  %1789 = vmatpush1.bf16.msra.mxu1 %v3255_v32  ;;  %v2754_v31 = vcombine.high %v102_v26, %v106_v27  ;;  %v108_v32 = vld [vmem:[%s4251_s0 + $0x300] sm:$0xff]  ;;  %v166_v26 = vld [vmem:[%s4251_s0 + $0x4d0] sm:$0xff] }
  0x64   :  { %2205 = vmatpush1.bf16.msra.mxu0 %v3256_v33  ;;  %1790 = vmatprep.subr.bf16.mxu1 %v3279_v0  ;;  %v112_v33 = vld [vmem:[%s4251_s0 + $0x320] sm:$0xff]  ;;  %v170_v27 = vld [vmem:[%s4251_s0 + $0x4f0] sm:$0xff] }
  0x65   :  { %2206 = vmatprep.subr.bf16.mxu0 %v3279_v0  ;;  %v2758_v38 = vcombine.high %v108_v32, %v112_v33 }
  0x67   :  { %1791 = vmatpush1.bf16.msra.mxu1 %v3257_v36  ;;  %v2749_v36 = vcombine.low %v100_v24, %v104_v25  ;;  %v164_v24 = vld [vmem:[%s4251_s0 + $0x4c0] sm:$0xff] }
  0x68   :  { %2207 = vmatpush1.bf16.msra.mxu0 %v3258_v39  ;;  %1792 = vmatprep.subr.bf16.mxu1 %v3279_v0  ;;  %v2762_v39 = vcombine.high %v110_v34, %v114_v35  ;;  %v168_v25 = vld [vmem:[%s4251_s0 + $0x4e0] sm:$0xff] }
  0x69   :  { %1637 = vmatmul.mubr.bf16.gmra.mrb[20].mxu1 %v2701_v40  ;;  %2208 = vmatprep.subr.bf16.mxu0 %v3279_v0  ;;  %v116_v40 = vld [vmem:[%s4251_s0 + $0x340] sm:$0xff] }
  0x6a   :  { %2053 = vmatmul.mubr.bf16.gmra.mrb[20].mxu0 %v2705_v41  ;;  %1644 = vmatprep.mubr.bf16.mxu1 %v2710_v42  ;;  %v120_v41 = vld [vmem:[%s4251_s0 + $0x360] sm:$0xff]  ;;  %v118_v42 = vld [vmem:[%s4251_s0 + $0x350] sm:$0xff] }
  0x6b   :  { %2060 = vmatprep.mubr.bf16.mxu0 %v2714_v43  ;;  %1793 = vmatpush1.bf16.msra.mxu1 %v3259_v44  ;;  %v122_v43 = vld [vmem:[%s4251_s0 + $0x370] sm:$0xff]  ;;  %v2757_v44 = vcombine.low %v108_v32, %v112_v33  ;;  %v2766_v46 = vcombine.high %v116_v40, %v120_v41  ;;  %v172_v32 = vld [vmem:[%s4251_s0 + $0x500] sm:$0xff] }
  0x6c   :  { %2209 = vmatpush1.bf16.msra.mxu0 %v3260_v45  ;;  %1794 = vmatprep.subr.bf16.mxu1 %v3279_v0  ;;  %v2761_v45 = vcombine.low %v110_v34, %v114_v35  ;;  %v2770_v47 = vcombine.high %v118_v42, %v122_v43  ;;  %v176_v33 = vld [vmem:[%s4251_s0 + $0x520] sm:$0xff]  ;;  %v174_v34 = vld [vmem:[%s4251_s0 + $0x510] sm:$0xff] }
  0x6d   :  { %2210 = vmatprep.subr.bf16.mxu0 %v3279_v0  ;;  %v178_v35 = vld [vmem:[%s4251_s0 + $0x530] sm:$0xff] }
  0x6f   :  { %1795 = vmatpush1.bf16.msra.mxu1 %v3261_v48  ;;  %v124_v48 = vld [vmem:[%s4251_s0 + $0x380] sm:$0xff] }
  0x70   :  { %2211 = vmatpush1.bf16.msra.mxu0 %v3262_v51  ;;  %1796 = vmatprep.subr.bf16.mxu1 %v3279_v0  ;;  %v130_v51 = vld [vmem:[%s4251_s0 + $0x3b0] sm:$0xff] }
  0x71   :  { %1645 = vmatmul.mubr.bf16.gmra.mrb[24].mxu1 %v2709_v52  ;;  %2212 = vmatprep.subr.bf16.mxu0 %v3279_v0  ;;  %v2765_v52 = vcombine.low %v116_v40, %v120_v41  ;;  %v2777_v61 = vcombine.low %v126_v50, %v130_v51  ;;  %v180_v40 = vld [vmem:[%s4251_s0 + $0x540] sm:$0x11]  ;;  %v182_v41 = vld [vmem:[%s4251_s0 + $0x550] sm:$0x11] }
  0x72   :  { %2061 = vmatmul.mubr.bf16.gmra.mrb[24].mxu0 %v2713_v53  ;;  %1652 = vmatprep.mubr.bf16.mxu1 %v2718_v54  ;;  %v2769_v53 = vcombine.low %v118_v42, %v122_v43  ;;  %v2774_v54 = vcombine.high %v124_v48, %v128_v49  ;;  %v2821_v42 = vcombine.low %v172_v32, %v176_v33 }
  0x73   :  { %2068 = vmatprep.mubr.bf16.mxu0 %v2722_v55  ;;  %1797 = vmatpush1.bf16.msra.mxu1 %v3263_v56  ;;  %v2778_v55 = vcombine.high %v126_v50, %v130_v51  ;;  %v132_v56 = vld [vmem:[%s4251_s0 + $0x3c0] sm:$0xff]  ;;  %v2825_v43 = vcombine.low %v174_v34, %v178_v35  ;;  %v2829_v50 = vcombine.low %v180_v40, %v180_v40 }
  0x74   :  { %2213 = vmatpush1.bf16.msra.mxu0 %v3264_v57  ;;  %1798 = vmatprep.subr.bf16.mxu1 %v3279_v0  ;;  %v136_v57 = vld [vmem:[%s4251_s0 + $0x3e0] sm:$0xff]  ;;  %v2833_v51 = vcombine.low %v182_v41, %v182_v41 }
  0x75   :  { %2214 = vmatprep.subr.bf16.mxu0 %v3279_v0  ;;  %v2782_v62 = vcombine.high %v132_v56, %v136_v57 }
  0x77   :  { %1799 = vmatpush1.bf16.msra.mxu1 %v3265_v60  ;;  %v2773_v60 = vcombine.low %v124_v48, %v128_v49  ;;  %v15_v48 = vld [vmem:[%s4251_s0 + $0x18] sm:$0xff] }
  0x78   :  { %2215 = vmatpush1.bf16.msra.mxu0 %v3266_v63  ;;  %1800 = vmatprep.subr.bf16.mxu1 %v3279_v0  ;;  %v2786_v63 = vcombine.high %v134_v58, %v138_v59  ;;  %v19_v49 = vld [vmem:[%s4251_s0 + $0x38] sm:$0xff] }
  0x79   :  { %1653 = vmatmul.mubr.bf16.gmra.mrb[28].mxu1 %v2717_v1  ;;  %2216 = vmatprep.subr.bf16.mxu0 %v3279_v0  ;;  %v140_v1 = vld [vmem:[%s4251_s0 + $0x400] sm:$0xff] }
  0x7a   :  { %2069 = vmatmul.mubr.bf16.gmra.mrb[28].mxu0 %v2721_v2  ;;  %1660 = vmatprep.mubr.bf16.mxu1 %v2726_v3  ;;  %v144_v2 = vld [vmem:[%s4251_s0 + $0x420] sm:$0xff]  ;;  %v142_v3 = vld [vmem:[%s4251_s0 + $0x410] sm:$0xff] }
  0x7b   :  { %2076 = vmatprep.mubr.bf16.mxu0 %v2730_v4  ;;  %1801 = vmatpush1.bf16.msra.mxu1 %v3267_v5  ;;  %v146_v4 = vld [vmem:[%s4251_s0 + $0x430] sm:$0xff]  ;;  %v2781_v5 = vcombine.low %v132_v56, %v136_v57  ;;  %v2790_v7 = vcombine.high %v140_v1, %v144_v2  ;;  %v23_v56 = vld [vmem:[%s4251_s0 + $0x58] sm:$0xff] }
  0x7c   :  { %2217 = vmatpush1.bf16.msra.mxu0 %v3268_v6  ;;  %1802 = vmatprep.subr.bf16.mxu1 %v3279_v0  ;;  %v2785_v6 = vcombine.low %v134_v58, %v138_v59  ;;  %v2794_v8 = vcombine.high %v142_v3, %v146_v4  ;;  %v27_v57 = vld [vmem:[%s4251_s0 + $0x78] sm:$0xff]  ;;  %v2667_v59 = vcombine.low %v15_v48, %v19_v49 }
  0x7d   :  { %2218 = vmatprep.subr.bf16.mxu0 %v3279_v0  ;;  %v94_v0 = vld [vmem:[%s4251_s0 + $0x290] sm:$0xff] }
  0x7e   :  { %v2746_v23 = vcombine.high %v94_v0, %v98_v19  ;;  %v2745_v29 = vcombine.low %v94_v0, %v98_v19  ;;  %v158_v0 = vld [vmem:[%s4251_s0 + $0x490] sm:$0xff] }
  0x7f   :  { %1803 = vmatpush1.bf16.msra.mxu1 %v3269_v9  ;;  %v148_v9 = vld [vmem:[%s4251_s0 + $0x440] sm:$0xff]  ;;  %v162_v19 = vld [vmem:[%s4251_s0 + $0x4b0] sm:$0xff] }
  0x80   :  { %2219 = vmatpush1.bf16.msra.mxu0 %v3270_v12  ;;  %v154_v12 = vld [vmem:[%s4251_s0 + $0x470] sm:$0xff] }
  0x81   :  { %1661 = vmatmul.mubr.bf16.gmra.mrb[32].mxu1 %v2725_v13  ;;  %v2789_v13 = vcombine.low %v140_v1, %v144_v2  ;;  %v31_v1 = vld [vmem:[%s4251_s0 + $0x98] sm:$0xff] }
  0x82   :  { %2077 = vmatmul.mubr.bf16.gmra.mrb[32].mxu0 %v2729_v14  ;;  %1668 = vmatprep.mubr.bf16.mxu1 %v2734_v15  ;;  %v2793_v14 = vcombine.low %v142_v3, %v146_v4  ;;  %v2798_v15 = vcombine.high %v148_v9, %v152_v10  ;;  %v35_v2 = vld [vmem:[%s4251_s0 + $0xb8] sm:$0xff]  ;;  %v2675_v4 = vcombine.low %v23_v56, %v27_v57 }
  0x83   :  { %2084 = vmatprep.mubr.bf16.mxu0 %v2738_v16  ;;  %v2802_v16 = vcombine.high %v150_v11, %v154_v12 }
  0x89   :  { %1669 = vmatmul.mubr.bf16.gmra.mrb[36].mxu1 %v2733_v20  ;;  %v2797_v20 = vcombine.low %v148_v9, %v152_v10  ;;  %v39_v9 = vld [vmem:[%s4251_s0 + $0xd8] sm:$0xff] }
  0x8a   :  { %2085 = vmatmul.mubr.bf16.gmra.mrb[36].mxu0 %v2737_v21  ;;  %1676 = vmatprep.mubr.bf16.mxu1 %v2742_v22  ;;  %v2801_v21 = vcombine.low %v150_v11, %v154_v12  ;;  %v2806_v22 = vcombine.high %v156_v17, %v160_v18  ;;  %v43_v10 = vld [vmem:[%s4251_s0 + $0xf8] sm:$0xff]  ;;  %v2683_v12 = vcombine.low %v31_v1, %v35_v2 }
  0x8b   :  { %2092 = vmatprep.mubr.bf16.mxu0 %v2746_v23  ;;  %v2810_v23 = vcombine.high %v158_v0, %v162_v19 }
  0x91   :  { %1677 = vmatmul.mubr.bf16.gmra.mrb[40].mxu1 %v2741_v28  ;;  %v2805_v28 = vcombine.low %v156_v17, %v160_v18  ;;  %v47_v17 = vld [vmem:[%s4251_s0 + $0x118] sm:$0xff] }
  0x92   :  { %2093 = vmatmul.mubr.bf16.gmra.mrb[40].mxu0 %v2745_v29  ;;  %1684 = vmatprep.mubr.bf16.mxu1 %v2750_v30  ;;  %v2809_v29 = vcombine.low %v158_v0, %v162_v19  ;;  %v2814_v30 = vcombine.high %v164_v24, %v168_v25  ;;  %v51_v18 = vld [vmem:[%s4251_s0 + $0x138] sm:$0xff]  ;;  %v2691_v19 = vcombine.low %v39_v9, %v43_v10 }
  0x93   :  { %2100 = vmatprep.mubr.bf16.mxu0 %v2754_v31  ;;  %v2818_v31 = vcombine.high %v166_v26, %v170_v27 }
  0x99   :  { %1685 = vmatmul.mubr.bf16.gmra.mrb[44].mxu1 %v2749_v36  ;;  %v2813_v36 = vcombine.low %v164_v24, %v168_v25  ;;  %v55_v24 = vld [vmem:[%s4251_s0 + $0x158] sm:$0xff] }
  0x9a   :  { %2101 = vmatmul.mubr.bf16.gmra.mrb[44].mxu0 %v2753_v37  ;;  %1692 = vmatprep.mubr.bf16.mxu1 %v2758_v38  ;;  %v2817_v37 = vcombine.low %v166_v26, %v170_v27  ;;  %v2822_v38 = vcombine.high %v172_v32, %v176_v33  ;;  %v59_v25 = vld [vmem:[%s4251_s0 + $0x178] sm:$0xff]  ;;  %v2699_v27 = vcombine.low %v47_v17, %v51_v18 }
  0x9b   :  { %2108 = vmatprep.mubr.bf16.mxu0 %v2762_v39  ;;  %v2826_v39 = vcombine.high %v174_v34, %v178_v35  ;;  %v63_v32 = vld [vmem:[%s4251_s0 + $0x198] sm:$0xff]  ;;  %v2707_v35 = vcombine.low %v55_v24, %v59_v25 }
  0x9c   :  { %v67_v33 = vld [vmem:[%s4251_s0 + $0x1b8] sm:$0xff] }
  0xa1   :  { %1693 = vmatmul.mubr.bf16.gmra.mrb[48].mxu1 %v2757_v44  ;;  %v2830_v44 = vcombine.high %v180_v40, %v180_v40  ;;  %v71_v40 = vld [vmem:[%s4251_s0 + $0x1d8] sm:$0xff] }
  0xa2   :  { %2109 = vmatmul.mubr.bf16.gmra.mrb[48].mxu0 %v2761_v45  ;;  %1700 = vmatprep.mubr.bf16.mxu1 %v2766_v46  ;;  %v2834_v45 = vcombine.high %v182_v41, %v182_v41  ;;  %v13_v46 = vld [vmem:[%s4251_s0 + $0x8] sm:$0xff]  ;;  %v75_v41 = vld [vmem:[%s4251_s0 + $0x1f8] sm:$0xff] }
  0xa3   :  { %2116 = vmatprep.mubr.bf16.mxu0 %v2770_v47  ;;  %v17_v47 = vld [vmem:[%s4251_s0 + $0x28] sm:$0xff] }
  0xa4   :  { %v2663_v58 = vcombine.low %v13_v46, %v17_v47 }
  0xa9   :  { %1701 = vmatmul.mubr.bf16.gmra.mrb[52].mxu1 %v2765_v52  ;;  %v2664_v52 = vcombine.high %v13_v46, %v17_v47  ;;  %v77_v46 = vld [vmem:[%s4251_s0 + $0x208] sm:$0xff] }
  0xaa   :  { %2117 = vmatmul.mubr.bf16.gmra.mrb[52].mxu0 %v2769_v53  ;;  %1708 = vmatprep.mubr.bf16.mxu1 %v2774_v54  ;;  %v2668_v53 = vcombine.high %v15_v48, %v19_v49  ;;  %v21_v54 = vld [vmem:[%s4251_s0 + $0x48] sm:$0xff]  ;;  %v79_v48 = vld [vmem:[%s4251_s0 + $0x218] sm:$0xff] }
  0xab   :  { %2124 = vmatprep.mubr.bf16.mxu0 %v2778_v55  ;;  %v25_v55 = vld [vmem:[%s4251_s0 + $0x68] sm:$0xff]  ;;  %v83_v49 = vld [vmem:[%s4251_s0 + $0x238] sm:$0xff] }
  0xac   :  { %v2671_v3 = vcombine.low %v21_v54, %v25_v55  ;;  %v81_v47 = vld [vmem:[%s4251_s0 + $0x228] sm:$0xff] }
  0xb1   :  { %1709 = vmatmul.mubr.bf16.gmra.mrb[56].mxu1 %v2773_v60  ;;  %v2672_v60 = vcombine.high %v21_v54, %v25_v55  ;;  %v85_v54 = vld [vmem:[%s4251_s0 + $0x248] sm:$0xff] }
  0xb2   :  { %2125 = vmatmul.mubr.bf16.gmra.mrb[56].mxu0 %v2777_v61  ;;  %1716 = vmatprep.mubr.bf16.mxu1 %v2782_v62  ;;  %v2676_v61 = vcombine.high %v23_v56, %v27_v57  ;;  %v29_v62 = vld [vmem:[%s4251_s0 + $0x88] sm:$0xff]  ;;  %v87_v56 = vld [vmem:[%s4251_s0 + $0x258] sm:$0xff] }
  0xb3   :  { %2132 = vmatprep.mubr.bf16.mxu0 %v2786_v63  ;;  %v33_v63 = vld [vmem:[%s4251_s0 + $0xa8] sm:$0xff]  ;;  %v91_v57 = vld [vmem:[%s4251_s0 + $0x278] sm:$0xff] }
  0xb4   :  { %v2679_v11 = vcombine.low %v29_v62, %v33_v63  ;;  %v89_v55 = vld [vmem:[%s4251_s0 + $0x268] sm:$0xff] }
  0xb9   :  { %1717 = vmatmul.mubr.bf16.gmra.mrb[60].mxu1 %v2781_v5  ;;  %v2680_v5 = vcombine.high %v29_v62, %v33_v63  ;;  %v93_v62 = vld [vmem:[%s4251_s0 + $0x288] sm:$0xff] }
  0xba   :  { %2133 = vmatmul.mubr.bf16.gmra.mrb[60].mxu0 %v2785_v6  ;;  %1724 = vmatprep.mubr.bf16.mxu1 %v2790_v7  ;;  %v2684_v6 = vcombine.high %v31_v1, %v35_v2  ;;  %v37_v7 = vld [vmem:[%s4251_s0 + $0xc8] sm:$0xff]  ;;  %v95_v1 = vld [vmem:[%s4251_s0 + $0x298] sm:$0xff] }
  0xbb   :  { %2140 = vmatprep.mubr.bf16.mxu0 %v2794_v8  ;;  %v41_v8 = vld [vmem:[%s4251_s0 + $0xe8] sm:$0xff]  ;;  %v99_v2 = vld [vmem:[%s4251_s0 + $0x2b8] sm:$0xff] }
  0xbc   :  { %v2687_v0 = vcombine.low %v37_v7, %v41_v8  ;;  %v97_v63 = vld [vmem:[%s4251_s0 + $0x2a8] sm:$0xff] }
  0xc1   :  { %1725 = vmatmul.mubr.bf16.gmra.mrb[64].mxu1 %v2789_v13  ;;  %v2688_v13 = vcombine.high %v37_v7, %v41_v8  ;;  %v101_v7 = vld [vmem:[%s4251_s0 + $0x2c8] sm:$0xff] }
  0xc2   :  { %2141 = vmatmul.mubr.bf16.gmra.mrb[64].mxu0 %v2793_v14  ;;  %1732 = vmatprep.mubr.bf16.mxu1 %v2798_v15  ;;  %v2692_v14 = vcombine.high %v39_v9, %v43_v10  ;;  %v45_v15 = vld [vmem:[%s4251_s0 + $0x108] sm:$0xff]  ;;  %v103_v9 = vld [vmem:[%s4251_s0 + $0x2d8] sm:$0xff] }
  0xc3   :  { %2148 = vmatprep.mubr.bf16.mxu0 %v2802_v16  ;;  %v49_v16 = vld [vmem:[%s4251_s0 + $0x128] sm:$0xff]  ;;  %v107_v10 = vld [vmem:[%s4251_s0 + $0x2f8] sm:$0xff] }
  0xc4   :  { %v2695_v26 = vcombine.low %v45_v15, %v49_v16  ;;  %v105_v8 = vld [vmem:[%s4251_s0 + $0x2e8] sm:$0xff] }
  0xc9   :  { %1733 = vmatmul.mubr.bf16.gmra.mrb[68].mxu1 %v2797_v20  ;;  %v2696_v20 = vcombine.high %v45_v15, %v49_v16  ;;  %v109_v15 = vld [vmem:[%s4251_s0 + $0x308] sm:$0xff] }
  0xca   :  { %2149 = vmatmul.mubr.bf16.gmra.mrb[68].mxu0 %v2801_v21  ;;  %1740 = vmatprep.mubr.bf16.mxu1 %v2806_v22  ;;  %v2700_v21 = vcombine.high %v47_v17, %v51_v18  ;;  %v53_v22 = vld [vmem:[%s4251_s0 + $0x148] sm:$0xff]  ;;  %v111_v17 = vld [vmem:[%s4251_s0 + $0x318] sm:$0xff] }
  0xcb   :  { %2156 = vmatprep.mubr.bf16.mxu0 %v2810_v23  ;;  %v57_v23 = vld [vmem:[%s4251_s0 + $0x168] sm:$0xff]  ;;  %v115_v18 = vld [vmem:[%s4251_s0 + $0x338] sm:$0xff] }
  0xcc   :  { %v2703_v34 = vcombine.low %v53_v22, %v57_v23  ;;  %v113_v16 = vld [vmem:[%s4251_s0 + $0x328] sm:$0xff] }
  0xd1   :  { %1741 = vmatmul.mubr.bf16.gmra.mrb[72].mxu1 %v2805_v28  ;;  %v2704_v28 = vcombine.high %v53_v22, %v57_v23  ;;  %v117_v22 = vld [vmem:[%s4251_s0 + $0x348] sm:$0xff] }
  0xd2   :  { %2157 = vmatmul.mubr.bf16.gmra.mrb[72].mxu0 %v2809_v29  ;;  %1748 = vmatprep.mubr.bf16.mxu1 %v2814_v30  ;;  %v2708_v29 = vcombine.high %v55_v24, %v59_v25  ;;  %v61_v30 = vld [vmem:[%s4251_s0 + $0x188] sm:$0xff]  ;;  %v119_v24 = vld [vmem:[%s4251_s0 + $0x358] sm:$0xff] }
  0xd3   :  { %2164 = vmatprep.mubr.bf16.mxu0 %v2818_v31  ;;  %v65_v31 = vld [vmem:[%s4251_s0 + $0x1a8] sm:$0xff]  ;;  %v123_v25 = vld [vmem:[%s4251_s0 + $0x378] sm:$0xff] }
  0xd4   :  { %v121_v23 = vld [vmem:[%s4251_s0 + $0x368] sm:$0xff] }
  0xd9   :  { %1749 = vmatmul.mubr.bf16.gmra.mrb[76].mxu1 %v2813_v36  ;;  %v2712_v36 = vcombine.high %v61_v30, %v65_v31 }
  0xda   :  { %2165 = vmatmul.mubr.bf16.gmra.mrb[76].mxu0 %v2817_v37  ;;  %1756 = vmatprep.mubr.bf16.mxu1 %v2822_v38  ;;  %v2716_v37 = vcombine.high %v63_v32, %v67_v33  ;;  %v69_v38 = vld [vmem:[%s4251_s0 + $0x1c8] sm:$0xff] }
  0xdb   :  { %2172 = vmatprep.mubr.bf16.mxu0 %v2826_v39  ;;  %v73_v39 = vld [vmem:[%s4251_s0 + $0x1e8] sm:$0xff] }
  0xe1   :  { %1757 = vmatmul.mubr.bf16.gmra.mrb[80].mxu1 %v2821_v42  ;;  %v2711_v42 = vcombine.low %v61_v30, %v65_v31  ;;  %v125_v30 = vld [vmem:[%s4251_s0 + $0x388] sm:$0xff] }
  0xe2   :  { %2173 = vmatmul.mubr.bf16.gmra.mrb[80].mxu0 %v2825_v43  ;;  %1764 = vmatprep.mubr.bf16.mxu1 %v2830_v44  ;;  %v2715_v43 = vcombine.low %v63_v32, %v67_v33  ;;  %v2720_v44 = vcombine.high %v69_v38, %v73_v39  ;;  %v129_v31 = vld [vmem:[%s4251_s0 + $0x3a8] sm:$0xff]  ;;  %v127_v32 = vld [vmem:[%s4251_s0 + $0x398] sm:$0xff] }
  0xe3   :  { %2180 = vmatprep.mubr.bf16.mxu0 %v2834_v45  ;;  %v2724_v45 = vcombine.high %v71_v40, %v75_v41  ;;  %v131_v33 = vld [vmem:[%s4251_s0 + $0x3b8] sm:$0xff] }
  0xe9   :  { %1765 = vmatmul.mubr.bf16.gmra.mrb[84].mxu1 %v2829_v50  ;;  %v2719_v50 = vcombine.low %v69_v38, %v73_v39  ;;  %v133_v38 = vld [vmem:[%s4251_s0 + $0x3c8] sm:$0xff] }
  0xea   :  { %2181 = vmatmul.mubr.bf16.gmra.mrb[84].mxu0 %v2833_v51  ;;  %1804 = vmatprep.mubr.bf16.mxu1 %v2664_v52  ;;  %v2723_v51 = vcombine.low %v71_v40, %v75_v41  ;;  %v2728_v52 = vcombine.high %v77_v46, %v81_v47  ;;  %v137_v39 = vld [vmem:[%s4251_s0 + $0x3e8] sm:$0xff]  ;;  %v135_v40 = vld [vmem:[%s4251_s0 + $0x3d8] sm:$0xff] }
  0xeb   :  { %2220 = vmatprep.mubr.bf16.mxu0 %v2668_v53  ;;  %v2732_v53 = vcombine.high %v79_v48, %v83_v49  ;;  %v139_v41 = vld [vmem:[%s4251_s0 + $0x3f8] sm:$0xff] }
  0xf1   :  { %1805 = vmatmul.mubr.bf16.vlgmr.msra.gmra.mrb[0].mxu1 %v2663_v58  ;;  %v2727_v58 = vcombine.low %v77_v46, %v81_v47  ;;  %v141_v46 = vld [vmem:[%s4251_s0 + $0x408] sm:$0xff] }
  0xf2   :  { %2221 = vmatmul.mubr.bf16.vlgmr.msra.gmra.mrb[0].mxu0 %v2667_v59  ;;  %1812 = vmatprep.mubr.bf16.mxu1 %v2672_v60  ;;  %v2731_v59 = vcombine.low %v79_v48, %v83_v49  ;;  %v2736_v60 = vcombine.high %v85_v54, %v89_v55  ;;  %v145_v47 = vld [vmem:[%s4251_s0 + $0x428] sm:$0xff]  ;;  %v143_v48 = vld [vmem:[%s4251_s0 + $0x418] sm:$0xff] }
  0xf3   :  { %2228 = vmatprep.mubr.bf16.mxu0 %v2676_v61  ;;  %v2740_v61 = vcombine.high %v87_v56, %v91_v57  ;;  %v147_v49 = vld [vmem:[%s4251_s0 + $0x438] sm:$0xff] }
  0xf9   :  { %1813 = vmatmul.mubr.bf16.gmra.mrb[4].mxu1 %v2671_v3  ;;  %v2735_v3 = vcombine.low %v85_v54, %v89_v55  ;;  %v149_v54 = vld [vmem:[%s4251_s0 + $0x448] sm:$0xff] }
  0xfa   :  { %2229 = vmatmul.mubr.bf16.gmra.mrb[4].mxu0 %v2675_v4  ;;  %1820 = vmatprep.mubr.bf16.mxu1 %v2680_v5  ;;  %v2739_v4 = vcombine.low %v87_v56, %v91_v57  ;;  %v2744_v5 = vcombine.high %v93_v62, %v97_v63  ;;  %v153_v55 = vld [vmem:[%s4251_s0 + $0x468] sm:$0xff]  ;;  %v151_v56 = vld [vmem:[%s4251_s0 + $0x458] sm:$0xff] }
  0xfb   :  { %2236 = vmatprep.mubr.bf16.mxu0 %v2684_v6  ;;  %v2748_v6 = vcombine.high %v95_v1, %v99_v2  ;;  %v155_v57 = vld [vmem:[%s4251_s0 + $0x478] sm:$0xff] }
 0x101   :  { %1821 = vmatmul.mubr.bf16.gmra.mrb[8].mxu1 %v2679_v11  ;;  %v2743_v11 = vcombine.low %v93_v62, %v97_v63  ;;  %v157_v62 = vld [vmem:[%s4251_s0 + $0x488] sm:$0xff] }
 0x102   :  { %2237 = vmatmul.mubr.bf16.gmra.mrb[8].mxu0 %v2683_v12  ;;  %1828 = vmatprep.mubr.bf16.mxu1 %v2688_v13  ;;  %v2747_v12 = vcombine.low %v95_v1, %v99_v2  ;;  %v2752_v13 = vcombine.high %v101_v7, %v105_v8  ;;  %v161_v63 = vld [vmem:[%s4251_s0 + $0x4a8] sm:$0xff]  ;;  %v159_v1 = vld [vmem:[%s4251_s0 + $0x498] sm:$0xff] }
 0x103   :  { %2244 = vmatprep.mubr.bf16.mxu0 %v2692_v14  ;;  %v2756_v14 = vcombine.high %v103_v9, %v107_v10  ;;  %v163_v2 = vld [vmem:[%s4251_s0 + $0x4b8] sm:$0xff] }
 0x109   :  { %1829 = vmatmul.mubr.bf16.gmra.mrb[12].mxu1 %v2687_v0  ;;  %v2751_v0 = vcombine.low %v101_v7, %v105_v8  ;;  %v165_v7 = vld [vmem:[%s4251_s0 + $0x4c8] sm:$0xff] }
 0x10a   :  { %2245 = vmatmul.mubr.bf16.gmra.mrb[12].mxu0 %v2691_v19  ;;  %1836 = vmatprep.mubr.bf16.mxu1 %v2696_v20  ;;  %v2755_v19 = vcombine.low %v103_v9, %v107_v10  ;;  %v2760_v20 = vcombine.high %v109_v15, %v113_v16  ;;  %v169_v8 = vld [vmem:[%s4251_s0 + $0x4e8] sm:$0xff]  ;;  %v167_v9 = vld [vmem:[%s4251_s0 + $0x4d8] sm:$0xff] }
 0x10b   :  { %2252 = vmatprep.mubr.bf16.mxu0 %v2700_v21  ;;  %v2764_v21 = vcombine.high %v111_v17, %v115_v18  ;;  %v171_v10 = vld [vmem:[%s4251_s0 + $0x4f8] sm:$0xff] }
 0x111   :  { %1837 = vmatmul.mubr.bf16.gmra.mrb[16].mxu1 %v2695_v26  ;;  %v2759_v26 = vcombine.low %v109_v15, %v113_v16  ;;  %v173_v15 = vld [vmem:[%s4251_s0 + $0x508] sm:$0xff] }
 0x112   :  { %2253 = vmatmul.mubr.bf16.gmra.mrb[16].mxu0 %v2699_v27  ;;  %1844 = vmatprep.mubr.bf16.mxu1 %v2704_v28  ;;  %v2763_v27 = vcombine.low %v111_v17, %v115_v18  ;;  %v2768_v28 = vcombine.high %v117_v22, %v121_v23  ;;  %v177_v16 = vld [vmem:[%s4251_s0 + $0x528] sm:$0xff]  ;;  %v175_v17 = vld [vmem:[%s4251_s0 + $0x518] sm:$0xff] }
 0x113   :  { %2260 = vmatprep.mubr.bf16.mxu0 %v2708_v29  ;;  %v2772_v29 = vcombine.high %v119_v24, %v123_v25  ;;  %v179_v18 = vld [vmem:[%s4251_s0 + $0x538] sm:$0xff] }
 0x119   :  { %1845 = vmatmul.mubr.bf16.gmra.mrb[20].mxu1 %v2703_v34  ;;  %v2767_v34 = vcombine.low %v117_v22, %v121_v23  ;;  %v181_v22 = vld [vmem:[%s4251_s0 + $0x548] sm:$0x11]  ;;  %v183_v23 = vld [vmem:[%s4251_s0 + $0x558] sm:$0x11] }
 0x11a   :  { %2261 = vmatmul.mubr.bf16.gmra.mrb[20].mxu0 %v2707_v35  ;;  %1852 = vmatprep.mubr.bf16.mxu1 %v2712_v36  ;;  %v2771_v35 = vcombine.low %v119_v24, %v123_v25  ;;  %v2776_v36 = vcombine.high %v125_v30, %v129_v31  ;;  %v2823_v24 = vcombine.low %v173_v15, %v177_v16 }
 0x11b   :  { %2268 = vmatprep.mubr.bf16.mxu0 %v2716_v37  ;;  %v2780_v37 = vcombine.high %v127_v32, %v131_v33  ;;  %v2827_v25 = vcombine.low %v175_v17, %v179_v18 }
 0x121   :  { %1853 = vmatmul.mubr.bf16.gmra.mrb[24].mxu1 %v2711_v42  ;;  %v2775_v42 = vcombine.low %v125_v30, %v129_v31 }
 0x122   :  { %2269 = vmatmul.mubr.bf16.gmra.mrb[24].mxu0 %v2715_v43  ;;  %1860 = vmatprep.mubr.bf16.mxu1 %v2720_v44  ;;  %v2779_v43 = vcombine.low %v127_v32, %v131_v33  ;;  %v2784_v44 = vcombine.high %v133_v38, %v137_v39 }
 0x123   :  { %2276 = vmatprep.mubr.bf16.mxu0 %v2724_v45  ;;  %v2788_v45 = vcombine.high %v135_v40, %v139_v41 }
 0x129   :  { %1861 = vmatmul.mubr.bf16.gmra.mrb[28].mxu1 %v2719_v50  ;;  %v2783_v50 = vcombine.low %v133_v38, %v137_v39 }
 0x12a   :  { %2277 = vmatmul.mubr.bf16.gmra.mrb[28].mxu0 %v2723_v51  ;;  %1868 = vmatprep.mubr.bf16.mxu1 %v2728_v52  ;;  %v2787_v51 = vcombine.low %v135_v40, %v139_v41  ;;  %v2792_v52 = vcombine.high %v141_v46, %v145_v47 }
 0x12b   :  { %2284 = vmatprep.mubr.bf16.mxu0 %v2732_v53  ;;  %v2796_v53 = vcombine.high %v143_v48, %v147_v49 }
 0x131   :  { %1869 = vmatmul.mubr.bf16.gmra.mrb[32].mxu1 %v2727_v58  ;;  %v2791_v58 = vcombine.low %v141_v46, %v145_v47 }
 0x132   :  { %2285 = vmatmul.mubr.bf16.gmra.mrb[32].mxu0 %v2731_v59  ;;  %1876 = vmatprep.mubr.bf16.mxu1 %v2736_v60  ;;  %v2795_v59 = vcombine.low %v143_v48, %v147_v49  ;;  %v2800_v60 = vcombine.high %v149_v54, %v153_v55 }
 0x133   :  { %2292 = vmatprep.mubr.bf16.mxu0 %v2740_v61  ;;  %v2804_v61 = vcombine.high %v151_v56, %v155_v57 }
 0x139   :  { %1877 = vmatmul.mubr.bf16.gmra.mrb[36].mxu1 %v2735_v3  ;;  %v2799_v3 = vcombine.low %v149_v54, %v153_v55 }
 0x13a   :  { %2293 = vmatmul.mubr.bf16.gmra.mrb[36].mxu0 %v2739_v4  ;;  %1884 = vmatprep.mubr.bf16.mxu1 %v2744_v5  ;;  %v2803_v4 = vcombine.low %v151_v56, %v155_v57  ;;  %v2808_v5 = vcombine.high %v157_v62, %v161_v63 }
 0x13b   :  { %2300 = vmatprep.mubr.bf16.mxu0 %v2748_v6  ;;  %v2812_v6 = vcombine.high %v159_v1, %v163_v2 }
 0x141   :  { %1885 = vmatmul.mubr.bf16.gmra.mrb[40].mxu1 %v2743_v11  ;;  %v2807_v11 = vcombine.low %v157_v62, %v161_v63 }
 0x142   :  { %2301 = vmatmul.mubr.bf16.gmra.mrb[40].mxu0 %v2747_v12  ;;  %1892 = vmatprep.mubr.bf16.mxu1 %v2752_v13  ;;  %v2811_v12 = vcombine.low %v159_v1, %v163_v2  ;;  %v2816_v13 = vcombine.high %v165_v7, %v169_v8 }
 0x143   :  { %2308 = vmatprep.mubr.bf16.mxu0 %v2756_v14  ;;  %v2820_v14 = vcombine.high %v167_v9, %v171_v10 }
 0x149   :  { %1893 = vmatmul.mubr.bf16.gmra.mrb[44].mxu1 %v2751_v0  ;;  %v2815_v0 = vcombine.low %v165_v7, %v169_v8 }
 0x14a   :  { %2309 = vmatmul.mubr.bf16.gmra.mrb[44].mxu0 %v2755_v19  ;;  %1900 = vmatprep.mubr.bf16.mxu1 %v2760_v20  ;;  %v2819_v19 = vcombine.low %v167_v9, %v171_v10  ;;  %v2824_v20 = vcombine.high %v173_v15, %v177_v16 }
 0x14b   :  { %2316 = vmatprep.mubr.bf16.mxu0 %v2764_v21  ;;  %v2828_v21 = vcombine.high %v175_v17, %v179_v18 }
 0x151   :  { %1901 = vmatmul.mubr.bf16.gmra.mrb[48].mxu1 %v2759_v26  ;;  %v2832_v26 = vcombine.high %v181_v22, %v181_v22 }
 0x152   :  { %2317 = vmatmul.mubr.bf16.gmra.mrb[48].mxu0 %v2763_v27  ;;  %1908 = vmatprep.mubr.bf16.mxu1 %v2768_v28  ;;  %v2836_v27 = vcombine.high %v183_v23, %v183_v23  ;;  %v2831_v28 = vcombine.low %v181_v22, %v181_v22 }
 0x153   :  { %2324 = vmatprep.mubr.bf16.mxu0 %v2772_v29  ;;  %v2835_v29 = vcombine.low %v183_v23, %v183_v23 }
 0x159   :  { %1909 = vmatmul.mubr.bf16.gmra.mrb[52].mxu1 %v2767_v34 }
 0x15a   :  { %2325 = vmatmul.mubr.bf16.gmra.mrb[52].mxu0 %v2771_v35  ;;  %1916 = vmatprep.mubr.bf16.mxu1 %v2776_v36 }
 0x15b   :  { %2332 = vmatprep.mubr.bf16.mxu0 %v2780_v37 }
 0x161   :  { %1917 = vmatmul.mubr.bf16.gmra.mrb[56].mxu1 %v2775_v42 }
 0x162   :  { %2333 = vmatmul.mubr.bf16.gmra.mrb[56].mxu0 %v2779_v43  ;;  %1924 = vmatprep.mubr.bf16.mxu1 %v2784_v44 }
 0x163   :  { %2340 = vmatprep.mubr.bf16.mxu0 %v2788_v45 }
 0x169   :  { %1925 = vmatmul.mubr.bf16.gmra.mrb[60].mxu1 %v2783_v50 }
 0x16a   :  { %2341 = vmatmul.mubr.bf16.gmra.mrb[60].mxu0 %v2787_v51  ;;  %1932 = vmatprep.mubr.bf16.mxu1 %v2792_v52 }
 0x16b   :  { %2348 = vmatprep.mubr.bf16.mxu0 %v2796_v53 }
 0x171   :  { %1933 = vmatmul.mubr.bf16.gmra.mrb[64].mxu1 %v2791_v58 }
 0x172   :  { %2349 = vmatmul.mubr.bf16.gmra.mrb[64].mxu0 %v2795_v59  ;;  %1940 = vmatprep.mubr.bf16.mxu1 %v2800_v60 }
 0x173   :  { %2356 = vmatprep.mubr.bf16.mxu0 %v2804_v61 }
 0x179   :  { %1941 = vmatmul.mubr.bf16.gmra.mrb[68].mxu1 %v2799_v3 }
 0x17a   :  { %2357 = vmatmul.mubr.bf16.gmra.mrb[68].mxu0 %v2803_v4  ;;  %1948 = vmatprep.mubr.bf16.mxu1 %v2808_v5 }
 0x17b   :  { %2364 = vmatprep.mubr.bf16.mxu0 %v2812_v6 }
 0x181   :  { %1949 = vmatmul.mubr.bf16.gmra.mrb[72].mxu1 %v2807_v11 }
 0x182   :  { %2365 = vmatmul.mubr.bf16.gmra.mrb[72].mxu0 %v2811_v12  ;;  %1956 = vmatprep.mubr.bf16.mxu1 %v2816_v13 }
 0x183   :  { %2372 = vmatprep.mubr.bf16.mxu0 %v2820_v14 }
 0x189   :  { %1957 = vmatmul.mubr.bf16.gmra.mrb[76].mxu1 %v2815_v0 }
 0x18a   :  { %2373 = vmatmul.mubr.bf16.gmra.mrb[76].mxu0 %v2819_v19  ;;  %1964 = vmatprep.mubr.bf16.mxu1 %v2824_v20 }
 0x18b   :  { %2380 = vmatprep.mubr.bf16.mxu0 %v2828_v21 }
 0x191   :  { %1965 = vmatmul.mubr.bf16.gmra.mrb[80].mxu1 %v2823_v24 }
 0x192   :  { %2381 = vmatmul.mubr.bf16.gmra.mrb[80].mxu0 %v2827_v25  ;;  %1972 = vmatprep.mubr.bf16.mxu1 %v2832_v26 }
 0x193   :  { %2388 = vmatprep.mubr.bf16.mxu0 %v2836_v27 }
 0x199   :  { %1973 = vmatmul.mubr.bf16.gmra.mrb[84].mxu1 %v2831_v28 }
 0x19a   :  { %2389 = vmatmul.mubr.bf16.gmra.mrb[84].mxu0 %v2835_v29 }
 0x1c4   :  { %v1806_v30 = vpop.f32.mrb[0].mxu1 }
 0x1c5   :  { %v2222_v31 = vpop.f32.mrb[0].mxu0  ;;  %v1808_v32 = vpop.f32.mrb[1].mxu1 }
 0x1c6   :  { %v2987_v33 = vadd.f32 %v2222_v31, %v1806_v30  ;;  %v2224_v34 = vpop.f32.mrb[1].mxu0  ;;  %v1809_v35 = vpop.f32.mrb[2].mxu1 }
 0x1c7   :  { %v2225_v36 = vpop.f32.mrb[2].mxu0  ;;  %v1811_v37 = vpop.f32.mrb[3].mxu1 }
 0x1c8   :  { %v2396_v38 = vmax.f32 %v2987_v33, 0.0  ;;  %v2988_v39 = vadd.f32 %v2225_v36, %v1809_v35  ;;  %v2227_v40 = vpop.f32.mrb[3].mxu0 }
 0x1ca   :  { %v2944_v41 = vpack.c.bf16 %v2396_v38, %v2396_v38  ;;  %v2397_v42 = vmax.f32 %v2988_v39, 0.0 }
 0x1cc   :  { %2613 = vst.msk [vmem:[%s4252_s2] sm:$0xf] %vm2612_vm0, %v2944_v41  ;;  %v2945_v43 = vpack.c.bf16 %v2397_v42, %v2397_v42  ;;  %v1814_v44 = vpop.f32.mrb[4].mxu1 }
 0x1cd   :  { %v2230_v45 = vpop.f32.mrb[4].mxu0  ;;  %v1816_v46 = vpop.f32.mrb[5].mxu1 }
 0x1ce   :  { %2614 = vst.msk [vmem:[%s4252_s2 + $0x4] sm:$0xf] %vm2612_vm0, %v2945_v43  ;;  %v2989_v47 = vadd.f32 %v2230_v45, %v1814_v44  ;;  %v2232_v48 = vpop.f32.mrb[5].mxu0  ;;  %v1817_v49 = vpop.f32.mrb[6].mxu1 }
 0x1cf   :  { %v2233_v50 = vpop.f32.mrb[6].mxu0  ;;  %v1819_v51 = vpop.f32.mrb[7].mxu1 }
 0x1d0   :  { %v2398_v52 = vmax.f32 %v2989_v47, 0.0  ;;  %v2990_v53 = vadd.f32 %v2233_v50, %v1817_v49  ;;  %v2235_v54 = vpop.f32.mrb[7].mxu0 }
 0x1d2   :  { %v2946_v55 = vpack.c.bf16 %v2398_v52, %v2398_v52  ;;  %v2399_v56 = vmax.f32 %v2990_v53, 0.0 }
 0x1d4   :  { %2615 = vst.msk [vmem:[%s4252_s2 + $0x8] sm:$0xf] %vm2612_vm0, %v2946_v55  ;;  %v2947_v57 = vpack.c.bf16 %v2399_v56, %v2399_v56  ;;  %v1822_v58 = vpop.f32.mrb[8].mxu1 }
 0x1d5   :  { %v2238_v59 = vpop.f32.mrb[8].mxu0  ;;  %v1824_v60 = vpop.f32.mrb[9].mxu1 }
 0x1d6   :  { %2616 = vst.msk [vmem:[%s4252_s2 + $0xc] sm:$0xf] %vm2612_vm0, %v2947_v57  ;;  %v2991_v61 = vadd.f32 %v2238_v59, %v1822_v58  ;;  %v2240_v62 = vpop.f32.mrb[9].mxu0  ;;  %v1825_v63 = vpop.f32.mrb[10].mxu1 }
 0x1d7   :  { %v2241_v1 = vpop.f32.mrb[10].mxu0  ;;  %v1827_v2 = vpop.f32.mrb[11].mxu1 }
 0x1d8   :  { %v2400_v3 = vmax.f32 %v2991_v61, 0.0  ;;  %v2992_v4 = vadd.f32 %v2241_v1, %v1825_v63  ;;  %v2243_v5 = vpop.f32.mrb[11].mxu0 }
 0x1da   :  { %v2948_v6 = vpack.c.bf16 %v2400_v3, %v2400_v3  ;;  %v2401_v7 = vmax.f32 %v2992_v4, 0.0 }
 0x1dc   :  { %2617 = vst.msk [vmem:[%s4252_s2 + $0x10] sm:$0xf] %vm2612_vm0, %v2948_v6  ;;  %v2949_v8 = vpack.c.bf16 %v2401_v7, %v2401_v7  ;;  %v1830_v9 = vpop.f32.mrb[12].mxu1 }
 0x1dd   :  { %v2246_v10 = vpop.f32.mrb[12].mxu0  ;;  %v1832_v11 = vpop.f32.mrb[13].mxu1 }
 0x1de   :  { %2618 = vst.msk [vmem:[%s4252_s2 + $0x14] sm:$0xf] %vm2612_vm0, %v2949_v8  ;;  %v2993_v12 = vadd.f32 %v2246_v10, %v1830_v9  ;;  %v2248_v13 = vpop.f32.mrb[13].mxu0  ;;  %v1833_v14 = vpop.f32.mrb[14].mxu1 }
 0x1df   :  { %v2249_v15 = vpop.f32.mrb[14].mxu0  ;;  %v1835_v16 = vpop.f32.mrb[15].mxu1 }
 0x1e0   :  { %v2402_v17 = vmax.f32 %v2993_v12, 0.0  ;;  %v2994_v18 = vadd.f32 %v2249_v15, %v1833_v14  ;;  %v2251_v0 = vpop.f32.mrb[15].mxu0 }
 0x1e2   :  { %v2950_v19 = vpack.c.bf16 %v2402_v17, %v2402_v17  ;;  %v2403_v20 = vmax.f32 %v2994_v18, 0.0 }
 0x1e4   :  { %2619 = vst.msk [vmem:[%s4252_s2 + $0x18] sm:$0xf] %vm2612_vm0, %v2950_v19  ;;  %v2951_v21 = vpack.c.bf16 %v2403_v20, %v2403_v20  ;;  %v1838_v22 = vpop.f32.mrb[16].mxu1 }
 0x1e5   :  { %v2254_v23 = vpop.f32.mrb[16].mxu0  ;;  %v1840_v24 = vpop.f32.mrb[17].mxu1 }
 0x1e6   :  { %2620 = vst.msk [vmem:[%s4252_s2 + $0x1c] sm:$0xf] %vm2612_vm0, %v2951_v21  ;;  %v2995_v25 = vadd.f32 %v2254_v23, %v1838_v22  ;;  %v2256_v26 = vpop.f32.mrb[17].mxu0  ;;  %v1841_v27 = vpop.f32.mrb[18].mxu1 }
 0x1e7   :  { %v2257_v28 = vpop.f32.mrb[18].mxu0  ;;  %v1843_v29 = vpop.f32.mrb[19].mxu1 }
 0x1e8   :  { %v2404_v30 = vmax.f32 %v2995_v25, 0.0  ;;  %v2996_v31 = vadd.f32 %v2257_v28, %v1841_v27  ;;  %v2259_v32 = vpop.f32.mrb[19].mxu0 }
 0x1ea   :  { %v2952_v33 = vpack.c.bf16 %v2404_v30, %v2404_v30  ;;  %v2405_v34 = vmax.f32 %v2996_v31, 0.0 }
 0x1ec   :  { %2621 = vst.msk [vmem:[%s4252_s2 + $0x20] sm:$0xf] %vm2612_vm0, %v2952_v33  ;;  %v2953_v35 = vpack.c.bf16 %v2405_v34, %v2405_v34  ;;  %v1846_v36 = vpop.f32.mrb[20].mxu1 }
 0x1ed   :  { %v2262_v37 = vpop.f32.mrb[20].mxu0  ;;  %v1848_v38 = vpop.f32.mrb[21].mxu1 }
 0x1ee   :  { %2622 = vst.msk [vmem:[%s4252_s2 + $0x24] sm:$0xf] %vm2612_vm0, %v2953_v35  ;;  %v2997_v39 = vadd.f32 %v2262_v37, %v1846_v36  ;;  %v2264_v40 = vpop.f32.mrb[21].mxu0  ;;  %v1849_v41 = vpop.f32.mrb[22].mxu1 }
 0x1ef   :  { %v2265_v42 = vpop.f32.mrb[22].mxu0  ;;  %v1851_v43 = vpop.f32.mrb[23].mxu1 }
 0x1f0   :  { %v2406_v44 = vmax.f32 %v2997_v39, 0.0  ;;  %v2998_v45 = vadd.f32 %v2265_v42, %v1849_v41  ;;  %v2267_v46 = vpop.f32.mrb[23].mxu0 }
 0x1f2   :  { %v2954_v47 = vpack.c.bf16 %v2406_v44, %v2406_v44  ;;  %v2407_v48 = vmax.f32 %v2998_v45, 0.0 }
 0x1f4   :  { %2623 = vst.msk [vmem:[%s4252_s2 + $0x28] sm:$0xf] %vm2612_vm0, %v2954_v47  ;;  %v2955_v49 = vpack.c.bf16 %v2407_v48, %v2407_v48  ;;  %v1854_v50 = vpop.f32.mrb[24].mxu1 }
 0x1f5   :  { %v2270_v51 = vpop.f32.mrb[24].mxu0  ;;  %v1856_v52 = vpop.f32.mrb[25].mxu1 }
 0x1f6   :  { %2624 = vst.msk [vmem:[%s4252_s2 + $0x2c] sm:$0xf] %vm2612_vm0, %v2955_v49  ;;  %v2999_v53 = vadd.f32 %v2270_v51, %v1854_v50  ;;  %v2272_v54 = vpop.f32.mrb[25].mxu0  ;;  %v1857_v55 = vpop.f32.mrb[26].mxu1 }
 0x1f7   :  { %v2273_v56 = vpop.f32.mrb[26].mxu0  ;;  %v1859_v57 = vpop.f32.mrb[27].mxu1 }
 0x1f8   :  { %v2408_v58 = vmax.f32 %v2999_v53, 0.0  ;;  %v3000_v59 = vadd.f32 %v2273_v56, %v1857_v55  ;;  %v2275_v60 = vpop.f32.mrb[27].mxu0 }
 0x1fa   :  { %v2956_v61 = vpack.c.bf16 %v2408_v58, %v2408_v58  ;;  %v2409_v62 = vmax.f32 %v3000_v59, 0.0 }
 0x1fc   :  { %2625 = vst.msk [vmem:[%s4252_s2 + $0x30] sm:$0xf] %vm2612_vm0, %v2956_v61  ;;  %v2957_v63 = vpack.c.bf16 %v2409_v62, %v2409_v62  ;;  %v1862_v1 = vpop.f32.mrb[28].mxu1 }
 0x1fd   :  { %v2278_v2 = vpop.f32.mrb[28].mxu0  ;;  %v1864_v3 = vpop.f32.mrb[29].mxu1 }
 0x1fe   :  { %2626 = vst.msk [vmem:[%s4252_s2 + $0x34] sm:$0xf] %vm2612_vm0, %v2957_v63  ;;  %v3001_v4 = vadd.f32 %v2278_v2, %v1862_v1  ;;  %v2280_v5 = vpop.f32.mrb[29].mxu0  ;;  %v1865_v6 = vpop.f32.mrb[30].mxu1 }
 0x1ff   :  { %v2281_v7 = vpop.f32.mrb[30].mxu0  ;;  %v1867_v8 = vpop.f32.mrb[31].mxu1 }
 0x200   :  { %v2410_v9 = vmax.f32 %v3001_v4, 0.0  ;;  %v3002_v10 = vadd.f32 %v2281_v7, %v1865_v6  ;;  %v2283_v11 = vpop.f32.mrb[31].mxu0 }
 0x202   :  { %v2958_v12 = vpack.c.bf16 %v2410_v9, %v2410_v9  ;;  %v2411_v13 = vmax.f32 %v3002_v10, 0.0 }
 0x204   :  { %2627 = vst.msk [vmem:[%s4252_s2 + $0x38] sm:$0xf] %vm2612_vm0, %v2958_v12  ;;  %v2959_v14 = vpack.c.bf16 %v2411_v13, %v2411_v13  ;;  %v1870_v15 = vpop.f32.mrb[32].mxu1 }
 0x205   :  { %v2286_v16 = vpop.f32.mrb[32].mxu0  ;;  %v1872_v17 = vpop.f32.mrb[33].mxu1 }
 0x206   :  { %2628 = vst.msk [vmem:[%s4252_s2 + $0x3c] sm:$0xf] %vm2612_vm0, %v2959_v14  ;;  %v3003_v18 = vadd.f32 %v2286_v16, %v1870_v15  ;;  %v2288_v0 = vpop.f32.mrb[33].mxu0  ;;  %v1873_v19 = vpop.f32.mrb[34].mxu1 }
 0x207   :  { %v2289_v20 = vpop.f32.mrb[34].mxu0  ;;  %v1875_v21 = vpop.f32.mrb[35].mxu1 }
 0x208   :  { %v2412_v22 = vmax.f32 %v3003_v18, 0.0  ;;  %v3004_v23 = vadd.f32 %v2289_v20, %v1873_v19  ;;  %v2291_v24 = vpop.f32.mrb[35].mxu0 }
 0x20a   :  { %v2960_v25 = vpack.c.bf16 %v2412_v22, %v2412_v22  ;;  %v2413_v26 = vmax.f32 %v3004_v23, 0.0 }
 0x20c   :  { %2629 = vst.msk [vmem:[%s4252_s2 + $0x40] sm:$0xf] %vm2612_vm0, %v2960_v25  ;;  %v2961_v27 = vpack.c.bf16 %v2413_v26, %v2413_v26  ;;  %v1878_v28 = vpop.f32.mrb[36].mxu1 }
 0x20d   :  { %v2294_v29 = vpop.f32.mrb[36].mxu0  ;;  %v1880_v30 = vpop.f32.mrb[37].mxu1 }
 0x20e   :  { %2630 = vst.msk [vmem:[%s4252_s2 + $0x44] sm:$0xf] %vm2612_vm0, %v2961_v27  ;;  %v3005_v31 = vadd.f32 %v2294_v29, %v1878_v28  ;;  %v2296_v32 = vpop.f32.mrb[37].mxu0  ;;  %v1881_v33 = vpop.f32.mrb[38].mxu1 }
 0x20f   :  { %v2297_v34 = vpop.f32.mrb[38].mxu0  ;;  %v1883_v35 = vpop.f32.mrb[39].mxu1 }
 0x210   :  { %v2414_v36 = vmax.f32 %v3005_v31, 0.0  ;;  %v3006_v37 = vadd.f32 %v2297_v34, %v1881_v33  ;;  %v2299_v38 = vpop.f32.mrb[39].mxu0 }
 0x212   :  { %v2962_v39 = vpack.c.bf16 %v2414_v36, %v2414_v36  ;;  %v2415_v40 = vmax.f32 %v3006_v37, 0.0 }
 0x214   :  { %2631 = vst.msk [vmem:[%s4252_s2 + $0x48] sm:$0xf] %vm2612_vm0, %v2962_v39  ;;  %v2963_v41 = vpack.c.bf16 %v2415_v40, %v2415_v40  ;;  %v1886_v42 = vpop.f32.mrb[40].mxu1 }
 0x215   :  { %v2302_v43 = vpop.f32.mrb[40].mxu0  ;;  %v1888_v44 = vpop.f32.mrb[41].mxu1 }
 0x216   :  { %2632 = vst.msk [vmem:[%s4252_s2 + $0x4c] sm:$0xf] %vm2612_vm0, %v2963_v41  ;;  %v3007_v45 = vadd.f32 %v2302_v43, %v1886_v42  ;;  %v2304_v46 = vpop.f32.mrb[41].mxu0  ;;  %v1889_v47 = vpop.f32.mrb[42].mxu1 }
 0x217   :  { %v2305_v48 = vpop.f32.mrb[42].mxu0  ;;  %v1891_v49 = vpop.f32.mrb[43].mxu1 }
 0x218   :  { %v2416_v50 = vmax.f32 %v3007_v45, 0.0  ;;  %v3008_v51 = vadd.f32 %v2305_v48, %v1889_v47  ;;  %v2307_v52 = vpop.f32.mrb[43].mxu0 }
 0x21a   :  { %v2964_v53 = vpack.c.bf16 %v2416_v50, %v2416_v50  ;;  %v2417_v54 = vmax.f32 %v3008_v51, 0.0 }
 0x21c   :  { %2633 = vst.msk [vmem:[%s4252_s2 + $0x50] sm:$0xf] %vm2612_vm0, %v2964_v53  ;;  %v2965_v55 = vpack.c.bf16 %v2417_v54, %v2417_v54  ;;  %v1894_v56 = vpop.f32.mrb[44].mxu1 }
 0x21d   :  { %v2310_v57 = vpop.f32.mrb[44].mxu0  ;;  %v1896_v58 = vpop.f32.mrb[45].mxu1 }
 0x21e   :  { %2634 = vst.msk [vmem:[%s4252_s2 + $0x54] sm:$0xf] %vm2612_vm0, %v2965_v55  ;;  %v3009_v59 = vadd.f32 %v2310_v57, %v1894_v56  ;;  %v2312_v60 = vpop.f32.mrb[45].mxu0  ;;  %v1897_v61 = vpop.f32.mrb[46].mxu1 }
 0x21f   :  { %v2313_v62 = vpop.f32.mrb[46].mxu0  ;;  %v1899_v63 = vpop.f32.mrb[47].mxu1 }
 0x220   :  { %v2418_v1 = vmax.f32 %v3009_v59, 0.0  ;;  %v3010_v2 = vadd.f32 %v2313_v62, %v1897_v61  ;;  %v2315_v3 = vpop.f32.mrb[47].mxu0 }
 0x222   :  { %v2966_v4 = vpack.c.bf16 %v2418_v1, %v2418_v1  ;;  %v2419_v5 = vmax.f32 %v3010_v2, 0.0 }
 0x224   :  { %2635 = vst.msk [vmem:[%s4252_s2 + $0x58] sm:$0xf] %vm2612_vm0, %v2966_v4  ;;  %v2967_v6 = vpack.c.bf16 %v2419_v5, %v2419_v5  ;;  %v1902_v7 = vpop.f32.mrb[48].mxu1 }
 0x225   :  { %v2318_v8 = vpop.f32.mrb[48].mxu0  ;;  %v1904_v9 = vpop.f32.mrb[49].mxu1 }
 0x226   :  { %2636 = vst.msk [vmem:[%s4252_s2 + $0x5c] sm:$0xf] %vm2612_vm0, %v2967_v6  ;;  %v3011_v10 = vadd.f32 %v2318_v8, %v1902_v7  ;;  %v2320_v11 = vpop.f32.mrb[49].mxu0  ;;  %v1905_v12 = vpop.f32.mrb[50].mxu1 }
 0x227   :  { %v2321_v13 = vpop.f32.mrb[50].mxu0  ;;  %v1907_v14 = vpop.f32.mrb[51].mxu1 }
 0x228   :  { %v2420_v15 = vmax.f32 %v3011_v10, 0.0  ;;  %v3012_v16 = vadd.f32 %v2321_v13, %v1905_v12  ;;  %v2323_v17 = vpop.f32.mrb[51].mxu0 }
 0x22a   :  { %v2968_v18 = vpack.c.bf16 %v2420_v15, %v2420_v15  ;;  %v2421_v0 = vmax.f32 %v3012_v16, 0.0 }
 0x22c   :  { %2637 = vst.msk [vmem:[%s4252_s2 + $0x60] sm:$0xf] %vm2612_vm0, %v2968_v18  ;;  %v2969_v19 = vpack.c.bf16 %v2421_v0, %v2421_v0  ;;  %v1910_v20 = vpop.f32.mrb[52].mxu1 }
 0x22d   :  { %v2326_v21 = vpop.f32.mrb[52].mxu0  ;;  %v1912_v22 = vpop.f32.mrb[53].mxu1 }
 0x22e   :  { %2638 = vst.msk [vmem:[%s4252_s2 + $0x64] sm:$0xf] %vm2612_vm0, %v2969_v19  ;;  %v3013_v23 = vadd.f32 %v2326_v21, %v1910_v20  ;;  %v2328_v24 = vpop.f32.mrb[53].mxu0  ;;  %v1913_v25 = vpop.f32.mrb[54].mxu1 }
 0x22f   :  { %v2329_v26 = vpop.f32.mrb[54].mxu0  ;;  %v1915_v27 = vpop.f32.mrb[55].mxu1 }
 0x230   :  { %v2422_v28 = vmax.f32 %v3013_v23, 0.0  ;;  %v3014_v29 = vadd.f32 %v2329_v26, %v1913_v25  ;;  %v2331_v30 = vpop.f32.mrb[55].mxu0 }
 0x232   :  { %v2970_v31 = vpack.c.bf16 %v2422_v28, %v2422_v28  ;;  %v2423_v32 = vmax.f32 %v3014_v29, 0.0 }
 0x234   :  { %2639 = vst.msk [vmem:[%s4252_s2 + $0x68] sm:$0xf] %vm2612_vm0, %v2970_v31  ;;  %v2971_v33 = vpack.c.bf16 %v2423_v32, %v2423_v32  ;;  %v1918_v34 = vpop.f32.mrb[56].mxu1 }
 0x235   :  { %v2334_v35 = vpop.f32.mrb[56].mxu0  ;;  %v1920_v36 = vpop.f32.mrb[57].mxu1 }
 0x236   :  { %2640 = vst.msk [vmem:[%s4252_s2 + $0x6c] sm:$0xf] %vm2612_vm0, %v2971_v33  ;;  %v3015_v37 = vadd.f32 %v2334_v35, %v1918_v34  ;;  %v2336_v38 = vpop.f32.mrb[57].mxu0  ;;  %v1921_v39 = vpop.f32.mrb[58].mxu1 }
 0x237   :  { %v2337_v40 = vpop.f32.mrb[58].mxu0  ;;  %v1923_v41 = vpop.f32.mrb[59].mxu1 }
 0x238   :  { %v2424_v42 = vmax.f32 %v3015_v37, 0.0  ;;  %v3016_v43 = vadd.f32 %v2337_v40, %v1921_v39  ;;  %v2339_v44 = vpop.f32.mrb[59].mxu0 }
 0x23a   :  { %v2972_v45 = vpack.c.bf16 %v2424_v42, %v2424_v42  ;;  %v2425_v46 = vmax.f32 %v3016_v43, 0.0 }
 0x23c   :  { %2641 = vst.msk [vmem:[%s4252_s2 + $0x70] sm:$0xf] %vm2612_vm0, %v2972_v45  ;;  %v2973_v47 = vpack.c.bf16 %v2425_v46, %v2425_v46  ;;  %v1926_v48 = vpop.f32.mrb[60].mxu1 }
 0x23d   :  { %v2342_v49 = vpop.f32.mrb[60].mxu0  ;;  %v1928_v50 = vpop.f32.mrb[61].mxu1 }
 0x23e   :  { %2642 = vst.msk [vmem:[%s4252_s2 + $0x74] sm:$0xf] %vm2612_vm0, %v2973_v47  ;;  %v3017_v51 = vadd.f32 %v2342_v49, %v1926_v48  ;;  %v2344_v52 = vpop.f32.mrb[61].mxu0  ;;  %v1929_v53 = vpop.f32.mrb[62].mxu1 }
 0x23f   :  { %v2345_v54 = vpop.f32.mrb[62].mxu0  ;;  %v1931_v55 = vpop.f32.mrb[63].mxu1 }
 0x240   :  { %v2426_v56 = vmax.f32 %v3017_v51, 0.0  ;;  %v3018_v57 = vadd.f32 %v2345_v54, %v1929_v53  ;;  %v2347_v58 = vpop.f32.mrb[63].mxu0 }
 0x242   :  { %v2974_v59 = vpack.c.bf16 %v2426_v56, %v2426_v56  ;;  %v2427_v60 = vmax.f32 %v3018_v57, 0.0 }
 0x244   :  { %2643 = vst.msk [vmem:[%s4252_s2 + $0x78] sm:$0xf] %vm2612_vm0, %v2974_v59  ;;  %v2975_v61 = vpack.c.bf16 %v2427_v60, %v2427_v60  ;;  %v1934_v62 = vpop.f32.mrb[64].mxu1 }
 0x245   :  { %v2350_v63 = vpop.f32.mrb[64].mxu0  ;;  %v1936_v1 = vpop.f32.mrb[65].mxu1 }
 0x246   :  { %2644 = vst.msk [vmem:[%s4252_s2 + $0x7c] sm:$0xf] %vm2612_vm0, %v2975_v61  ;;  %v3019_v2 = vadd.f32 %v2350_v63, %v1934_v62  ;;  %v2352_v3 = vpop.f32.mrb[65].mxu0  ;;  %v1937_v4 = vpop.f32.mrb[66].mxu1 }
 0x247   :  { %v2353_v5 = vpop.f32.mrb[66].mxu0  ;;  %v1939_v6 = vpop.f32.mrb[67].mxu1 }
 0x248   :  { %v2428_v7 = vmax.f32 %v3019_v2, 0.0  ;;  %v3020_v8 = vadd.f32 %v2353_v5, %v1937_v4  ;;  %v2355_v9 = vpop.f32.mrb[67].mxu0 }
 0x24a   :  { %v2976_v10 = vpack.c.bf16 %v2428_v7, %v2428_v7  ;;  %v2429_v11 = vmax.f32 %v3020_v8, 0.0 }
 0x24c   :  { %2645 = vst.msk [vmem:[%s4252_s2 + $0x80] sm:$0xf] %vm2612_vm0, %v2976_v10  ;;  %v2977_v12 = vpack.c.bf16 %v2429_v11, %v2429_v11  ;;  %v1942_v13 = vpop.f32.mrb[68].mxu1 }
 0x24d   :  { %v2358_v14 = vpop.f32.mrb[68].mxu0  ;;  %v1944_v15 = vpop.f32.mrb[69].mxu1 }
 0x24e   :  { %2646 = vst.msk [vmem:[%s4252_s2 + $0x84] sm:$0xf] %vm2612_vm0, %v2977_v12  ;;  %v3021_v16 = vadd.f32 %v2358_v14, %v1942_v13  ;;  %v2360_v17 = vpop.f32.mrb[69].mxu0  ;;  %v1945_v18 = vpop.f32.mrb[70].mxu1 }
 0x24f   :  { %v2361_v0 = vpop.f32.mrb[70].mxu0  ;;  %v1947_v19 = vpop.f32.mrb[71].mxu1 }
 0x250   :  { %v2430_v20 = vmax.f32 %v3021_v16, 0.0  ;;  %v3022_v21 = vadd.f32 %v2361_v0, %v1945_v18  ;;  %v2363_v22 = vpop.f32.mrb[71].mxu0 }
 0x252   :  { %v2978_v23 = vpack.c.bf16 %v2430_v20, %v2430_v20  ;;  %v2431_v24 = vmax.f32 %v3022_v21, 0.0 }
 0x254   :  { %2647 = vst.msk [vmem:[%s4252_s2 + $0x88] sm:$0xf] %vm2612_vm0, %v2978_v23  ;;  %v2979_v25 = vpack.c.bf16 %v2431_v24, %v2431_v24  ;;  %v1950_v26 = vpop.f32.mrb[72].mxu1 }
 0x255   :  { %v2366_v27 = vpop.f32.mrb[72].mxu0  ;;  %v1952_v28 = vpop.f32.mrb[73].mxu1 }
 0x256   :  { %2648 = vst.msk [vmem:[%s4252_s2 + $0x8c] sm:$0xf] %vm2612_vm0, %v2979_v25  ;;  %v3023_v29 = vadd.f32 %v2366_v27, %v1950_v26  ;;  %v2368_v30 = vpop.f32.mrb[73].mxu0  ;;  %v1953_v31 = vpop.f32.mrb[74].mxu1 }
 0x257   :  { %v2369_v32 = vpop.f32.mrb[74].mxu0  ;;  %v1955_v33 = vpop.f32.mrb[75].mxu1 }
 0x258   :  { %v2432_v34 = vmax.f32 %v3023_v29, 0.0  ;;  %v3024_v35 = vadd.f32 %v2369_v32, %v1953_v31  ;;  %v2371_v36 = vpop.f32.mrb[75].mxu0 }
 0x25a   :  { %v2980_v37 = vpack.c.bf16 %v2432_v34, %v2432_v34  ;;  %v2433_v38 = vmax.f32 %v3024_v35, 0.0 }
 0x25c   :  { %2649 = vst.msk [vmem:[%s4252_s2 + $0x90] sm:$0xf] %vm2612_vm0, %v2980_v37  ;;  %v2981_v39 = vpack.c.bf16 %v2433_v38, %v2433_v38  ;;  %v1958_v40 = vpop.f32.mrb[76].mxu1 }
 0x25d   :  { %v2374_v41 = vpop.f32.mrb[76].mxu0  ;;  %v1960_v42 = vpop.f32.mrb[77].mxu1 }
 0x25e   :  { %2650 = vst.msk [vmem:[%s4252_s2 + $0x94] sm:$0xf] %vm2612_vm0, %v2981_v39  ;;  %v3025_v43 = vadd.f32 %v2374_v41, %v1958_v40  ;;  %v2376_v44 = vpop.f32.mrb[77].mxu0  ;;  %v1961_v45 = vpop.f32.mrb[78].mxu1 }
 0x25f   :  { %v2377_v46 = vpop.f32.mrb[78].mxu0  ;;  %v1963_v47 = vpop.f32.mrb[79].mxu1 }
 0x260   :  { %v2434_v48 = vmax.f32 %v3025_v43, 0.0  ;;  %v3026_v49 = vadd.f32 %v2377_v46, %v1961_v45  ;;  %v2379_v50 = vpop.f32.mrb[79].mxu0 }
 0x262   :  { %v2982_v51 = vpack.c.bf16 %v2434_v48, %v2434_v48  ;;  %v2435_v52 = vmax.f32 %v3026_v49, 0.0 }
 0x264   :  { %2651 = vst.msk [vmem:[%s4252_s2 + $0x98] sm:$0xf] %vm2612_vm0, %v2982_v51  ;;  %v2983_v53 = vpack.c.bf16 %v2435_v52, %v2435_v52  ;;  %v1966_v54 = vpop.f32.mrb[80].mxu1 }
 0x265   :  { %v2382_v55 = vpop.f32.mrb[80].mxu0  ;;  %v1968_v56 = vpop.f32.mrb[81].mxu1 }
 0x266   :  { %2652 = vst.msk [vmem:[%s4252_s2 + $0x9c] sm:$0xf] %vm2612_vm0, %v2983_v53  ;;  %v3027_v57 = vadd.f32 %v2382_v55, %v1966_v54  ;;  %v2384_v58 = vpop.f32.mrb[81].mxu0  ;;  %v1969_v59 = vpop.f32.mrb[82].mxu1 }
 0x267   :  { %v2385_v60 = vpop.f32.mrb[82].mxu0  ;;  %v1971_v61 = vpop.f32.mrb[83].mxu1 }
 0x268   :  { %v2436_v62 = vmax.f32 %v3027_v57, 0.0  ;;  %v3028_v63 = vadd.f32 %v2385_v60, %v1969_v59  ;;  %v2387_v1 = vpop.f32.mrb[83].mxu0 }
 0x26a   :  { %v2984_v2 = vpack.c.bf16 %v2436_v62, %v2436_v62  ;;  %v2437_v3 = vmax.f32 %v3028_v63, 0.0 }
 0x26c   :  { %2653 = vst.msk [vmem:[%s4252_s2 + $0xa0] sm:$0xf] %vm2612_vm0, %v2984_v2  ;;  %v2985_v4 = vpack.c.bf16 %v2437_v3, %v2437_v3  ;;  %v1974_v5 = vpop.f32.mrb[84].mxu1 }
 0x26d   :  { %v2390_v6 = vpop.f32.mrb[84].mxu0  ;;  %v1976_v7 = vpop.f32.mrb[85].mxu1 }
 0x26e   :  { %2654 = vst.msk [vmem:[%s4252_s2 + $0xa4] sm:$0xf] %vm2612_vm0, %v2985_v4  ;;  %v3029_v8 = vadd.f32 %v2390_v6, %v1974_v5  ;;  %v2392_v9 = vpop.f32.mrb[85].mxu0  ;;  %v1977_v10 = vpop.f32.mrb[86].mxu1 }
 0x26f   :  { %v2393_v11 = vpop.f32.mrb[86].mxu0  ;;  %v1978_v12 = vpop.f32.mrb[87].mxu1 }
 0x270   :  { %v2438_v13 = vmax.f32 %v3029_v8, 0.0  ;;  %v2394_v14 = vpop.f32.mrb[87].mxu0 }
 0x272   :  { %v2986_v15 = vpack.c.bf16 %v2438_v13, %v2438_v13 }
 0x274   :  { %2656 = vst.msk [vmem:[%s4252_s2 + $0xa8] sm:$0x1] %vm2655_vm1, %v2986_v15 }

// kernel: conv_ode_net_forward.5
= control target key start
LH: loop header
LB: loop body
LE: loop exit
PB: predicated region body
PF: predicated region fallthrough
CT: control target
= control target key end

     0   :  { %vm1055_vm0 = vcmask 523264   ;;  %s13485_s0 = inlined_call_operand.vmem [shape: bf16[72,1024], index: 0, kind: input, shape index: {}]   ;;  %s13486_s1 = inlined_call_operand.vmem [shape: bf16[1024,64], index: 1, kind: input, shape index: {}]   ;;  %s13487_s2 = inlined_call_operand.vmem [shape: bf16[9,64,64], index: 2, kind: input, shape index: {}]   ;;  %s13488_s3 = inlined_call_operand.vmem [shape: bf16[9,64,64], index: 3, kind: input, shape index: {}]   ;;  %s13489_s4 = inlined_call_operand.vmem [shape: f32[9,72,64], index: 4, kind: input, shape index: {}]   ;;  %s13490_s5 = inlined_call_operand.vmem [shape: f32[2,72], index: 5, kind: input, shape index: {}]   ;;  %s13491_s6 = inlined_call_operand.vmem [shape: f32[64,10], index: 6, kind: input, shape index: {}]   ;;  %s13492_s7 = inlined_call_operand.vmem [shape: f32[1,10], index: 7, kind: input, shape index: {}]   ;;  %s13493_s8 = inlined_call_operand.hbm [shape: f32[2,10], index: 8, kind: output, shape index: {}]  }
   0x1   :  { %v10275_v0 = vld [vmem:[%s13486_s1 + $0x40] sm:$0xff]   ;;  %v10279_v4 = vld [vmem:[%s13486_s1 + $0x48] sm:$0xff]   ;;  %v10283_v8 = vld [vmem:[%s13486_s1 + $0x50] sm:$0xff]  }
   0x2   :  { %v10276_v1 = vld [vmem:[%s13486_s1 + $0xc0] sm:$0xff]   ;;  %8032 = vmatprep.subr.bf16.mxu0 %v10275_v0  ;;  %v10280_v5 = vld [vmem:[%s13486_s1 + $0xc8] sm:$0xff]   ;;  %v10284_v9 = vld [vmem:[%s13486_s1 + $0xd0] sm:$0xff]  }
   0x3   :  { %v10277_v2 = vld [vmem:[%s13486_s1] sm:$0xff]   ;;  %8078 = vmatprep.subr.bf16.mxu1 %v10276_v1  ;;  %v10281_v6 = vld [vmem:[%s13486_s1 + $0x8] sm:$0xff]   ;;  %v10285_v10 = vld [vmem:[%s13486_s1 + $0x10] sm:$0xff]  }
   0x4   :  { %v10278_v3 = vld [vmem:[%s13486_s1 + $0x80] sm:$0xff]   ;;  %8033 = vmatpush3.bf16.msra.mxu0 %v10277_v2  ;;  %v10282_v7 = vld [vmem:[%s13486_s1 + $0x88] sm:$0xff]   ;;  %v10286_v11 = vld [vmem:[%s13486_s1 + $0x90] sm:$0xff]  }
   0x5   :  { %8079 = vmatpush3.bf16.msra.mxu1 %v10278_v3  ;;  %8034 = vmatprep.subr.bf16.mxu0 %v10279_v4  ;;  %v10287_v12 = vld [vmem:[%s13486_s1 + $0x58] sm:$0xff]   ;;  %v10291_v16 = vld [vmem:[%s13486_s1 + $0x60] sm:$0xff]   ;;  %v10295_v20 = vld [vmem:[%s13486_s1 + $0x68] sm:$0xff]  }
   0x6   :  { %8080 = vmatprep.subr.bf16.mxu1 %v10280_v5  ;;  %v10288_v13 = vld [vmem:[%s13486_s1 + $0xd8] sm:$0xff]   ;;  %v10292_v17 = vld [vmem:[%s13486_s1 + $0xe0] sm:$0xff]   ;;  %v10296_v21 = vld [vmem:[%s13486_s1 + $0xe8] sm:$0xff]  }
   0x7   :  { %v10289_v14 = vld [vmem:[%s13486_s1 + $0x18] sm:$0xff]   ;;  %v10293_v18 = vld [vmem:[%s13486_s1 + $0x20] sm:$0xff]   ;;  %v10297_v22 = vld [vmem:[%s13486_s1 + $0x28] sm:$0xff]  }
   0x8   :  { %8035 = vmatpush3.bf16.msra.mxu0 %v10281_v6  ;;  %v10290_v15 = vld [vmem:[%s13486_s1 + $0x98] sm:$0xff]   ;;  %v10294_v19 = vld [vmem:[%s13486_s1 + $0xa0] sm:$0xff]   ;;  %v10298_v23 = vld [vmem:[%s13486_s1 + $0xa8] sm:$0xff]  }
   0x9   :  { %8081 = vmatpush3.bf16.msra.mxu1 %v10282_v7  ;;  %8036 = vmatprep.subr.bf16.mxu0 %v10283_v8  ;;  %v10299_v24 = vld [vmem:[%s13486_s1 + $0x70] sm:$0xff]   ;;  %v10303_v28 = vld [vmem:[%s13486_s1 + $0x78] sm:$0xff]   ;;  %v31_v32 = vld [vmem:[%s13485_s0] sm:$0xff] }
   0xa   :  { %8082 = vmatprep.subr.bf16.mxu1 %v10284_v9  ;;  %v10300_v25 = vld [vmem:[%s13486_s1 + $0xf0] sm:$0xff]   ;;  %v10304_v29 = vld [vmem:[%s13486_s1 + $0xf8] sm:$0xff]   ;;  %v35_v33 = vld [vmem:[%s13485_s0 + $0x20] sm:$0xff] }
   0xb   :  { %v10301_v26 = vld [vmem:[%s13486_s1 + $0x30] sm:$0xff]   ;;  %v10305_v30 = vld [vmem:[%s13486_s1 + $0x38] sm:$0xff]   ;;  %v32_v34 = vld [vmem:[%s13485_s0 + $0x8] sm:$0xff]  ;;  %v7057_v35 = vcombine.low %v31_v32, %v35_v33  ;;  %v7058_v36 = vcombine.high %v31_v32, %v35_v33 }
   0xc   :  { %8037 = vmatpush3.bf16.msra.mxu0 %v10285_v10  ;;  %v10302_v27 = vld [vmem:[%s13486_s1 + $0xb0] sm:$0xff]   ;;  %v10306_v31 = vld [vmem:[%s13486_s1 + $0xb8] sm:$0xff]   ;;  %v36_v37 = vld [vmem:[%s13485_s0 + $0x28] sm:$0xff] }
   0xd   :  { %8083 = vmatpush3.bf16.msra.mxu1 %v10286_v11  ;;  %8038 = vmatprep.subr.bf16.mxu0 %v10287_v12  ;;  %v39_v38 = vld [vmem:[%s13485_s0 + $0x40] sm:$0xff]  ;;  %v7059_v40 = vcombine.low %v32_v34, %v36_v37  ;;  %v7060_v41 = vcombine.high %v32_v34, %v36_v37  ;;  %v40_v43 = vld [vmem:[%s13485_s0 + $0x48] sm:$0xff]  ;;  %v10315_v62 = vld [vmem:[%s13486_s1 + $0x150] sm:$0xff]  }
   0xe   :  { %8084 = vmatprep.subr.bf16.mxu1 %v10288_v13  ;;  %v43_v39 = vld [vmem:[%s13485_s0 + $0x60] sm:$0xff]  ;;  %v44_v44 = vld [vmem:[%s13485_s0 + $0x68] sm:$0xff]  ;;  %799 = vmatprep.mubr.bf16.mxu0 %v7058_v36  ;;  %v10316_v63 = vld [vmem:[%s13486_s1 + $0x1d0] sm:$0xff]  }
   0xf   :  { %v7066_v42 = vcombine.high %v39_v38, %v43_v39  ;;  %v7068_v45 = vcombine.high %v40_v43, %v44_v44  ;;  %v10307_v46 = vld [vmem:[%s13486_s1 + $0x140] sm:$0xff]   ;;  %871 = vmatprep.mubr.bf16.mxu1 %v7060_v41  ;;  %v10311_v50 = vld [vmem:[%s13486_s1 + $0x148] sm:$0xff]   ;;  %v7065_v51 = vcombine.low %v39_v38, %v43_v39  ;;  %v7067_v53 = vcombine.low %v40_v43, %v44_v44  ;;  %v10317_v0 = vld [vmem:[%s13486_s1 + $0x110] sm:$0xff]  }
  0x10   :  { %8039 = vmatpush3.bf16.msra.mxu0 %v10289_v14  ;;  %v10308_v47 = vld [vmem:[%s13486_s1 + $0x1c0] sm:$0xff]   ;;  %v10312_v52 = vld [vmem:[%s13486_s1 + $0x1c8] sm:$0xff]   ;;  %v10318_v1 = vld [vmem:[%s13486_s1 + $0x190] sm:$0xff]  }
  0x11   :  { %8085 = vmatpush3.bf16.msra.mxu1 %v10290_v15  ;;  %8040 = vmatprep.subr.bf16.mxu0 %v10291_v16  ;;  %v10309_v48 = vld [vmem:[%s13486_s1 + $0x100] sm:$0xff]   ;;  %v10313_v54 = vld [vmem:[%s13486_s1 + $0x108] sm:$0xff]   ;;  %v10319_v3 = vld [vmem:[%s13486_s1 + $0x158] sm:$0xff]  }
  0x12   :  { %8086 = vmatprep.subr.bf16.mxu1 %v10292_v17  ;;  %v10310_v49 = vld [vmem:[%s13486_s1 + $0x180] sm:$0xff]   ;;  %v10314_v55 = vld [vmem:[%s13486_s1 + $0x188] sm:$0xff]   ;;  %v10320_v5 = vld [vmem:[%s13486_s1 + $0x1d8] sm:$0xff]  }
  0x13   :  { %v47_v56 = vld [vmem:[%s13485_s0 + $0x80] sm:$0xff]  ;;  %v48_v58 = vld [vmem:[%s13485_s0 + $0x88] sm:$0xff]  ;;  %v10321_v6 = vld [vmem:[%s13486_s1 + $0x118] sm:$0xff]  }
  0x14   :  { %8041 = vmatpush3.bf16.msra.mxu0 %v10293_v18  ;;  %v51_v57 = vld [vmem:[%s13485_s0 + $0xa0] sm:$0xff]  ;;  %v52_v59 = vld [vmem:[%s13485_s0 + $0xa8] sm:$0xff]  ;;  %v10322_v7 = vld [vmem:[%s13486_s1 + $0x198] sm:$0xff]  }
  0x15   :  { %8087 = vmatpush3.bf16.msra.mxu1 %v10294_v19  ;;  %8042 = vmatprep.subr.bf16.mxu0 %v10295_v20  ;;  %v7074_v60 = vcombine.high %v47_v56, %v51_v57  ;;  %v7076_v61 = vcombine.high %v48_v58, %v52_v59  ;;  %v7073_v2 = vcombine.low %v47_v56, %v51_v57  ;;  %v55_v8 = vld [vmem:[%s13485_s0 + $0xc0] sm:$0xff]  ;;  %v56_v10 = vld [vmem:[%s13485_s0 + $0xc8] sm:$0xff]  ;;  %v10338_v33 = vld [vmem:[%s13486_s1 + $0x1b0] sm:$0xff]  }
  0x16   :  { %8088 = vmatprep.subr.bf16.mxu1 %v10296_v21  ;;  %v7075_v4 = vcombine.low %v48_v58, %v52_v59  ;;  %v59_v9 = vld [vmem:[%s13485_s0 + $0xe0] sm:$0xff]  ;;  %v60_v12 = vld [vmem:[%s13485_s0 + $0xe8] sm:$0xff]  ;;  %v10339_v34 = vld [vmem:[%s13486_s1 + $0x178] sm:$0xff]  }
  0x17   :  { %v7082_v11 = vcombine.high %v55_v8, %v59_v9  ;;  %v7084_v13 = vcombine.high %v56_v10, %v60_v12  ;;  %v10323_v14 = vld [vmem:[%s13486_s1 + $0x160] sm:$0xff]   ;;  %v7081_v16 = vcombine.low %v55_v8, %v59_v9  ;;  %v7083_v18 = vcombine.low %v56_v10, %v60_v12  ;;  %v10327_v20 = vld [vmem:[%s13486_s1 + $0x168] sm:$0xff]   ;;  %v10341_v36 = vld [vmem:[%s13486_s1 + $0x138] sm:$0xff]  }
  0x18   :  { %8043 = vmatpush3.bf16.msra.mxu0 %v10297_v22  ;;  %v10324_v15 = vld [vmem:[%s13486_s1 + $0x1e0] sm:$0xff]   ;;  %v10328_v21 = vld [vmem:[%s13486_s1 + $0x1e8] sm:$0xff]   ;;  %v10342_v37 = vld [vmem:[%s13486_s1 + $0x1b8] sm:$0xff]   ;;  %v10515_v12 = vmov 0.0  }
  0x19   :  { %8089 = vmatpush3.bf16.msra.mxu1 %v10298_v23  ;;  %8044 = vmatprep.subr.bf16.mxu0 %v10299_v24  ;;  %v10325_v17 = vld [vmem:[%s13486_s1 + $0x120] sm:$0xff]   ;;  %v10329_v22 = vld [vmem:[%s13486_s1 + $0x128] sm:$0xff]   ;;  %v33_v38 = vld [vmem:[%s13485_s0 + $0x10] sm:$0xff]  ;;  %1057 = vst.msk [vmem:[#allocation2 + $0x8] sm:$0xff] %vm1055_vm0, %v10515_v12 }
  0x1a   :  { %8090 = vmatprep.subr.bf16.mxu1 %v10300_v25  ;;  %v10326_v19 = vld [vmem:[%s13486_s1 + $0x1a0] sm:$0xff]   ;;  %v10330_v23 = vld [vmem:[%s13486_s1 + $0x1a8] sm:$0xff]   ;;  %v37_v39 = vld [vmem:[%s13485_s0 + $0x30] sm:$0xff]  ;;  %1056 = vst.msk [vmem:[#allocation2] sm:$0xff] %vm1055_vm0, %v10515_v12 }
  0x1b   :  { %v63_v24 = vld [vmem:[%s13485_s0 + $0x100] sm:$0xff]  ;;  %v64_v25 = vld [vmem:[%s13485_s0 + $0x108] sm:$0xff]  ;;  %v7062_v41 = vcombine.high %v33_v38, %v37_v39  ;;  %v41_v43 = vld [vmem:[%s13485_s0 + $0x50] sm:$0xff]  ;;  %1058 = vst.msk [vmem:[#allocation2 + $0x10] sm:$0xff] %vm1055_vm0, %v10515_v12 }
  0x1c   :  { %8045 = vmatpush3.bf16.msra.mxu0 %v10301_v26  ;;  %v7090_v26 = vcombine.high %v63_v24, %v63_v24  ;;  %v7091_v32 = vcombine.low %v64_v25, %v64_v25  ;;  %v45_v44 = vld [vmem:[%s13485_s0 + $0x70] sm:$0xff]  ;;  %1059 = vst.msk [vmem:[#allocation2 + $0x18] sm:$0xff] %vm1055_vm0, %v10515_v12  ;;  %1060 = vst.msk [vmem:[#allocation2 + $0x20] sm:$0xff] %vm1055_vm0, %v10515_v12 }
  0x1d   :  { %8091 = vmatpush3.bf16.msra.mxu1 %v10302_v27  ;;  %8046 = vmatprep.subr.bf16.mxu0 %v10303_v28  ;;  %v7092_v27 = vcombine.high %v64_v25, %v64_v25  ;;  %v10335_v28 = vld [vmem:[%s13486_s1 + $0x170] sm:$0xff]   ;;  %v7069_v56 = vcombine.low %v41_v43, %v45_v44  ;;  %1061 = vst.msk [vmem:[#allocation2 + $0x28] sm:$0xff] %vm1055_vm0, %v10515_v12  ;;  %1062 = vst.msk [vmem:[#allocation2 + $0x30] sm:$0xff] %vm1055_vm0, %v10515_v12 }
  0x1e   :  { %8092 = vmatprep.subr.bf16.mxu1 %v10304_v29  ;;  %v10336_v29 = vld [vmem:[%s13486_s1 + $0x1f0] sm:$0xff]   ;;  %1063 = vst.msk [vmem:[#allocation2 + $0x38] sm:$0xff] %vm1055_vm0, %v10515_v12  ;;  %1064 = vst.msk [vmem:[#allocation2 + $0x40] sm:$0xff] %vm1055_vm0, %v10515_v12 }
  0x1f   :  { %1065 = vst.msk [vmem:[#allocation2 + $0x48] sm:$0xff] %vm1055_vm0, %v10515_v12  ;;  %1066 = vst.msk [vmem:[#allocation2 + $0x50] sm:$0xff] %vm1055_vm0, %v10515_v12 }
  0x20   :  { %8047 = vmatpush3.bf16.msra.mxu0 %v10305_v30  ;;  %v7089_v30 = vcombine.low %v63_v24, %v63_v24 }
  0x21   :  { %8093 = vmatpush3.bf16.msra.mxu1 %v10306_v31  ;;  %8124 = vmatprep.subr.bf16.mxu0 %v10307_v46  ;;  %v10337_v31 = vld [vmem:[%s13486_s1 + $0x130] sm:$0xff]  }
  0x22   :  { %8170 = vmatprep.subr.bf16.mxu1 %v10308_v47  ;;  %v42_v47 = vld [vmem:[%s13485_s0 + $0x58] sm:$0xff] }
  0x23   :  { %800 = vmatmul.mubr.bf16.vlgmr.msra.gmra.mrb[0].mxu0 %v7057_v35  ;;  %v10340_v35 = vld [vmem:[%s13486_s1 + $0x1f8] sm:$0xff]  }
  0x24   :  { %872 = vmatmul.mubr.bf16.vlgmr.msra.gmra.mrb[0].mxu1 %v7059_v40  ;;  %807 = vmatprep.mubr.bf16.mxu0 %v7066_v42  ;;  %v34_v40 = vld [vmem:[%s13485_s0 + $0x18] sm:$0xff] }
  0x25   :  { %879 = vmatprep.mubr.bf16.mxu1 %v7068_v45  ;;  %8125 = vmatpush3.bf16.msra.mxu0 %v10309_v48  ;;  %v38_v42 = vld [vmem:[%s13485_s0 + $0x38] sm:$0xff]  ;;  %v7061_v45 = vcombine.low %v33_v38, %v37_v39 }
  0x26   :  { %8171 = vmatpush3.bf16.msra.mxu1 %v10310_v49  ;;  %8126 = vmatprep.subr.bf16.mxu0 %v10311_v50  ;;  %v7064_v46 = vcombine.high %v34_v40, %v38_v42  ;;  %v46_v48 = vld [vmem:[%s13485_s0 + $0x78] sm:$0xff]  ;;  %v7063_v49 = vcombine.low %v34_v40, %v38_v42  ;;  %v7070_v50 = vcombine.high %v41_v43, %v45_v44 }
  0x27   :  { %8172 = vmatprep.subr.bf16.mxu1 %v10312_v52  ;;  %v49_v52 = vld [vmem:[%s13485_s0 + $0x90] sm:$0xff]  ;;  %v7071_v57 = vcombine.low %v42_v47, %v46_v48 }
  0x29   :  { %8127 = vmatpush3.bf16.msra.mxu0 %v10313_v54  ;;  %v50_v54 = vld [vmem:[%s13485_s0 + $0x98] sm:$0xff] }
  0x2a   :  { %8173 = vmatpush3.bf16.msra.mxu1 %v10314_v55  ;;  %8128 = vmatprep.subr.bf16.mxu0 %v10315_v62  ;;  %v54_v55 = vld [vmem:[%s13485_s0 + $0xb8] sm:$0xff] }
  0x2b   :  { %808 = vmatmul.mubr.bf16.gmra.mrb[4].mxu0 %v7065_v51  ;;  %8174 = vmatprep.subr.bf16.mxu1 %v10316_v63  ;;  %v7072_v51 = vcombine.high %v42_v47, %v46_v48  ;;  %v7080_v59 = vcombine.high %v50_v54, %v54_v55  ;;  %v58_v62 = vld [vmem:[%s13485_s0 + $0xd8] sm:$0xff] }
  0x2c   :  { %880 = vmatmul.mubr.bf16.gmra.mrb[4].mxu1 %v7067_v53  ;;  %815 = vmatprep.mubr.bf16.mxu0 %v7074_v60  ;;  %v53_v53 = vld [vmem:[%s13485_s0 + $0xb0] sm:$0xff]  ;;  %v62_v63 = vld [vmem:[%s13485_s0 + $0xf8] sm:$0xff] }
  0x2d   :  { %887 = vmatprep.mubr.bf16.mxu1 %v7076_v61  ;;  %8129 = vmatpush3.bf16.msra.mxu0 %v10317_v0  ;;  %v7078_v58 = vcombine.high %v49_v52, %v53_v53  ;;  %v57_v60 = vld [vmem:[%s13485_s0 + $0xd0] sm:$0xff]  ;;  %v7077_v0 = vcombine.low %v49_v52, %v53_v53 }
  0x2e   :  { %8175 = vmatpush3.bf16.msra.mxu1 %v10318_v1  ;;  %8130 = vmatprep.subr.bf16.mxu0 %v10319_v3  ;;  %v61_v61 = vld [vmem:[%s13485_s0 + $0xf0] sm:$0xff]  ;;  %v7079_v1 = vcombine.low %v50_v54, %v54_v55  ;;  %v7088_v3 = vcombine.high %v58_v62, %v62_v63 }
  0x2f   :  { %8176 = vmatprep.subr.bf16.mxu1 %v10320_v5  ;;  %v66_v5 = vld [vmem:[%s13485_s0 + $0x118] sm:$0xff] }
  0x30   :  { %v7096_v9 = vcombine.high %v66_v5, %v66_v5 }
  0x31   :  { %8131 = vmatpush3.bf16.msra.mxu0 %v10321_v6  ;;  %v7085_v6 = vcombine.low %v57_v60, %v61_v61 }
  0x32   :  { %8177 = vmatpush3.bf16.msra.mxu1 %v10322_v7  ;;  %8132 = vmatprep.subr.bf16.mxu0 %v10323_v14  ;;  %v7087_v7 = vcombine.low %v58_v62, %v62_v63  ;;  %v10348_v14 = vld [vmem:[%s13487_s2 + $0x28] sm:$0xff]  }
  0x33   :  { %816 = vmatmul.mubr.bf16.gmra.mrb[8].mxu0 %v7073_v2  ;;  %8178 = vmatprep.subr.bf16.mxu1 %v10324_v15  ;;  %v7086_v2 = vcombine.high %v57_v60, %v61_v61  ;;  %v10349_v15 = vld [vmem:[%s13487_s2 + $0x30] sm:$0xff]  }
  0x34   :  { %888 = vmatmul.mubr.bf16.gmra.mrb[8].mxu1 %v7075_v4  ;;  %823 = vmatprep.mubr.bf16.mxu0 %v7082_v11  ;;  %v65_v4 = vld [vmem:[%s13485_s0 + $0x110] sm:$0xff]  ;;  %v7095_v11 = vcombine.low %v66_v5, %v66_v5 }
  0x35   :  { %895 = vmatprep.mubr.bf16.mxu1 %v7084_v13  ;;  %8133 = vmatpush3.bf16.msra.mxu0 %v10325_v17  ;;  %v7094_v8 = vcombine.high %v65_v4, %v65_v4  ;;  %v7093_v10 = vcombine.low %v65_v4, %v65_v4  ;;  %v10347_v13 = vld [vmem:[%s13487_s2 + $0x20] sm:$0xff]  }
  0x36   :  { %8179 = vmatpush3.bf16.msra.mxu1 %v10326_v19  ;;  %8134 = vmatprep.subr.bf16.mxu0 %v10327_v20 }
  0x37   :  { %8180 = vmatprep.subr.bf16.mxu1 %v10328_v21 }
  0x39   :  { %8135 = vmatpush3.bf16.msra.mxu0 %v10329_v22 }
  0x3a   :  { %8181 = vmatpush3.bf16.msra.mxu1 %v10330_v23  ;;  %8136 = vmatprep.subr.bf16.mxu0 %v10335_v28 }
  0x3b   :  { %824 = vmatmul.mubr.bf16.gmra.mrb[12].mxu0 %v7081_v16  ;;  %8182 = vmatprep.subr.bf16.mxu1 %v10336_v29 }
  0x3c   :  { %896 = vmatmul.mubr.bf16.gmra.mrb[12].mxu1 %v7083_v18  ;;  %831 = vmatprep.mubr.bf16.mxu0 %v7090_v26 }
  0x3d   :  { %903 = vmatprep.mubr.bf16.mxu1 %v7092_v27  ;;  %8137 = vmatpush3.bf16.msra.mxu0 %v10337_v31 }
  0x3e   :  { %8183 = vmatpush3.bf16.msra.mxu1 %v10338_v33  ;;  %8138 = vmatprep.subr.bf16.mxu0 %v10339_v34 }
  0x3f   :  { %8184 = vmatprep.subr.bf16.mxu1 %v10340_v35 }
  0x41   :  { %8139 = vmatpush3.bf16.msra.mxu0 %v10341_v36 }
  0x42   :  { %8185 = vmatpush3.bf16.msra.mxu1 %v10342_v37  ;;  %8559 = vmatprep.subr.bf16.mxu0 %v10515_v12 }
  0x43   :  { %832 = vmatmul.mubr.bf16.gmra.mrb[16].mxu0 %v7089_v30  ;;  %8811 = vmatprep.subr.bf16.mxu1 %v10515_v12 }
  0x44   :  { %904 = vmatmul.mubr.bf16.gmra.mrb[16].mxu1 %v7091_v32  ;;  %943 = vmatprep.mubr.bf16.mxu0 %v7062_v41 }
  0x45   :  { %1015 = vmatprep.mubr.bf16.mxu1 %v7064_v46 }
  0x4b   :  { %944 = vmatmul.mubr.bf16.vlgmr.msra.gmra.mrb[20].mxu0 %v7061_v45 }
  0x4c   :  { %1016 = vmatmul.mubr.bf16.vlgmr.msra.gmra.mrb[20].mxu1 %v7063_v49  ;;  %951 = vmatprep.mubr.bf16.mxu0 %v7070_v50 }
  0x4d   :  { %1023 = vmatprep.mubr.bf16.mxu1 %v7072_v51  ;;  %8560 = vmatpush3.bf16.msra.mxu0 %v10347_v13 }
  0x4e   :  { %8561 = vmatprep.subr.bf16.mxu0 %v10515_v12 }
  0x51   :  { %8562 = vmatpush3.bf16.msra.mxu0 %v10348_v14 }
  0x52   :  { %8563 = vmatprep.subr.bf16.mxu0 %v10515_v12 }
  0x53   :  { %952 = vmatmul.mubr.bf16.gmra.mrb[24].mxu0 %v7069_v56 }
  0x54   :  { %1024 = vmatmul.mubr.bf16.gmra.mrb[24].mxu1 %v7071_v57  ;;  %959 = vmatprep.mubr.bf16.mxu0 %v7078_v58 }
  0x55   :  { %1031 = vmatprep.mubr.bf16.mxu1 %v7080_v59 }
  0x5b   :  { %960 = vmatmul.mubr.bf16.gmra.mrb[28].mxu0 %v7077_v0 }
  0x5c   :  { %1032 = vmatmul.mubr.bf16.gmra.mrb[28].mxu1 %v7079_v1  ;;  %967 = vmatprep.mubr.bf16.mxu0 %v7086_v2 }
  0x5d   :  { %1039 = vmatprep.mubr.bf16.mxu1 %v7088_v3 }
  0x63   :  { %968 = vmatmul.mubr.bf16.gmra.mrb[32].mxu0 %v7085_v6 }
  0x64   :  { %1040 = vmatmul.mubr.bf16.gmra.mrb[32].mxu1 %v7087_v7  ;;  %975 = vmatprep.mubr.bf16.mxu0 %v7094_v8 }
  0x65   :  { %1047 = vmatprep.mubr.bf16.mxu1 %v7096_v9 }
  0x6b   :  { %976 = vmatmul.mubr.bf16.gmra.mrb[36].mxu0 %v7093_v10 }
  0x6c   :  { %1048 = vmatmul.mubr.bf16.gmra.mrb[36].mxu1 %v7095_v11 }
  0x6d   :  { %13 = vsyncpa [#allocation4], 0  ;;  %8564 = vmatpush3.bf16.msra.mxu0 %v10349_v15  ;;  %v10350_v16 = vld [vmem:[%s13487_s2 + $0x38] sm:$0xff]   ;;  %vm10516_vm1 = vmmov 0   ;;  %vm6879_vm2 = vcmask 588800   ;;  %s10518_s10 = smov [#allocation3]  }
  0x6e   :  { %8565 = vmatprep.subr.bf16.mxu0 %v10515_v12  ;;  %8567 = vmatprep.mubr.msk.bf16.mxu0 %vm10516_vm1, %v10515_v12  ;;  %s7049_s11 = sshll.u32 %s10518_s10, 4  ;;  %vm7041_vm3 = vcmask 74752   ;;  %s7050_s11 = int_to_ptr.vmem [resolvable:$true] %s7049_s11 }
  0x6f   :  { %8819 = vmatprep.mubr.msk.bf16.mxu1 %vm10516_vm1, %v10515_v12  ;;  %p10496_p1 = scmp.lt.s32.totalorder %s7050_s11, %s7050_s11 }
  0x71   :  { %8566 = vmatpush3.bf16.msra.mxu0 %v10350_v16 }
  0x72   :  { %8587 = vmatprep.subr.bf16.mxu0 %v10515_v12 }
  0xf6   :  { %v8048_v17 = vpop.f32.mrb[0].mxu0 }
  0xf7   :  { %v8094_v18 = vpop.f32.mrb[0].mxu1  ;;  %v8049_v19 = vpop.f32.mrb[1].mxu0 }
  0xf8   :  { %v8050_v20 = vadd.f32 %v8049_v19, %v8048_v17  ;;  %v8095_v21 = vpop.f32.mrb[1].mxu1  ;;  %v8051_v22 = vpop.f32.mrb[2].mxu0 }
  0xf9   :  { %v8096_v23 = vadd.f32 %v8095_v21, %v8094_v18  ;;  %v8097_v24 = vpop.f32.mrb[2].mxu1  ;;  %v8052_v25 = vpop.f32.mrb[3].mxu0 }
  0xfa   :  { %v8053_v26 = vadd.f32 %v8052_v25, %v8051_v22  ;;  %v8098_v27 = vpop.f32.mrb[3].mxu1 }
  0xfb   :  { %v10908_v28 = vadd.f32 %v8096_v23, %v8050_v20  ;;  %v8099_v29 = vadd.f32 %v8098_v27, %v8097_v24 }
  0xfd   :  { %v10910_v30 = vadd.f32 %v8099_v29, %v8053_v26 }
  0xfe   :  { %v8054_v31 = vpop.f32.mrb[4].mxu0 }
  0xff   :  { %v8100_v32 = vpop.f32.mrb[4].mxu1  ;;  %v8055_v33 = vpop.f32.mrb[5].mxu0 }
 0x100   :  { %v8056_v34 = vadd.f32 %v8055_v33, %v8054_v31  ;;  %v8101_v35 = vpop.f32.mrb[5].mxu1  ;;  %v8057_v36 = vpop.f32.mrb[6].mxu0 }
 0x101   :  { %v8102_v37 = vadd.f32 %v8101_v35, %v8100_v32  ;;  %v8103_v38 = vpop.f32.mrb[6].mxu1  ;;  %v8058_v39 = vpop.f32.mrb[7].mxu0 }
 0x102   :  { %v8059_v40 = vadd.f32 %v8058_v39, %v8057_v36  ;;  %v8104_v41 = vpop.f32.mrb[7].mxu1 }
 0x103   :  { %v10912_v42 = vadd.f32 %v8102_v37, %v8056_v34  ;;  %v8105_v43 = vadd.f32 %v8104_v41, %v8103_v38 }
 0x105   :  { %v10914_v44 = vadd.f32 %v8105_v43, %v8059_v40 }
 0x106   :  { %v8060_v45 = vpop.f32.mrb[8].mxu0 }
 0x107   :  { %v8106_v46 = vpop.f32.mrb[8].mxu1  ;;  %v8061_v47 = vpop.f32.mrb[9].mxu0 }
 0x108   :  { %v8062_v48 = vadd.f32 %v8061_v47, %v8060_v45  ;;  %v8107_v49 = vpop.f32.mrb[9].mxu1  ;;  %v8063_v50 = vpop.f32.mrb[10].mxu0 }
 0x109   :  { %v8108_v51 = vadd.f32 %v8107_v49, %v8106_v46  ;;  %v8109_v52 = vpop.f32.mrb[10].mxu1  ;;  %v8064_v53 = vpop.f32.mrb[11].mxu0 }
 0x10a   :  { %v8065_v54 = vadd.f32 %v8064_v53, %v8063_v50  ;;  %v8110_v55 = vpop.f32.mrb[11].mxu1 }
 0x10b   :  { %v10916_v56 = vadd.f32 %v8108_v51, %v8062_v48  ;;  %v8111_v57 = vadd.f32 %v8110_v55, %v8109_v52  ;;  %v7161_v55 = vld [vmem:[%s13489_s4 + $0x48] sm:$0xff] }
 0x10d   :  { %v10918_v58 = vadd.f32 %v8111_v57, %v8065_v54  ;;  %v7162_v57 = vld [vmem:[%s13489_s4 + $0x50] sm:$0xff] }
 0x10e   :  { %v8066_v59 = vpop.f32.mrb[12].mxu0 }
 0x10f   :  { %v8112_v60 = vpop.f32.mrb[12].mxu1  ;;  %v8067_v61 = vpop.f32.mrb[13].mxu0 }
 0x110   :  { %v8068_v62 = vadd.f32 %v8067_v61, %v8066_v59  ;;  %v8113_v63 = vpop.f32.mrb[13].mxu1  ;;  %v8069_v0 = vpop.f32.mrb[14].mxu0 }
 0x111   :  { %v8114_v1 = vadd.f32 %v8113_v63, %v8112_v60  ;;  %v8115_v2 = vpop.f32.mrb[14].mxu1  ;;  %v8070_v3 = vpop.f32.mrb[15].mxu0 }
 0x112   :  { %v8071_v4 = vadd.f32 %v8070_v3, %v8069_v0  ;;  %v8116_v5 = vpop.f32.mrb[15].mxu1 }
 0x113   :  { %v10920_v6 = vadd.f32 %v8114_v1, %v8068_v62  ;;  %v8117_v7 = vadd.f32 %v8116_v5, %v8115_v2 }
 0x115   :  { %v10922_v8 = vadd.f32 %v8117_v7, %v8071_v4  ;;  %v10351_v7 = vld [vmem:[%s13487_s2] sm:$0xff]  }
 0x116   :  { %v8072_v9 = vpop.f32.mrb[16].mxu0 }
 0x117   :  { %v8118_v10 = vpop.f32.mrb[16].mxu1  ;;  %v8073_v11 = vpop.f32.mrb[17].mxu0 }
 0x118   :  { %v8074_v13 = vadd.f32 %v8073_v11, %v8072_v9  ;;  %v8119_v14 = vpop.f32.mrb[17].mxu1  ;;  %v8075_v15 = vpop.f32.mrb[18].mxu0 }
 0x119   :  { %v8120_v16 = vadd.f32 %v8119_v14, %v8118_v10  ;;  %v8121_v17 = vpop.f32.mrb[18].mxu1  ;;  %v8076_v18 = vpop.f32.mrb[19].mxu0 }
 0x11a   :  { %v8122_v19 = vpop.f32.mrb[19].mxu1  ;;  %v7163_v17 = vld [vmem:[%s13489_s4 + $0x58] sm:$0xff] }
 0x11b   :  { %v10924_v20 = vadd.f32 %v8120_v16, %v8074_v13  ;;  %v10352_v19 = vld [vmem:[%s13487_s2 + $0x8] sm:$0xff]  }
 0x11e   :  { %v8140_v21 = vpop.f32.mrb[20].mxu0 }
 0x11f   :  { %v8186_v22 = vpop.f32.mrb[20].mxu1  ;;  %v8141_v23 = vpop.f32.mrb[21].mxu0 }
 0x120   :  { %v8142_v24 = vadd.f32 %v8141_v23, %v8140_v21  ;;  %v8187_v25 = vpop.f32.mrb[21].mxu1  ;;  %v8143_v26 = vpop.f32.mrb[22].mxu0 }
 0x121   :  { %v8188_v27 = vadd.f32 %v8187_v25, %v8186_v22  ;;  %v8189_v29 = vpop.f32.mrb[22].mxu1  ;;  %v8144_v31 = vpop.f32.mrb[23].mxu0 }
 0x122   :  { %v946_v32 = vadd.f32 %v8142_v24, %v10908_v28  ;;  %v8145_v33 = vadd.f32 %v8144_v31, %v8143_v26  ;;  %v8190_v34 = vpop.f32.mrb[23].mxu1 }
 0x123   :  { %v8191_v35 = vadd.f32 %v8190_v34, %v8189_v29 }
 0x124   :  { %v10927_v36 = vadd.f32 %v8188_v27, %v946_v32  ;;  %v949_v37 = vadd.f32 %v8145_v33, %v10910_v30 }
 0x126   :  { %1067 = vst.msk [vmem:[#allocation2 + $0x8] sm:$0xff] %vm1055_vm0, %v10927_v36  ;;  %v10932_v38 = vadd.f32 %v8191_v35, %v949_v37  ;;  %v8146_v39 = vpop.f32.mrb[24].mxu0  ;;  %v10353_v35 = vld [vmem:[%s13487_s2 + $0x10] sm:$0xff]  }
 0x127   :  { %v8192_v40 = vpop.f32.mrb[24].mxu1  ;;  %v8147_v41 = vpop.f32.mrb[25].mxu0 }
 0x128   :  { %1068 = vst.msk [vmem:[#allocation2 + $0x10] sm:$0xff] %vm1055_vm0, %v10932_v38  ;;  %v8148_v43 = vadd.f32 %v8147_v41, %v8146_v39  ;;  %v8193_v28 = vpop.f32.mrb[25].mxu1  ;;  %v8149_v45 = vpop.f32.mrb[26].mxu0 }
 0x129   :  { %v8194_v46 = vadd.f32 %v8193_v28, %v8192_v40  ;;  %v8195_v47 = vpop.f32.mrb[26].mxu1  ;;  %v8150_v48 = vpop.f32.mrb[27].mxu0 }
 0x12a   :  { %v954_v49 = vadd.f32 %v8148_v43, %v10912_v42  ;;  %v8151_v30 = vadd.f32 %v8150_v48, %v8149_v45  ;;  %v8196_v50 = vpop.f32.mrb[27].mxu1  ;;  %v10354_v48 = vld [vmem:[%s13487_s2 + $0x18] sm:$0xff]  }
 0x12b   :  { %v8197_v51 = vadd.f32 %v8196_v50, %v8195_v47  ;;  %v7166_v47 = vld [vmem:[%s13489_s4 + $0x70] sm:$0xff] }
 0x12c   :  { %v10937_v52 = vadd.f32 %v8194_v46, %v954_v49  ;;  %v957_v53 = vadd.f32 %v8151_v30, %v10914_v44  ;;  %v7165_v46 = vld [vmem:[%s13489_s4 + $0x68] sm:$0xff] }
 0x12d   :  { %v1116_v54 = vld [vmem:[#allocation2 + $0x2] sm:$0xff] }
 0x12e   :  { %1069 = vst.msk [vmem:[#allocation2 + $0x18] sm:$0xff] %vm1055_vm0, %v10937_v52  ;;  %v10948_v42 = vadd.f32 %v8197_v51, %v957_v53  ;;  %v8152_v59 = vpop.f32.mrb[28].mxu0  ;;  %v1135_v1 = vmul.f32 %v7161_v55, %v1116_v54 }
 0x12f   :  { %v8198_v60 = vpop.f32.mrb[28].mxu1  ;;  %v8153_v61 = vpop.f32.mrb[29].mxu0  ;;  %v1117_v62 = vld [vmem:[#allocation2 + $0xa] sm:$0xff] }
 0x130   :  { %1070 = vst.msk [vmem:[#allocation2 + $0x20] sm:$0xff] %vm1055_vm0, %v10948_v42  ;;  %v8154_v44 = vadd.f32 %v8153_v61, %v8152_v59  ;;  %v8199_v63 = vpop.f32.mrb[29].mxu1  ;;  %v8155_v0 = vpop.f32.mrb[30].mxu0  ;;  %v1136_v2 = vmul.f32 %v7162_v57, %v1117_v62 }
 0x131   :  { %v8200_v3 = vadd.f32 %v8199_v63, %v8198_v60  ;;  %v8201_v4 = vpop.f32.mrb[30].mxu1  ;;  %v8156_v5 = vpop.f32.mrb[31].mxu0 }
 0x132   :  { %v962_v9 = vadd.f32 %v8154_v44, %v10916_v56  ;;  %v8157_v10 = vadd.f32 %v8156_v5, %v8155_v0  ;;  %v8202_v11 = vpop.f32.mrb[31].mxu1  ;;  %v1144_v13 = vpack.c.bf16 %v1136_v2, %v1135_v1  ;;  %v7164_v56 = vld [vmem:[%s13489_s4 + $0x60] sm:$0xff] }
 0x133   :  { %v8203_v14 = vadd.f32 %v8202_v11, %v8201_v4 }
 0x134   :  { %v10956_v15 = vadd.f32 %v8200_v3, %v962_v9  ;;  %v965_v16 = vadd.f32 %v8157_v10, %v10918_v58  ;;  %8568 = vmatmul.mubr.msk.bf16.vlgmr.msra.gmra.mrb[40].mxu0 %vm1055_vm0, %v1144_v13  ;;  %v7167_v3 = vld [vmem:[%s13489_s4 + $0x78] sm:$0xff]  ;;  %v7169_v10 = vld [vmem:[%s13489_s4 + $0x88] sm:$0xff] }
 0x135   :  { %8571 = vmatprep.mubr.msk.bf16.mxu0 %vm10516_vm1, %v10515_v12  ;;  %v1118_v18 = vld [vmem:[#allocation2 + $0x12] sm:$0xff]  ;;  %8588 = vmatpush3.bf16.msra.mxu0 %v10351_v7 }
 0x136   :  { %1071 = vst.msk [vmem:[#allocation2 + $0x28] sm:$0xff] %vm1055_vm0, %v10956_v15  ;;  %v10973_v58 = vadd.f32 %v8203_v14, %v965_v16  ;;  %v8158_v21 = vpop.f32.mrb[32].mxu0  ;;  %8589 = vmatprep.subr.bf16.mxu0 %v10515_v12  ;;  %v1137_v29 = vmul.f32 %v7163_v17, %v1118_v18  ;;  %v11026_v16 = vld [vmem:[#allocation2 + $0x9] sm:$0xff]  ;;  %v1076_v18 = vld [vmem:[#allocation2 + $0x1] sm:$0xff] }
 0x137   :  { %v8204_v22 = vpop.f32.mrb[32].mxu1  ;;  %v8159_v23 = vpop.f32.mrb[33].mxu0  ;;  %v1119_v24 = vld [vmem:[#allocation2 + $0x1a] sm:$0xff]  ;;  %v1086_v17 = vld [vmem:[%s13489_s4 + $0x8] sm:$0xff] }
 0x138   :  { %1072 = vst.msk [vmem:[#allocation2 + $0x30] sm:$0xff] %vm1055_vm0, %v10973_v58  ;;  %v8160_v25 = vadd.f32 %v8159_v23, %v8158_v21  ;;  %v8205_v26 = vpop.f32.mrb[33].mxu1  ;;  %v8161_v27 = vpop.f32.mrb[34].mxu0  ;;  %v1138_v31 = vmul.f32 %v7164_v56, %v1119_v24  ;;  %v1085_v56 = vld [vmem:[%s13489_s4] sm:$0xff] }
 0x139   :  { %v8206_v32 = vadd.f32 %v8205_v26, %v8204_v22  ;;  %v8207_v33 = vpop.f32.mrb[34].mxu1  ;;  %v8162_v34 = vpop.f32.mrb[35].mxu0  ;;  %8590 = vmatpush3.bf16.msra.mxu0 %v10352_v19  ;;  %v1095_v19 = vmul.f32 %v1086_v17, %v11026_v16  ;;  %v1094_v21 = vmul.f32 %v1085_v56, %v1076_v18  ;;  %v10355_v22 = vld [vmem:[%s13487_s2 + $0x40] sm:$0xff]   ;;  %v11049_v26 = vld [vmem:[#allocation2 + $0x11] sm:$0xff] }
 0x13a   :  { %v970_v37 = vadd.f32 %v8160_v25, %v10920_v6  ;;  %v8163_v39 = vadd.f32 %v8162_v34, %v8161_v27  ;;  %v8208_v40 = vpop.f32.mrb[35].mxu1  ;;  %v1145_v41 = vpack.c.bf16 %v1138_v31, %v1137_v29  ;;  %8591 = vmatprep.subr.bf16.mxu0 %v10515_v12  ;;  %v11041_v24 = vld [vmem:[#allocation2 + $0x19] sm:$0xff]  ;;  %v1087_v27 = vld [vmem:[%s13489_s4 + $0x10] sm:$0xff]  ;;  %v10356_v29 = vld [vmem:[%s13487_s2 + $0x48] sm:$0xff]  }
 0x13b   :  { %v8209_v43 = vadd.f32 %v8208_v40, %v8207_v33  ;;  %v1103_v23 = vpack.c.bf16 %v1095_v19, %v1094_v21  ;;  %v1088_v25 = vld [vmem:[%s13489_s4 + $0x18] sm:$0xff]  ;;  %v10357_v33 = vld [vmem:[%s13487_s2 + $0x50] sm:$0xff]   ;;  %v1089_v40 = vld [vmem:[%s13489_s4 + $0x20] sm:$0xff] }
 0x13c   :  { %v10983_v28 = vadd.f32 %v8206_v32, %v970_v37  ;;  %v973_v45 = vadd.f32 %v8163_v39, %v10922_v8  ;;  %8572 = vmatmul.mubr.msk.bf16.gmra.mrb[44].mxu0 %vm1055_vm0, %v1145_v41  ;;  %v1097_v31 = vmul.f32 %v1088_v25, %v11041_v24  ;;  %v1096_v32 = vmul.f32 %v1087_v27, %v11049_v26  ;;  %v1090_v37 = vld [vmem:[%s13489_s4 + $0x28] sm:$0xff]  ;;  %v10358_v41 = vld [vmem:[%s13487_s2 + $0x58] sm:$0xff]   ;;  %v7200_v56 = vld [vmem:[%s13489_s4 + $0xb0] sm:$0xff] }
 0x13d   :  { %8575 = vmatprep.mubr.msk.bf16.mxu0 %vm10516_vm1, %v10515_v12  ;;  %v1120_v6 = vld [vmem:[#allocation2 + $0x22] sm:$0xff]  ;;  %8592 = vmatpush3.bf16.msra.mxu0 %v10353_v35  ;;  %v7201_v17 = vld [vmem:[%s13489_s4 + $0xb8] sm:$0xff] }
 0x13e   :  { %1073 = vst.msk [vmem:[#allocation2 + $0x38] sm:$0xff] %vm1055_vm0, %v10983_v28  ;;  %v11000_v8 = vadd.f32 %v8209_v43, %v973_v45  ;;  %v8164_v49 = vpop.f32.mrb[36].mxu0  ;;  %8593 = vmatprep.subr.bf16.mxu0 %v10515_v12  ;;  %v1139_v57 = vmul.f32 %v7165_v46, %v1120_v6  ;;  %v1104_v34 = vpack.c.bf16 %v1097_v31, %v1096_v32  ;;  %v11072_v39 = vld [vmem:[#allocation2 + $0x21] sm:$0xff]  ;;  %v10362_v19 = vld [vmem:[%s13487_s2 + $0x78] sm:$0xff]  }
 0x13f   :  { %v8165_v30 = vpop.f32.mrb[37].mxu0  ;;  %v8210_v50 = vpop.f32.mrb[36].mxu1  ;;  %v1121_v51 = vld [vmem:[#allocation2 + $0x2a] sm:$0xff]  ;;  %v1098_v45 = vmul.f32 %v1089_v40, %v11072_v39  ;;  %v7202_v31 = vld [vmem:[%s13489_s4 + $0xc0] sm:$0xff] }
 0x140   :  { %1074 = vst.msk [vmem:[#allocation2 + $0x40] sm:$0xff] %vm1055_vm0, %v11000_v8  ;;  %v8166_v53 = vadd.f32 %v8165_v30, %v8164_v49  ;;  %v8167_v54 = vpop.f32.mrb[38].mxu0  ;;  %v8211_v55 = vpop.f32.mrb[37].mxu1  ;;  %v1140_v59 = vmul.f32 %v7166_v47, %v1121_v51  ;;  %v11064_v35 = vld [vmem:[#allocation2 + $0x29] sm:$0xff]  ;;  %v1092_v47 = vld [vmem:[%s13489_s4 + $0x38] sm:$0xff] }
 0x141   :  { %v8212_v60 = vadd.f32 %v8211_v55, %v8210_v50  ;;  %v8168_v61 = vpop.f32.mrb[39].mxu0  ;;  %v8213_v62 = vpop.f32.mrb[38].mxu1  ;;  %8594 = vmatpush3.bf16.msra.mxu0 %v10354_v48  ;;  %v1099_v43 = vmul.f32 %v1090_v37, %v11064_v35  ;;  %v1091_v49 = vld [vmem:[%s13489_s4 + $0x30] sm:$0xff]  ;;  %v1093_v54 = vld [vmem:[%s13489_s4 + $0x40] sm:$0xff]  ;;  %v7203_v27 = vld [vmem:[%s13489_s4 + $0xc8] sm:$0xff] }
 0x142   :  { %v978_v44 = vadd.f32 %v8166_v53, %v10924_v20  ;;  %v8214_v63 = vpop.f32.mrb[39].mxu1  ;;  %v1146_v0 = vpack.c.bf16 %v1140_v59, %v1139_v57  ;;  %8615 = vmatprep.subr.bf16.mxu0 %v10515_v12  ;;  %v7168_v20 = vld [vmem:[%s13489_s4 + $0x80] sm:$0xff]  ;;  %v1381_v59 = vld [vmem:[#allocation2 + $0xb] sm:$0xff] }
 0x143   :  { %v1105_v46 = vpack.c.bf16 %v1099_v43, %v1098_v45  ;;  %v1380_v61 = vld [vmem:[#allocation2 + $0x3] sm:$0xff]  ;;  %v7196_v62 = vld [vmem:[%s13489_s4 + $0x90] sm:$0xff] }
 0x144   :  { %v11007_v1 = vadd.f32 %v8212_v60, %v978_v44  ;;  %8576 = vmatmul.mubr.msk.bf16.gmra.mrb[48].mxu0 %vm1055_vm0, %v1146_v0  ;;  %v7197_v60 = vld [vmem:[%s13489_s4 + $0x98] sm:$0xff]  ;;  %v1399_v63 = vmul.f32 %v7196_v62, %v1380_v61  ;;  %v10359_v0 = vld [vmem:[%s13487_s2 + $0x60] sm:$0xff]   ;;  %v7204_v40 = vld [vmem:[%s13489_s4 + $0xd0] sm:$0xff] }
 0x145   :  { %8579 = vmatprep.mubr.msk.bf16.mxu0 %vm10516_vm1, %v10515_v12  ;;  %v1122_v2 = vld [vmem:[#allocation2 + $0x32] sm:$0xff]  ;;  %v1400_v44 = vmul.f32 %v7197_v60, %v1381_v59  ;;  %v1384_v18 = vld [vmem:[#allocation2 + $0x23] sm:$0xff] }
 0x146   :  { %1075 = vst.msk [vmem:[#allocation2 + $0x48] sm:$0xff] %vm1055_vm0, %v11007_v1  ;;  %v1141_v5 = vmul.f32 %v7167_v3, %v1122_v2  ;;  %v11092_v48 = vld [vmem:[#allocation2 + $0x31] sm:$0xff]  ;;  %v1383_v3 = vld [vmem:[#allocation2 + $0x1b] sm:$0xff]  ;;  %v7224_v60 = vld [vmem:[%s13489_s4 + $0xe8] sm:$0xff] }
 0x147   :  { %v1123_v4 = vld [vmem:[#allocation2 + $0x3a] sm:$0xff]  ;;  %v1100_v50 = vmul.f32 %v1091_v49, %v11092_v48  ;;  %v1408_v2 = vpack.c.bf16 %v1400_v44, %v1399_v63  ;;  %v11166_v45 = vld [vmem:[#allocation2 + $0xf] sm:$0xff] }
 0x148   :  { %v1142_v7 = vmul.f32 %v7168_v20, %v1123_v4  ;;  %v11084_v6 = vld [vmem:[#allocation2 + $0x39] sm:$0xff]  ;;  %v7199_v20 = vld [vmem:[%s13489_s4 + $0xa8] sm:$0xff]  ;;  %v10365_v63 = vld [vmem:[%s13487_s2 + $0x90] sm:$0xff]  }
 0x149   :  { %v1101_v30 = vmul.f32 %v1092_v47, %v11084_v6  ;;  %v1382_v4 = vld [vmem:[#allocation2 + $0x13] sm:$0xff]  ;;  %v1387_v25 = vld [vmem:[#allocation2 + $0x3b] sm:$0xff]  ;;  %v1542_v47 = vld [vmem:[#allocation2 + $0x7] sm:$0xff] }
 0x14a   :  { %v1147_v9 = vpack.c.bf16 %v1142_v7, %v1141_v5  ;;  %v7198_v5 = vld [vmem:[%s13489_s4 + $0xa0] sm:$0xff]  ;;  %v10360_v7 = vld [vmem:[%s13487_s2 + $0x68] sm:$0xff]   ;;  %v1406_v32 = vmul.f32 %v7203_v27, %v1387_v25  ;;  %v7222_v49 = vld [vmem:[%s13489_s4 + $0xd8] sm:$0xff] }
 0x14b   :  { %v1106_v51 = vpack.c.bf16 %v1101_v30, %v1100_v50  ;;  %v1561_v50 = vmul.f32 %v7222_v49, %v1542_v47  ;;  %v11189_v59 = vld [vmem:[#allocation2 + $0x17] sm:$0xff]  ;;  %v10364_v61 = vld [vmem:[%s13487_s2 + $0x88] sm:$0xff]  }
 0x14c   :  { %8580 = vmatmul.mubr.msk.bf16.gmra.mrb[52].mxu0 %vm1055_vm0, %v1147_v9  ;;  %v1402_v9 = vmul.f32 %v7199_v20, %v1383_v3  ;;  %v1563_v44 = vmul.f32 %v7224_v60, %v11189_v59  ;;  %v7227_v3 = vld [vmem:[%s13489_s4 + $0x100] sm:$0xff]  ;;  %v1705_v27 = vld [vmem:[#allocation2 + $0x10] sm:$0xff]  ;;  %v10368_v49 = vld [vmem:[%s13487_s2 + $0xa8] sm:$0xff]  }
 0x14d   :  { %8583 = vmatprep.mubr.msk.bf16.mxu0 %vm10516_vm1, %v10515_v12  ;;  %v1124_v11 = vld [vmem:[#allocation2 + $0x42] sm:$0xff]  ;;  %v7250_v47 = vld [vmem:[%s13489_s4 + $0x130] sm:$0xff] }
 0x14e   :  { %v1143_v13 = vmul.f32 %v7169_v10, %v1124_v11  ;;  %v11099_v53 = vld [vmem:[#allocation2 + $0x41] sm:$0xff]  ;;  %v1401_v10 = vmul.f32 %v7198_v5, %v1382_v4  ;;  %v10361_v11 = vld [vmem:[%s13487_s2 + $0x70] sm:$0xff]   ;;  %v7226_v4 = vld [vmem:[%s13489_s4 + $0xf8] sm:$0xff] }
 0x14f   :  { %v1102_v55 = vmul.f32 %v1093_v54, %v11099_v53  ;;  %v1388_v37 = vld [vmem:[#allocation2 + $0x43] sm:$0xff]  ;;  %v10366_v5 = vld [vmem:[%s13487_s2 + $0x98] sm:$0xff]  }
 0x150   :  { %v1148_v14 = vpack.c.bf16 %v1143_v13, %v1143_v13  ;;  %v1409_v13 = vpack.c.bf16 %v1402_v9, %v1401_v10  ;;  %v11212_v20 = vld [vmem:[#allocation2 + $0x27] sm:$0xff] }
 0x151   :  { %v1107_v57 = vpack.c.bf16 %v1102_v55, %v1102_v55  ;;  %v11181_v55 = vld [vmem:[#allocation2 + $0x1f] sm:$0xff]  ;;  %v1565_v9 = vmul.f32 %v7226_v4, %v11212_v20  ;;  %v7253_v60 = vld [vmem:[%s13489_s4 + $0x148] sm:$0xff] }
 0x152   :  { %v1711_v4 = vld [vmem:[#allocation2 + $0x40] sm:$0xff] }
 0x154   :  { %8584 = vmatmul.mubr.msk.bf16.gmra.mrb[56].mxu0 %vm1055_vm0, %v1148_v14  ;;  %v1385_v14 = vld [vmem:[#allocation2 + $0x2b] sm:$0xff] }
 0x155   :  { %8595 = vmatprep.mubr.msk.bf16.mxu0 %vm10516_vm1, %v10515_v12  ;;  %v1404_v21 = vmul.f32 %v7201_v17, %v1385_v14  ;;  %v11232_v14 = vld [vmem:[#allocation2 + $0x37] sm:$0xff]  ;;  %v7228_v17 = vld [vmem:[%s13489_s4 + $0x108] sm:$0xff] }
 0x15c   :  { %8596 = vmatmul.mubr.msk.bf16.vlgmr.msra.gmra.mrb[40].mxu0 %vm1055_vm0, %v1103_v23 }
 0x15d   :  { %8599 = vmatprep.mubr.msk.bf16.mxu0 %vm10516_vm1, %v10515_v12  ;;  %8616 = vmatpush3.bf16.msra.mxu0 %v10355_v22  ;;  %v1403_v22 = vmul.f32 %v7200_v56, %v1384_v18  ;;  %v1567_v56 = vmul.f32 %v7228_v17, %v11232_v14 }
 0x15e   :  { %8617 = vmatprep.subr.bf16.mxu0 %v10515_v12 }
 0x15f   :  { %v1410_v23 = vpack.c.bf16 %v1404_v21, %v1403_v22  ;;  %v11239_v21 = vld [vmem:[#allocation2 + $0x47] sm:$0xff]  ;;  %v7230_v22 = vld [vmem:[%s13489_s4 + $0x118] sm:$0xff] }
 0x161   :  { %8618 = vmatpush3.bf16.msra.mxu0 %v10356_v29  ;;  %v1386_v29 = vld [vmem:[#allocation2 + $0x33] sm:$0xff] }
 0x162   :  { %8619 = vmatprep.subr.bf16.mxu0 %v10515_v12 }
 0x164   :  { %8600 = vmatmul.mubr.msk.bf16.gmra.mrb[44].mxu0 %vm1055_vm0, %v1104_v34 }
 0x165   :  { %8603 = vmatprep.mubr.msk.bf16.mxu0 %vm10516_vm1, %v10515_v12  ;;  %8620 = vmatpush3.bf16.msra.mxu0 %v10357_v33  ;;  %v1405_v33 = vmul.f32 %v7202_v31, %v1386_v29  ;;  %v7249_v29 = vld [vmem:[%s13489_s4 + $0x128] sm:$0xff] }
 0x166   :  { %8621 = vmatprep.subr.bf16.mxu0 %v10515_v12  ;;  %v1704_v31 = vld [vmem:[#allocation2 + $0x8] sm:$0xff] }
 0x167   :  { %v1411_v34 = vpack.c.bf16 %v1406_v32, %v1405_v33  ;;  %v7248_v32 = vld [vmem:[%s13489_s4 + $0x120] sm:$0xff]  ;;  %v1724_v33 = vmul.f32 %v7249_v29, %v1705_v27 }
 0x169   :  { %8622 = vmatpush3.bf16.msra.mxu0 %v10358_v41  ;;  %v1407_v41 = vmul.f32 %v7204_v40, %v1388_v37  ;;  %v10367_v37 = vld [vmem:[%s13487_s2 + $0xa0] sm:$0xff]  }
 0x16a   :  { %8643 = vmatprep.subr.bf16.mxu0 %v10515_v12 }
 0x16b   :  { %v1412_v43 = vpack.c.bf16 %v1407_v41, %v1407_v41  ;;  %v1707_v41 = vld [vmem:[#allocation2 + $0x20] sm:$0xff] }
 0x16c   :  { %8604 = vmatmul.mubr.msk.bf16.gmra.mrb[48].mxu0 %vm1055_vm0, %v1105_v46  ;;  %v7223_v46 = vld [vmem:[%s13489_s4 + $0xe0] sm:$0xff] }
 0x16d   :  { %8607 = vmatprep.mubr.msk.bf16.mxu0 %vm10516_vm1, %v10515_v12  ;;  %v1562_v30 = vmul.f32 %v7223_v46, %v11166_v45  ;;  %v1706_v46 = vld [vmem:[#allocation2 + $0x18] sm:$0xff] }
 0x16f   :  { %v1570_v54 = vpack.c.bf16 %v1562_v30, %v1561_v50  ;;  %v1725_v50 = vmul.f32 %v7250_v47, %v1706_v46 }
 0x174   :  { %8608 = vmatmul.mubr.msk.bf16.gmra.mrb[52].mxu0 %vm1055_vm0, %v1106_v51  ;;  %v10363_v51 = vld [vmem:[%s13487_s2 + $0x80] sm:$0xff]  }
 0x175   :  { %8611 = vmatprep.mubr.msk.bf16.mxu0 %vm10516_vm1, %v10515_v12 }
 0x17c   :  { %8612 = vmatmul.mubr.msk.bf16.gmra.mrb[56].mxu0 %vm1055_vm0, %v1107_v57  ;;  %v7225_v57 = vld [vmem:[%s13489_s4 + $0xf0] sm:$0xff] }
 0x17d   :  { %8623 = vmatprep.mubr.msk.bf16.mxu0 %vm10516_vm1, %v10515_v12  ;;  %v1564_v62 = vmul.f32 %v7225_v57, %v11181_v55  ;;  %v1709_v57 = vld [vmem:[#allocation2 + $0x30] sm:$0xff] }
 0x184   :  { %8624 = vmatmul.mubr.msk.bf16.vlgmr.msra.gmra.mrb[40].mxu0 %vm1055_vm0, %v1408_v2  ;;  %v11204_v2 = vld [vmem:[#allocation2 + $0x2f] sm:$0xff] }
 0x185   :  { %8627 = vmatprep.mubr.msk.bf16.mxu0 %vm10516_vm1, %v10515_v12  ;;  %8644 = vmatpush3.bf16.msra.mxu0 %v10359_v0  ;;  %v1571_v0 = vpack.c.bf16 %v1564_v62, %v1563_v44  ;;  %v7252_v62 = vld [vmem:[%s13489_s4 + $0x140] sm:$0xff]  ;;  %v10370_v44 = vld [vmem:[%s13487_s2 + $0xb8] sm:$0xff]  }
 0x186   :  { %8645 = vmatprep.subr.bf16.mxu0 %v10515_v12 }
 0x189   :  { %8646 = vmatpush3.bf16.msra.mxu0 %v10360_v7  ;;  %v1566_v7 = vmul.f32 %v7227_v3, %v11204_v2 }
 0x18a   :  { %8647 = vmatprep.subr.bf16.mxu0 %v10515_v12 }
 0x18b   :  { %v1572_v10 = vpack.c.bf16 %v1566_v7, %v1565_v9  ;;  %v1710_v7 = vld [vmem:[#allocation2 + $0x38] sm:$0xff]  ;;  %v7254_v9 = vld [vmem:[%s13489_s4 + $0x150] sm:$0xff] }
 0x18c   :  { %8628 = vmatmul.mubr.msk.bf16.gmra.mrb[44].mxu0 %vm1055_vm0, %v1409_v13  ;;  %v7229_v13 = vld [vmem:[%s13489_s4 + $0x110] sm:$0xff] }
 0x18d   :  { %8631 = vmatprep.mubr.msk.bf16.mxu0 %vm10516_vm1, %v10515_v12  ;;  %8648 = vmatpush3.bf16.msra.mxu0 %v10361_v11  ;;  %v11224_v11 = vld [vmem:[#allocation2 + $0x3f] sm:$0xff] }
 0x18e   :  { %8649 = vmatprep.subr.bf16.mxu0 %v10515_v12  ;;  %v1568_v18 = vmul.f32 %v7229_v13, %v11224_v11  ;;  %v1729_v13 = vmul.f32 %v7254_v9, %v1710_v7  ;;  %v2031_v9 = vld [vmem:[#allocation2 + $0x25] sm:$0xff] }
 0x191   :  { %8650 = vmatpush3.bf16.msra.mxu0 %v10362_v19  ;;  %v1573_v19 = vpack.c.bf16 %v1568_v18, %v1567_v56  ;;  %v1712_v18 = vld [vmem:[#allocation2 + $0x48] sm:$0xff]  ;;  %v7256_v56 = vld [vmem:[%s13489_s4 + $0x160] sm:$0xff] }
 0x192   :  { %8671 = vmatprep.subr.bf16.mxu0 %v10515_v12 }
 0x194   :  { %8632 = vmatmul.mubr.msk.bf16.gmra.mrb[48].mxu0 %vm1055_vm0, %v1410_v23  ;;  %v1569_v23 = vmul.f32 %v7230_v22, %v11239_v21 }
 0x195   :  { %8635 = vmatprep.mubr.msk.bf16.mxu0 %vm10516_vm1, %v10515_v12 }
 0x196   :  { %v1574_v25 = vpack.c.bf16 %v1569_v23, %v1569_v23  ;;  %v7275_v23 = vld [vmem:[%s13489_s4 + $0x170] sm:$0xff] }
 0x197   :  { %v1886_v27 = vmul.f32 %v7275_v23, %v11049_v26  ;;  %v7276_v26 = vld [vmem:[%s13489_s4 + $0x178] sm:$0xff] }
 0x19c   :  { %8636 = vmatmul.mubr.msk.bf16.gmra.mrb[52].mxu0 %vm1055_vm0, %v1411_v34  ;;  %v1723_v34 = vmul.f32 %v7248_v32, %v1704_v31  ;;  %v10371_v31 = vld [vmem:[%s13487_s2 + $0xc0] sm:$0xff]  }
 0x19d   :  { %8639 = vmatprep.mubr.msk.bf16.mxu0 %vm10516_vm1, %v10515_v12 }
 0x19e   :  { %v1732_v40 = vpack.c.bf16 %v1724_v33, %v1723_v34  ;;  %v7277_v33 = vld [vmem:[%s13489_s4 + $0x180] sm:$0xff] }
 0x19f   :  { %v1888_v34 = vmul.f32 %v7277_v33, %v11072_v39  ;;  %v10374_v39 = vld [vmem:[%s13487_s2 + $0xd8] sm:$0xff]  }
 0x1a4   :  { %8640 = vmatmul.mubr.msk.bf16.gmra.mrb[56].mxu0 %vm1055_vm0, %v1412_v43  ;;  %v7251_v43 = vld [vmem:[%s13489_s4 + $0x138] sm:$0xff] }
 0x1a5   :  { %8651 = vmatprep.mubr.msk.bf16.mxu0 %vm10516_vm1, %v10515_v12  ;;  %v1726_v30 = vmul.f32 %v7251_v43, %v1707_v41  ;;  %v7279_v43 = vld [vmem:[%s13489_s4 + $0x190] sm:$0xff] }
 0x1a6   :  { %v1890_v46 = vmul.f32 %v7279_v43, %v11092_v48  ;;  %v7280_v48 = vld [vmem:[%s13489_s4 + $0x198] sm:$0xff] }
 0x1ac   :  { %8652 = vmatmul.mubr.msk.bf16.vlgmr.msra.gmra.mrb[40].mxu0 %vm1055_vm0, %v1570_v54  ;;  %v1733_v54 = vpack.c.bf16 %v1726_v30, %v1725_v50  ;;  %v7281_v30 = vld [vmem:[%s13489_s4 + $0x1a0] sm:$0xff] }
 0x1ad   :  { %8655 = vmatprep.mubr.msk.bf16.mxu0 %vm10516_vm1, %v10515_v12  ;;  %8672 = vmatpush3.bf16.msra.mxu0 %v10363_v51  ;;  %v10369_v51 = vld [vmem:[%s13487_s2 + $0xb0] sm:$0xff]   ;;  %v1892_v50 = vmul.f32 %v7281_v30, %v11099_v53 }
 0x1ae   :  { %8673 = vmatprep.subr.bf16.mxu0 %v10515_v12 }
 0x1b1   :  { %8674 = vmatpush3.bf16.msra.mxu0 %v10364_v61  ;;  %v1708_v61 = vld [vmem:[#allocation2 + $0x28] sm:$0xff] }
 0x1b2   :  { %8675 = vmatprep.subr.bf16.mxu0 %v10515_v12 }
 0x1b4   :  { %8656 = vmatmul.mubr.msk.bf16.gmra.mrb[44].mxu0 %vm1055_vm0, %v1571_v0  ;;  %v1727_v0 = vmul.f32 %v7252_v62, %v1708_v61  ;;  %v2029_v62 = vld [vmem:[#allocation2 + $0x15] sm:$0xff] }
 0x1b5   :  { %8659 = vmatprep.mubr.msk.bf16.mxu0 %vm10516_vm1, %v10515_v12  ;;  %8676 = vmatpush3.bf16.msra.mxu0 %v10365_v63  ;;  %v1728_v63 = vmul.f32 %v7253_v60, %v1709_v57  ;;  %v7282_v57 = vld [vmem:[%s13489_s4 + $0x1a8] sm:$0xff]  ;;  %v10383_v60 = vld [vmem:[%s13488_s3 + $0x20] sm:$0xff]  }
 0x1b6   :  { %8677 = vmatprep.subr.bf16.mxu0 %v10515_v12  ;;  %8812 = vmatpush3.bf16.msra.mxu1 %v10383_v60  ;;  %v10379_v60 = vld [vmem:[%s13487_s2 + $0x100] sm:$0xff]  }
 0x1b7   :  { %v1734_v3 = vpack.c.bf16 %v1728_v63, %v1727_v0  ;;  %8813 = vmatprep.subr.bf16.mxu1 %v10515_v12  ;;  %v2028_v63 = vld [vmem:[#allocation2 + $0xd] sm:$0xff] }
 0x1b8   :  { %v7300_v0 = vld [vmem:[%s13489_s4 + $0x1b0] sm:$0xff] }
 0x1b9   :  { %8678 = vmatpush3.bf16.msra.mxu0 %v10366_v5  ;;  %v7255_v5 = vld [vmem:[%s13489_s4 + $0x158] sm:$0xff] }
 0x1ba   :  { %8699 = vmatprep.subr.bf16.mxu0 %v10515_v12 }
 0x1bc   :  { %8660 = vmatmul.mubr.msk.bf16.gmra.mrb[48].mxu0 %vm1055_vm0, %v1572_v10  ;;  %v1730_v10 = vmul.f32 %v7255_v5, %v1711_v4  ;;  %v2047_v4 = vmul.f32 %v7300_v0, %v2028_v63  ;;  %v10375_v5 = vld [vmem:[%s13487_s2 + $0xe0] sm:$0xff]   ;;  %v10380_v63 = vld [vmem:[%s13487_s2 + $0x108] sm:$0xff]  }
 0x1bd   :  { %8663 = vmatprep.mubr.msk.bf16.mxu0 %vm10516_vm1, %v10515_v12 }
 0x1be   :  { %v1735_v17 = vpack.c.bf16 %v1730_v10, %v1729_v13  ;;  %v7303_v10 = vld [vmem:[%s13489_s4 + $0x1c8] sm:$0xff]  ;;  %v2030_v13 = vld [vmem:[#allocation2 + $0x1d] sm:$0xff] }
 0x1c4   :  { %8664 = vmatmul.mubr.msk.bf16.gmra.mrb[52].mxu0 %vm1055_vm0, %v1573_v19  ;;  %v1731_v19 = vmul.f32 %v7256_v56, %v1712_v18  ;;  %v10376_v18 = vld [vmem:[%s13487_s2 + $0xe8] sm:$0xff]   ;;  %v2050_v56 = vmul.f32 %v7303_v10, %v2031_v9  ;;  %v7331_v9 = vld [vmem:[%s13489_s4 + $0x220] sm:$0xff] }
 0x1c5   :  { %8667 = vmatprep.mubr.msk.bf16.mxu0 %vm10516_vm1, %v10515_v12  ;;  %v2194_v10 = vld [vmem:[#allocation2 + $0x2e] sm:$0xff] }
 0x1c6   :  { %v1736_v22 = vpack.c.bf16 %v1731_v19, %v1731_v19 }
 0x1cc   :  { %8668 = vmatmul.mubr.msk.bf16.gmra.mrb[56].mxu0 %vm1055_vm0, %v1574_v25  ;;  %v7274_v25 = vld [vmem:[%s13489_s4 + $0x168] sm:$0xff] }
 0x1cd   :  { %8679 = vmatprep.mubr.msk.bf16.mxu0 %vm10516_vm1, %v10515_v12  ;;  %v1885_v29 = vmul.f32 %v7274_v25, %v11026_v16  ;;  %v10372_v16 = vld [vmem:[%s13487_s2 + $0xc8] sm:$0xff]   ;;  %v2033_v25 = vld [vmem:[#allocation2 + $0x35] sm:$0xff] }
 0x1cf   :  { %v1894_v32 = vpack.c.bf16 %v1886_v27, %v1885_v29  ;;  %v7305_v27 = vld [vmem:[%s13489_s4 + $0x1d8] sm:$0xff]  ;;  %v2032_v29 = vld [vmem:[#allocation2 + $0x2d] sm:$0xff] }
 0x1d0   :  { %v2052_v33 = vmul.f32 %v7305_v27, %v2033_v25  ;;  %v2196_v25 = vld [vmem:[#allocation2 + $0x3e] sm:$0xff]  ;;  %v7332_v27 = vld [vmem:[%s13489_s4 + $0x228] sm:$0xff] }
 0x1d4   :  { %8680 = vmatmul.mubr.msk.bf16.vlgmr.msra.gmra.mrb[40].mxu0 %vm1055_vm0, %v1732_v40  ;;  %v10373_v40 = vld [vmem:[%s13487_s2 + $0xd0] sm:$0xff]  }
 0x1d5   :  { %8683 = vmatprep.mubr.msk.bf16.mxu0 %vm10516_vm1, %v10515_v12  ;;  %8700 = vmatpush3.bf16.msra.mxu0 %v10367_v37  ;;  %v1887_v37 = vmul.f32 %v7276_v26, %v11041_v24  ;;  %v7278_v24 = vld [vmem:[%s13489_s4 + $0x188] sm:$0xff] }
 0x1d6   :  { %8701 = vmatprep.subr.bf16.mxu0 %v10515_v12  ;;  %v1889_v47 = vmul.f32 %v7278_v24, %v11064_v35  ;;  %v1891_v35 = vmul.f32 %v7280_v48, %v11084_v6  ;;  %v10384_v6 = vld [vmem:[%s13488_s3 + $0x28] sm:$0xff]   ;;  %v2191_v48 = vld [vmem:[#allocation2 + $0x16] sm:$0xff] }
 0x1d7   :  { %v1895_v41 = vpack.c.bf16 %v1888_v34, %v1887_v37  ;;  %8814 = vmatpush3.bf16.msra.mxu1 %v10384_v6  ;;  %v2035_v34 = vld [vmem:[#allocation2 + $0x45] sm:$0xff] }
 0x1d8   :  { %8815 = vmatprep.subr.bf16.mxu1 %v10515_v12  ;;  %v7307_v37 = vld [vmem:[%s13489_s4 + $0x1e8] sm:$0xff] }
 0x1d9   :  { %8702 = vmatpush3.bf16.msra.mxu0 %v10368_v49  ;;  %v1896_v49 = vpack.c.bf16 %v1890_v46, %v1889_v47  ;;  %v2054_v43 = vmul.f32 %v7307_v37, %v2035_v34  ;;  %v2036_v46 = vld [vmem:[#allocation2 + $0x4d] sm:$0xff] }
 0x1da   :  { %8703 = vmatprep.subr.bf16.mxu0 %v10515_v12  ;;  %v7308_v47 = vld [vmem:[%s13489_s4 + $0x1f0] sm:$0xff]  ;;  %v2193_v6 = vld [vmem:[#allocation2 + $0x26] sm:$0xff] }
 0x1db   :  { %v7353_v37 = vld [vmem:[%s13489_s4 + $0x248] sm:$0xff] }
 0x1dc   :  { %8684 = vmatmul.mubr.msk.bf16.gmra.mrb[44].mxu0 %vm1055_vm0, %v1733_v54  ;;  %v1874_v54 = vld [vmem:[#allocation2 + $0x49] sm:$0xff] }
 0x1dd   :  { %8687 = vmatprep.mubr.msk.bf16.mxu0 %vm10516_vm1, %v10515_v12  ;;  %8704 = vmatpush3.bf16.msra.mxu0 %v10369_v51  ;;  %v1897_v51 = vpack.c.bf16 %v1892_v50, %v1891_v35  ;;  %v1893_v61 = vmul.f32 %v7282_v57, %v1874_v54  ;;  %v7327_v50 = vld [vmem:[%s13489_s4 + $0x200] sm:$0xff]  ;;  %v2190_v35 = vld [vmem:[#allocation2 + $0xe] sm:$0xff] }
 0x1de   :  { %8705 = vmatprep.subr.bf16.mxu0 %v10515_v12  ;;  %v2210_v54 = vmul.f32 %v7327_v50, %v2191_v48 }
 0x1df   :  { %v1898_v53 = vpack.c.bf16 %v1893_v61, %v1893_v61 }
 0x1e1   :  { %8706 = vmatpush3.bf16.msra.mxu0 %v10370_v44  ;;  %v7301_v44 = vld [vmem:[%s13489_s4 + $0x1b8] sm:$0xff] }
 0x1e2   :  { %8727 = vmatprep.subr.bf16.mxu0 %v10515_v12 }
 0x1e4   :  { %8688 = vmatmul.mubr.msk.bf16.gmra.mrb[48].mxu0 %vm1055_vm0, %v1734_v3  ;;  %v2048_v3 = vmul.f32 %v7301_v44, %v2029_v62  ;;  %v2192_v62 = vld [vmem:[#allocation2 + $0x1e] sm:$0xff]  ;;  %v7328_v44 = vld [vmem:[%s13489_s4 + $0x208] sm:$0xff] }
 0x1e5   :  { %8691 = vmatprep.mubr.msk.bf16.mxu0 %vm10516_vm1, %v10515_v12 }
 0x1e6   :  { %v2056_v7 = vpack.c.bf16 %v2048_v3, %v2047_v4  ;;  %v2211_v3 = vmul.f32 %v7328_v44, %v2192_v62  ;;  %v10381_v4 = vld [vmem:[%s13487_s2 + $0x110] sm:$0xff]  }
 0x1ec   :  { %8692 = vmatmul.mubr.msk.bf16.gmra.mrb[52].mxu0 %vm1055_vm0, %v1735_v17  ;;  %v7302_v17 = vld [vmem:[%s13489_s4 + $0x1c0] sm:$0xff] }
 0x1ed   :  { %8695 = vmatprep.mubr.msk.bf16.mxu0 %vm10516_vm1, %v10515_v12  ;;  %v2049_v19 = vmul.f32 %v7302_v17, %v2030_v13  ;;  %v7330_v13 = vld [vmem:[%s13489_s4 + $0x218] sm:$0xff] }
 0x1ee   :  { %v10382_v17 = vld [vmem:[%s13487_s2 + $0x118] sm:$0xff]  }
 0x1ef   :  { %v2057_v23 = vpack.c.bf16 %v2050_v56, %v2049_v19  ;;  %v2213_v56 = vmul.f32 %v7330_v13, %v2194_v10  ;;  %v7378_v10 = vld [vmem:[%s13489_s4 + $0x48] sm:$0xff]  ;;  %v7379_v13 = vld [vmem:[%s13489_s4 + $0x50] sm:$0xff] }
 0x1f4   :  { %8696 = vmatmul.mubr.msk.bf16.gmra.mrb[56].mxu0 %vm1055_vm0, %v1736_v22  ;;  %v10377_v22 = vld [vmem:[%s13487_s2 + $0xf0] sm:$0xff]  }
 0x1f5   :  { %8707 = vmatprep.mubr.msk.bf16.mxu0 %vm10516_vm1, %v10515_v12 }
 0x1fc   :  { %8708 = vmatmul.mubr.msk.bf16.vlgmr.msra.gmra.mrb[40].mxu0 %vm1055_vm0, %v1894_v32  ;;  %v10378_v32 = vld [vmem:[%s13487_s2 + $0xf8] sm:$0xff]  }
 0x1fd   :  { %8711 = vmatprep.mubr.msk.bf16.mxu0 %vm10516_vm1, %v10515_v12  ;;  %8728 = vmatpush3.bf16.msra.mxu0 %v10371_v31  ;;  %v7304_v31 = vld [vmem:[%s13489_s4 + $0x1d0] sm:$0xff] }
 0x1fe   :  { %8729 = vmatprep.subr.bf16.mxu0 %v10515_v12  ;;  %v2051_v26 = vmul.f32 %v7304_v31, %v2032_v29  ;;  %v2215_v31 = vmul.f32 %v7332_v27, %v2196_v25 }
 0x201   :  { %8730 = vmatpush3.bf16.msra.mxu0 %v10372_v16  ;;  %v2058_v16 = vpack.c.bf16 %v2052_v33, %v2051_v26  ;;  %v2198_v33 = vld [vmem:[#allocation2 + $0x4e] sm:$0xff]  ;;  %v7334_v26 = vld [vmem:[%s13489_s4 + $0x238] sm:$0xff] }
 0x202   :  { %8731 = vmatprep.subr.bf16.mxu0 %v10515_v12 }
 0x204   :  { %8712 = vmatmul.mubr.msk.bf16.gmra.mrb[44].mxu0 %vm1055_vm0, %v1895_v41  ;;  %v7306_v41 = vld [vmem:[%s13489_s4 + $0x1e0] sm:$0xff] }
 0x205   :  { %8715 = vmatprep.mubr.msk.bf16.mxu0 %vm10516_vm1, %v10515_v12  ;;  %8732 = vmatpush3.bf16.msra.mxu0 %v10373_v40  ;;  %v2034_v40 = vld [vmem:[#allocation2 + $0x3d] sm:$0xff] }
 0x206   :  { %8733 = vmatprep.subr.bf16.mxu0 %v10515_v12  ;;  %v2053_v24 = vmul.f32 %v7306_v41, %v2034_v40  ;;  %v7352_v40 = vld [vmem:[%s13489_s4 + $0x240] sm:$0xff]  ;;  %v2372_v41 = vmul.f32 %v7353_v37, %v11189_v59 }
 0x209   :  { %8734 = vmatpush3.bf16.msra.mxu0 %v10374_v39  ;;  %v2059_v39 = vpack.c.bf16 %v2054_v43, %v2053_v24  ;;  %v2371_v43 = vmul.f32 %v7352_v40, %v11166_v45  ;;  %v7357_v45 = vld [vmem:[%s13489_s4 + $0x268] sm:$0xff] }
 0x20a   :  { %8755 = vmatprep.subr.bf16.mxu0 %v10515_v12  ;;  %v2376_v48 = vmul.f32 %v7357_v45, %v11232_v14  ;;  %v7382_v45 = vld [vmem:[%s13489_s4 + $0x68] sm:$0xff] }
 0x20b   :  { %v2380_v24 = vpack.c.bf16 %v2372_v41, %v2371_v43 }
 0x20c   :  { %8716 = vmatmul.mubr.msk.bf16.gmra.mrb[48].mxu0 %vm1055_vm0, %v1896_v49  ;;  %v2055_v49 = vmul.f32 %v7308_v47, %v2036_v46  ;;  %v7354_v46 = vld [vmem:[%s13489_s4 + $0x250] sm:$0xff] }
 0x20d   :  { %8719 = vmatprep.mubr.msk.bf16.mxu0 %vm10516_vm1, %v10515_v12  ;;  %v2373_v59 = vmul.f32 %v7354_v46, %v11181_v55  ;;  %v7359_v55 = vld [vmem:[%s13489_s4 + $0x278] sm:$0xff] }
 0x20e   :  { %v2060_v30 = vpack.c.bf16 %v2055_v49, %v2055_v49 }
 0x214   :  { %8720 = vmatmul.mubr.msk.bf16.gmra.mrb[52].mxu0 %vm1055_vm0, %v1897_v51  ;;  %v7326_v51 = vld [vmem:[%s13489_s4 + $0x1f8] sm:$0xff] }
 0x215   :  { %8723 = vmatprep.mubr.msk.bf16.mxu0 %vm10516_vm1, %v10515_v12  ;;  %v2209_v57 = vmul.f32 %v7326_v51, %v2190_v35  ;;  %v7358_v35 = vld [vmem:[%s13489_s4 + $0x270] sm:$0xff]  ;;  %v2378_v51 = vmul.f32 %v7359_v55, %v11239_v21  ;;  %v10386_v21 = vld [vmem:[%s13488_s3 + $0x38] sm:$0xff]  }
 0x216   :  { %v2377_v14 = vmul.f32 %v7358_v35, %v11224_v11  ;;  %v10385_v11 = vld [vmem:[%s13488_s3 + $0x30] sm:$0xff]  }
 0x217   :  { %v2218_v61 = vpack.c.bf16 %v2210_v54, %v2209_v57  ;;  %v7360_v57 = vld [vmem:[%s13489_s4 + $0x280] sm:$0xff]  ;;  %8816 = vmatpush3.bf16.msra.mxu1 %v10385_v11 }
 0x218   :  { %v2383_v54 = vpack.c.bf16 %v2378_v51, %v2377_v14  ;;  %8817 = vmatprep.subr.bf16.mxu1 %v10515_v12 }
 0x21b   :  { %8818 = vmatpush3.bf16.msra.mxu1 %v10386_v21 }
 0x21c   :  { %8724 = vmatmul.mubr.msk.bf16.gmra.mrb[56].mxu0 %vm1055_vm0, %v1898_v53  ;;  %v7329_v53 = vld [vmem:[%s13489_s4 + $0x210] sm:$0xff]  ;;  %8839 = vmatprep.subr.bf16.mxu1 %v10515_v12 }
 0x21d   :  { %8735 = vmatprep.mubr.msk.bf16.mxu0 %vm10516_vm1, %v10515_v12  ;;  %v2212_v0 = vmul.f32 %v7329_v53, %v2193_v6 }
 0x224   :  { %8736 = vmatmul.mubr.msk.bf16.vlgmr.msra.gmra.mrb[40].mxu0 %vm1055_vm0, %v2056_v7  ;;  %v2195_v7 = vld [vmem:[#allocation2 + $0x36] sm:$0xff] }
 0x225   :  { %8739 = vmatprep.mubr.msk.bf16.mxu0 %vm10516_vm1, %v10515_v12  ;;  %8756 = vmatpush3.bf16.msra.mxu0 %v10375_v5  ;;  %v2219_v5 = vpack.c.bf16 %v2212_v0, %v2211_v3 }
 0x226   :  { %8757 = vmatprep.subr.bf16.mxu0 %v10515_v12 }
 0x229   :  { %8758 = vmatpush3.bf16.msra.mxu0 %v10376_v18  ;;  %v2214_v18 = vmul.f32 %v7331_v9, %v2195_v7 }
 0x22a   :  { %8759 = vmatprep.subr.bf16.mxu0 %v10515_v12 }
 0x22b   :  { %v2220_v19 = vpack.c.bf16 %v2214_v18, %v2213_v56 }
 0x22c   :  { %8740 = vmatmul.mubr.msk.bf16.gmra.mrb[44].mxu0 %vm1055_vm0, %v2057_v23  ;;  %v7333_v23 = vld [vmem:[%s13489_s4 + $0x230] sm:$0xff] }
 0x22d   :  { %8743 = vmatprep.mubr.msk.bf16.mxu0 %vm10516_vm1, %v10515_v12  ;;  %8760 = vmatpush3.bf16.msra.mxu0 %v10377_v22  ;;  %v2197_v22 = vld [vmem:[#allocation2 + $0x46] sm:$0xff] }
 0x22e   :  { %8761 = vmatprep.subr.bf16.mxu0 %v10515_v12  ;;  %v2216_v29 = vmul.f32 %v7333_v23, %v2197_v22  ;;  %v10387_v23 = vld [vmem:[%s13488_s3] sm:$0xff]  }
 0x231   :  { %8762 = vmatpush3.bf16.msra.mxu0 %v10378_v32  ;;  %v2221_v32 = vpack.c.bf16 %v2216_v29, %v2215_v31 }
 0x232   :  { %8783 = vmatprep.subr.bf16.mxu0 %v10515_v12 }
 0x234   :  { %8744 = vmatmul.mubr.msk.bf16.gmra.mrb[48].mxu0 %vm1055_vm0, %v2058_v16  ;;  %v2217_v16 = vmul.f32 %v7334_v26, %v2198_v33 }
 0x235   :  { %8747 = vmatprep.mubr.msk.bf16.mxu0 %vm10516_vm1, %v10515_v12 }
 0x236   :  { %v2222_v34 = vpack.c.bf16 %v2217_v16, %v2217_v16  ;;  %v7381_v16 = vld [vmem:[%s13489_s4 + $0x60] sm:$0xff] }
 0x23c   :  { %8748 = vmatmul.mubr.msk.bf16.gmra.mrb[52].mxu0 %vm1055_vm0, %v2059_v39  ;;  %v7355_v39 = vld [vmem:[%s13489_s4 + $0x258] sm:$0xff] }
 0x23d   :  { %8751 = vmatprep.mubr.msk.bf16.mxu0 %vm10516_vm1, %v10515_v12  ;;  %v2374_v47 = vmul.f32 %v7355_v39, %v11212_v20  ;;  %v10389_v39 = vld [vmem:[%s13488_s3 + $0x10] sm:$0xff]  }
 0x23f   :  { %v2381_v49 = vpack.c.bf16 %v2374_v47, %v2373_v59 }
 0x244   :  { %8752 = vmatmul.mubr.msk.bf16.gmra.mrb[56].mxu0 %vm1055_vm0, %v2060_v30  ;;  %v7356_v30 = vld [vmem:[%s13489_s4 + $0x260] sm:$0xff] }
 0x245   :  { %8763 = vmatprep.mubr.msk.bf16.mxu0 %vm10516_vm1, %v10515_v12  ;;  %v2375_v20 = vmul.f32 %v7356_v30, %v11204_v2  ;;  %v2360_v2 = vld [vmem:[#allocation2 + $0x4f] sm:$0xff] }
 0x247   :  { %v2382_v50 = vpack.c.bf16 %v2376_v48, %v2375_v20  ;;  %v7383_v20 = vld [vmem:[%s13489_s4 + $0x70] sm:$0xff] }
 0x24c   :  { %8764 = vmatmul.mubr.msk.bf16.vlgmr.msra.gmra.mrb[40].mxu0 %vm1055_vm0, %v2218_v61 }
 0x24d   :  { %8767 = vmatprep.mubr.msk.bf16.mxu0 %vm10516_vm1, %v10515_v12  ;;  %8784 = vmatpush3.bf16.msra.mxu0 %v10379_v60  ;;  %v2379_v60 = vmul.f32 %v7360_v57, %v2360_v2 }
 0x24e   :  { %8785 = vmatprep.subr.bf16.mxu0 %v10515_v12 }
 0x24f   :  { %v2384_v61 = vpack.c.bf16 %v2379_v60, %v2379_v60 }
 0x251   :  { %8786 = vmatpush3.bf16.msra.mxu0 %v10380_v63 }
 0x252   :  { %8787 = vmatprep.subr.bf16.mxu0 %v10515_v12 }
 0x254   :  { %8768 = vmatmul.mubr.msk.bf16.gmra.mrb[44].mxu0 %vm1055_vm0, %v2219_v5 }
 0x255   :  { %8771 = vmatprep.mubr.msk.bf16.mxu0 %vm10516_vm1, %v10515_v12  ;;  %8788 = vmatpush3.bf16.msra.mxu0 %v10381_v4 }
 0x256   :  { %8789 = vmatprep.subr.bf16.mxu0 %v10515_v12 }
 0x259   :  { %8790 = vmatpush3.bf16.msra.mxu0 %v10382_v17 }
 0x25a   :  { %9063 = vmatprep.subr.bf16.mxu0 %v10515_v12 }
 0x25c   :  { %8772 = vmatmul.mubr.msk.bf16.gmra.mrb[48].mxu0 %vm1055_vm0, %v2220_v19 }
 0x25d   :  { %8775 = vmatprep.mubr.msk.bf16.mxu0 %vm10516_vm1, %v10515_v12 }
 0x264   :  { %8776 = vmatmul.mubr.msk.bf16.gmra.mrb[52].mxu0 %vm1055_vm0, %v2221_v32  ;;  %v7380_v32 = vld [vmem:[%s13489_s4 + $0x58] sm:$0xff] }
 0x265   :  { %8779 = vmatprep.mubr.msk.bf16.mxu0 %vm10516_vm1, %v10515_v12 }
 0x26c   :  { %8780 = vmatmul.mubr.msk.bf16.gmra.mrb[56].mxu0 %vm1055_vm0, %v2222_v34  ;;  %v10388_v34 = vld [vmem:[%s13488_s3 + $0x8] sm:$0xff]  }
 0x26d   :  { %8791 = vmatprep.mubr.msk.bf16.mxu0 %vm10516_vm1, %v10515_v12 }
 0x274   :  { %8792 = vmatmul.mubr.msk.bf16.vlgmr.msra.gmra.mrb[40].mxu0 %vm1055_vm0, %v2380_v24 }
 0x275   :  { %8795 = vmatprep.mubr.msk.bf16.mxu0 %vm10516_vm1, %v10515_v12 }
 0x27c   :  { %8796 = vmatmul.mubr.msk.bf16.gmra.mrb[44].mxu0 %vm1055_vm0, %v2381_v49 }
 0x27d   :  { %8799 = vmatprep.mubr.msk.bf16.mxu0 %vm10516_vm1, %v10515_v12 }
 0x284   :  { %8800 = vmatmul.mubr.msk.bf16.gmra.mrb[48].mxu0 %vm1055_vm0, %v2382_v50  ;;  %v10390_v50 = vld [vmem:[%s13488_s3 + $0x18] sm:$0xff]  }
 0x285   :  { %8803 = vmatprep.mubr.msk.bf16.mxu0 %vm10516_vm1, %v10515_v12 }
 0x28c   :  { %8804 = vmatmul.mubr.msk.bf16.gmra.mrb[52].mxu0 %vm1055_vm0, %v2383_v54 }
 0x28d   :  { %8807 = vmatprep.mubr.msk.bf16.mxu0 %vm10516_vm1, %v10515_v12 }
 0x294   :  { %8808 = vmatmul.mubr.msk.bf16.gmra.mrb[56].mxu0 %vm1055_vm0, %v2384_v61 }
 0x295   :  { %9071 = vmatprep.mubr.msk.bf16.mxu0 %vm10516_vm1, %v10515_v12 }
 0x347   :  { %v2467_v6 = vpop.f32.mrb[40].mxu0 }
 0x348   :  { %v2514_v53 = vmax.f32 %v2467_v6, 0.0  ;;  %v8793_v62 = vpop.f32.mrb[41].mxu0  ;;  %v7384_v6 = vld [vmem:[%s13489_s4 + $0x78] sm:$0xff] }
 0x349   :  { %v2470_v44 = vpop.f32.mrb[42].mxu0 }
 0x34a   :  { %2523 = vst.msk [vmem:[#allocation2 + $0x8] sm:$0xff] %vm1055_vm0, %v2514_v53  ;;  %v2515_v63 = vmax.f32 %v2470_v44, 0.0  ;;  %v8794_v0 = vpop.f32.mrb[43].mxu0  ;;  %v7385_v53 = vld [vmem:[%s13489_s4 + $0x80] sm:$0xff] }
 0x34c   :  { %2524 = vst.msk [vmem:[#allocation2 + $0x10] sm:$0xff] %vm1055_vm0, %v2515_v63 }
 0x34f   :  { %v2475_v3 = vpop.f32.mrb[44].mxu0 }
 0x350   :  { %v2516_v4 = vmax.f32 %v2475_v3, 0.0  ;;  %v8797_v5 = vpop.f32.mrb[45].mxu0 }
 0x351   :  { %v2478_v7 = vpop.f32.mrb[46].mxu0  ;;  %v2572_v9 = vld [vmem:[#allocation2 + $0x2] sm:$0xff] }
 0x352   :  { %2525 = vst.msk [vmem:[#allocation2 + $0x18] sm:$0xff] %vm1055_vm0, %v2516_v4  ;;  %v2517_v17 = vmax.f32 %v2478_v7, 0.0  ;;  %v8798_v18 = vpop.f32.mrb[47].mxu0  ;;  %v2590_v19 = vmul.f32 %v7378_v10, %v2572_v9  ;;  %v7386_v4 = vld [vmem:[%s13489_s4 + $0x88] sm:$0xff] }
 0x353   :  { %v2573_v56 = vld [vmem:[#allocation2 + $0xa] sm:$0xff]  ;;  %v2541_v18 = vld [vmem:[%s13489_s4] sm:$0xff] }
 0x354   :  { %2526 = vst.msk [vmem:[#allocation2 + $0x20] sm:$0xff] %vm1055_vm0, %v2517_v17  ;;  %v2591_v22 = vmul.f32 %v7379_v13, %v2573_v56  ;;  %v11621_v10 = vld [vmem:[#allocation2 + $0x9] sm:$0xff]  ;;  %v2532_v17 = vld [vmem:[#allocation2 + $0x1] sm:$0xff] }
 0x355   :  { %v2542_v13 = vld [vmem:[%s13489_s4 + $0x8] sm:$0xff] }
 0x356   :  { %v2599_v25 = vpack.c.bf16 %v2591_v22, %v2590_v19  ;;  %v2551_v56 = vmul.f32 %v2542_v13, %v11621_v10  ;;  %v2550_v19 = vmul.f32 %v2541_v18, %v2532_v17  ;;  %v10391_v22 = vld [vmem:[%s13488_s3 + $0x40] sm:$0xff]   ;;  %v7418_v13 = vld [vmem:[%s13489_s4 + $0xb8] sm:$0xff]  ;;  %v7417_v18 = vld [vmem:[%s13489_s4 + $0xb0] sm:$0xff] }
 0x357   :  { %v2483_v27 = vpop.f32.mrb[48].mxu0 }
 0x358   :  { %v2518_v29 = vmax.f32 %v2483_v27, 0.0  ;;  %v8801_v31 = vpop.f32.mrb[49].mxu0  ;;  %8820 = vmatmul.mubr.msk.bf16.vlgmr.msra.gmra.mrb[40].mxu1 %vm1055_vm0, %v2599_v25  ;;  %v2544_v27 = vld [vmem:[%s13489_s4 + $0x18] sm:$0xff] }
 0x359   :  { %v2486_v33 = vpop.f32.mrb[50].mxu0  ;;  %8823 = vmatprep.mubr.msk.bf16.mxu1 %vm10516_vm1, %v10515_v12  ;;  %v2574_v26 = vld [vmem:[#allocation2 + $0x12] sm:$0xff]  ;;  %8840 = vmatpush3.bf16.msra.mxu1 %v10387_v23  ;;  %v2559_v23 = vpack.c.bf16 %v2551_v56, %v2550_v19 }
 0x35a   :  { %2527 = vst.msk [vmem:[#allocation2 + $0x28] sm:$0xff] %vm1055_vm0, %v2518_v29  ;;  %v2519_v37 = vmax.f32 %v2486_v33, 0.0  ;;  %v8802_v40 = vpop.f32.mrb[51].mxu0  ;;  %8841 = vmatprep.subr.bf16.mxu1 %v10515_v12  ;;  %v2592_v43 = vmul.f32 %v7380_v32, %v2574_v26  ;;  %v11644_v29 = vld [vmem:[#allocation2 + $0x11] sm:$0xff]  ;;  %v10392_v32 = vld [vmem:[%s13488_s3 + $0x48] sm:$0xff]  }
 0x35b   :  { %v2575_v41 = vld [vmem:[#allocation2 + $0x1a] sm:$0xff]  ;;  %v2543_v31 = vld [vmem:[%s13489_s4 + $0x10] sm:$0xff]  ;;  %v2546_v40 = vld [vmem:[%s13489_s4 + $0x28] sm:$0xff] }
 0x35c   :  { %2528 = vst.msk [vmem:[#allocation2 + $0x30] sm:$0xff] %vm1055_vm0, %v2519_v37  ;;  %v2593_v24 = vmul.f32 %v7381_v16, %v2575_v41  ;;  %v11636_v25 = vld [vmem:[#allocation2 + $0x19] sm:$0xff]  ;;  %v2552_v26 = vmul.f32 %v2543_v31, %v11644_v29  ;;  %v10393_v16 = vld [vmem:[%s13488_s3 + $0x50] sm:$0xff]   ;;  %v7420_v31 = vld [vmem:[%s13489_s4 + $0xc8] sm:$0xff] }
 0x35d   :  { %8842 = vmatpush3.bf16.msra.mxu1 %v10388_v34  ;;  %v2553_v33 = vmul.f32 %v2544_v27, %v11636_v25  ;;  %v10398_v56 = vld [vmem:[%s13488_s3 + $0x78] sm:$0xff]  }
 0x35e   :  { %v2600_v46 = vpack.c.bf16 %v2593_v24, %v2592_v43  ;;  %8843 = vmatprep.subr.bf16.mxu1 %v10515_v12  ;;  %v2545_v43 = vld [vmem:[%s13489_s4 + $0x20] sm:$0xff]  ;;  %v10394_v24 = vld [vmem:[%s13488_s3 + $0x58] sm:$0xff]  }
 0x35f   :  { %v2491_v47 = vpop.f32.mrb[52].mxu0  ;;  %v2560_v34 = vpack.c.bf16 %v2553_v33, %v2552_v26  ;;  %v7419_v33 = vld [vmem:[%s13489_s4 + $0xc0] sm:$0xff] }
 0x360   :  { %v2520_v59 = vmax.f32 %v2491_v47, 0.0  ;;  %v8805_v49 = vpop.f32.mrb[53].mxu0  ;;  %8824 = vmatmul.mubr.msk.bf16.gmra.mrb[44].mxu1 %vm1055_vm0, %v2600_v46 }
 0x361   :  { %v2494_v30 = vpop.f32.mrb[54].mxu0  ;;  %8827 = vmatprep.mubr.msk.bf16.mxu1 %vm10516_vm1, %v10515_v12  ;;  %v2576_v48 = vld [vmem:[#allocation2 + $0x22] sm:$0xff]  ;;  %8844 = vmatpush3.bf16.msra.mxu1 %v10389_v39  ;;  %v2548_v49 = vld [vmem:[%s13489_s4 + $0x38] sm:$0xff] }
 0x362   :  { %2529 = vst.msk [vmem:[#allocation2 + $0x38] sm:$0xff] %vm1055_vm0, %v2520_v59  ;;  %v2521_v55 = vmax.f32 %v2494_v30, 0.0  ;;  %v8806_v35 = vpop.f32.mrb[55].mxu0  ;;  %8845 = vmatprep.subr.bf16.mxu1 %v10515_v12  ;;  %v2594_v14 = vmul.f32 %v7382_v45, %v2576_v48  ;;  %v11667_v41 = vld [vmem:[#allocation2 + $0x21] sm:$0xff]  ;;  %v2547_v30 = vld [vmem:[%s13489_s4 + $0x30] sm:$0xff] }
 0x363   :  { %v2577_v51 = vld [vmem:[#allocation2 + $0x2a] sm:$0xff]  ;;  %v2554_v46 = vmul.f32 %v2545_v43, %v11667_v41  ;;  %v2549_v35 = vld [vmem:[%s13489_s4 + $0x40] sm:$0xff] }
 0x364   :  { %2530 = vst.msk [vmem:[#allocation2 + $0x40] sm:$0xff] %vm1055_vm0, %v2521_v55  ;;  %v2595_v54 = vmul.f32 %v7383_v20, %v2577_v51  ;;  %v11659_v37 = vld [vmem:[#allocation2 + $0x29] sm:$0xff] }
 0x365   :  { %8846 = vmatpush3.bf16.msra.mxu1 %v10390_v50  ;;  %v2555_v39 = vmul.f32 %v2546_v40, %v11659_v37  ;;  %v2839_v17 = vld [vmem:[#allocation2 + $0x23] sm:$0xff]  ;;  %v7421_v43 = vld [vmem:[%s13489_s4 + $0xd0] sm:$0xff] }
 0x366   :  { %v2601_v2 = vpack.c.bf16 %v2595_v54, %v2594_v14  ;;  %8867 = vmatprep.subr.bf16.mxu1 %v10515_v12  ;;  %v2836_v54 = vld [vmem:[#allocation2 + $0xb] sm:$0xff] }
 0x367   :  { %v2499_v57 = vpop.f32.mrb[56].mxu0  ;;  %v2561_v47 = vpack.c.bf16 %v2555_v39, %v2554_v46  ;;  %v11761_v46 = vld [vmem:[#allocation2 + $0xf] sm:$0xff] }
 0x368   :  { %v2522_v60 = vmax.f32 %v2499_v57, 0.0  ;;  %v8809_v61 = vpop.f32.mrb[57].mxu0  ;;  %8828 = vmatmul.mubr.msk.bf16.gmra.mrb[48].mxu1 %vm1055_vm0, %v2601_v2  ;;  %v7414_v2 = vld [vmem:[%s13489_s4 + $0x98] sm:$0xff]  ;;  %v2835_v57 = vld [vmem:[#allocation2 + $0x3] sm:$0xff] }
 0x369   :  { %v2502_v11 = vpop.f32.mrb[58].mxu0  ;;  %8831 = vmatprep.mubr.msk.bf16.mxu1 %vm10516_vm1, %v10515_v12  ;;  %v2578_v21 = vld [vmem:[#allocation2 + $0x32] sm:$0xff]  ;;  %v2854_v61 = vmul.f32 %v7414_v2, %v2836_v54  ;;  %v7441_v2 = vld [vmem:[%s13489_s4 + $0xe8] sm:$0xff] }
 0x36a   :  { %2531 = vst.msk [vmem:[#allocation2 + $0x48] sm:$0xff] %vm1055_vm0, %v2522_v60  ;;  %v8810_v62 = vpop.f32.mrb[59].mxu0  ;;  %v2596_v63 = vmul.f32 %v7384_v6, %v2578_v21  ;;  %v11687_v45 = vld [vmem:[#allocation2 + $0x31] sm:$0xff]  ;;  %v10395_v21 = vld [vmem:[%s13488_s3 + $0x60] sm:$0xff]  }
 0x36b   :  { %v2579_v44 = vld [vmem:[#allocation2 + $0x3a] sm:$0xff]  ;;  %v2556_v20 = vmul.f32 %v2547_v30, %v11687_v45  ;;  %v7413_v60 = vld [vmem:[%s13489_s4 + $0x90] sm:$0xff]  ;;  %v7416_v62 = vld [vmem:[%s13489_s4 + $0xa8] sm:$0xff] }
 0x36c   :  { %v2597_v0 = vmul.f32 %v7385_v53, %v2579_v44  ;;  %v11679_v59 = vld [vmem:[#allocation2 + $0x39] sm:$0xff]  ;;  %v2853_v11 = vmul.f32 %v7413_v60, %v2835_v57  ;;  %v10400_v57 = vld [vmem:[%s13488_s3 + $0x88] sm:$0xff]  }
 0x36d   :  { %v2557_v48 = vmul.f32 %v2548_v49, %v11679_v59  ;;  %v2838_v53 = vld [vmem:[#allocation2 + $0x1b] sm:$0xff]  ;;  %v2837_v44 = vld [vmem:[#allocation2 + $0x13] sm:$0xff]  ;;  %v2996_v49 = vld [vmem:[#allocation2 + $0x7] sm:$0xff] }
 0x36e   :  { %v2602_v3 = vpack.c.bf16 %v2597_v0, %v2596_v63  ;;  %v2862_v6 = vpack.c.bf16 %v2854_v61, %v2853_v11  ;;  %v7415_v63 = vld [vmem:[%s13489_s4 + $0xa0] sm:$0xff]  ;;  %v10396_v0 = vld [vmem:[%s13488_s3 + $0x68] sm:$0xff]   ;;  %v7439_v30 = vld [vmem:[%s13489_s4 + $0xd8] sm:$0xff] }
 0x36f   :  { %v2562_v50 = vpack.c.bf16 %v2557_v48, %v2556_v20  ;;  %v2842_v27 = vld [vmem:[#allocation2 + $0x3b] sm:$0xff]  ;;  %v3014_v20 = vmul.f32 %v7439_v30, %v2996_v49  ;;  %v10401_v11 = vld [vmem:[%s13488_s3 + $0x90] sm:$0xff]   ;;  %v10404_v30 = vld [vmem:[%s13488_s3 + $0xa8] sm:$0xff]  }
 0x370   :  { %8832 = vmatmul.mubr.msk.bf16.gmra.mrb[52].mxu1 %vm1055_vm0, %v2602_v3  ;;  %v2856_v3 = vmul.f32 %v7416_v62, %v2838_v53  ;;  %v2860_v26 = vmul.f32 %v7420_v31, %v2842_v27  ;;  %v11784_v54 = vld [vmem:[#allocation2 + $0x17] sm:$0xff]  ;;  %v7444_v53 = vld [vmem:[%s13489_s4 + $0x100] sm:$0xff] }
 0x371   :  { %8835 = vmatprep.mubr.msk.bf16.mxu1 %vm10516_vm1, %v10515_v12  ;;  %v2580_v5 = vld [vmem:[#allocation2 + $0x42] sm:$0xff]  ;;  %v3016_v61 = vmul.f32 %v7441_v2, %v11784_v54  ;;  %v3158_v31 = vld [vmem:[#allocation2 + $0x10] sm:$0xff] }
 0x372   :  { %v2598_v7 = vmul.f32 %v7386_v4, %v2580_v5  ;;  %v11694_v55 = vld [vmem:[#allocation2 + $0x41] sm:$0xff]  ;;  %v2855_v4 = vmul.f32 %v7415_v63, %v2837_v44  ;;  %v10397_v5 = vld [vmem:[%s13488_s3 + $0x70] sm:$0xff]   ;;  %v7443_v44 = vld [vmem:[%s13489_s4 + $0xf8] sm:$0xff] }
 0x373   :  { %v2558_v51 = vmul.f32 %v2549_v35, %v11694_v55  ;;  %v2843_v40 = vld [vmem:[#allocation2 + $0x43] sm:$0xff]  ;;  %v10402_v63 = vld [vmem:[%s13488_s3 + $0x98] sm:$0xff]   ;;  %v7467_v49 = vld [vmem:[%s13489_s4 + $0x130] sm:$0xff] }
 0x374   :  { %v2603_v9 = vpack.c.bf16 %v2598_v7, %v2598_v7  ;;  %v2863_v7 = vpack.c.bf16 %v2856_v3, %v2855_v4  ;;  %v11807_v62 = vld [vmem:[#allocation2 + $0x27] sm:$0xff] }
 0x375   :  { %v2563_v14 = vpack.c.bf16 %v2558_v51, %v2558_v51  ;;  %v11776_v51 = vld [vmem:[#allocation2 + $0x1f] sm:$0xff]  ;;  %v3018_v3 = vmul.f32 %v7443_v44, %v11807_v62  ;;  %v7470_v2 = vld [vmem:[%s13489_s4 + $0x148] sm:$0xff] }
 0x376   :  { %v3164_v44 = vld [vmem:[#allocation2 + $0x40] sm:$0xff] }
 0x378   :  { %8836 = vmatmul.mubr.msk.bf16.gmra.mrb[56].mxu1 %vm1055_vm0, %v2603_v9  ;;  %v2840_v9 = vld [vmem:[#allocation2 + $0x2b] sm:$0xff] }
 0x379   :  { %8847 = vmatprep.mubr.msk.bf16.mxu1 %vm10516_vm1, %v10515_v12  ;;  %v2858_v19 = vmul.f32 %v7418_v13, %v2840_v9  ;;  %v11827_v9 = vld [vmem:[#allocation2 + $0x37] sm:$0xff]  ;;  %v7445_v13 = vld [vmem:[%s13489_s4 + $0x108] sm:$0xff] }
 0x380   :  { %8848 = vmatmul.mubr.msk.bf16.vlgmr.msra.gmra.mrb[40].mxu1 %vm1055_vm0, %v2559_v23 }
 0x381   :  { %8851 = vmatprep.mubr.msk.bf16.mxu1 %vm10516_vm1, %v10515_v12  ;;  %8868 = vmatpush3.bf16.msra.mxu1 %v10391_v22  ;;  %v2857_v22 = vmul.f32 %v7417_v18, %v2839_v17  ;;  %v3020_v18 = vmul.f32 %v7445_v13, %v11827_v9 }
 0x382   :  { %8869 = vmatprep.subr.bf16.mxu1 %v10515_v12 }
 0x383   :  { %v2864_v23 = vpack.c.bf16 %v2858_v19, %v2857_v22  ;;  %v11834_v19 = vld [vmem:[#allocation2 + $0x47] sm:$0xff]  ;;  %v7447_v22 = vld [vmem:[%s13489_s4 + $0x118] sm:$0xff] }
 0x385   :  { %8870 = vmatpush3.bf16.msra.mxu1 %v10392_v32  ;;  %v2841_v32 = vld [vmem:[#allocation2 + $0x33] sm:$0xff] }
 0x386   :  { %8871 = vmatprep.subr.bf16.mxu1 %v10515_v12 }
 0x388   :  { %8852 = vmatmul.mubr.msk.bf16.gmra.mrb[44].mxu1 %vm1055_vm0, %v2560_v34 }
 0x389   :  { %8855 = vmatprep.mubr.msk.bf16.mxu1 %vm10516_vm1, %v10515_v12  ;;  %8872 = vmatpush3.bf16.msra.mxu1 %v10393_v16  ;;  %v2859_v16 = vmul.f32 %v7419_v33, %v2841_v32  ;;  %v7466_v32 = vld [vmem:[%s13489_s4 + $0x128] sm:$0xff] }
 0x38a   :  { %8873 = vmatprep.subr.bf16.mxu1 %v10515_v12  ;;  %v3157_v33 = vld [vmem:[#allocation2 + $0x8] sm:$0xff] }
 0x38b   :  { %v2865_v34 = vpack.c.bf16 %v2860_v26, %v2859_v16  ;;  %v7465_v26 = vld [vmem:[%s13489_s4 + $0x120] sm:$0xff]  ;;  %v3176_v16 = vmul.f32 %v7466_v32, %v3158_v31 }
 0x38d   :  { %8874 = vmatpush3.bf16.msra.mxu1 %v10394_v24  ;;  %v2861_v24 = vmul.f32 %v7421_v43, %v2843_v40  ;;  %v10403_v40 = vld [vmem:[%s13488_s3 + $0xa0] sm:$0xff]  }
 0x38e   :  { %8895 = vmatprep.subr.bf16.mxu1 %v10515_v12 }
 0x38f   :  { %v2866_v39 = vpack.c.bf16 %v2861_v24, %v2861_v24  ;;  %v3160_v24 = vld [vmem:[#allocation2 + $0x20] sm:$0xff] }
 0x390   :  { %8856 = vmatmul.mubr.msk.bf16.gmra.mrb[48].mxu1 %vm1055_vm0, %v2561_v47  ;;  %v7440_v47 = vld [vmem:[%s13489_s4 + $0xe0] sm:$0xff] }
 0x391   :  { %8859 = vmatprep.mubr.msk.bf16.mxu1 %vm10516_vm1, %v10515_v12  ;;  %v3015_v48 = vmul.f32 %v7440_v47, %v11761_v46  ;;  %v3159_v47 = vld [vmem:[#allocation2 + $0x18] sm:$0xff] }
 0x393   :  { %v3023_v35 = vpack.c.bf16 %v3015_v48, %v3014_v20  ;;  %v3177_v20 = vmul.f32 %v7467_v49, %v3159_v47 }
 0x398   :  { %8860 = vmatmul.mubr.msk.bf16.gmra.mrb[52].mxu1 %vm1055_vm0, %v2562_v50  ;;  %v10399_v50 = vld [vmem:[%s13488_s3 + $0x80] sm:$0xff]  }
 0x399   :  { %8863 = vmatprep.mubr.msk.bf16.mxu1 %vm10516_vm1, %v10515_v12 }
 0x3a0   :  { %8864 = vmatmul.mubr.msk.bf16.gmra.mrb[56].mxu1 %vm1055_vm0, %v2563_v14  ;;  %v7442_v14 = vld [vmem:[%s13489_s4 + $0xf0] sm:$0xff] }
 0x3a1   :  { %8875 = vmatprep.mubr.msk.bf16.mxu1 %vm10516_vm1, %v10515_v12  ;;  %v3017_v60 = vmul.f32 %v7442_v14, %v11776_v51  ;;  %v3162_v14 = vld [vmem:[#allocation2 + $0x30] sm:$0xff] }
 0x3a8   :  { %8876 = vmatmul.mubr.msk.bf16.vlgmr.msra.gmra.mrb[40].mxu1 %vm1055_vm0, %v2862_v6  ;;  %v11799_v6 = vld [vmem:[#allocation2 + $0x2f] sm:$0xff] }
 0x3a9   :  { %8879 = vmatprep.mubr.msk.bf16.mxu1 %vm10516_vm1, %v10515_v12  ;;  %8896 = vmatpush3.bf16.msra.mxu1 %v10395_v21  ;;  %v3024_v21 = vpack.c.bf16 %v3017_v60, %v3016_v61  ;;  %v7469_v60 = vld [vmem:[%s13489_s4 + $0x140] sm:$0xff]  ;;  %v10406_v61 = vld [vmem:[%s13488_s3 + $0xb8] sm:$0xff]  }
 0x3aa   :  { %8897 = vmatprep.subr.bf16.mxu1 %v10515_v12 }
 0x3ad   :  { %8898 = vmatpush3.bf16.msra.mxu1 %v10396_v0  ;;  %v3019_v0 = vmul.f32 %v7444_v53, %v11799_v6 }
 0x3ae   :  { %8899 = vmatprep.subr.bf16.mxu1 %v10515_v12 }
 0x3af   :  { %v3025_v4 = vpack.c.bf16 %v3019_v0, %v3018_v3  ;;  %v3163_v0 = vld [vmem:[#allocation2 + $0x38] sm:$0xff]  ;;  %v7471_v3 = vld [vmem:[%s13489_s4 + $0x150] sm:$0xff] }
 0x3b0   :  { %8880 = vmatmul.mubr.msk.bf16.gmra.mrb[44].mxu1 %vm1055_vm0, %v2863_v7  ;;  %v7446_v7 = vld [vmem:[%s13489_s4 + $0x110] sm:$0xff] }
 0x3b1   :  { %8883 = vmatprep.mubr.msk.bf16.mxu1 %vm10516_vm1, %v10515_v12  ;;  %8900 = vmatpush3.bf16.msra.mxu1 %v10397_v5  ;;  %v11819_v5 = vld [vmem:[#allocation2 + $0x3f] sm:$0xff] }
 0x3b2   :  { %8901 = vmatprep.subr.bf16.mxu1 %v10515_v12  ;;  %v3021_v17 = vmul.f32 %v7446_v7, %v11819_v5  ;;  %v3181_v7 = vmul.f32 %v7471_v3, %v3163_v0  ;;  %v3482_v0 = vld [vmem:[#allocation2 + $0x25] sm:$0xff] }
 0x3b3   :  { %v7520_v3 = vld [vmem:[%s13489_s4 + $0x1c8] sm:$0xff] }
 0x3b5   :  { %8902 = vmatpush3.bf16.msra.mxu1 %v10398_v56  ;;  %v3026_v56 = vpack.c.bf16 %v3021_v17, %v3020_v18  ;;  %v3165_v17 = vld [vmem:[#allocation2 + $0x48] sm:$0xff]  ;;  %v7473_v18 = vld [vmem:[%s13489_s4 + $0x160] sm:$0xff] }
 0x3b6   :  { %8923 = vmatprep.subr.bf16.mxu1 %v10515_v12 }
 0x3b8   :  { %8884 = vmatmul.mubr.msk.bf16.gmra.mrb[48].mxu1 %vm1055_vm0, %v2864_v23  ;;  %v3022_v23 = vmul.f32 %v7447_v22, %v11834_v19 }
 0x3b9   :  { %8887 = vmatprep.mubr.msk.bf16.mxu1 %vm10516_vm1, %v10515_v12 }
 0x3ba   :  { %v3027_v27 = vpack.c.bf16 %v3022_v23, %v3022_v23  ;;  %v7492_v23 = vld [vmem:[%s13489_s4 + $0x170] sm:$0xff] }
 0x3bb   :  { %v3337_v31 = vmul.f32 %v7492_v23, %v11644_v29  ;;  %v7493_v29 = vld [vmem:[%s13489_s4 + $0x178] sm:$0xff] }
 0x3bc   :  { %v3484_v23 = vld [vmem:[#allocation2 + $0x35] sm:$0xff] }
 0x3c0   :  { %8888 = vmatmul.mubr.msk.bf16.gmra.mrb[52].mxu1 %vm1055_vm0, %v2865_v34  ;;  %v3175_v34 = vmul.f32 %v7465_v26, %v3157_v33  ;;  %v10407_v33 = vld [vmem:[%s13488_s3 + $0xc0] sm:$0xff]  }
 0x3c1   :  { %8891 = vmatprep.mubr.msk.bf16.mxu1 %vm10516_vm1, %v10515_v12 }
 0x3c2   :  { %v3184_v43 = vpack.c.bf16 %v3176_v16, %v3175_v34  ;;  %v7494_v16 = vld [vmem:[%s13489_s4 + $0x180] sm:$0xff] }
 0x3c3   :  { %v3339_v34 = vmul.f32 %v7494_v16, %v11667_v41  ;;  %v10410_v41 = vld [vmem:[%s13488_s3 + $0xd8] sm:$0xff]  }
 0x3c8   :  { %8892 = vmatmul.mubr.msk.bf16.gmra.mrb[56].mxu1 %vm1055_vm0, %v2866_v39  ;;  %v7468_v39 = vld [vmem:[%s13489_s4 + $0x138] sm:$0xff] }
 0x3c9   :  { %8903 = vmatprep.mubr.msk.bf16.mxu1 %vm10516_vm1, %v10515_v12  ;;  %v3178_v48 = vmul.f32 %v7468_v39, %v3160_v24  ;;  %v7496_v39 = vld [vmem:[%s13489_s4 + $0x190] sm:$0xff] }
 0x3ca   :  { %v3341_v47 = vmul.f32 %v7496_v39, %v11687_v45  ;;  %v7497_v45 = vld [vmem:[%s13489_s4 + $0x198] sm:$0xff] }
 0x3d0   :  { %8904 = vmatmul.mubr.msk.bf16.vlgmr.msra.gmra.mrb[40].mxu1 %vm1055_vm0, %v3023_v35  ;;  %v3185_v35 = vpack.c.bf16 %v3178_v48, %v3177_v20  ;;  %v7498_v48 = vld [vmem:[%s13489_s4 + $0x1a0] sm:$0xff] }
 0x3d1   :  { %8907 = vmatprep.mubr.msk.bf16.mxu1 %vm10516_vm1, %v10515_v12  ;;  %8924 = vmatpush3.bf16.msra.mxu1 %v10399_v50  ;;  %v10405_v50 = vld [vmem:[%s13488_s3 + $0xb0] sm:$0xff]   ;;  %v3343_v20 = vmul.f32 %v7498_v48, %v11694_v55 }
 0x3d2   :  { %8925 = vmatprep.subr.bf16.mxu1 %v10515_v12  ;;  %v3480_v55 = vld [vmem:[#allocation2 + $0x15] sm:$0xff] }
 0x3d3   :  { %v3641_v48 = vld [vmem:[#allocation2 + $0x16] sm:$0xff] }
 0x3d5   :  { %8926 = vmatpush3.bf16.msra.mxu1 %v10400_v57  ;;  %v3161_v57 = vld [vmem:[#allocation2 + $0x28] sm:$0xff] }
 0x3d6   :  { %8927 = vmatprep.subr.bf16.mxu1 %v10515_v12 }
 0x3d8   :  { %8908 = vmatmul.mubr.msk.bf16.gmra.mrb[44].mxu1 %vm1055_vm0, %v3024_v21  ;;  %v3179_v21 = vmul.f32 %v7469_v60, %v3161_v57  ;;  %v7518_v60 = vld [vmem:[%s13489_s4 + $0x1b8] sm:$0xff] }
 0x3d9   :  { %8911 = vmatprep.mubr.msk.bf16.mxu1 %vm10516_vm1, %v10515_v12  ;;  %8928 = vmatpush3.bf16.msra.mxu1 %v10401_v11  ;;  %v3180_v11 = vmul.f32 %v7470_v2, %v3162_v14  ;;  %v7499_v14 = vld [vmem:[%s13489_s4 + $0x1a8] sm:$0xff]  ;;  %v10419_v2 = vld [vmem:[%s13487_s2 + $0x20] sm:$0xff]  }
 0x3da   :  { %8929 = vmatprep.subr.bf16.mxu1 %v10515_v12  ;;  %9064 = vmatpush3.bf16.msra.mxu0 %v10419_v2 }
 0x3db   :  { %v3186_v53 = vpack.c.bf16 %v3180_v11, %v3179_v21  ;;  %9065 = vmatprep.subr.bf16.mxu0 %v10515_v12  ;;  %v7517_v11 = vld [vmem:[%s13489_s4 + $0x1b0] sm:$0xff]  ;;  %v3498_v21 = vmul.f32 %v7518_v60, %v3480_v55  ;;  %v3642_v55 = vld [vmem:[#allocation2 + $0x1e] sm:$0xff]  ;;  %v7545_v60 = vld [vmem:[%s13489_s4 + $0x208] sm:$0xff] }
 0x3dd   :  { %8930 = vmatpush3.bf16.msra.mxu1 %v10402_v63  ;;  %v7472_v63 = vld [vmem:[%s13489_s4 + $0x158] sm:$0xff] }
 0x3de   :  { %8951 = vmatprep.subr.bf16.mxu1 %v10515_v12 }
 0x3e0   :  { %8912 = vmatmul.mubr.msk.bf16.gmra.mrb[48].mxu1 %vm1055_vm0, %v3025_v4  ;;  %v3182_v4 = vmul.f32 %v7472_v63, %v3164_v44  ;;  %v10411_v44 = vld [vmem:[%s13488_s3 + $0xe0] sm:$0xff]  }
 0x3e1   :  { %8915 = vmatprep.mubr.msk.bf16.mxu1 %vm10516_vm1, %v10515_v12 }
 0x3e2   :  { %v3187_v13 = vpack.c.bf16 %v3182_v4, %v3181_v7  ;;  %v3481_v4 = vld [vmem:[#allocation2 + $0x1d] sm:$0xff] }
 0x3e3   :  { %v7519_v7 = vld [vmem:[%s13489_s4 + $0x1c0] sm:$0xff] }
 0x3e8   :  { %8916 = vmatmul.mubr.msk.bf16.gmra.mrb[52].mxu1 %vm1055_vm0, %v3026_v56  ;;  %v3183_v56 = vmul.f32 %v7473_v18, %v3165_v17  ;;  %v3500_v17 = vmul.f32 %v7520_v3, %v3482_v0  ;;  %v3499_v18 = vmul.f32 %v7519_v7, %v3481_v4  ;;  %v7548_v0 = vld [vmem:[%s13489_s4 + $0x220] sm:$0xff]  ;;  %v3644_v3 = vld [vmem:[#allocation2 + $0x2e] sm:$0xff]  ;;  %v7547_v4 = vld [vmem:[%s13489_s4 + $0x218] sm:$0xff] }
 0x3e9   :  { %8919 = vmatprep.mubr.msk.bf16.mxu1 %vm10516_vm1, %v10515_v12  ;;  %v10418_v7 = vld [vmem:[%s13488_s3 + $0x118] sm:$0xff]  }
 0x3ea   :  { %v3188_v22 = vpack.c.bf16 %v3183_v56, %v3183_v56  ;;  %v10413_v56 = vld [vmem:[%s13488_s3 + $0xf0] sm:$0xff]  }
 0x3f0   :  { %8920 = vmatmul.mubr.msk.bf16.gmra.mrb[56].mxu1 %vm1055_vm0, %v3027_v27  ;;  %v7491_v27 = vld [vmem:[%s13489_s4 + $0x168] sm:$0xff] }
 0x3f1   :  { %8931 = vmatprep.mubr.msk.bf16.mxu1 %vm10516_vm1, %v10515_v12  ;;  %v3336_v32 = vmul.f32 %v7491_v27, %v11621_v10  ;;  %v10408_v10 = vld [vmem:[%s13488_s3 + $0xc8] sm:$0xff]   ;;  %v7522_v27 = vld [vmem:[%s13489_s4 + $0x1d8] sm:$0xff] }
 0x3f3   :  { %v3345_v26 = vpack.c.bf16 %v3337_v31, %v3336_v32  ;;  %v3483_v31 = vld [vmem:[#allocation2 + $0x2d] sm:$0xff] }
 0x3f4   :  { %v7521_v32 = vld [vmem:[%s13489_s4 + $0x1d0] sm:$0xff] }
 0x3f5   :  { %v3501_v16 = vmul.f32 %v7521_v32, %v3483_v31 }
 0x3f8   :  { %8932 = vmatmul.mubr.msk.bf16.vlgmr.msra.gmra.mrb[40].mxu1 %vm1055_vm0, %v3184_v43  ;;  %v10409_v43 = vld [vmem:[%s13488_s3 + $0xd0] sm:$0xff]  }
 0x3f9   :  { %8935 = vmatprep.mubr.msk.bf16.mxu1 %vm10516_vm1, %v10515_v12  ;;  %8952 = vmatpush3.bf16.msra.mxu1 %v10403_v40  ;;  %v3338_v40 = vmul.f32 %v7493_v29, %v11636_v25  ;;  %v7495_v25 = vld [vmem:[%s13489_s4 + $0x188] sm:$0xff] }
 0x3fa   :  { %8953 = vmatprep.subr.bf16.mxu1 %v10515_v12  ;;  %v3340_v49 = vmul.f32 %v7495_v25, %v11659_v37  ;;  %v3342_v37 = vmul.f32 %v7497_v45, %v11679_v59  ;;  %v7544_v45 = vld [vmem:[%s13489_s4 + $0x200] sm:$0xff] }
 0x3fb   :  { %v3346_v24 = vpack.c.bf16 %v3339_v34, %v3338_v40  ;;  %v7524_v34 = vld [vmem:[%s13489_s4 + $0x1e8] sm:$0xff]  ;;  %v3485_v40 = vld [vmem:[#allocation2 + $0x3d] sm:$0xff] }
 0x3fd   :  { %8954 = vmatpush3.bf16.msra.mxu1 %v10404_v30  ;;  %v3347_v30 = vpack.c.bf16 %v3341_v47, %v3340_v49  ;;  %v7525_v47 = vld [vmem:[%s13489_s4 + $0x1f0] sm:$0xff] }
 0x3fe   :  { %8955 = vmatprep.subr.bf16.mxu1 %v10515_v12 }
 0x400   :  { %8936 = vmatmul.mubr.msk.bf16.gmra.mrb[44].mxu1 %vm1055_vm0, %v3185_v35  ;;  %v3326_v35 = vld [vmem:[#allocation2 + $0x49] sm:$0xff] }
 0x401   :  { %8939 = vmatprep.mubr.msk.bf16.mxu1 %vm10516_vm1, %v10515_v12  ;;  %8956 = vmatpush3.bf16.msra.mxu1 %v10405_v50  ;;  %v3348_v50 = vpack.c.bf16 %v3343_v20, %v3342_v37  ;;  %v3344_v57 = vmul.f32 %v7499_v14, %v3326_v35  ;;  %v3640_v20 = vld [vmem:[#allocation2 + $0xe] sm:$0xff]  ;;  %v7543_v37 = vld [vmem:[%s13489_s4 + $0x1f8] sm:$0xff]  ;;  %v10415_v14 = vld [vmem:[%s13488_s3 + $0x100] sm:$0xff]  }
 0x402   :  { %8957 = vmatprep.subr.bf16.mxu1 %v10515_v12  ;;  %v3658_v35 = vmul.f32 %v7543_v37, %v3640_v20  ;;  %v7575_v20 = vld [vmem:[%s13489_s4 + $0x270] sm:$0xff] }
 0x403   :  { %v3349_v59 = vpack.c.bf16 %v3344_v57, %v3344_v57  ;;  %v3643_v57 = vld [vmem:[#allocation2 + $0x26] sm:$0xff] }
 0x405   :  { %8958 = vmatpush3.bf16.msra.mxu1 %v10406_v61  ;;  %v3479_v61 = vld [vmem:[#allocation2 + $0xd] sm:$0xff] }
 0x406   :  { %8979 = vmatprep.subr.bf16.mxu1 %v10515_v12 }
 0x408   :  { %8940 = vmatmul.mubr.msk.bf16.gmra.mrb[48].mxu1 %vm1055_vm0, %v3186_v53  ;;  %v3497_v53 = vmul.f32 %v7517_v11, %v3479_v61  ;;  %v10416_v61 = vld [vmem:[%s13488_s3 + $0x108] sm:$0xff]  }
 0x409   :  { %8943 = vmatprep.mubr.msk.bf16.mxu1 %vm10516_vm1, %v10515_v12 }
 0x40a   :  { %v3506_v63 = vpack.c.bf16 %v3498_v21, %v3497_v53  ;;  %v3660_v21 = vmul.f32 %v7545_v60, %v3642_v55  ;;  %v10417_v53 = vld [vmem:[%s13488_s3 + $0x110] sm:$0xff]  }
 0x410   :  { %8944 = vmatmul.mubr.msk.bf16.gmra.mrb[52].mxu1 %vm1055_vm0, %v3187_v13  ;;  %v10412_v13 = vld [vmem:[%s13488_s3 + $0xe8] sm:$0xff]  }
 0x411   :  { %8947 = vmatprep.mubr.msk.bf16.mxu1 %vm10516_vm1, %v10515_v12 }
 0x418   :  { %8948 = vmatmul.mubr.msk.bf16.gmra.mrb[56].mxu1 %vm1055_vm0, %v3188_v22  ;;  %v3507_v22 = vpack.c.bf16 %v3500_v17, %v3499_v18  ;;  %v3662_v17 = vmul.f32 %v7547_v4, %v3644_v3 }
 0x419   :  { %8959 = vmatprep.mubr.msk.bf16.mxu1 %vm10516_vm1, %v10515_v12 }
 0x420   :  { %8960 = vmatmul.mubr.msk.bf16.vlgmr.msra.gmra.mrb[40].mxu1 %vm1055_vm0, %v3345_v26  ;;  %v3502_v26 = vmul.f32 %v7522_v27, %v3484_v23  ;;  %v3646_v23 = vld [vmem:[#allocation2 + $0x3e] sm:$0xff]  ;;  %v7549_v27 = vld [vmem:[%s13489_s4 + $0x228] sm:$0xff] }
 0x421   :  { %8963 = vmatprep.mubr.msk.bf16.mxu1 %vm10516_vm1, %v10515_v12  ;;  %8980 = vmatpush3.bf16.msra.mxu1 %v10407_v33  ;;  %v10414_v33 = vld [vmem:[%s13488_s3 + $0xf8] sm:$0xff]   ;;  %v3664_v32 = vmul.f32 %v7549_v27, %v3646_v23 }
 0x422   :  { %8981 = vmatprep.subr.bf16.mxu1 %v10515_v12  ;;  %v3508_v29 = vpack.c.bf16 %v3502_v26, %v3501_v16  ;;  %v3648_v26 = vld [vmem:[#allocation2 + $0x4e] sm:$0xff]  ;;  %v7551_v16 = vld [vmem:[%s13489_s4 + $0x238] sm:$0xff] }
 0x425   :  { %8982 = vmatpush3.bf16.msra.mxu1 %v10408_v10  ;;  %v3486_v10 = vld [vmem:[#allocation2 + $0x45] sm:$0xff] }
 0x426   :  { %8983 = vmatprep.subr.bf16.mxu1 %v10515_v12 }
 0x428   :  { %8964 = vmatmul.mubr.msk.bf16.gmra.mrb[44].mxu1 %vm1055_vm0, %v3346_v24  ;;  %v3504_v24 = vmul.f32 %v7524_v34, %v3486_v10  ;;  %v7570_v34 = vld [vmem:[%s13489_s4 + $0x248] sm:$0xff] }
 0x429   :  { %8967 = vmatprep.mubr.msk.bf16.mxu1 %vm10516_vm1, %v10515_v12  ;;  %8984 = vmatpush3.bf16.msra.mxu1 %v10409_v43  ;;  %v7523_v43 = vld [vmem:[%s13489_s4 + $0x1e0] sm:$0xff] }
 0x42a   :  { %8985 = vmatprep.subr.bf16.mxu1 %v10515_v12  ;;  %v3503_v39 = vmul.f32 %v7523_v43, %v3485_v40  ;;  %v7569_v40 = vld [vmem:[%s13489_s4 + $0x240] sm:$0xff]  ;;  %v3820_v43 = vmul.f32 %v7570_v34, %v11784_v54  ;;  %v7597_v34 = vld [vmem:[%s13489_s4 + $0x58] sm:$0xff] }
 0x42c   :  { %v3509_v25 = vpack.c.bf16 %v3504_v24, %v3503_v39  ;;  %v3819_v24 = vmul.f32 %v7569_v40, %v11761_v46  ;;  %v7574_v46 = vld [vmem:[%s13489_s4 + $0x268] sm:$0xff] }
 0x42d   :  { %8986 = vmatpush3.bf16.msra.mxu1 %v10410_v41  ;;  %v3487_v41 = vld [vmem:[#allocation2 + $0x4d] sm:$0xff] }
 0x42e   :  { %9007 = vmatprep.subr.bf16.mxu1 %v10515_v12  ;;  %v3505_v49 = vmul.f32 %v7525_v47, %v3487_v41  ;;  %v3828_v39 = vpack.c.bf16 %v3820_v43, %v3819_v24  ;;  %v7571_v41 = vld [vmem:[%s13489_s4 + $0x250] sm:$0xff]  ;;  %v7598_v43 = vld [vmem:[%s13489_s4 + $0x60] sm:$0xff] }
 0x42f   :  { %v3821_v54 = vmul.f32 %v7571_v41, %v11776_v51  ;;  %v7576_v51 = vld [vmem:[%s13489_s4 + $0x278] sm:$0xff] }
 0x430   :  { %8968 = vmatmul.mubr.msk.bf16.gmra.mrb[48].mxu1 %vm1055_vm0, %v3347_v30  ;;  %v3510_v30 = vpack.c.bf16 %v3505_v49, %v3505_v49  ;;  %v3826_v37 = vmul.f32 %v7576_v51, %v11834_v19  ;;  %v10421_v19 = vld [vmem:[%s13487_s2 + $0x30] sm:$0xff]   ;;  %v7599_v51 = vld [vmem:[%s13489_s4 + $0x68] sm:$0xff] }
 0x431   :  { %8971 = vmatprep.mubr.msk.bf16.mxu1 %vm10516_vm1, %v10515_v12 }
 0x438   :  { %8972 = vmatmul.mubr.msk.bf16.gmra.mrb[52].mxu1 %vm1055_vm0, %v3348_v50  ;;  %v3659_v50 = vmul.f32 %v7544_v45, %v3641_v48  ;;  %v3824_v48 = vmul.f32 %v7574_v46, %v11827_v9  ;;  %v3825_v9 = vmul.f32 %v7575_v20, %v11819_v5  ;;  %v10420_v5 = vld [vmem:[%s13487_s2 + $0x28] sm:$0xff]  }
 0x439   :  { %8975 = vmatprep.mubr.msk.bf16.mxu1 %vm10516_vm1, %v10515_v12  ;;  %9066 = vmatpush3.bf16.msra.mxu0 %v10420_v5 }
 0x43a   :  { %v3667_v2 = vpack.c.bf16 %v3659_v50, %v3658_v35  ;;  %v3831_v50 = vpack.c.bf16 %v3826_v37, %v3825_v9  ;;  %v7577_v35 = vld [vmem:[%s13489_s4 + $0x280] sm:$0xff]  ;;  %9067 = vmatprep.subr.bf16.mxu0 %v10515_v12  ;;  %v7600_v37 = vld [vmem:[%s13489_s4 + $0x70] sm:$0xff] }
 0x43d   :  { %9068 = vmatpush3.bf16.msra.mxu0 %v10421_v19 }
 0x43e   :  { %9069 = vmatprep.subr.bf16.mxu0 %v10515_v12 }
 0x440   :  { %8976 = vmatmul.mubr.msk.bf16.gmra.mrb[56].mxu1 %vm1055_vm0, %v3349_v59  ;;  %v7546_v59 = vld [vmem:[%s13489_s4 + $0x210] sm:$0xff] }
 0x441   :  { %8987 = vmatprep.mubr.msk.bf16.mxu1 %vm10516_vm1, %v10515_v12  ;;  %v3661_v11 = vmul.f32 %v7546_v59, %v3643_v57  ;;  %v10422_v57 = vld [vmem:[%s13487_s2 + $0x38] sm:$0xff]  }
 0x442   :  { %9070 = vmatpush3.bf16.msra.mxu0 %v10422_v57 }
 0x443   :  { %9091 = vmatprep.subr.bf16.mxu0 %v10515_v12 }
 0x448   :  { %8988 = vmatmul.mubr.msk.bf16.vlgmr.msra.gmra.mrb[40].mxu1 %vm1055_vm0, %v3506_v63  ;;  %v3645_v63 = vld [vmem:[#allocation2 + $0x36] sm:$0xff] }
 0x449   :  { %8991 = vmatprep.mubr.msk.bf16.mxu1 %vm10516_vm1, %v10515_v12  ;;  %9008 = vmatpush3.bf16.msra.mxu1 %v10411_v44  ;;  %v3668_v44 = vpack.c.bf16 %v3661_v11, %v3660_v21 }
 0x44a   :  { %9009 = vmatprep.subr.bf16.mxu1 %v10515_v12 }
 0x44d   :  { %9010 = vmatpush3.bf16.msra.mxu1 %v10412_v13  ;;  %v3663_v13 = vmul.f32 %v7548_v0, %v3645_v63 }
 0x44e   :  { %9011 = vmatprep.subr.bf16.mxu1 %v10515_v12 }
 0x44f   :  { %v3669_v18 = vpack.c.bf16 %v3663_v13, %v3662_v17 }
 0x450   :  { %8992 = vmatmul.mubr.msk.bf16.gmra.mrb[44].mxu1 %vm1055_vm0, %v3507_v22  ;;  %v7550_v22 = vld [vmem:[%s13489_s4 + $0x230] sm:$0xff] }
 0x451   :  { %8995 = vmatprep.mubr.msk.bf16.mxu1 %vm10516_vm1, %v10515_v12  ;;  %9012 = vmatpush3.bf16.msra.mxu1 %v10413_v56  ;;  %v3647_v56 = vld [vmem:[#allocation2 + $0x46] sm:$0xff] }
 0x452   :  { %9013 = vmatprep.subr.bf16.mxu1 %v10515_v12  ;;  %v3665_v31 = vmul.f32 %v7550_v22, %v3647_v56 }
 0x455   :  { %9014 = vmatpush3.bf16.msra.mxu1 %v10414_v33  ;;  %v3670_v33 = vpack.c.bf16 %v3665_v31, %v3664_v32  ;;  %v10423_v31 = vld [vmem:[%s13487_s2] sm:$0xff]  }
 0x456   :  { %9035 = vmatprep.subr.bf16.mxu1 %v10515_v12 }
 0x458   :  { %8996 = vmatmul.mubr.msk.bf16.gmra.mrb[48].mxu1 %vm1055_vm0, %v3508_v29  ;;  %v3666_v29 = vmul.f32 %v7551_v16, %v3648_v26 }
 0x459   :  { %8999 = vmatprep.mubr.msk.bf16.mxu1 %vm10516_vm1, %v10515_v12 }
 0x45a   :  { %v3671_v10 = vpack.c.bf16 %v3666_v29, %v3666_v29 }
 0x460   :  { %9000 = vmatmul.mubr.msk.bf16.gmra.mrb[52].mxu1 %vm1055_vm0, %v3509_v25  ;;  %v7572_v25 = vld [vmem:[%s13489_s4 + $0x258] sm:$0xff] }
 0x461   :  { %9003 = vmatprep.mubr.msk.bf16.mxu1 %vm10516_vm1, %v10515_v12  ;;  %v3822_v47 = vmul.f32 %v7572_v25, %v11807_v62 }
 0x463   :  { %v3829_v49 = vpack.c.bf16 %v3822_v47, %v3821_v54  ;;  %v10425_v54 = vld [vmem:[%s13487_s2 + $0x10] sm:$0xff]  }
 0x468   :  { %9004 = vmatmul.mubr.msk.bf16.gmra.mrb[56].mxu1 %vm1055_vm0, %v3510_v30  ;;  %v7573_v30 = vld [vmem:[%s13489_s4 + $0x260] sm:$0xff] }
 0x469   :  { %9015 = vmatprep.mubr.msk.bf16.mxu1 %vm10516_vm1, %v10515_v12  ;;  %v3823_v62 = vmul.f32 %v7573_v30, %v11799_v6  ;;  %v3809_v6 = vld [vmem:[#allocation2 + $0x4f] sm:$0xff] }
 0x46b   :  { %v3830_v45 = vpack.c.bf16 %v3824_v48, %v3823_v62 }
 0x470   :  { %9016 = vmatmul.mubr.msk.bf16.vlgmr.msra.gmra.mrb[40].mxu1 %vm1055_vm0, %v3667_v2 }
 0x471   :  { %9019 = vmatprep.mubr.msk.bf16.mxu1 %vm10516_vm1, %v10515_v12  ;;  %9036 = vmatpush3.bf16.msra.mxu1 %v10415_v14  ;;  %v3827_v14 = vmul.f32 %v7577_v35, %v3809_v6 }
 0x472   :  { %9037 = vmatprep.subr.bf16.mxu1 %v10515_v12 }
 0x473   :  { %v3832_v2 = vpack.c.bf16 %v3827_v14, %v3827_v14 }
 0x475   :  { %9038 = vmatpush3.bf16.msra.mxu1 %v10416_v61 }
 0x476   :  { %9039 = vmatprep.subr.bf16.mxu1 %v10515_v12 }
 0x478   :  { %9020 = vmatmul.mubr.msk.bf16.gmra.mrb[44].mxu1 %vm1055_vm0, %v3668_v44 }
 0x479   :  { %9023 = vmatprep.mubr.msk.bf16.mxu1 %vm10516_vm1, %v10515_v12  ;;  %9040 = vmatpush3.bf16.msra.mxu1 %v10417_v53 }
 0x47a   :  { %9041 = vmatprep.subr.bf16.mxu1 %v10515_v12 }
 0x47d   :  { %9042 = vmatpush3.bf16.msra.mxu1 %v10418_v7 }
 0x47e   :  { %9315 = vmatprep.subr.bf16.mxu1 %v10515_v12 }
 0x480   :  { %9024 = vmatmul.mubr.msk.bf16.gmra.mrb[48].mxu1 %vm1055_vm0, %v3669_v18  ;;  %v7595_v18 = vld [vmem:[%s13489_s4 + $0x48] sm:$0xff] }
 0x481   :  { %9027 = vmatprep.mubr.msk.bf16.mxu1 %vm10516_vm1, %v10515_v12 }
 0x488   :  { %9028 = vmatmul.mubr.msk.bf16.gmra.mrb[52].mxu1 %vm1055_vm0, %v3670_v33 }
 0x489   :  { %9031 = vmatprep.mubr.msk.bf16.mxu1 %vm10516_vm1, %v10515_v12 }
 0x490   :  { %9032 = vmatmul.mubr.msk.bf16.gmra.mrb[56].mxu1 %vm1055_vm0, %v3671_v10 }
 0x491   :  { %9043 = vmatprep.mubr.msk.bf16.mxu1 %vm10516_vm1, %v10515_v12 }
 0x498   :  { %9044 = vmatmul.mubr.msk.bf16.vlgmr.msra.gmra.mrb[40].mxu1 %vm1055_vm0, %v3828_v39 }
 0x499   :  { %9047 = vmatprep.mubr.msk.bf16.mxu1 %vm10516_vm1, %v10515_v12 }
 0x4a0   :  { %9048 = vmatmul.mubr.msk.bf16.gmra.mrb[44].mxu1 %vm1055_vm0, %v3829_v49 }
 0x4a1   :  { %9051 = vmatprep.mubr.msk.bf16.mxu1 %vm10516_vm1, %v10515_v12 }
 0x4a8   :  { %9052 = vmatmul.mubr.msk.bf16.gmra.mrb[48].mxu1 %vm1055_vm0, %v3830_v45 }
 0x4a9   :  { %9055 = vmatprep.mubr.msk.bf16.mxu1 %vm10516_vm1, %v10515_v12 }
 0x4b0   :  { %9056 = vmatmul.mubr.msk.bf16.gmra.mrb[52].mxu1 %vm1055_vm0, %v3831_v50 }
 0x4b1   :  { %9059 = vmatprep.mubr.msk.bf16.mxu1 %vm10516_vm1, %v10515_v12 }
 0x4b8   :  { %9060 = vmatmul.mubr.msk.bf16.gmra.mrb[56].mxu1 %vm1055_vm0, %v3832_v2 }
 0x4b9   :  { %9323 = vmatprep.mubr.msk.bf16.mxu1 %vm10516_vm1, %v10515_v12 }
 0x56b   :  { %v3915_v59 = vpop.f32.mrb[40].mxu1 }
 0x56c   :  { %v3962_v55 = vmul.f32 0.5, %v3915_v59  ;;  %v9045_v60 = vpop.f32.mrb[41].mxu1 }
 0x56d   :  { %v3918_v61 = vpop.f32.mrb[42].mxu1  ;;  %v7601_v60 = vld [vmem:[%s13489_s4 + $0x78] sm:$0xff] }
 0x56e   :  { %v12153_v11 = vadd.f32 %v3962_v55, %v10927_v36  ;;  %v3963_v21 = vmul.f32 0.5, %v3918_v61  ;;  %v9046_v53 = vpop.f32.mrb[43].mxu1  ;;  %v7602_v61 = vld [vmem:[%s13489_s4 + $0x80] sm:$0xff] }
 0x570   :  { %3980 = vst.msk [vmem:[#allocation2 + $0x8] sm:$0xff] %vm1055_vm0, %v12153_v11  ;;  %v12158_v44 = vadd.f32 %v3963_v21, %v10932_v38  ;;  %v7596_v38 = vld [vmem:[%s13489_s4 + $0x50] sm:$0xff] }
 0x572   :  { %3981 = vst.msk [vmem:[#allocation2 + $0x10] sm:$0xff] %vm1055_vm0, %v12158_v44 }
 0x573   :  { %v3923_v63 = vpop.f32.mrb[44].mxu1 }
 0x574   :  { %v3964_v0 = vmul.f32 0.5, %v3923_v63  ;;  %v9049_v3 = vpop.f32.mrb[45].mxu1 }
 0x575   :  { %v3926_v4 = vpop.f32.mrb[46].mxu1 }
 0x576   :  { %v12163_v7 = vadd.f32 %v3964_v0, %v10937_v52  ;;  %v3965_v36 = vmul.f32 0.5, %v3926_v4  ;;  %v9050_v13 = vpop.f32.mrb[47].mxu1  ;;  %v7603_v0 = vld [vmem:[%s13489_s4 + $0x88] sm:$0xff] }
 0x577   :  { %v4029_v17 = vld [vmem:[#allocation2 + $0x2] sm:$0xff] }
 0x578   :  { %3982 = vst.msk [vmem:[#allocation2 + $0x18] sm:$0xff] %vm1055_vm0, %v12163_v7  ;;  %v12174_v56 = vadd.f32 %v3965_v36, %v10948_v42  ;;  %v4047_v52 = vmul.f32 %v7595_v18, %v4029_v17  ;;  %v3999_v17 = vld [vmem:[%s13489_s4 + $0x8] sm:$0xff] }
 0x579   :  { %v4030_v22 = vld [vmem:[#allocation2 + $0xa] sm:$0xff]  ;;  %v3989_v18 = vld [vmem:[#allocation2 + $0x1] sm:$0xff] }
 0x57a   :  { %3983 = vst.msk [vmem:[#allocation2 + $0x20] sm:$0xff] %vm1055_vm0, %v12174_v56  ;;  %v4048_v23 = vmul.f32 %v7596_v38, %v4030_v22  ;;  %v12252_v13 = vld [vmem:[#allocation2 + $0x9] sm:$0xff]  ;;  %v3998_v38 = vld [vmem:[%s13489_s4] sm:$0xff] }
 0x57b   :  { %v3931_v27 = vpop.f32.mrb[48].mxu1  ;;  %v4008_v22 = vmul.f32 %v3999_v17, %v12252_v13  ;;  %v7635_v17 = vld [vmem:[%s13489_s4 + $0xb8] sm:$0xff] }
 0x57c   :  { %v3966_v32 = vmul.f32 0.5, %v3931_v27  ;;  %v9053_v33 = vpop.f32.mrb[49].mxu1  ;;  %v4056_v26 = vpack.c.bf16 %v4048_v23, %v4047_v52  ;;  %v4007_v52 = vmul.f32 %v3998_v38, %v3989_v18  ;;  %v10427_v23 = vld [vmem:[%s13487_s2 + $0x40] sm:$0xff]   ;;  %v7634_v38 = vld [vmem:[%s13489_s4 + $0xb0] sm:$0xff] }
 0x57d   :  { %v3934_v16 = vpop.f32.mrb[50].mxu1 }
 0x57e   :  { %v12182_v29 = vadd.f32 %v3966_v32, %v10956_v15  ;;  %v3967_v42 = vmul.f32 0.5, %v3934_v16  ;;  %v9054_v10 = vpop.f32.mrb[51].mxu1  ;;  %9072 = vmatmul.mubr.msk.bf16.vlgmr.msra.gmra.mrb[60].mxu0 %vm1055_vm0, %v4056_v26  ;;  %v10424_v15 = vld [vmem:[%s13487_s2 + $0x8] sm:$0xff]   ;;  %v4016_v27 = vpack.c.bf16 %v4008_v22, %v4007_v52  ;;  %v4001_v32 = vld [vmem:[%s13489_s4 + $0x18] sm:$0xff]  ;;  %v4000_v26 = vld [vmem:[%s13489_s4 + $0x10] sm:$0xff] }
 0x57f   :  { %9075 = vmatprep.mubr.msk.bf16.mxu0 %vm10516_vm1, %v10515_v12  ;;  %v4031_v40 = vld [vmem:[#allocation2 + $0x12] sm:$0xff]  ;;  %9092 = vmatpush3.bf16.msra.mxu0 %v10423_v31  ;;  %v10428_v16 = vld [vmem:[%s13487_s2 + $0x48] sm:$0xff]  }
 0x580   :  { %3984 = vst.msk [vmem:[#allocation2 + $0x28] sm:$0xff] %vm1055_vm0, %v12182_v29  ;;  %v12199_v24 = vadd.f32 %v3967_v42, %v10973_v58  ;;  %9093 = vmatprep.subr.bf16.mxu0 %v10515_v12  ;;  %v4049_v25 = vmul.f32 %v7597_v34, %v4031_v40  ;;  %v12275_v33 = vld [vmem:[#allocation2 + $0x11] sm:$0xff] }
 0x581   :  { %v4032_v39 = vld [vmem:[#allocation2 + $0x1a] sm:$0xff]  ;;  %v4009_v10 = vmul.f32 %v4000_v26, %v12275_v33  ;;  %v10429_v34 = vld [vmem:[%s13487_s2 + $0x50] sm:$0xff]   ;;  %v7637_v26 = vld [vmem:[%s13489_s4 + $0xc8] sm:$0xff] }
 0x582   :  { %3985 = vst.msk [vmem:[#allocation2 + $0x30] sm:$0xff] %vm1055_vm0, %v12199_v24  ;;  %v4050_v41 = vmul.f32 %v7598_v43, %v4032_v39  ;;  %v12267_v31 = vld [vmem:[#allocation2 + $0x19] sm:$0xff] }
 0x583   :  { %v3939_v47 = vpop.f32.mrb[52].mxu1  ;;  %9094 = vmatpush3.bf16.msra.mxu0 %v10424_v15  ;;  %v4010_v42 = vmul.f32 %v4001_v32, %v12267_v31  ;;  %v4003_v15 = vld [vmem:[%s13489_s4 + $0x28] sm:$0xff]  ;;  %v10434_v22 = vld [vmem:[%s13487_s2 + $0x78] sm:$0xff]  }
 0x584   :  { %v3968_v49 = vmul.f32 0.5, %v3939_v47  ;;  %v9057_v46 = vpop.f32.mrb[53].mxu1  ;;  %v4057_v30 = vpack.c.bf16 %v4050_v41, %v4049_v25  ;;  %9095 = vmatprep.subr.bf16.mxu0 %v10515_v12  ;;  %v4002_v25 = vld [vmem:[%s13489_s4 + $0x20] sm:$0xff]  ;;  %v10430_v41 = vld [vmem:[%s13487_s2 + $0x58] sm:$0xff]  }
 0x585   :  { %v3942_v58 = vpop.f32.mrb[54].mxu1  ;;  %v4017_v40 = vpack.c.bf16 %v4010_v42, %v4009_v10  ;;  %v7636_v42 = vld [vmem:[%s13489_s4 + $0xc0] sm:$0xff] }
 0x586   :  { %v12209_v48 = vadd.f32 %v3968_v49, %v10983_v28  ;;  %v3969_v62 = vmul.f32 0.5, %v3942_v58  ;;  %v9058_v45 = vpop.f32.mrb[55].mxu1  ;;  %9076 = vmatmul.mubr.msk.bf16.gmra.mrb[64].mxu0 %vm1055_vm0, %v4057_v30  ;;  %v10426_v28 = vld [vmem:[%s13487_s2 + $0x18] sm:$0xff]  }
 0x587   :  { %9079 = vmatprep.mubr.msk.bf16.mxu0 %vm10516_vm1, %v10515_v12  ;;  %v4033_v20 = vld [vmem:[#allocation2 + $0x22] sm:$0xff]  ;;  %9096 = vmatpush3.bf16.msra.mxu0 %v10425_v54  ;;  %v4005_v30 = vld [vmem:[%s13489_s4 + $0x38] sm:$0xff] }
 0x588   :  { %3986 = vst.msk [vmem:[#allocation2 + $0x38] sm:$0xff] %vm1055_vm0, %v12209_v48  ;;  %v12226_v9 = vadd.f32 %v3969_v62, %v11000_v8  ;;  %9097 = vmatprep.subr.bf16.mxu0 %v10515_v12  ;;  %v4051_v6 = vmul.f32 %v7599_v51, %v4033_v20  ;;  %v12298_v39 = vld [vmem:[#allocation2 + $0x21] sm:$0xff]  ;;  %v4004_v62 = vld [vmem:[%s13489_s4 + $0x30] sm:$0xff] }
 0x589   :  { %v4034_v50 = vld [vmem:[#allocation2 + $0x2a] sm:$0xff]  ;;  %v4011_v54 = vmul.f32 %v4002_v25, %v12298_v39 }
 0x58a   :  { %3987 = vst.msk [vmem:[#allocation2 + $0x40] sm:$0xff] %vm1055_vm0, %v12226_v9  ;;  %v4052_v35 = vmul.f32 %v7600_v37, %v4034_v50  ;;  %v12290_v43 = vld [vmem:[#allocation2 + $0x29] sm:$0xff] }
 0x58b   :  { %v3947_v14 = vpop.f32.mrb[56].mxu1  ;;  %9098 = vmatpush3.bf16.msra.mxu0 %v10426_v28  ;;  %v4012_v47 = vmul.f32 %v4003_v15, %v12290_v43  ;;  %v4006_v28 = vld [vmem:[%s13489_s4 + $0x40] sm:$0xff]  ;;  %v7638_v25 = vld [vmem:[%s13489_s4 + $0xd0] sm:$0xff] }
 0x58c   :  { %v3970_v2 = vmul.f32 0.5, %v3947_v14  ;;  %v9061_v5 = vpop.f32.mrb[57].mxu1  ;;  %v4058_v19 = vpack.c.bf16 %v4052_v35, %v4051_v6  ;;  %9119 = vmatprep.subr.bf16.mxu0 %v10515_v12  ;;  %v4292_v35 = vld [vmem:[#allocation2 + $0xb] sm:$0xff]  ;;  %v7631_v14 = vld [vmem:[%s13489_s4 + $0x98] sm:$0xff]  ;;  %v4295_v18 = vld [vmem:[#allocation2 + $0x23] sm:$0xff] }
 0x58d   :  { %v3950_v57 = vpop.f32.mrb[58].mxu1  ;;  %v4018_v49 = vpack.c.bf16 %v4012_v47, %v4011_v54  ;;  %v7630_v5 = vld [vmem:[%s13489_s4 + $0x90] sm:$0xff] }
 0x58e   :  { %v12233_v59 = vadd.f32 %v3970_v2, %v11007_v1  ;;  %v9062_v8 = vpop.f32.mrb[59].mxu1  ;;  %9080 = vmatmul.mubr.msk.bf16.gmra.mrb[68].mxu0 %vm1055_vm0, %v4058_v19  ;;  %v4291_v2 = vld [vmem:[#allocation2 + $0x3] sm:$0xff]  ;;  %v4310_v19 = vmul.f32 %v7631_v14, %v4292_v35  ;;  %v12392_v54 = vld [vmem:[#allocation2 + $0xf] sm:$0xff]  ;;  %v12415_v35 = vld [vmem:[#allocation2 + $0x17] sm:$0xff] }
 0x58f   :  { %9083 = vmatprep.mubr.msk.bf16.mxu0 %vm10516_vm1, %v10515_v12  ;;  %v4035_v55 = vld [vmem:[#allocation2 + $0x32] sm:$0xff]  ;;  %v4309_v57 = vmul.f32 %v7630_v5, %v4291_v2  ;;  %v10431_v8 = vld [vmem:[%s13487_s2 + $0x60] sm:$0xff]   ;;  %v7658_v14 = vld [vmem:[%s13489_s4 + $0xe8] sm:$0xff] }
 0x590   :  { %3988 = vst.msk [vmem:[#allocation2 + $0x48] sm:$0xff] %vm1055_vm0, %v12233_v59  ;;  %v4053_v21 = vmul.f32 %v7601_v60, %v4035_v55  ;;  %v12318_v58 = vld [vmem:[#allocation2 + $0x31] sm:$0xff]  ;;  %v4294_v60 = vld [vmem:[#allocation2 + $0x1b] sm:$0xff]  ;;  %v10436_v2 = vld [vmem:[%s13487_s2 + $0x88] sm:$0xff]  }
 0x591   :  { %v4036_v1 = vld [vmem:[#allocation2 + $0x3a] sm:$0xff]  ;;  %v4013_v51 = vmul.f32 %v4004_v62, %v12318_v58  ;;  %v4318_v55 = vpack.c.bf16 %v4310_v19, %v4309_v57  ;;  %v4471_v19 = vmul.f32 %v7658_v14, %v12415_v35  ;;  %v10437_v57 = vld [vmem:[%s13487_s2 + $0x90] sm:$0xff]   ;;  %v7687_v14 = vld [vmem:[%s13489_s4 + $0x148] sm:$0xff] }
 0x592   :  { %v4054_v53 = vmul.f32 %v7602_v61, %v4036_v1  ;;  %v12310_v46 = vld [vmem:[#allocation2 + $0x39] sm:$0xff]  ;;  %v7633_v61 = vld [vmem:[%s13489_s4 + $0xa8] sm:$0xff] }
 0x593   :  { %v4014_v45 = vmul.f32 %v4005_v30, %v12310_v46  ;;  %v4293_v1 = vld [vmem:[#allocation2 + $0x13] sm:$0xff]  ;;  %v4298_v32 = vld [vmem:[#allocation2 + $0x3b] sm:$0xff]  ;;  %v4451_v30 = vld [vmem:[#allocation2 + $0x7] sm:$0xff] }
 0x594   :  { %v4059_v63 = vpack.c.bf16 %v4054_v53, %v4053_v21  ;;  %v7632_v21 = vld [vmem:[%s13489_s4 + $0xa0] sm:$0xff]  ;;  %v10432_v53 = vld [vmem:[%s13487_s2 + $0x68] sm:$0xff]   ;;  %v4316_v10 = vmul.f32 %v7637_v26, %v4298_v32  ;;  %v7656_v62 = vld [vmem:[%s13489_s4 + $0xd8] sm:$0xff] }
 0x595   :  { %v4019_v20 = vpack.c.bf16 %v4014_v45, %v4013_v51  ;;  %v4469_v51 = vmul.f32 %v7656_v62, %v4451_v30  ;;  %v4612_v26 = vld [vmem:[#allocation2 + $0x10] sm:$0xff]  ;;  %v10440_v62 = vld [vmem:[%s13487_s2 + $0xa8] sm:$0xff]  }
 0x596   :  { %9084 = vmatmul.mubr.msk.bf16.gmra.mrb[72].mxu0 %vm1055_vm0, %v4059_v63  ;;  %v4312_v63 = vmul.f32 %v7633_v61, %v4294_v60  ;;  %v7661_v60 = vld [vmem:[%s13489_s4 + $0x100] sm:$0xff]  ;;  %v7684_v30 = vld [vmem:[%s13489_s4 + $0x130] sm:$0xff] }
 0x597   :  { %9087 = vmatprep.mubr.msk.bf16.mxu0 %vm10516_vm1, %v10515_v12  ;;  %v4037_v3 = vld [vmem:[#allocation2 + $0x42] sm:$0xff] }
 0x598   :  { %v4055_v4 = vmul.f32 %v7603_v0, %v4037_v3  ;;  %v12325_v37 = vld [vmem:[#allocation2 + $0x41] sm:$0xff]  ;;  %v4311_v0 = vmul.f32 %v7632_v21, %v4293_v1  ;;  %v10433_v3 = vld [vmem:[%s13487_s2 + $0x70] sm:$0xff]   ;;  %v7660_v1 = vld [vmem:[%s13489_s4 + $0xf8] sm:$0xff] }
 0x599   :  { %v4015_v50 = vmul.f32 %v4006_v28, %v12325_v37  ;;  %v4299_v15 = vld [vmem:[#allocation2 + $0x43] sm:$0xff]  ;;  %v10438_v21 = vld [vmem:[%s13487_s2 + $0x98] sm:$0xff]  }
 0x59a   :  { %v4060_v36 = vpack.c.bf16 %v4055_v4, %v4055_v4  ;;  %v4319_v4 = vpack.c.bf16 %v4312_v63, %v4311_v0  ;;  %v12438_v61 = vld [vmem:[#allocation2 + $0x27] sm:$0xff] }
 0x59b   :  { %v4020_v6 = vpack.c.bf16 %v4015_v50, %v4015_v50  ;;  %v12407_v50 = vld [vmem:[#allocation2 + $0x1f] sm:$0xff]  ;;  %v4473_v63 = vmul.f32 %v7660_v1, %v12438_v61 }
 0x59c   :  { %v4618_v1 = vld [vmem:[#allocation2 + $0x40] sm:$0xff] }
 0x59e   :  { %9088 = vmatmul.mubr.msk.bf16.gmra.mrb[76].mxu0 %vm1055_vm0, %v4060_v36  ;;  %v4296_v36 = vld [vmem:[#allocation2 + $0x2b] sm:$0xff] }
 0x59f   :  { %9099 = vmatprep.mubr.msk.bf16.mxu0 %vm10516_vm1, %v10515_v12  ;;  %v4314_v52 = vmul.f32 %v7635_v17, %v4296_v36  ;;  %v12458_v36 = vld [vmem:[#allocation2 + $0x37] sm:$0xff]  ;;  %v7662_v17 = vld [vmem:[%s13489_s4 + $0x108] sm:$0xff] }
 0x5a6   :  { %9100 = vmatmul.mubr.msk.bf16.vlgmr.msra.gmra.mrb[60].mxu0 %vm1055_vm0, %v4016_v27 }
 0x5a7   :  { %9103 = vmatprep.mubr.msk.bf16.mxu0 %vm10516_vm1, %v10515_v12  ;;  %9120 = vmatpush3.bf16.msra.mxu0 %v10427_v23  ;;  %v4313_v23 = vmul.f32 %v7634_v38, %v4295_v18  ;;  %v4475_v38 = vmul.f32 %v7662_v17, %v12458_v36 }
 0x5a8   :  { %9121 = vmatprep.subr.bf16.mxu0 %v10515_v12 }
 0x5a9   :  { %v4320_v27 = vpack.c.bf16 %v4314_v52, %v4313_v23  ;;  %v12465_v52 = vld [vmem:[#allocation2 + $0x47] sm:$0xff]  ;;  %v7664_v23 = vld [vmem:[%s13489_s4 + $0x118] sm:$0xff] }
 0x5ab   :  { %9122 = vmatpush3.bf16.msra.mxu0 %v10428_v16  ;;  %v4297_v16 = vld [vmem:[#allocation2 + $0x33] sm:$0xff] }
 0x5ac   :  { %9123 = vmatprep.subr.bf16.mxu0 %v10515_v12 }
 0x5ae   :  { %9104 = vmatmul.mubr.msk.bf16.gmra.mrb[64].mxu0 %vm1055_vm0, %v4017_v40 }
 0x5af   :  { %9107 = vmatprep.mubr.msk.bf16.mxu0 %vm10516_vm1, %v10515_v12  ;;  %9124 = vmatpush3.bf16.msra.mxu0 %v10429_v34  ;;  %v4315_v34 = vmul.f32 %v7636_v42, %v4297_v16  ;;  %v7683_v16 = vld [vmem:[%s13489_s4 + $0x128] sm:$0xff] }
 0x5b0   :  { %9125 = vmatprep.subr.bf16.mxu0 %v10515_v12  ;;  %v4611_v42 = vld [vmem:[#allocation2 + $0x8] sm:$0xff] }
 0x5b1   :  { %v4321_v40 = vpack.c.bf16 %v4316_v10, %v4315_v34  ;;  %v7682_v10 = vld [vmem:[%s13489_s4 + $0x120] sm:$0xff]  ;;  %v4630_v34 = vmul.f32 %v7683_v16, %v4612_v26 }
 0x5b3   :  { %9126 = vmatpush3.bf16.msra.mxu0 %v10430_v41  ;;  %v4317_v41 = vmul.f32 %v7638_v25, %v4299_v15  ;;  %v10439_v15 = vld [vmem:[%s13487_s2 + $0xa0] sm:$0xff]  }
 0x5b4   :  { %9147 = vmatprep.subr.bf16.mxu0 %v10515_v12 }
 0x5b5   :  { %v4322_v47 = vpack.c.bf16 %v4317_v41, %v4317_v41  ;;  %v4614_v41 = vld [vmem:[#allocation2 + $0x20] sm:$0xff] }
 0x5b6   :  { %9108 = vmatmul.mubr.msk.bf16.gmra.mrb[68].mxu0 %vm1055_vm0, %v4018_v49  ;;  %v7657_v49 = vld [vmem:[%s13489_s4 + $0xe0] sm:$0xff] }
 0x5b7   :  { %9111 = vmatprep.mubr.msk.bf16.mxu0 %vm10516_vm1, %v10515_v12  ;;  %v4470_v45 = vmul.f32 %v7657_v49, %v12392_v54  ;;  %v4613_v49 = vld [vmem:[#allocation2 + $0x18] sm:$0xff] }
 0x5b9   :  { %v4478_v28 = vpack.c.bf16 %v4470_v45, %v4469_v51  ;;  %v4631_v51 = vmul.f32 %v7684_v30, %v4613_v49 }
 0x5be   :  { %9112 = vmatmul.mubr.msk.bf16.gmra.mrb[72].mxu0 %vm1055_vm0, %v4019_v20  ;;  %v10435_v20 = vld [vmem:[%s13487_s2 + $0x80] sm:$0xff]  }
 0x5bf   :  { %9115 = vmatprep.mubr.msk.bf16.mxu0 %vm10516_vm1, %v10515_v12 }
 0x5c6   :  { %9116 = vmatmul.mubr.msk.bf16.gmra.mrb[76].mxu0 %vm1055_vm0, %v4020_v6  ;;  %v7659_v6 = vld [vmem:[%s13489_s4 + $0xf0] sm:$0xff] }
 0x5c7   :  { %9127 = vmatprep.mubr.msk.bf16.mxu0 %vm10516_vm1, %v10515_v12  ;;  %v4472_v5 = vmul.f32 %v7659_v6, %v12407_v50  ;;  %v4616_v6 = vld [vmem:[#allocation2 + $0x30] sm:$0xff] }
 0x5ce   :  { %9128 = vmatmul.mubr.msk.bf16.vlgmr.msra.gmra.mrb[60].mxu0 %vm1055_vm0, %v4318_v55  ;;  %v12430_v55 = vld [vmem:[#allocation2 + $0x2f] sm:$0xff] }
 0x5cf   :  { %9131 = vmatprep.mubr.msk.bf16.mxu0 %vm10516_vm1, %v10515_v12  ;;  %9148 = vmatpush3.bf16.msra.mxu0 %v10431_v8  ;;  %v4479_v8 = vpack.c.bf16 %v4472_v5, %v4471_v19  ;;  %v7686_v5 = vld [vmem:[%s13489_s4 + $0x140] sm:$0xff]  ;;  %v10442_v19 = vld [vmem:[%s13487_s2 + $0xb8] sm:$0xff]  }
 0x5d0   :  { %9149 = vmatprep.subr.bf16.mxu0 %v10515_v12 }
 0x5d3   :  { %9150 = vmatpush3.bf16.msra.mxu0 %v10432_v53  ;;  %v4474_v53 = vmul.f32 %v7661_v60, %v12430_v55 }
 0x5d4   :  { %9151 = vmatprep.subr.bf16.mxu0 %v10515_v12 }
 0x5d5   :  { %v4480_v0 = vpack.c.bf16 %v4474_v53, %v4473_v63  ;;  %v4617_v53 = vld [vmem:[#allocation2 + $0x38] sm:$0xff]  ;;  %v7688_v63 = vld [vmem:[%s13489_s4 + $0x150] sm:$0xff] }
 0x5d6   :  { %9132 = vmatmul.mubr.msk.bf16.gmra.mrb[64].mxu0 %vm1055_vm0, %v4319_v4  ;;  %v7663_v4 = vld [vmem:[%s13489_s4 + $0x110] sm:$0xff] }
 0x5d7   :  { %9135 = vmatprep.mubr.msk.bf16.mxu0 %vm10516_vm1, %v10515_v12  ;;  %9152 = vmatpush3.bf16.msra.mxu0 %v10433_v3  ;;  %v12450_v3 = vld [vmem:[#allocation2 + $0x3f] sm:$0xff] }
 0x5d8   :  { %9153 = vmatprep.subr.bf16.mxu0 %v10515_v12  ;;  %v4476_v18 = vmul.f32 %v7663_v4, %v12450_v3  ;;  %v4635_v4 = vmul.f32 %v7688_v63, %v4617_v53  ;;  %v4934_v63 = vld [vmem:[#allocation2 + $0x25] sm:$0xff] }
 0x5db   :  { %9154 = vmatpush3.bf16.msra.mxu0 %v10434_v22  ;;  %v4481_v22 = vpack.c.bf16 %v4476_v18, %v4475_v38  ;;  %v4619_v18 = vld [vmem:[#allocation2 + $0x48] sm:$0xff]  ;;  %v7690_v38 = vld [vmem:[%s13489_s4 + $0x160] sm:$0xff] }
 0x5dc   :  { %9175 = vmatprep.subr.bf16.mxu0 %v10515_v12 }
 0x5de   :  { %9136 = vmatmul.mubr.msk.bf16.gmra.mrb[68].mxu0 %vm1055_vm0, %v4320_v27  ;;  %v4477_v27 = vmul.f32 %v7664_v23, %v12465_v52 }
 0x5df   :  { %9139 = vmatprep.mubr.msk.bf16.mxu0 %vm10516_vm1, %v10515_v12 }
 0x5e0   :  { %v4482_v32 = vpack.c.bf16 %v4477_v27, %v4477_v27  ;;  %v7709_v27 = vld [vmem:[%s13489_s4 + $0x170] sm:$0xff] }
 0x5e1   :  { %v4790_v26 = vmul.f32 %v7709_v27, %v12275_v33  ;;  %v7710_v33 = vld [vmem:[%s13489_s4 + $0x178] sm:$0xff] }
 0x5e6   :  { %9140 = vmatmul.mubr.msk.bf16.gmra.mrb[72].mxu0 %vm1055_vm0, %v4321_v40  ;;  %v4629_v40 = vmul.f32 %v7682_v10, %v4611_v42  ;;  %v10443_v42 = vld [vmem:[%s13487_s2 + $0xc0] sm:$0xff]  }
 0x5e7   :  { %9143 = vmatprep.mubr.msk.bf16.mxu0 %vm10516_vm1, %v10515_v12 }
 0x5e8   :  { %v4638_v25 = vpack.c.bf16 %v4630_v34, %v4629_v40  ;;  %v7711_v34 = vld [vmem:[%s13489_s4 + $0x180] sm:$0xff] }
 0x5e9   :  { %v4792_v40 = vmul.f32 %v7711_v34, %v12298_v39  ;;  %v10446_v39 = vld [vmem:[%s13487_s2 + $0xd8] sm:$0xff]  }
 0x5ee   :  { %9144 = vmatmul.mubr.msk.bf16.gmra.mrb[76].mxu0 %vm1055_vm0, %v4322_v47  ;;  %v7685_v47 = vld [vmem:[%s13489_s4 + $0x138] sm:$0xff] }
 0x5ef   :  { %9155 = vmatprep.mubr.msk.bf16.mxu0 %vm10516_vm1, %v10515_v12  ;;  %v4632_v45 = vmul.f32 %v7685_v47, %v4614_v41  ;;  %v7713_v47 = vld [vmem:[%s13489_s4 + $0x190] sm:$0xff] }
 0x5f0   :  { %v4794_v49 = vmul.f32 %v7713_v47, %v12318_v58  ;;  %v7714_v58 = vld [vmem:[%s13489_s4 + $0x198] sm:$0xff] }
 0x5f6   :  { %9156 = vmatmul.mubr.msk.bf16.vlgmr.msra.gmra.mrb[60].mxu0 %vm1055_vm0, %v4478_v28  ;;  %v4639_v28 = vpack.c.bf16 %v4632_v45, %v4631_v51  ;;  %v7715_v45 = vld [vmem:[%s13489_s4 + $0x1a0] sm:$0xff] }
 0x5f7   :  { %9159 = vmatprep.mubr.msk.bf16.mxu0 %vm10516_vm1, %v10515_v12  ;;  %9176 = vmatpush3.bf16.msra.mxu0 %v10435_v20  ;;  %v10441_v20 = vld [vmem:[%s13487_s2 + $0xb0] sm:$0xff]   ;;  %v4796_v51 = vmul.f32 %v7715_v45, %v12325_v37 }
 0x5f8   :  { %9177 = vmatprep.subr.bf16.mxu0 %v10515_v12 }
 0x5fb   :  { %9178 = vmatpush3.bf16.msra.mxu0 %v10436_v2  ;;  %v4615_v2 = vld [vmem:[#allocation2 + $0x28] sm:$0xff] }
 0x5fc   :  { %9179 = vmatprep.subr.bf16.mxu0 %v10515_v12 }
 0x5fe   :  { %9160 = vmatmul.mubr.msk.bf16.gmra.mrb[64].mxu0 %vm1055_vm0, %v4479_v8  ;;  %v4633_v8 = vmul.f32 %v7686_v5, %v4615_v2  ;;  %v4932_v5 = vld [vmem:[#allocation2 + $0x15] sm:$0xff] }
 0x5ff   :  { %9163 = vmatprep.mubr.msk.bf16.mxu0 %vm10516_vm1, %v10515_v12  ;;  %9180 = vmatpush3.bf16.msra.mxu0 %v10437_v57  ;;  %v4634_v57 = vmul.f32 %v7687_v14, %v4616_v6  ;;  %v7716_v6 = vld [vmem:[%s13489_s4 + $0x1a8] sm:$0xff]  ;;  %v10455_v14 = vld [vmem:[%s13488_s3 + $0x20] sm:$0xff]  }
 0x600   :  { %9181 = vmatprep.subr.bf16.mxu0 %v10515_v12  ;;  %9316 = vmatpush3.bf16.msra.mxu1 %v10455_v14  ;;  %v10451_v14 = vld [vmem:[%s13487_s2 + $0x100] sm:$0xff]  }
 0x601   :  { %v4640_v60 = vpack.c.bf16 %v4634_v57, %v4633_v8  ;;  %9317 = vmatprep.subr.bf16.mxu1 %v10515_v12  ;;  %v4931_v57 = vld [vmem:[#allocation2 + $0xd] sm:$0xff] }
 0x602   :  { %v7734_v8 = vld [vmem:[%s13489_s4 + $0x1b0] sm:$0xff] }
 0x603   :  { %9182 = vmatpush3.bf16.msra.mxu0 %v10438_v21  ;;  %v7689_v21 = vld [vmem:[%s13489_s4 + $0x158] sm:$0xff] }
 0x604   :  { %9203 = vmatprep.subr.bf16.mxu0 %v10515_v12 }
 0x606   :  { %9164 = vmatmul.mubr.msk.bf16.gmra.mrb[68].mxu0 %vm1055_vm0, %v4480_v0  ;;  %v4636_v0 = vmul.f32 %v7689_v21, %v4618_v1  ;;  %v4949_v1 = vmul.f32 %v7734_v8, %v4931_v57  ;;  %v10447_v21 = vld [vmem:[%s13487_s2 + $0xe0] sm:$0xff]   ;;  %v10452_v57 = vld [vmem:[%s13487_s2 + $0x108] sm:$0xff]  }
 0x607   :  { %9167 = vmatprep.mubr.msk.bf16.mxu0 %vm10516_vm1, %v10515_v12 }
 0x608   :  { %v4641_v17 = vpack.c.bf16 %v4636_v0, %v4635_v4  ;;  %v7737_v0 = vld [vmem:[%s13489_s4 + $0x1c8] sm:$0xff]  ;;  %v4933_v4 = vld [vmem:[#allocation2 + $0x1d] sm:$0xff] }
 0x60e   :  { %9168 = vmatmul.mubr.msk.bf16.gmra.mrb[72].mxu0 %vm1055_vm0, %v4481_v22  ;;  %v4637_v22 = vmul.f32 %v7690_v38, %v4619_v18  ;;  %v10448_v18 = vld [vmem:[%s13487_s2 + $0xe8] sm:$0xff]   ;;  %v4952_v38 = vmul.f32 %v7737_v0, %v4934_v63  ;;  %v7765_v63 = vld [vmem:[%s13489_s4 + $0x220] sm:$0xff] }
 0x60f   :  { %9171 = vmatprep.mubr.msk.bf16.mxu0 %vm10516_vm1, %v10515_v12  ;;  %v5095_v0 = vld [vmem:[#allocation2 + $0x2e] sm:$0xff] }
 0x610   :  { %v4642_v23 = vpack.c.bf16 %v4637_v22, %v4637_v22 }
 0x616   :  { %9172 = vmatmul.mubr.msk.bf16.gmra.mrb[76].mxu0 %vm1055_vm0, %v4482_v32  ;;  %v7708_v32 = vld [vmem:[%s13489_s4 + $0x168] sm:$0xff] }
 0x617   :  { %9183 = vmatprep.mubr.msk.bf16.mxu0 %vm10516_vm1, %v10515_v12  ;;  %v4789_v16 = vmul.f32 %v7708_v32, %v12252_v13  ;;  %v10444_v13 = vld [vmem:[%s13487_s2 + $0xc8] sm:$0xff]   ;;  %v4936_v32 = vld [vmem:[#allocation2 + $0x35] sm:$0xff] }
 0x619   :  { %v4798_v10 = vpack.c.bf16 %v4790_v26, %v4789_v16  ;;  %v7739_v26 = vld [vmem:[%s13489_s4 + $0x1d8] sm:$0xff]  ;;  %v4935_v16 = vld [vmem:[#allocation2 + $0x2d] sm:$0xff] }
 0x61a   :  { %v4954_v34 = vmul.f32 %v7739_v26, %v4936_v32  ;;  %v5097_v32 = vld [vmem:[#allocation2 + $0x3e] sm:$0xff]  ;;  %v7766_v26 = vld [vmem:[%s13489_s4 + $0x228] sm:$0xff] }
 0x61e   :  { %9184 = vmatmul.mubr.msk.bf16.vlgmr.msra.gmra.mrb[60].mxu0 %vm1055_vm0, %v4638_v25  ;;  %v10445_v25 = vld [vmem:[%s13487_s2 + $0xd0] sm:$0xff]  }
 0x61f   :  { %9187 = vmatprep.mubr.msk.bf16.mxu0 %vm10516_vm1, %v10515_v12  ;;  %9204 = vmatpush3.bf16.msra.mxu0 %v10439_v15  ;;  %v4791_v15 = vmul.f32 %v7710_v33, %v12267_v31  ;;  %v7712_v31 = vld [vmem:[%s13489_s4 + $0x188] sm:$0xff] }
 0x620   :  { %9205 = vmatprep.subr.bf16.mxu0 %v10515_v12  ;;  %v4793_v30 = vmul.f32 %v7712_v31, %v12290_v43  ;;  %v4795_v43 = vmul.f32 %v7714_v58, %v12310_v46  ;;  %v10456_v46 = vld [vmem:[%s13488_s3 + $0x28] sm:$0xff]   ;;  %v5092_v58 = vld [vmem:[#allocation2 + $0x16] sm:$0xff] }
 0x621   :  { %v4799_v41 = vpack.c.bf16 %v4792_v40, %v4791_v15  ;;  %9318 = vmatpush3.bf16.msra.mxu1 %v10456_v46  ;;  %v4938_v40 = vld [vmem:[#allocation2 + $0x45] sm:$0xff] }
 0x622   :  { %9319 = vmatprep.subr.bf16.mxu1 %v10515_v12  ;;  %v7741_v15 = vld [vmem:[%s13489_s4 + $0x1e8] sm:$0xff] }
 0x623   :  { %9206 = vmatpush3.bf16.msra.mxu0 %v10440_v62  ;;  %v4800_v62 = vpack.c.bf16 %v4794_v49, %v4793_v30  ;;  %v4956_v47 = vmul.f32 %v7741_v15, %v4938_v40  ;;  %v4939_v49 = vld [vmem:[#allocation2 + $0x4d] sm:$0xff] }
 0x624   :  { %9207 = vmatprep.subr.bf16.mxu0 %v10515_v12  ;;  %v7742_v30 = vld [vmem:[%s13489_s4 + $0x1f0] sm:$0xff]  ;;  %v5094_v46 = vld [vmem:[#allocation2 + $0x26] sm:$0xff] }
 0x625   :  { %v7787_v15 = vld [vmem:[%s13489_s4 + $0x248] sm:$0xff] }
 0x626   :  { %9188 = vmatmul.mubr.msk.bf16.gmra.mrb[64].mxu0 %vm1055_vm0, %v4639_v28  ;;  %v4779_v28 = vld [vmem:[#allocation2 + $0x49] sm:$0xff] }
 0x627   :  { %9191 = vmatprep.mubr.msk.bf16.mxu0 %vm10516_vm1, %v10515_v12  ;;  %9208 = vmatpush3.bf16.msra.mxu0 %v10441_v20  ;;  %v4801_v20 = vpack.c.bf16 %v4796_v51, %v4795_v43  ;;  %v4797_v2 = vmul.f32 %v7716_v6, %v4779_v28  ;;  %v7761_v51 = vld [vmem:[%s13489_s4 + $0x200] sm:$0xff]  ;;  %v5091_v43 = vld [vmem:[#allocation2 + $0xe] sm:$0xff] }
 0x628   :  { %9209 = vmatprep.subr.bf16.mxu0 %v10515_v12  ;;  %v5110_v28 = vmul.f32 %v7761_v51, %v5092_v58 }
 0x629   :  { %v4802_v37 = vpack.c.bf16 %v4797_v2, %v4797_v2 }
 0x62b   :  { %9210 = vmatpush3.bf16.msra.mxu0 %v10442_v19  ;;  %v7735_v19 = vld [vmem:[%s13489_s4 + $0x1b8] sm:$0xff] }
 0x62c   :  { %9231 = vmatprep.subr.bf16.mxu0 %v10515_v12 }
 0x62e   :  { %9192 = vmatmul.mubr.msk.bf16.gmra.mrb[68].mxu0 %vm1055_vm0, %v4640_v60  ;;  %v4950_v60 = vmul.f32 %v7735_v19, %v4932_v5  ;;  %v5093_v5 = vld [vmem:[#allocation2 + $0x1e] sm:$0xff]  ;;  %v7762_v19 = vld [vmem:[%s13489_s4 + $0x208] sm:$0xff] }
 0x62f   :  { %9195 = vmatprep.mubr.msk.bf16.mxu0 %vm10516_vm1, %v10515_v12 }
 0x630   :  { %v4958_v53 = vpack.c.bf16 %v4950_v60, %v4949_v1  ;;  %v5111_v60 = vmul.f32 %v7762_v19, %v5093_v5  ;;  %v10453_v1 = vld [vmem:[%s13487_s2 + $0x110] sm:$0xff]  }
 0x636   :  { %9196 = vmatmul.mubr.msk.bf16.gmra.mrb[72].mxu0 %vm1055_vm0, %v4641_v17  ;;  %v7736_v17 = vld [vmem:[%s13489_s4 + $0x1c0] sm:$0xff] }
 0x637   :  { %9199 = vmatprep.mubr.msk.bf16.mxu0 %vm10516_vm1, %v10515_v12  ;;  %v4951_v22 = vmul.f32 %v7736_v17, %v4933_v4  ;;  %v7764_v4 = vld [vmem:[%s13489_s4 + $0x218] sm:$0xff] }
 0x638   :  { %v10454_v17 = vld [vmem:[%s13487_s2 + $0x118] sm:$0xff]  }
 0x639   :  { %v4959_v27 = vpack.c.bf16 %v4952_v38, %v4951_v22  ;;  %v5113_v38 = vmul.f32 %v7764_v4, %v5095_v0  ;;  %v7812_v0 = vld [vmem:[%s13489_s4 + $0x48] sm:$0xff]  ;;  %v7813_v4 = vld [vmem:[%s13489_s4 + $0x50] sm:$0xff] }
 0x63e   :  { %9200 = vmatmul.mubr.msk.bf16.gmra.mrb[76].mxu0 %vm1055_vm0, %v4642_v23  ;;  %v10449_v23 = vld [vmem:[%s13487_s2 + $0xf0] sm:$0xff]  }
 0x63f   :  { %9211 = vmatprep.mubr.msk.bf16.mxu0 %vm10516_vm1, %v10515_v12 }
 0x646   :  { %9212 = vmatmul.mubr.msk.bf16.vlgmr.msra.gmra.mrb[60].mxu0 %vm1055_vm0, %v4798_v10  ;;  %v10450_v10 = vld [vmem:[%s13487_s2 + $0xf8] sm:$0xff]  }
 0x647   :  { %9215 = vmatprep.mubr.msk.bf16.mxu0 %vm10516_vm1, %v10515_v12  ;;  %9232 = vmatpush3.bf16.msra.mxu0 %v10443_v42  ;;  %v7738_v42 = vld [vmem:[%s13489_s4 + $0x1d0] sm:$0xff] }
 0x648   :  { %9233 = vmatprep.subr.bf16.mxu0 %v10515_v12  ;;  %v4953_v33 = vmul.f32 %v7738_v42, %v4935_v16  ;;  %v5115_v42 = vmul.f32 %v7766_v26, %v5097_v32 }
 0x64b   :  { %9234 = vmatpush3.bf16.msra.mxu0 %v10444_v13  ;;  %v4960_v13 = vpack.c.bf16 %v4954_v34, %v4953_v33  ;;  %v5099_v34 = vld [vmem:[#allocation2 + $0x4e] sm:$0xff]  ;;  %v7768_v33 = vld [vmem:[%s13489_s4 + $0x238] sm:$0xff] }
 0x64c   :  { %9235 = vmatprep.subr.bf16.mxu0 %v10515_v12 }
 0x64e   :  { %9216 = vmatmul.mubr.msk.bf16.gmra.mrb[64].mxu0 %vm1055_vm0, %v4799_v41  ;;  %v7740_v41 = vld [vmem:[%s13489_s4 + $0x1e0] sm:$0xff] }
 0x64f   :  { %9219 = vmatprep.mubr.msk.bf16.mxu0 %vm10516_vm1, %v10515_v12  ;;  %9236 = vmatpush3.bf16.msra.mxu0 %v10445_v25  ;;  %v4937_v25 = vld [vmem:[#allocation2 + $0x3d] sm:$0xff] }
 0x650   :  { %9237 = vmatprep.subr.bf16.mxu0 %v10515_v12  ;;  %v4955_v31 = vmul.f32 %v7740_v41, %v4937_v25  ;;  %v7786_v25 = vld [vmem:[%s13489_s4 + $0x240] sm:$0xff]  ;;  %v5270_v41 = vmul.f32 %v7787_v15, %v12415_v35 }
 0x653   :  { %9238 = vmatpush3.bf16.msra.mxu0 %v10446_v39  ;;  %v4961_v39 = vpack.c.bf16 %v4956_v47, %v4955_v31  ;;  %v5269_v47 = vmul.f32 %v7786_v25, %v12392_v54  ;;  %v7791_v54 = vld [vmem:[%s13489_s4 + $0x268] sm:$0xff] }
 0x654   :  { %9259 = vmatprep.subr.bf16.mxu0 %v10515_v12  ;;  %v5274_v58 = vmul.f32 %v7791_v54, %v12458_v36 }
 0x655   :  { %v5278_v31 = vpack.c.bf16 %v5270_v41, %v5269_v47  ;;  %v10460_v41 = vld [vmem:[%s13488_s3 + $0x8] sm:$0xff]  }
 0x656   :  { %9220 = vmatmul.mubr.msk.bf16.gmra.mrb[68].mxu0 %vm1055_vm0, %v4800_v62  ;;  %v4957_v62 = vmul.f32 %v7742_v30, %v4939_v49  ;;  %v7788_v49 = vld [vmem:[%s13489_s4 + $0x250] sm:$0xff] }
 0x657   :  { %9223 = vmatprep.mubr.msk.bf16.mxu0 %vm10516_vm1, %v10515_v12  ;;  %v5271_v35 = vmul.f32 %v7788_v49, %v12407_v50  ;;  %v7793_v50 = vld [vmem:[%s13489_s4 + $0x278] sm:$0xff] }
 0x658   :  { %v4962_v45 = vpack.c.bf16 %v4957_v62, %v4957_v62 }
 0x65e   :  { %9224 = vmatmul.mubr.msk.bf16.gmra.mrb[72].mxu0 %vm1055_vm0, %v4801_v20  ;;  %v7760_v20 = vld [vmem:[%s13489_s4 + $0x1f8] sm:$0xff] }
 0x65f   :  { %9227 = vmatprep.mubr.msk.bf16.mxu0 %vm10516_vm1, %v10515_v12  ;;  %v5109_v6 = vmul.f32 %v7760_v20, %v5091_v43  ;;  %v7792_v43 = vld [vmem:[%s13489_s4 + $0x270] sm:$0xff]  ;;  %v5276_v20 = vmul.f32 %v7793_v50, %v12465_v52  ;;  %v10458_v52 = vld [vmem:[%s13488_s3 + $0x38] sm:$0xff]   ;;  %v7816_v50 = vld [vmem:[%s13489_s4 + $0x68] sm:$0xff] }
 0x660   :  { %v5275_v36 = vmul.f32 %v7792_v43, %v12450_v3  ;;  %v10457_v3 = vld [vmem:[%s13488_s3 + $0x30] sm:$0xff]  }
 0x661   :  { %v5118_v2 = vpack.c.bf16 %v5110_v28, %v5109_v6  ;;  %v7794_v6 = vld [vmem:[%s13489_s4 + $0x280] sm:$0xff]  ;;  %9320 = vmatpush3.bf16.msra.mxu1 %v10457_v3  ;;  %v7817_v43 = vld [vmem:[%s13489_s4 + $0x70] sm:$0xff] }
 0x662   :  { %v5281_v28 = vpack.c.bf16 %v5276_v20, %v5275_v36  ;;  %9321 = vmatprep.subr.bf16.mxu1 %v10515_v12  ;;  %v7927_v20 = vld [vmem:[%s13489_s4 + $0x178] sm:$0xff]  ;;  %v8004_v36 = vld [vmem:[%s13489_s4 + $0x248] sm:$0xff] }
 0x665   :  { %9322 = vmatpush3.bf16.msra.mxu1 %v10458_v52 }
 0x666   :  { %9228 = vmatmul.mubr.msk.bf16.gmra.mrb[76].mxu0 %vm1055_vm0, %v4802_v37  ;;  %v7763_v37 = vld [vmem:[%s13489_s4 + $0x210] sm:$0xff]  ;;  %9343 = vmatprep.subr.bf16.mxu1 %v10515_v12 }
 0x667   :  { %9239 = vmatprep.mubr.msk.bf16.mxu0 %vm10516_vm1, %v10515_v12  ;;  %v5112_v8 = vmul.f32 %v7763_v37, %v5094_v46 }
 0x66e   :  { %9240 = vmatmul.mubr.msk.bf16.vlgmr.msra.gmra.mrb[60].mxu0 %vm1055_vm0, %v4958_v53  ;;  %v5096_v53 = vld [vmem:[#allocation2 + $0x36] sm:$0xff] }
 0x66f   :  { %9243 = vmatprep.mubr.msk.bf16.mxu0 %vm10516_vm1, %v10515_v12  ;;  %9260 = vmatpush3.bf16.msra.mxu0 %v10447_v21  ;;  %v5119_v21 = vpack.c.bf16 %v5112_v8, %v5111_v60 }
 0x670   :  { %9261 = vmatprep.subr.bf16.mxu0 %v10515_v12 }
 0x673   :  { %9262 = vmatpush3.bf16.msra.mxu0 %v10448_v18  ;;  %v5114_v18 = vmul.f32 %v7765_v63, %v5096_v53 }
 0x674   :  { %9263 = vmatprep.subr.bf16.mxu0 %v10515_v12 }
 0x675   :  { %v5120_v22 = vpack.c.bf16 %v5114_v18, %v5113_v38 }
 0x676   :  { %9244 = vmatmul.mubr.msk.bf16.gmra.mrb[64].mxu0 %vm1055_vm0, %v4959_v27  ;;  %v7767_v27 = vld [vmem:[%s13489_s4 + $0x230] sm:$0xff] }
 0x677   :  { %9247 = vmatprep.mubr.msk.bf16.mxu0 %vm10516_vm1, %v10515_v12  ;;  %9264 = vmatpush3.bf16.msra.mxu0 %v10449_v23  ;;  %v5098_v23 = vld [vmem:[#allocation2 + $0x46] sm:$0xff] }
 0x678   :  { %9265 = vmatprep.subr.bf16.mxu0 %v10515_v12  ;;  %v5116_v16 = vmul.f32 %v7767_v27, %v5098_v23  ;;  %v10459_v27 = vld [vmem:[%s13488_s3] sm:$0xff]  }
 0x67b   :  { %9266 = vmatpush3.bf16.msra.mxu0 %v10450_v10  ;;  %v5121_v10 = vpack.c.bf16 %v5116_v16, %v5115_v42  ;;  %v7814_v16 = vld [vmem:[%s13489_s4 + $0x58] sm:$0xff]  ;;  %v7815_v42 = vld [vmem:[%s13489_s4 + $0x60] sm:$0xff] }
 0x67c   :  { %9287 = vmatprep.subr.bf16.mxu0 %v10515_v12 }
 0x67e   :  { %9248 = vmatmul.mubr.msk.bf16.gmra.mrb[68].mxu0 %vm1055_vm0, %v4960_v13  ;;  %v5117_v13 = vmul.f32 %v7768_v33, %v5099_v34 }
 0x67f   :  { %9251 = vmatprep.mubr.msk.bf16.mxu0 %vm10516_vm1, %v10515_v12 }
 0x680   :  { %v5122_v40 = vpack.c.bf16 %v5117_v13, %v5117_v13  ;;  %v7925_v13 = vld [vmem:[%s13489_s4 + $0x168] sm:$0xff] }
 0x686   :  { %9252 = vmatmul.mubr.msk.bf16.gmra.mrb[72].mxu0 %vm1055_vm0, %v4961_v39  ;;  %v7789_v39 = vld [vmem:[%s13489_s4 + $0x258] sm:$0xff] }
 0x687   :  { %9255 = vmatprep.mubr.msk.bf16.mxu0 %vm10516_vm1, %v10515_v12  ;;  %v5272_v30 = vmul.f32 %v7789_v39, %v12438_v61 }
 0x689   :  { %v5279_v62 = vpack.c.bf16 %v5272_v30, %v5271_v35 }
 0x68e   :  { %9256 = vmatmul.mubr.msk.bf16.gmra.mrb[76].mxu0 %vm1055_vm0, %v4962_v45  ;;  %v7790_v45 = vld [vmem:[%s13489_s4 + $0x260] sm:$0xff] }
 0x68f   :  { %9267 = vmatprep.mubr.msk.bf16.mxu0 %vm10516_vm1, %v10515_v12  ;;  %v5273_v61 = vmul.f32 %v7790_v45, %v12430_v55  ;;  %v5259_v55 = vld [vmem:[#allocation2 + $0x4f] sm:$0xff] }
 0x690   :  { %v10461_v45 = vld [vmem:[%s13488_s3 + $0x10] sm:$0xff]  }
 0x691   :  { %v5280_v51 = vpack.c.bf16 %v5274_v58, %v5273_v61 }
 0x696   :  { %9268 = vmatmul.mubr.msk.bf16.vlgmr.msra.gmra.mrb[60].mxu0 %vm1055_vm0, %v5118_v2 }
 0x697   :  { %9271 = vmatprep.mubr.msk.bf16.mxu0 %vm10516_vm1, %v10515_v12  ;;  %9288 = vmatpush3.bf16.msra.mxu0 %v10451_v14  ;;  %v5277_v14 = vmul.f32 %v7794_v6, %v5259_v55  ;;  %v10462_v6 = vld [vmem:[%s13488_s3 + $0x18] sm:$0xff]  }
 0x698   :  { %9289 = vmatprep.subr.bf16.mxu0 %v10515_v12 }
 0x699   :  { %v5282_v2 = vpack.c.bf16 %v5277_v14, %v5277_v14 }
 0x69b   :  { %9290 = vmatpush3.bf16.msra.mxu0 %v10452_v57 }
 0x69c   :  { %9291 = vmatprep.subr.bf16.mxu0 %v10515_v12 }
 0x69e   :  { %9272 = vmatmul.mubr.msk.bf16.gmra.mrb[64].mxu0 %vm1055_vm0, %v5119_v21 }
 0x69f   :  { %9275 = vmatprep.mubr.msk.bf16.mxu0 %vm10516_vm1, %v10515_v12  ;;  %9292 = vmatpush3.bf16.msra.mxu0 %v10453_v1 }
 0x6a0   :  { %9293 = vmatprep.subr.bf16.mxu0 %v10515_v12 }
 0x6a3   :  { %9294 = vmatpush3.bf16.msra.mxu0 %v10454_v17 }
 0x6a6   :  { %9276 = vmatmul.mubr.msk.bf16.gmra.mrb[68].mxu0 %vm1055_vm0, %v5120_v22 }
 0x6a7   :  { %9279 = vmatprep.mubr.msk.bf16.mxu0 %vm10516_vm1, %v10515_v12 }
 0x6ae   :  { %9280 = vmatmul.mubr.msk.bf16.gmra.mrb[72].mxu0 %vm1055_vm0, %v5121_v10 }
 0x6af   :  { %9283 = vmatprep.mubr.msk.bf16.mxu0 %vm10516_vm1, %v10515_v12 }
 0x6b6   :  { %9284 = vmatmul.mubr.msk.bf16.gmra.mrb[76].mxu0 %vm1055_vm0, %v5122_v40  ;;  %v7926_v40 = vld [vmem:[%s13489_s4 + $0x170] sm:$0xff] }
 0x6b7   :  { %9295 = vmatprep.mubr.msk.bf16.mxu0 %vm10516_vm1, %v10515_v12 }
 0x6be   :  { %9296 = vmatmul.mubr.msk.bf16.vlgmr.msra.gmra.mrb[60].mxu0 %vm1055_vm0, %v5278_v31 }
 0x6bf   :  { %9299 = vmatprep.mubr.msk.bf16.mxu0 %vm10516_vm1, %v10515_v12 }
 0x6c6   :  { %9300 = vmatmul.mubr.msk.bf16.gmra.mrb[64].mxu0 %vm1055_vm0, %v5279_v62 }
 0x6c7   :  { %9303 = vmatprep.mubr.msk.bf16.mxu0 %vm10516_vm1, %v10515_v12 }
 0x6ce   :  { %9304 = vmatmul.mubr.msk.bf16.gmra.mrb[68].mxu0 %vm1055_vm0, %v5280_v51 }
 0x6cf   :  { %9307 = vmatprep.mubr.msk.bf16.mxu0 %vm10516_vm1, %v10515_v12 }
 0x6d6   :  { %9308 = vmatmul.mubr.msk.bf16.gmra.mrb[72].mxu0 %vm1055_vm0, %v5281_v28 }
 0x6d7   :  { %9311 = vmatprep.mubr.msk.bf16.mxu0 %vm10516_vm1, %v10515_v12 }
 0x6de   :  { %9312 = vmatmul.mubr.msk.bf16.gmra.mrb[76].mxu0 %vm1055_vm0, %v5282_v2  ;;  %v7928_v2 = vld [vmem:[%s13489_s4 + $0x180] sm:$0xff] }
 0x6df   :  { %9585 = vmatprep.mubr.msk.f32.mxu0 %vm10516_vm1, %v10515_v12 }
 0x791   :  { %v5364_v46 = vpop.f32.mrb[60].mxu0 }
 0x792   :  { %v5411_v37 = vmax.f32 %v5364_v46, 0.0  ;;  %v9297_v5 = vpop.f32.mrb[61].mxu0 }
 0x793   :  { %v5367_v19 = vpop.f32.mrb[62].mxu0 }
 0x794   :  { %5420 = vst.msk [vmem:[#allocation2 + $0x8] sm:$0xff] %vm1055_vm0, %v5411_v37  ;;  %v5412_v57 = vmax.f32 %v5367_v19, 0.0  ;;  %v9298_v8 = vpop.f32.mrb[63].mxu0 }
 0x796   :  { %5421 = vst.msk [vmem:[#allocation2 + $0x10] sm:$0xff] %vm1055_vm0, %v5412_v57 }
 0x799   :  { %v5372_v60 = vpop.f32.mrb[64].mxu0 }
 0x79a   :  { %v5413_v1 = vmax.f32 %v5372_v60, 0.0  ;;  %v9301_v21 = vpop.f32.mrb[65].mxu0 }
 0x79b   :  { %v5375_v53 = vpop.f32.mrb[66].mxu0  ;;  %v5469_v63 = vld [vmem:[#allocation2 + $0x2] sm:$0xff] }
 0x79c   :  { %5422 = vst.msk [vmem:[#allocation2 + $0x18] sm:$0xff] %vm1055_vm0, %v5413_v1  ;;  %v5414_v17 = vmax.f32 %v5375_v53, 0.0  ;;  %v9302_v18 = vpop.f32.mrb[67].mxu0  ;;  %v5487_v22 = vmul.f32 %v7812_v0, %v5469_v63  ;;  %v8003_v21 = vld [vmem:[%s13489_s4 + $0x240] sm:$0xff] }
 0x79d   :  { %v5470_v38 = vld [vmem:[#allocation2 + $0xa] sm:$0xff]  ;;  %v8006_v18 = vld [vmem:[%s13489_s4 + $0x258] sm:$0xff] }
 0x79e   :  { %5423 = vst.msk [vmem:[#allocation2 + $0x20] sm:$0xff] %vm1055_vm0, %v5414_v17  ;;  %v5488_v23 = vmul.f32 %v7813_v4, %v5470_v38  ;;  %v12802_v33 = vld [vmem:[#allocation2 + $0x9] sm:$0xff] }
 0x79f   :  { %v12820_v30 = vmul.f32 %v7925_v13, %v12802_v33  ;;  %v12861_v8 = vld [vmem:[#allocation2 + $0xf] sm:$0xff]  ;;  %v7818_v13 = vld [vmem:[%s13489_s4 + $0x78] sm:$0xff] }
 0x7a0   :  { %v5496_v32 = vpack.c.bf16 %v5488_v23, %v5487_v22  ;;  %v12887_v23 = vmul.f32 %v8003_v21, %v12861_v8  ;;  %v7932_v21 = vld [vmem:[%s13489_s4 + $0x1a0] sm:$0xff] }
 0x7a1   :  { %v5380_v26 = vpop.f32.mrb[68].mxu0 }
 0x7a2   :  { %v5415_v10 = vmax.f32 %v5380_v26, 0.0  ;;  %v9305_v34 = vpop.f32.mrb[69].mxu0  ;;  %9324 = vmatmul.mubr.msk.bf16.vlgmr.msra.gmra.mrb[60].mxu1 %vm1055_vm0, %v5496_v32 }
 0x7a3   :  { %v5383_v15 = vpop.f32.mrb[70].mxu0  ;;  %9327 = vmatprep.mubr.msk.bf16.mxu1 %vm10516_vm1, %v10515_v12  ;;  %v5471_v25 = vld [vmem:[#allocation2 + $0x12] sm:$0xff]  ;;  %9344 = vmatpush3.bf16.msra.mxu1 %v10459_v27 }
 0x7a4   :  { %v12815_v47 = vld [vmem:[#allocation2 + $0x11] sm:$0xff]  ;;  %5424 = vst.msk [vmem:[#allocation2 + $0x28] sm:$0xff] %vm1055_vm0, %v5415_v10  ;;  %v5416_v31 = vmax.f32 %v5383_v15, 0.0  ;;  %v9306_v39 = vpop.f32.mrb[71].mxu0  ;;  %9345 = vmatprep.subr.bf16.mxu1 %v10515_v12  ;;  %v5489_v62 = vmul.f32 %v7814_v16, %v5471_v25  ;;  %v7929_v16 = vld [vmem:[%s13489_s4 + $0x188] sm:$0xff] }
 0x7a5   :  { %v5472_v49 = vld [vmem:[#allocation2 + $0x1a] sm:$0xff]  ;;  %v12823_v35 = vmul.f32 %v7926_v40, %v12815_v47  ;;  %v8005_v27 = vld [vmem:[%s13489_s4 + $0x250] sm:$0xff] }
 0x7a6   :  { %5425 = vst.msk [vmem:[#allocation2 + $0x30] sm:$0xff] %vm1055_vm0, %v5416_v31  ;;  %v5490_v54 = vmul.f32 %v7815_v42, %v5472_v49  ;;  %v12848_v14 = vld [vmem:[#allocation2 + $0x19] sm:$0xff]  ;;  %v7930_v42 = vld [vmem:[%s13489_s4 + $0x190] sm:$0xff] }
 0x7a7   :  { %9346 = vmatpush3.bf16.msra.mxu1 %v10460_v41  ;;  %v6238_v58 = vpack.c.bf16 %v12823_v35, %v12820_v30  ;;  %v12857_v37 = vld [vmem:[#allocation2 + $0x17] sm:$0xff]  ;;  %v12864_v60 = vmul.f32 %v7927_v20, %v12848_v14  ;;  %v12884_v22 = vld [vmem:[#allocation2 + $0x1f] sm:$0xff] }
 0x7a8   :  { %v5497_v61 = vpack.c.bf16 %v5490_v54, %v5489_v62  ;;  %9347 = vmatprep.subr.bf16.mxu1 %v10515_v12  ;;  %v12874_v0 = vmul.f32 %v8004_v36, %v12857_v37  ;;  %v7819_v40 = vld [vmem:[%s13489_s4 + $0x80] sm:$0xff]  ;;  %v12917_v49 = vmul.f32 %v8005_v27, %v12884_v22  ;;  %v8008_v62 = vld [vmem:[%s13489_s4 + $0x268] sm:$0xff]  ;;  %v10482_v30 = vld [vmem:[%s13488_s3 + $0xd8] sm:$0xff]  }
 0x7a9   :  { %v5388_v51 = vpop.f32.mrb[72].mxu0  ;;  %v8007_v36 = vld [vmem:[%s13489_s4 + $0x260] sm:$0xff] }
 0x7aa   :  { %v5417_v28 = vmax.f32 %v5388_v51, 0.0  ;;  %v9309_v55 = vpop.f32.mrb[73].mxu0  ;;  %9328 = vmatmul.mubr.msk.bf16.gmra.mrb[64].mxu1 %vm1055_vm0, %v5497_v61  ;;  %v6718_v15 = vpack.c.bf16 %v12874_v0, %v12887_v23  ;;  %v8011_v23 = vld [vmem:[%s13489_s4 + $0x280] sm:$0xff] }
 0x7ab   :  { %v5391_v3 = vpop.f32.mrb[74].mxu0  ;;  %9331 = vmatprep.mubr.msk.bf16.mxu1 %vm10516_vm1, %v10515_v12  ;;  %v5473_v52 = vld [vmem:[#allocation2 + $0x22] sm:$0xff]  ;;  %9348 = vmatpush3.bf16.msra.mxu1 %v10461_v45 }
 0x7ac   :  { %v12855_v46 = vld [vmem:[#allocation2 + $0x21] sm:$0xff]  ;;  %5426 = vst.msk [vmem:[#allocation2 + $0x38] sm:$0xff] %vm1055_vm0, %v5417_v28  ;;  %v5418_v5 = vmax.f32 %v5391_v3, 0.0  ;;  %v9310_v19 = vpop.f32.mrb[75].mxu0  ;;  %9349 = vmatprep.subr.bf16.mxu1 %v10515_v12  ;;  %v5491_v53 = vmul.f32 %v7816_v50, %v5473_v52 }
 0x7ad   :  { %v5474_v57 = vld [vmem:[#allocation2 + $0x2a] sm:$0xff]  ;;  %v12867_v1 = vmul.f32 %v7928_v2, %v12855_v46 }
 0x7ae   :  { %5427 = vst.msk [vmem:[#allocation2 + $0x40] sm:$0xff] %vm1055_vm0, %v5418_v5  ;;  %v5492_v63 = vmul.f32 %v7817_v43, %v5474_v57  ;;  %v12876_v4 = vld [vmem:[#allocation2 + $0x27] sm:$0xff]  ;;  %v12931_v43 = vld [vmem:[#allocation2 + $0x2f] sm:$0xff]  ;;  %v7931_v57 = vld [vmem:[%s13489_s4 + $0x198] sm:$0xff] }
 0x7af   :  { %9350 = vmatpush3.bf16.msra.mxu1 %v10462_v6  ;;  %v6239_v17 = vpack.c.bf16 %v12867_v1, %v12864_v60  ;;  %v12892_v26 = vld [vmem:[#allocation2 + $0x29] sm:$0xff]  ;;  %v12910_v25 = vmul.f32 %v8006_v18, %v12876_v4  ;;  %v12947_v5 = vmul.f32 %v8007_v36, %v12931_v43  ;;  %v8010_v18 = vld [vmem:[%s13489_s4 + $0x278] sm:$0xff]  ;;  %v5438_v36 = vld [vmem:[%s13489_s4] sm:$0xff] }
 0x7b0   :  { %v5498_v38 = vpack.c.bf16 %v5492_v63, %v5491_v53  ;;  %9371 = vmatprep.subr.bf16.mxu1 %v10515_v12  ;;  %v12926_v61 = vmul.f32 %v7929_v16, %v12892_v26  ;;  %v7820_v52 = vld [vmem:[%s13489_s4 + $0x88] sm:$0xff]  ;;  %v8009_v63 = vld [vmem:[%s13489_s4 + $0x270] sm:$0xff] }
 0x7b1   :  { %v5396_v32 = vpop.f32.mrb[76].mxu0  ;;  %v6719_v20 = vpack.c.bf16 %v12910_v25, %v12917_v49  ;;  %v10517_v49 = vmov 0.0|0.0  }
 0x7b2   :  { %v5419_v10 = vmax.f32 %v5396_v32, 0.0  ;;  %v9313_v34 = vpop.f32.mrb[77].mxu0  ;;  %9332 = vmatmul.mubr.msk.bf16.gmra.mrb[68].mxu1 %vm1055_vm0, %v5498_v38  ;;  %9607 = vmatprep.subr.bf16.mxu0 %v10517_v49 }
 0x7b3   :  { %v5399_v41 = vpop.f32.mrb[78].mxu0  ;;  %9335 = vmatprep.mubr.msk.bf16.mxu1 %vm10516_vm1, %v10515_v12  ;;  %v5475_v31 = vld [vmem:[#allocation2 + $0x32] sm:$0xff] }
 0x7b4   :  { %v12914_v39 = vld [vmem:[#allocation2 + $0x31] sm:$0xff]  ;;  %5428 = vst.msk [vmem:[#allocation2 + $0x48] sm:$0xff] %vm1055_vm0, %v5419_v10  ;;  %v9314_v54 = vpop.f32.mrb[79].mxu0  ;;  %v5493_v28 = vmul.f32 %v7818_v13, %v5475_v31 }
 0x7b5   :  { %v12923_v45 = vld [vmem:[#allocation2 + $0x37] sm:$0xff]  ;;  %v12929_v51 = vmul.f32 %v7930_v42, %v12914_v39  ;;  %v12966_v32 = vld [vmem:[#allocation2 + $0x3f] sm:$0xff]  ;;  %v5439_v54 = vld [vmem:[%s13489_s4 + $0x8] sm:$0xff] }
 0x7b6   :  { %v5476_v50 = vld [vmem:[#allocation2 + $0x3a] sm:$0xff]  ;;  %v12941_v2 = vmul.f32 %v8008_v62, %v12923_v45  ;;  %v12980_v41 = vmul.f32 %v8009_v63, %v12966_v32 }
 0x7b7   :  { %v5494_v55 = vmul.f32 %v7819_v40, %v5476_v50  ;;  %v6240_v6 = vpack.c.bf16 %v12929_v51, %v12926_v61  ;;  %v5436_v19 = vld [vmem:[#allocation2 + $0x39] sm:$0xff]  ;;  %v5429_v50 = vld [vmem:[#allocation2 + $0x1] sm:$0xff]  ;;  %v6371_v51 = vld [vmem:[#allocation2 + $0xd] sm:$0xff] }
 0x7b8   :  { %v6720_v53 = vpack.c.bf16 %v12941_v2, %v12947_v5  ;;  %v12970_v10 = vmul.f32 %v7931_v57, %v5436_v19  ;;  %v5441_v57 = vld [vmem:[%s13489_s4 + $0x18] sm:$0xff]  ;;  %v6954_v2 = vld [vmem:[%s13491_s6 + $0x8] sm:$0xff]  ;;  %v6955_v5 = vld [vmem:[%s13491_s6 + $0x10] sm:$0xff] }
 0x7b9   :  { %v5499_v3 = vpack.c.bf16 %v5494_v55, %v5493_v28  ;;  %v5448_v28 = vmul.f32 %v5439_v54, %v12802_v33  ;;  %v5447_v55 = vmul.f32 %v5438_v36, %v5429_v50  ;;  %v10464_v33 = vld [vmem:[%s13488_s3 + $0x48] sm:$0xff]   ;;  %v5450_v63 = vmul.f32 %v5441_v57, %v12848_v14  ;;  %v10466_v14 = vld [vmem:[%s13488_s3 + $0x58] sm:$0xff]  }
 0x7ba   :  { %v7952_v61 = vld [vmem:[%s13489_s4 + $0x1b8] sm:$0xff] }
 0x7bb   :  { %9336 = vmatmul.mubr.msk.bf16.gmra.mrb[72].mxu1 %vm1055_vm0, %v5499_v3  ;;  %v5477_v38 = vld [vmem:[#allocation2 + $0x42] sm:$0xff]  ;;  %v6699_v0 = vld [vmem:[#allocation2 + $0x4f] sm:$0xff] }
 0x7bc   :  { %9339 = vmatprep.mubr.msk.bf16.mxu1 %vm10516_vm1, %v10515_v12  ;;  %v5437_v27 = vld [vmem:[#allocation2 + $0x41] sm:$0xff]  ;;  %v5495_v16 = vmul.f32 %v7820_v52, %v5477_v38  ;;  %v5456_v52 = vpack.c.bf16 %v5448_v28, %v5447_v55  ;;  %v10465_v38 = vld [vmem:[%s13488_s3 + $0x50] sm:$0xff]   ;;  %v5445_v28 = vld [vmem:[%s13489_s4 + $0x38] sm:$0xff] }
 0x7bd   :  { %v12968_v42 = vld [vmem:[#allocation2 + $0x47] sm:$0xff]  ;;  %v12972_v34 = vmul.f32 %v7932_v21, %v5437_v27  ;;  %v5440_v21 = vld [vmem:[%s13489_s4 + $0x10] sm:$0xff]  ;;  %v5454_v55 = vmul.f32 %v5445_v28, %v5436_v19 }
 0x7be   :  { %v12975_v13 = vmul.f32 %v8010_v18, %v12968_v42  ;;  %v5500_v31 = vpack.c.bf16 %v5495_v16, %v5495_v16  ;;  %v10463_v3 = vld [vmem:[%s13488_s3 + $0x40] sm:$0xff]   ;;  %v5449_v18 = vmul.f32 %v5440_v21, %v12815_v47  ;;  %v7847_v19 = vld [vmem:[%s13489_s4 + $0x90] sm:$0xff] }
 0x7bf   :  { %v6241_v40 = vpack.c.bf16 %v12972_v34, %v12970_v10  ;;  %v5442_v47 = vld [vmem:[%s13489_s4 + $0x20] sm:$0xff]  ;;  %v6219_v35 = vld [vmem:[#allocation2 + $0x49] sm:$0xff] }
 0x7c0   :  { %v6721_v62 = vpack.c.bf16 %v12975_v13, %v12980_v41  ;;  %v5457_v16 = vpack.c.bf16 %v5450_v63, %v5449_v18  ;;  %v5451_v50 = vmul.f32 %v5442_v47, %v12855_v46  ;;  %v7848_v63 = vld [vmem:[%s13489_s4 + $0x98] sm:$0xff]  ;;  %v7850_v47 = vld [vmem:[%s13489_s4 + $0xa8] sm:$0xff] }
 0x7c1   :  { %v6956_v13 = vld [vmem:[%s13491_s6 + $0x18] sm:$0xff] }
 0x7c2   :  { %v9623_v41 = vpack.c.bf16 %v6956_v13, %v6955_v5 }
 0x7c3   :  { %9340 = vmatmul.mubr.msk.bf16.gmra.mrb[76].mxu1 %vm1055_vm0, %v5500_v31  ;;  %v5443_v31 = vld [vmem:[%s13489_s4 + $0x28] sm:$0xff] }
 0x7c4   :  { %9351 = vmatprep.mubr.msk.bf16.mxu1 %vm10516_vm1, %v10515_v12  ;;  %v5452_v54 = vmul.f32 %v5443_v31, %v12892_v26  ;;  %v5444_v26 = vld [vmem:[%s13489_s4 + $0x30] sm:$0xff]  ;;  %v5734_v31 = vld [vmem:[#allocation2 + $0x1b] sm:$0xff] }
 0x7c5   :  { %v5453_v46 = vmul.f32 %v5444_v26, %v12914_v39  ;;  %v5731_v39 = vld [vmem:[#allocation2 + $0x3] sm:$0xff]  ;;  %v10469_v26 = vld [vmem:[%s13488_s3 + $0x70] sm:$0xff]  }
 0x7c6   :  { %v5458_v36 = vpack.c.bf16 %v5452_v54, %v5451_v50  ;;  %v7849_v54 = vld [vmem:[%s13489_s4 + $0xa0] sm:$0xff]  ;;  %v10468_v50 = vld [vmem:[%s13488_s3 + $0x68] sm:$0xff]  }
 0x7cb   :  { %9352 = vmatmul.mubr.msk.bf16.vlgmr.msra.gmra.mrb[60].mxu1 %vm1055_vm0, %v5456_v52  ;;  %v5446_v52 = vld [vmem:[%s13489_s4 + $0x40] sm:$0xff] }
 0x7cc   :  { %9355 = vmatprep.mubr.msk.bf16.mxu1 %vm10516_vm1, %v10515_v12  ;;  %9372 = vmatpush3.bf16.msra.mxu1 %v10463_v3  ;;  %v5459_v3 = vpack.c.bf16 %v5454_v55, %v5453_v46  ;;  %v5455_v57 = vmul.f32 %v5446_v52, %v5437_v27  ;;  %v10467_v27 = vld [vmem:[%s13488_s3 + $0x60] sm:$0xff]   ;;  %v5736_v46 = vld [vmem:[#allocation2 + $0x2b] sm:$0xff] }
 0x7cd   :  { %9373 = vmatprep.subr.bf16.mxu1 %v10515_v12  ;;  %v5735_v52 = vld [vmem:[#allocation2 + $0x23] sm:$0xff] }
 0x7ce   :  { %v5460_v21 = vpack.c.bf16 %v5455_v57, %v5455_v57  ;;  %v7851_v57 = vld [vmem:[%s13489_s4 + $0xb0] sm:$0xff] }
 0x7d0   :  { %9374 = vmatpush3.bf16.msra.mxu1 %v10464_v33  ;;  %v5732_v33 = vld [vmem:[#allocation2 + $0xb] sm:$0xff] }
 0x7d1   :  { %9375 = vmatprep.subr.bf16.mxu1 %v10515_v12  ;;  %v5750_v18 = vmul.f32 %v7848_v63, %v5732_v33  ;;  %v5753_v63 = vmul.f32 %v7851_v57, %v5735_v52  ;;  %v10471_v52 = vld [vmem:[%s13488_s3 + $0x80] sm:$0xff]  }
 0x7d3   :  { %9356 = vmatmul.mubr.msk.bf16.gmra.mrb[64].mxu1 %vm1055_vm0, %v5457_v16 }
 0x7d4   :  { %9359 = vmatprep.mubr.msk.bf16.mxu1 %vm10516_vm1, %v10515_v12  ;;  %9376 = vmatpush3.bf16.msra.mxu1 %v10465_v38  ;;  %v5749_v38 = vmul.f32 %v7847_v19, %v5731_v39  ;;  %v5738_v19 = vld [vmem:[#allocation2 + $0x3b] sm:$0xff] }
 0x7d5   :  { %9377 = vmatprep.subr.bf16.mxu1 %v10515_v12 }
 0x7d6   :  { %v5758_v16 = vpack.c.bf16 %v5750_v18, %v5749_v38  ;;  %v7854_v18 = vld [vmem:[%s13489_s4 + $0xc8] sm:$0xff]  ;;  %v5737_v38 = vld [vmem:[#allocation2 + $0x33] sm:$0xff] }
 0x7d8   :  { %9378 = vmatpush3.bf16.msra.mxu1 %v10466_v14  ;;  %v5733_v14 = vld [vmem:[#allocation2 + $0x13] sm:$0xff] }
 0x7d9   :  { %9399 = vmatprep.subr.bf16.mxu1 %v10515_v12  ;;  %v5751_v28 = vmul.f32 %v7849_v54, %v5733_v14  ;;  %v5739_v14 = vld [vmem:[#allocation2 + $0x43] sm:$0xff]  ;;  %v7855_v54 = vld [vmem:[%s13489_s4 + $0xd0] sm:$0xff] }
 0x7db   :  { %9360 = vmatmul.mubr.msk.bf16.gmra.mrb[68].mxu1 %vm1055_vm0, %v5458_v36  ;;  %v5752_v36 = vmul.f32 %v7850_v47, %v5734_v31 }
 0x7dc   :  { %9363 = vmatprep.mubr.msk.bf16.mxu1 %vm10516_vm1, %v10515_v12 }
 0x7dd   :  { %v5759_v55 = vpack.c.bf16 %v5752_v36, %v5751_v28  ;;  %v7874_v28 = vld [vmem:[%s13489_s4 + $0xe0] sm:$0xff] }
 0x7e3   :  { %9364 = vmatmul.mubr.msk.bf16.gmra.mrb[72].mxu1 %vm1055_vm0, %v5459_v3  ;;  %v7852_v3 = vld [vmem:[%s13489_s4 + $0xb8] sm:$0xff] }
 0x7e4   :  { %9367 = vmatprep.mubr.msk.bf16.mxu1 %vm10516_vm1, %v10515_v12  ;;  %v5754_v33 = vmul.f32 %v7852_v3, %v5736_v46  ;;  %v5910_v46 = vmul.f32 %v7874_v28, %v12861_v8  ;;  %v10472_v8 = vld [vmem:[%s13488_s3 + $0x88] sm:$0xff]  }
 0x7e6   :  { %v5760_v39 = vpack.c.bf16 %v5754_v33, %v5753_v63  ;;  %v7875_v33 = vld [vmem:[%s13489_s4 + $0xe8] sm:$0xff] }
 0x7eb   :  { %9368 = vmatmul.mubr.msk.bf16.gmra.mrb[76].mxu1 %vm1055_vm0, %v5460_v21  ;;  %v10470_v21 = vld [vmem:[%s13488_s3 + $0x78] sm:$0xff]  }
 0x7ec   :  { %9379 = vmatprep.mubr.msk.bf16.mxu1 %vm10516_vm1, %v10515_v12 }
 0x7f3   :  { %9380 = vmatmul.mubr.msk.bf16.vlgmr.msra.gmra.mrb[60].mxu1 %vm1055_vm0, %v5758_v16  ;;  %v5756_v16 = vmul.f32 %v7854_v18, %v5738_v19  ;;  %v10473_v19 = vld [vmem:[%s13488_s3 + $0x90] sm:$0xff]  }
 0x7f4   :  { %9383 = vmatprep.mubr.msk.bf16.mxu1 %vm10516_vm1, %v10515_v12  ;;  %9400 = vmatpush3.bf16.msra.mxu1 %v10467_v27  ;;  %v7853_v27 = vld [vmem:[%s13489_s4 + $0xc0] sm:$0xff] }
 0x7f5   :  { %9401 = vmatprep.subr.bf16.mxu1 %v10515_v12  ;;  %v5755_v31 = vmul.f32 %v7853_v27, %v5737_v38  ;;  %v7878_v38 = vld [vmem:[%s13489_s4 + $0x100] sm:$0xff] }
 0x7f6   :  { %v5914_v27 = vmul.f32 %v7878_v38, %v12931_v43  ;;  %v7879_v43 = vld [vmem:[%s13489_s4 + $0x108] sm:$0xff] }
 0x7f7   :  { %v5761_v47 = vpack.c.bf16 %v5756_v16, %v5755_v31 }
 0x7f8   :  { %9402 = vmatpush3.bf16.msra.mxu1 %v10468_v50  ;;  %v5757_v50 = vmul.f32 %v7855_v54, %v5739_v14 }
 0x7f9   :  { %9403 = vmatprep.subr.bf16.mxu1 %v10515_v12 }
 0x7fa   :  { %v5762_v36 = vpack.c.bf16 %v5757_v50, %v5757_v50  ;;  %v7881_v50 = vld [vmem:[%s13489_s4 + $0x118] sm:$0xff] }
 0x7fb   :  { %9384 = vmatmul.mubr.msk.bf16.gmra.mrb[64].mxu1 %vm1055_vm0, %v5759_v55  ;;  %v7873_v55 = vld [vmem:[%s13489_s4 + $0xd8] sm:$0xff] }
 0x7fc   :  { %9387 = vmatprep.mubr.msk.bf16.mxu1 %vm10516_vm1, %v10515_v12  ;;  %9404 = vmatpush3.bf16.msra.mxu1 %v10469_v26  ;;  %v5891_v26 = vld [vmem:[#allocation2 + $0x7] sm:$0xff] }
 0x7fd   :  { %9405 = vmatprep.subr.bf16.mxu1 %v10515_v12  ;;  %v5909_v3 = vmul.f32 %v7873_v55, %v5891_v26  ;;  %v6052_v26 = vld [vmem:[#allocation2 + $0x10] sm:$0xff]  ;;  %v7899_v55 = vld [vmem:[%s13489_s4 + $0x120] sm:$0xff] }
 0x7ff   :  { %v5918_v57 = vpack.c.bf16 %v5910_v46, %v5909_v3 }
 0x800   :  { %9406 = vmatpush3.bf16.msra.mxu1 %v10470_v21  ;;  %v7876_v21 = vld [vmem:[%s13489_s4 + $0xf0] sm:$0xff] }
 0x801   :  { %9427 = vmatprep.subr.bf16.mxu1 %v10515_v12  ;;  %v5912_v63 = vmul.f32 %v7876_v21, %v12884_v22  ;;  %v10474_v22 = vld [vmem:[%s13488_s3 + $0x98] sm:$0xff]  }
 0x802   :  { %v7902_v21 = vld [vmem:[%s13489_s4 + $0x138] sm:$0xff] }
 0x803   :  { %9388 = vmatmul.mubr.msk.bf16.gmra.mrb[68].mxu1 %vm1055_vm0, %v5760_v39  ;;  %v5911_v39 = vmul.f32 %v7875_v33, %v12857_v37  ;;  %v7877_v37 = vld [vmem:[%s13489_s4 + $0xf8] sm:$0xff] }
 0x804   :  { %9391 = vmatprep.mubr.msk.bf16.mxu1 %vm10516_vm1, %v10515_v12  ;;  %v5913_v16 = vmul.f32 %v7877_v37, %v12876_v4  ;;  %v5915_v4 = vmul.f32 %v7879_v43, %v12923_v45  ;;  %v6051_v45 = vld [vmem:[#allocation2 + $0x8] sm:$0xff]  ;;  %v6053_v33 = vld [vmem:[#allocation2 + $0x18] sm:$0xff]  ;;  %v6056_v37 = vld [vmem:[#allocation2 + $0x30] sm:$0xff] }
 0x805   :  { %v5919_v18 = vpack.c.bf16 %v5912_v63, %v5911_v39  ;;  %v6069_v3 = vmul.f32 %v7899_v55, %v6051_v45  ;;  %v10476_v63 = vld [vmem:[%s13488_s3 + $0xa8] sm:$0xff]   ;;  %v7907_v55 = vld [vmem:[%s13489_s4 + $0x160] sm:$0xff] }
 0x806   :  { %v5920_v31 = vpack.c.bf16 %v5914_v27, %v5913_v16  ;;  %v6055_v27 = vld [vmem:[#allocation2 + $0x28] sm:$0xff]  ;;  %v7903_v16 = vld [vmem:[%s13489_s4 + $0x140] sm:$0xff] }
 0x807   :  { %v6073_v43 = vmul.f32 %v7903_v16, %v6055_v27  ;;  %v6059_v45 = vld [vmem:[#allocation2 + $0x48] sm:$0xff]  ;;  %v6376_v27 = vld [vmem:[#allocation2 + $0x35] sm:$0xff] }
 0x808   :  { %v7956_v16 = vld [vmem:[%s13489_s4 + $0x1d8] sm:$0xff] }
 0x80b   :  { %9392 = vmatmul.mubr.msk.bf16.gmra.mrb[72].mxu1 %vm1055_vm0, %v5761_v47  ;;  %v7880_v47 = vld [vmem:[%s13489_s4 + $0x110] sm:$0xff] }
 0x80c   :  { %9395 = vmatprep.mubr.msk.bf16.mxu1 %vm10516_vm1, %v10515_v12  ;;  %v5916_v14 = vmul.f32 %v7880_v47, %v12966_v32  ;;  %v7900_v32 = vld [vmem:[%s13489_s4 + $0x128] sm:$0xff] }
 0x80d   :  { %v6070_v46 = vmul.f32 %v7900_v32, %v6052_v26 }
 0x80e   :  { %v5921_v54 = vpack.c.bf16 %v5916_v14, %v5915_v4  ;;  %v6058_v4 = vld [vmem:[#allocation2 + $0x40] sm:$0xff] }
 0x813   :  { %9396 = vmatmul.mubr.msk.bf16.gmra.mrb[76].mxu1 %vm1055_vm0, %v5762_v36  ;;  %v5917_v36 = vmul.f32 %v7881_v50, %v12968_v42  ;;  %v10475_v42 = vld [vmem:[%s13488_s3 + $0xa0] sm:$0xff]   ;;  %v6057_v50 = vld [vmem:[#allocation2 + $0x38] sm:$0xff] }
 0x814   :  { %9407 = vmatprep.mubr.msk.bf16.mxu1 %vm10516_vm1, %v10515_v12 }
 0x815   :  { %v5922_v28 = vpack.c.bf16 %v5917_v36, %v5917_v36  ;;  %v7905_v36 = vld [vmem:[%s13489_s4 + $0x150] sm:$0xff] }
 0x816   :  { %v6075_v26 = vmul.f32 %v7905_v36, %v6057_v50  ;;  %v6378_v50 = vld [vmem:[#allocation2 + $0x45] sm:$0xff] }
 0x817   :  { %v7958_v36 = vld [vmem:[%s13489_s4 + $0x1e8] sm:$0xff] }
 0x81b   :  { %9408 = vmatmul.mubr.msk.bf16.vlgmr.msra.gmra.mrb[60].mxu1 %vm1055_vm0, %v5918_v57  ;;  %v6054_v57 = vld [vmem:[#allocation2 + $0x20] sm:$0xff] }
 0x81c   :  { %9411 = vmatprep.mubr.msk.bf16.mxu1 %vm10516_vm1, %v10515_v12  ;;  %9428 = vmatpush3.bf16.msra.mxu1 %v10471_v52  ;;  %v6078_v52 = vpack.c.bf16 %v6070_v46, %v6069_v3  ;;  %v6072_v39 = vmul.f32 %v7902_v21, %v6054_v57  ;;  %v6077_v46 = vmul.f32 %v7907_v55, %v6059_v45  ;;  %v10481_v57 = vld [vmem:[%s13488_s3 + $0xd0] sm:$0xff]  }
 0x81d   :  { %9429 = vmatprep.subr.bf16.mxu1 %v10515_v12 }
 0x81e   :  { %v6082_v3 = vpack.c.bf16 %v6077_v46, %v6077_v46  ;;  %v6379_v46 = vld [vmem:[#allocation2 + $0x4d] sm:$0xff] }
 0x820   :  { %9430 = vmatpush3.bf16.msra.mxu1 %v10472_v8  ;;  %v7901_v8 = vld [vmem:[%s13489_s4 + $0x130] sm:$0xff] }
 0x821   :  { %9431 = vmatprep.subr.bf16.mxu1 %v10515_v12 }
 0x823   :  { %9412 = vmatmul.mubr.msk.bf16.gmra.mrb[64].mxu1 %vm1055_vm0, %v5919_v18  ;;  %v10477_v18 = vld [vmem:[%s13488_s3 + $0xb0] sm:$0xff]  }
 0x824   :  { %9415 = vmatprep.mubr.msk.bf16.mxu1 %vm10516_vm1, %v10515_v12  ;;  %9432 = vmatpush3.bf16.msra.mxu1 %v10473_v19  ;;  %v6071_v19 = vmul.f32 %v7901_v8, %v6053_v33  ;;  %v6374_v33 = vld [vmem:[#allocation2 + $0x25] sm:$0xff] }
 0x825   :  { %9433 = vmatprep.subr.bf16.mxu1 %v10515_v12  ;;  %v7954_v8 = vld [vmem:[%s13489_s4 + $0x1c8] sm:$0xff] }
 0x826   :  { %v6079_v38 = vpack.c.bf16 %v6072_v39, %v6071_v19  ;;  %v7953_v39 = vld [vmem:[%s13489_s4 + $0x1c0] sm:$0xff]  ;;  %v10484_v19 = vld [vmem:[%s13488_s3 + $0xe8] sm:$0xff]  }
 0x828   :  { %9434 = vmatpush3.bf16.msra.mxu1 %v10474_v22  ;;  %v7904_v22 = vld [vmem:[%s13489_s4 + $0x148] sm:$0xff] }
 0x829   :  { %9455 = vmatprep.subr.bf16.mxu1 %v10515_v12  ;;  %v6074_v47 = vmul.f32 %v7904_v22, %v6056_v37  ;;  %v10485_v37 = vld [vmem:[%s13488_s3 + $0xf0] sm:$0xff]  }
 0x82b   :  { %9416 = vmatmul.mubr.msk.bf16.gmra.mrb[68].mxu1 %vm1055_vm0, %v5920_v31  ;;  %v10478_v31 = vld [vmem:[%s13488_s3 + $0xb8] sm:$0xff]   ;;  %v6080_v14 = vpack.c.bf16 %v6074_v47, %v6073_v43  ;;  %v7955_v47 = vld [vmem:[%s13489_s4 + $0x1d0] sm:$0xff] }
 0x82c   :  { %9419 = vmatprep.mubr.msk.bf16.mxu1 %vm10516_vm1, %v10515_v12  ;;  %v10486_v43 = vld [vmem:[%s13488_s3 + $0xf8] sm:$0xff]  }
 0x833   :  { %9420 = vmatmul.mubr.msk.bf16.gmra.mrb[72].mxu1 %vm1055_vm0, %v5921_v54  ;;  %v7906_v54 = vld [vmem:[%s13489_s4 + $0x158] sm:$0xff] }
 0x834   :  { %9423 = vmatprep.mubr.msk.bf16.mxu1 %vm10516_vm1, %v10515_v12 }
 0x83b   :  { %9424 = vmatmul.mubr.msk.bf16.gmra.mrb[76].mxu1 %vm1055_vm0, %v5922_v28  ;;  %v6076_v28 = vmul.f32 %v7906_v54, %v6058_v4 }
 0x83c   :  { %9435 = vmatprep.mubr.msk.bf16.mxu1 %vm10516_vm1, %v10515_v12 }
 0x83d   :  { %v6081_v32 = vpack.c.bf16 %v6076_v28, %v6075_v26  ;;  %v6377_v28 = vld [vmem:[#allocation2 + $0x3d] sm:$0xff] }
 0x83e   :  { %v7957_v26 = vld [vmem:[%s13489_s4 + $0x1e0] sm:$0xff] }
 0x83f   :  { %v6395_v45 = vmul.f32 %v7957_v26, %v6377_v28  ;;  %v7985_v28 = vld [vmem:[%s13489_s4 + $0x238] sm:$0xff] }
 0x843   :  { %9436 = vmatmul.mubr.msk.bf16.vlgmr.msra.gmra.mrb[60].mxu1 %vm1055_vm0, %v6078_v52  ;;  %v10480_v52 = vld [vmem:[%s13488_s3 + $0xc8] sm:$0xff]  }
 0x844   :  { %9439 = vmatprep.mubr.msk.bf16.mxu1 %vm10516_vm1, %v10515_v12  ;;  %9456 = vmatpush3.bf16.msra.mxu1 %v10475_v42  ;;  %v10479_v42 = vld [vmem:[%s13488_s3 + $0xc0] sm:$0xff]  }
 0x845   :  { %9457 = vmatprep.subr.bf16.mxu1 %v10515_v12 }
 0x848   :  { %9458 = vmatpush3.bf16.msra.mxu1 %v10476_v63  ;;  %v6373_v63 = vld [vmem:[#allocation2 + $0x1d] sm:$0xff] }
 0x849   :  { %9459 = vmatprep.subr.bf16.mxu1 %v10515_v12 }
 0x84b   :  { %9440 = vmatmul.mubr.msk.bf16.gmra.mrb[64].mxu1 %vm1055_vm0, %v6079_v38  ;;  %v6391_v38 = vmul.f32 %v7953_v39, %v6373_v63  ;;  %v6536_v39 = vld [vmem:[#allocation2 + $0x36] sm:$0xff] }
 0x84c   :  { %9443 = vmatprep.mubr.msk.bf16.mxu1 %vm10516_vm1, %v10515_v12  ;;  %9460 = vmatpush3.bf16.msra.mxu1 %v10477_v18  ;;  %v6392_v18 = vmul.f32 %v7954_v8, %v6374_v33  ;;  %v10489_v8 = vld [vmem:[%s13488_s3 + $0x110] sm:$0xff]  }
 0x84d   :  { %9461 = vmatprep.subr.bf16.mxu1 %v10515_v12 }
 0x84e   :  { %v6399_v22 = vpack.c.bf16 %v6392_v18, %v6391_v38  ;;  %v6535_v18 = vld [vmem:[#allocation2 + $0x2e] sm:$0xff]  ;;  %v7981_v38 = vld [vmem:[%s13489_s4 + $0x218] sm:$0xff] }
 0x850   :  { %9462 = vmatpush3.bf16.msra.mxu1 %v10478_v31  ;;  %v6375_v31 = vld [vmem:[#allocation2 + $0x2d] sm:$0xff] }
 0x851   :  { %9483 = vmatprep.subr.bf16.mxu1 %v10515_v12  ;;  %v6393_v4 = vmul.f32 %v7955_v47, %v6375_v31  ;;  %v6538_v31 = vld [vmem:[#allocation2 + $0x46] sm:$0xff]  ;;  %v7984_v47 = vld [vmem:[%s13489_s4 + $0x230] sm:$0xff] }
 0x853   :  { %9444 = vmatmul.mubr.msk.bf16.gmra.mrb[68].mxu1 %vm1055_vm0, %v6080_v14  ;;  %v6394_v14 = vmul.f32 %v7956_v16, %v6376_v27  ;;  %v6553_v27 = vmul.f32 %v7981_v38, %v6535_v18 }
 0x854   :  { %9447 = vmatprep.mubr.msk.bf16.mxu1 %vm10516_vm1, %v10515_v12 }
 0x855   :  { %v6400_v54 = vpack.c.bf16 %v6394_v14, %v6393_v4  ;;  %v7983_v14 = vld [vmem:[%s13489_s4 + $0x228] sm:$0xff]  ;;  %v6556_v4 = vmul.f32 %v7984_v47, %v6538_v31 }
 0x85b   :  { %9448 = vmatmul.mubr.msk.bf16.gmra.mrb[72].mxu1 %vm1055_vm0, %v6081_v32  ;;  %v6396_v32 = vmul.f32 %v7958_v36, %v6378_v50  ;;  %v6539_v36 = vld [vmem:[#allocation2 + $0x4e] sm:$0xff] }
 0x85c   :  { %9451 = vmatprep.mubr.msk.bf16.mxu1 %vm10516_vm1, %v10515_v12  ;;  %v6557_v26 = vmul.f32 %v7985_v28, %v6539_v36 }
 0x85d   :  { %v6401_v55 = vpack.c.bf16 %v6396_v32, %v6395_v45  ;;  %v6958_v45 = vld [vmem:[%s13491_s6 + $0x28] sm:$0xff] }
 0x85e   :  { %v6562_v32 = vpack.c.bf16 %v6557_v26, %v6557_v26 }
 0x863   :  { %9452 = vmatmul.mubr.msk.bf16.gmra.mrb[76].mxu1 %vm1055_vm0, %v6082_v3  ;;  %v7959_v3 = vld [vmem:[%s13489_s4 + $0x1f0] sm:$0xff] }
 0x864   :  { %9463 = vmatprep.mubr.msk.bf16.mxu1 %vm10516_vm1, %v10515_v12 }
 0x86b   :  { %9464 = vmatmul.mubr.msk.bf16.vlgmr.msra.gmra.mrb[60].mxu1 %vm1055_vm0, %v6238_v58  ;;  %v7933_v58 = vld [vmem:[%s13489_s4 + $0x1a8] sm:$0xff] }
 0x86c   :  { %9467 = vmatprep.mubr.msk.bf16.mxu1 %vm10516_vm1, %v10515_v12  ;;  %9484 = vmatpush3.bf16.msra.mxu1 %v10479_v42  ;;  %v6237_v60 = vmul.f32 %v7933_v58, %v6219_v35  ;;  %v6397_v42 = vmul.f32 %v7959_v3, %v6379_v46  ;;  %v6531_v35 = vld [vmem:[#allocation2 + $0xe] sm:$0xff]  ;;  %v7977_v58 = vld [vmem:[%s13489_s4 + $0x1f8] sm:$0xff] }
 0x86d   :  { %9485 = vmatprep.subr.bf16.mxu1 %v10515_v12  ;;  %v6959_v46 = vld [vmem:[%s13491_s6 + $0x30] sm:$0xff]  ;;  %v6960_v3 = vld [vmem:[%s13491_s6 + $0x38] sm:$0xff] }
 0x86e   :  { %v6242_v1 = vpack.c.bf16 %v6237_v60, %v6237_v60 }
 0x870   :  { %9486 = vmatpush3.bf16.msra.mxu1 %v10480_v52  ;;  %v6402_v52 = vpack.c.bf16 %v6397_v42, %v6397_v42  ;;  %v9629_v42 = vpack.c.bf16 %v6960_v3, %v6959_v46 }
 0x871   :  { %9487 = vmatprep.subr.bf16.mxu1 %v10515_v12 }
 0x873   :  { %9468 = vmatmul.mubr.msk.bf16.gmra.mrb[64].mxu1 %vm1055_vm0, %v6239_v17  ;;  %v6372_v17 = vld [vmem:[#allocation2 + $0x15] sm:$0xff] }
 0x874   :  { %9471 = vmatprep.mubr.msk.bf16.mxu1 %vm10516_vm1, %v10515_v12  ;;  %9488 = vmatpush3.bf16.msra.mxu1 %v10481_v57  ;;  %v6390_v10 = vmul.f32 %v7952_v61, %v6372_v17  ;;  %v6532_v57 = vld [vmem:[#allocation2 + $0x16] sm:$0xff]  ;;  %v10487_v17 = vld [vmem:[%s13488_s3 + $0x100] sm:$0xff]  }
 0x875   :  { %9489 = vmatprep.subr.bf16.mxu1 %v10515_v12 }
 0x878   :  { %9490 = vmatpush3.bf16.msra.mxu1 %v10482_v30  ;;  %v7978_v30 = vld [vmem:[%s13489_s4 + $0x200] sm:$0xff] }
 0x879   :  { %9511 = vmatprep.subr.bf16.mxu1 %v10515_v12  ;;  %v6550_v60 = vmul.f32 %v7978_v30, %v6532_v57 }
 0x87b   :  { %9472 = vmatmul.mubr.msk.bf16.gmra.mrb[68].mxu1 %vm1055_vm0, %v6240_v6  ;;  %v7951_v6 = vld [vmem:[%s13489_s4 + $0x1b0] sm:$0xff] }
 0x87c   :  { %9475 = vmatprep.mubr.msk.bf16.mxu1 %vm10516_vm1, %v10515_v12  ;;  %v6389_v34 = vmul.f32 %v7951_v6, %v6371_v51  ;;  %v6534_v51 = vld [vmem:[#allocation2 + $0x26] sm:$0xff]  ;;  %v7980_v6 = vld [vmem:[%s13489_s4 + $0x210] sm:$0xff] }
 0x87e   :  { %v6398_v21 = vpack.c.bf16 %v6390_v10, %v6389_v34  ;;  %v6533_v10 = vld [vmem:[#allocation2 + $0x1e] sm:$0xff]  ;;  %v7979_v34 = vld [vmem:[%s13489_s4 + $0x208] sm:$0xff] }
 0x87f   :  { %v6551_v33 = vmul.f32 %v7979_v34, %v6533_v10 }
 0x883   :  { %9476 = vmatmul.mubr.msk.bf16.gmra.mrb[72].mxu1 %vm1055_vm0, %v6241_v40  ;;  %v10483_v40 = vld [vmem:[%s13488_s3 + $0xe0] sm:$0xff]  }
 0x884   :  { %9479 = vmatprep.mubr.msk.bf16.mxu1 %vm10516_vm1, %v10515_v12 }
 0x88b   :  { %9480 = vmatmul.mubr.msk.bf16.gmra.mrb[76].mxu1 %vm1055_vm0, %v6242_v1  ;;  %v6549_v1 = vmul.f32 %v7977_v58, %v6531_v35 }
 0x88c   :  { %9491 = vmatprep.mubr.msk.bf16.mxu1 %vm10516_vm1, %v10515_v12 }
 0x88d   :  { %v6558_v61 = vpack.c.bf16 %v6550_v60, %v6549_v1 }
 0x893   :  { %9492 = vmatmul.mubr.msk.bf16.vlgmr.msra.gmra.mrb[60].mxu1 %vm1055_vm0, %v6398_v21  ;;  %v6552_v21 = vmul.f32 %v7980_v6, %v6534_v51 }
 0x894   :  { %9495 = vmatprep.mubr.msk.bf16.mxu1 %vm10516_vm1, %v10515_v12  ;;  %9512 = vmatpush3.bf16.msra.mxu1 %v10483_v40  ;;  %v10488_v40 = vld [vmem:[%s13488_s3 + $0x108] sm:$0xff]  }
 0x895   :  { %9513 = vmatprep.subr.bf16.mxu1 %v10515_v12  ;;  %v6559_v63 = vpack.c.bf16 %v6552_v21, %v6551_v33 }
 0x898   :  { %9514 = vmatpush3.bf16.msra.mxu1 %v10484_v19  ;;  %v7982_v19 = vld [vmem:[%s13489_s4 + $0x220] sm:$0xff] }
 0x899   :  { %9515 = vmatprep.subr.bf16.mxu1 %v10515_v12 }
 0x89b   :  { %9496 = vmatmul.mubr.msk.bf16.gmra.mrb[64].mxu1 %vm1055_vm0, %v6399_v22  ;;  %v6554_v22 = vmul.f32 %v7982_v19, %v6536_v39 }
 0x89c   :  { %9499 = vmatprep.mubr.msk.bf16.mxu1 %vm10516_vm1, %v10515_v12  ;;  %9516 = vmatpush3.bf16.msra.mxu1 %v10485_v37  ;;  %v10490_v37 = vld [vmem:[%s13488_s3 + $0x118] sm:$0xff]  }
 0x89d   :  { %9517 = vmatprep.subr.bf16.mxu1 %v10515_v12  ;;  %v6560_v16 = vpack.c.bf16 %v6554_v22, %v6553_v27 }
 0x8a0   :  { %9518 = vmatpush3.bf16.msra.mxu1 %v10486_v43  ;;  %v6537_v43 = vld [vmem:[#allocation2 + $0x3e] sm:$0xff] }
 0x8a1   :  { %9539 = vmatprep.subr.bf16.mxu1 %v10515_v12 }
 0x8a3   :  { %9500 = vmatmul.mubr.msk.bf16.gmra.mrb[68].mxu1 %vm1055_vm0, %v6400_v54  ;;  %v6555_v54 = vmul.f32 %v7983_v14, %v6537_v43 }
 0x8a4   :  { %9503 = vmatprep.mubr.msk.bf16.mxu1 %vm10516_vm1, %v10515_v12 }
 0x8a5   :  { %v6561_v50 = vpack.c.bf16 %v6556_v4, %v6555_v54 }
 0x8ab   :  { %9504 = vmatmul.mubr.msk.bf16.gmra.mrb[72].mxu1 %vm1055_vm0, %v6401_v55 }
 0x8ac   :  { %9507 = vmatprep.mubr.msk.bf16.mxu1 %vm10516_vm1, %v10515_v12 }
 0x8b3   :  { %9508 = vmatmul.mubr.msk.bf16.gmra.mrb[76].mxu1 %vm1055_vm0, %v6402_v52 }
 0x8b4   :  { %9519 = vmatprep.mubr.msk.bf16.mxu1 %vm10516_vm1, %v10515_v12 }
 0x8bb   :  { %9520 = vmatmul.mubr.msk.bf16.vlgmr.msra.gmra.mrb[60].mxu1 %vm1055_vm0, %v6558_v61 }
 0x8bc   :  { %9523 = vmatprep.mubr.msk.bf16.mxu1 %vm10516_vm1, %v10515_v12  ;;  %9540 = vmatpush3.bf16.msra.mxu1 %v10487_v17 }
 0x8bd   :  { %9541 = vmatprep.subr.bf16.mxu1 %v10515_v12 }
 0x8c0   :  { %9542 = vmatpush3.bf16.msra.mxu1 %v10488_v40 }
 0x8c1   :  { %9543 = vmatprep.subr.bf16.mxu1 %v10515_v12 }
 0x8c3   :  { %9524 = vmatmul.mubr.msk.bf16.gmra.mrb[64].mxu1 %vm1055_vm0, %v6559_v63 }
 0x8c4   :  { %9527 = vmatprep.mubr.msk.bf16.mxu1 %vm10516_vm1, %v10515_v12  ;;  %9544 = vmatpush3.bf16.msra.mxu1 %v10489_v8 }
 0x8c5   :  { %9545 = vmatprep.subr.bf16.mxu1 %v10515_v12 }
 0x8c8   :  { %9546 = vmatpush3.bf16.msra.mxu1 %v10490_v37 }
 0x8c9   :  { %9619 = vmatprep.subr.bf16.mxu1 %v10517_v49 }
 0x8cb   :  { %9528 = vmatmul.mubr.msk.bf16.gmra.mrb[68].mxu1 %vm1055_vm0, %v6560_v16 }
 0x8cc   :  { %9531 = vmatprep.mubr.msk.bf16.mxu1 %vm10516_vm1, %v10515_v12 }
 0x8d3   :  { %9532 = vmatmul.mubr.msk.bf16.gmra.mrb[72].mxu1 %vm1055_vm0, %v6561_v50 }
 0x8d4   :  { %9535 = vmatprep.mubr.msk.bf16.mxu1 %vm10516_vm1, %v10515_v12 }
 0x8db   :  { %9536 = vmatmul.mubr.msk.bf16.gmra.mrb[76].mxu1 %vm1055_vm0, %v6562_v32 }
 0x8dc   :  { %9547 = vmatprep.mubr.msk.bf16.mxu1 %vm10516_vm1, %v10515_v12 }
 0x8e3   :  { %9548 = vmatmul.mubr.msk.bf16.vlgmr.msra.gmra.mrb[60].mxu1 %vm1055_vm0, %v6718_v15  ;;  %v6717_v15 = vmul.f32 %v8011_v23, %v6699_v0 }
 0x8e4   :  { %9551 = vmatprep.mubr.msk.bf16.mxu1 %vm10516_vm1, %v10515_v12 }
 0x8e5   :  { %v6722_v25 = vpack.c.bf16 %v6717_v15, %v6717_v15 }
 0x8eb   :  { %9552 = vmatmul.mubr.msk.bf16.gmra.mrb[64].mxu1 %vm1055_vm0, %v6719_v20  ;;  %v6953_v20 = vld [vmem:[%s13491_s6] sm:$0xff] }
 0x8ec   :  { %9555 = vmatprep.mubr.msk.bf16.mxu1 %vm10516_vm1, %v10515_v12 }
 0x8f3   :  { %9556 = vmatmul.mubr.msk.bf16.gmra.mrb[68].mxu1 %vm1055_vm0, %v6720_v53  ;;  %v9620_v53 = vpack.c.bf16 %v6954_v2, %v6953_v20 }
 0x8f4   :  { %9559 = vmatprep.mubr.msk.bf16.mxu1 %vm10516_vm1, %v10515_v12 }
 0x8f5   :  { %9621 = vmatpush3.bf16.msra.mxu1 %v9620_v53 }
 0x8f6   :  { %9622 = vmatprep.subr.bf16.mxu1 %v10517_v49 }
 0x8f9   :  { %9624 = vmatpush3.bf16.msra.mxu1 %v9623_v41 }
 0x8fa   :  { %9625 = vmatprep.subr.bf16.mxu1 %v10517_v49 }
 0x8fb   :  { %9560 = vmatmul.mubr.msk.bf16.gmra.mrb[72].mxu1 %vm1055_vm0, %v6721_v62  ;;  %v6957_v62 = vld [vmem:[%s13491_s6 + $0x20] sm:$0xff] }
 0x8fc   :  { %9563 = vmatprep.mubr.msk.bf16.mxu1 %vm10516_vm1, %v10515_v12  ;;  %v9626_v55 = vpack.c.bf16 %v6958_v45, %v6957_v62 }
 0x8fe   :  { %9627 = vmatpush3.bf16.msra.mxu1 %v9626_v55 }
 0x8ff   :  { %9628 = vmatprep.subr.bf16.mxu1 %v10517_v49 }
 0x902   :  { %9630 = vmatpush3.bf16.msra.mxu1 %v9629_v42 }
 0x903   :  { %9564 = vmatmul.mubr.msk.bf16.gmra.mrb[76].mxu1 %vm1055_vm0, %v6722_v25 }
 0x904   :  { %9604 = vmatprep.mubr.msk.f32.mxu1 %vm10516_vm1, %v10515_v12 }
 0x9b6   :  { %v6804_v52 = vpop.f32.mrb[60].mxu1 }
 0x9b7   :  { %v6851_v57 = vmul.f32 0.5, %v6804_v52  ;;  %v9549_v30 = vpop.f32.mrb[61].mxu1 }
 0x9b8   :  { %v6807_v35 = vpop.f32.mrb[62].mxu1 }
 0x9b9   :  { %v6860_v58 = vadd.f32 %v6851_v57, %v12153_v11  ;;  %v6852_v60 = vmul.f32 0.5, %v6807_v35  ;;  %v9550_v1 = vpop.f32.mrb[63].mxu1 }
 0x9bb   :  { %v6861_v17 = vadd.f32 %v6852_v60, %v12158_v44  ;;  %v6869_v61 = vmax.f32 %v6860_v58, 0.0 }
 0x9bd   :  { %v6870_v51 = vmax.f32 %v6861_v17, 0.0 }
 0x9be   :  { %v6812_v6 = vpop.f32.mrb[64].mxu1 }
 0x9bf   :  { %v9608_v10 = vpack.c.bf16 %v6870_v51, %v6869_v61  ;;  %v6853_v34 = vmul.f32 0.5, %v6812_v6  ;;  %v9553_v40 = vpop.f32.mrb[65].mxu1 }
 0x9c0   :  { %v6815_v21 = vpop.f32.mrb[66].mxu1 }
 0x9c1   :  { %v6862_v33 = vadd.f32 %v6853_v34, %v12163_v7  ;;  %v6854_v8 = vmul.f32 0.5, %v6815_v21  ;;  %v9554_v63 = vpop.f32.mrb[67].mxu1  ;;  %9609 = vmatpush3.bf16.msra.mxu0 %v9608_v10 }
 0x9c2   :  { %9610 = vmatprep.subr.bf16.mxu0 %v10517_v49 }
 0x9c3   :  { %v6863_v11 = vadd.f32 %v6854_v8, %v12174_v56  ;;  %v6871_v39 = vmax.f32 %v6862_v33, 0.0 }
 0x9c5   :  { %v6872_v19 = vmax.f32 %v6863_v11, 0.0 }
 0x9c6   :  { %v6820_v18 = vpop.f32.mrb[68].mxu1 }
 0x9c7   :  { %v9611_v44 = vpack.c.bf16 %v6872_v19, %v6871_v39  ;;  %v6855_v38 = vmul.f32 0.5, %v6820_v18  ;;  %v9557_v37 = vpop.f32.mrb[69].mxu1 }
 0x9c8   :  { %v6823_v22 = vpop.f32.mrb[70].mxu1 }
 0x9c9   :  { %v6864_v27 = vadd.f32 %v6855_v38, %v12182_v29  ;;  %v6856_v16 = vmul.f32 0.5, %v6823_v22  ;;  %v9558_v31 = vpop.f32.mrb[71].mxu1  ;;  %9612 = vmatpush3.bf16.msra.mxu0 %v9611_v44 }
 0x9ca   :  { %9613 = vmatprep.subr.bf16.mxu0 %v10517_v49 }
 0x9cb   :  { %v6865_v7 = vadd.f32 %v6856_v16, %v12199_v24  ;;  %v6873_v47 = vmax.f32 %v6864_v27, 0.0 }
 0x9cd   :  { %v6874_v43 = vmax.f32 %v6865_v7, 0.0 }
 0x9ce   :  { %v6828_v14 = vpop.f32.mrb[72].mxu1 }
 0x9cf   :  { %v9614_v56 = vpack.c.bf16 %v6874_v43, %v6873_v47  ;;  %v6857_v4 = vmul.f32 0.5, %v6828_v14  ;;  %v9561_v54 = vpop.f32.mrb[73].mxu1 }
 0x9d0   :  { %v6831_v50 = vpop.f32.mrb[74].mxu1 }
 0x9d1   :  { %v6866_v36 = vadd.f32 %v6857_v4, %v12209_v48  ;;  %v6858_v28 = vmul.f32 0.5, %v6831_v50  ;;  %v9562_v26 = vpop.f32.mrb[75].mxu1  ;;  %9615 = vmatpush3.bf16.msra.mxu0 %v9614_v56 }
 0x9d2   :  { %9616 = vmatprep.subr.bf16.mxu0 %v10517_v49  ;;  %v6878_v49 = vld [vmem:[%s13490_s5] sm:$0x3]  ;;  %s10491_s5 = scalar_lea.vmem %s7050_s11, 32 }
 0x9d3   :  { %v6867_v29 = vadd.f32 %v6858_v28, %v12226_v9  ;;  %v6875_v32 = vmax.f32 %v6866_v36, 0.0  ;;  %p10492_p0 = scmp.ne.s32.totalorder %s7050_s11, %s10491_s5  ;;  %p10497_p2 = scmp.lt.s32.totalorder %s10491_s5, %s10491_s5 }
 0x9d5   :  { %v6876_v0 = vmax.f32 %v6867_v29, 0.0  ;;  %p10498_p3 = por %p10497_p2, %p10496_p1 }
 0x9d6   :  { %v6836_v23 = vpop.f32.mrb[76].mxu1 }
 0x9d7   :  { %v9617_v24 = vpack.c.bf16 %v6876_v0, %v6875_v32  ;;  %v6859_v15 = vmul.f32 0.5, %v6836_v23  ;;  %v9565_v25 = vpop.f32.mrb[77].mxu1  ;;  %p10499_p4 = pnand %p10498_p3, %p10492_p0 }
 0x9d8   :  { %v6839_v20 = vpop.f32.mrb[78].mxu1 }
 0x9d9   :  { %v6868_v2 = vadd.f32 %v6859_v15, %v12233_v59  ;;  %v9566_v5 = vpop.f32.mrb[79].mxu1  ;;  %9618 = vmatpush3.bf16.msra.mxu0 %v9617_v24  ;;  %v8030_v59 = vld [vmem:[%s13492_s7] ss:$0 sm:$0xff] }
 0x9da   :  { %9583 = vmatprep.subr.mxu0 %v10515_v12 }
 0x9db   :  { %v6877_v48 = vmax.f32 %v6868_v2, 0.0 }
 0x9dd   :  { %9584 = vmatpush3.msra.mxu0 %v6877_v48 }
 0x9de   :  { %9586 = vmatmul.mubr.msk.f32.vlgmr.msra.gmra.mrb[80].mxu0 %vm6879_vm2, %v6878_v49 }
 0xab1   :  { %v6949_v9 = vpop.f32.mrb[80].mxu0 }
 0xab2   :  { %v9587_v53 = vpop.f32.mrb[81].mxu0  ;;  %9605 = vmatmul.mubr.msk.f32.vlgmr.msra.gmra.mrb[80].mxu1 %vm1055_vm0, %v6949_v9 }
 0xb85   :  { %v7037_v13 = vpop.f32.mrb[80].mxu1 }
 0xb86   :  { %v7038_v12 = vadd.f32 %v8030_v59, %v7037_v13  ;;  %v9606_v41 = vpop.f32.mrb[81].mxu1 }
 0xb88   :  { %7042 = vst.msk [vmem:[#allocation3] sm:$0x3] %vm7041_vm3, %v7038_v12 }
 0xb89   :  { %10502 = shalt.err (!%p10499_p4)
}
 0xb8a   :  { %s10503_s3 = scalar_lea.hbm %s13493_s8, 32 }
 0xb8b   :  { %p10504_p5 = scmp.ne.s32.totalorder %s13493_s8, %s10503_s3  ;;  %p10507_p6 = scmp.lt.u32.totalorder %s10503_s3, %s13493_s8 }
 0xb8d   :  { %p10509_p7 = pnand %p10507_p6, %p10504_p5 }
 0xb8f   :  { %10512 = shalt.err (!%p10509_p7)
}
 0xb90   :  { %7052 = dma.vmem_to_hbm [thread:$0]  %s7050_s11, 32, %s13493_s8, [#allocation4]  }
 0xb91   :  { %10513 = dma.done.wait [#allocation4], 32  }
 0xb92   :  { %10514 = vsyncadd [#allocation4], 4294967264 }
 0xb93   :  { %7056 = vsyncpa [#allocation4], 1 }

</bundles_post_ra>
